<compile_context>
chip_gen: v5e
topology: v5e:2x2
jax: 0.10.0
libtpu: 0.0.40
codegen_flags: <defaults>
</compile_context>

<pallas_src>
import jax
import jax.numpy as jnp
from jax.experimental import pallas as pl
from jax.experimental.pallas import tpu as pltpu


# ---------------------------------------------------------------------------
# In-kernel helpers (operate on traced values living in vregs / VMEM)
# ---------------------------------------------------------------------------
def _silu(v):
    return v * jax.nn.sigmoid(v)


def _zero_pad_hw(x, top, bot, left, right):
    """Zero-pad a (H, W, C) value spatially via concatenation (Mosaic-safe)."""
    H, W, C = x.shape
    dt = x.dtype
    if top or bot:
        parts = []
        if top:
            parts.append(jnp.zeros((top, W, C), dt))
        parts.append(x)
        if bot:
            parts.append(jnp.zeros((bot, W, C), dt))
        x = jnp.concatenate(parts, axis=0)
    if left or right:
        Hp = x.shape[0]
        parts = []
        if left:
            parts.append(jnp.zeros((Hp, left, C), dt))
        parts.append(x)
        if right:
            parts.append(jnp.zeros((Hp, right, C), dt))
        x = jnp.concatenate(parts, axis=1)
    return x


def _im2col_3x3(xpad, H, W):
    """(H+2, W+2, C) -> (H*W, 9*C) patch matrix for a 3x3 / stride-1 conv."""
    C = xpad.shape[-1]
    cols = []
    for ky in range(3):
        for kx in range(3):
            cols.append(xpad[ky:ky + H, kx:kx + W, :].reshape(H * W, C))
    return jnp.concatenate(cols, axis=-1)


def _upsample2x_nearest(x, H, W, C):
    """(H, W, C) -> (2H, 2W, C) nearest upsample, fully in VMEM."""
    # W-repeat: duplicate each pixel along the flattened spatial axis.
    v = x.reshape(H * W, 1, C)
    v = jnp.broadcast_to(v, (H * W, 2, C)).reshape(H * W * 2, C)
    v = v.reshape(H, 1, 2 * W, C)
    # H-repeat: duplicate each row.
    v = jnp.broadcast_to(v, (H, 2, 2 * W, C)).reshape(2 * H, 2 * W, C)
    return v


# ---------------------------------------------------------------------------
# Fused kernel factory (one grid step == one batch element)
# ---------------------------------------------------------------------------
def _make_fused_up_c3_kernel(H1, W1, C1, H2, W2, C2, Cout, Cmid, n_bottle,
                             dy, dx):
    Hu, Wu = 2 * H1, 2 * W1
    f32 = jnp.float32
    bf16 = jnp.bfloat16

    def kernel(*refs):
        (x1_ref, x2_ref,
         upw_ref, upsh_ref,
         c1wa_ref, c1wb_ref, c1sh_ref,
         c2wa_ref, c2wb_ref, c2sh_ref) = refs[:10]
        b_refs = refs[10:10 + 4 * n_bottle]
        c3wa_ref, c3wb_ref, c3sh_ref, o_ref = refs[10 + 4 * n_bottle:]

        # ---- up path: nearest 2x upsample + 3x3 conv (BN folded) + ReLU ----
        xu = _upsample2x_nearest(x1_ref[0], H1, W1, C1)        # (Hu,Wu,C1) bf16
        xp = _zero_pad_hw(xu, 1, 1, 1, 1)                      # conv halo
        patches = _im2col_3x3(xp, Hu, Wu)                      # (Hu*Wu, 9*C1)
        up = jnp.dot(patches, upw_ref[...], preferred_element_type=f32)
        up = jnp.maximum(up + upsh_ref[0, :], 0.0)             # shift + ReLU

        # ---- F.pad(x1, [dx//2, dx-dx//2, dy//2, dy-dy//2]) ----
        if dy or dx:
            up3 = _zero_pad_hw(up.reshape(Hu, Wu, Cout),
                               dy // 2, dy - dy // 2, dx // 2, dx - dx // 2)
            up = up3.reshape(H2 * W2, Cout)

        x1b = up.astype(bf16)                                  # (H2*W2, Cout)
        x2b = x2_ref[0].reshape(H2 * W2, C2)                   # (H2*W2, C2)

        # ---- C3.cv1 / C3.cv2 on the implicit concat [x2, x1_up] ----
        y1 = (jnp.dot(x2b, c1wa_ref[...], preferred_element_type=f32)
              + jnp.dot(x1b, c1wb_ref[...], preferred_element_type=f32))
        y1 = _silu(y1 + c1sh_ref[0, :])
        y2 = (jnp.dot(x2b, c2wa_ref[...], preferred_element_type=f32)
              + jnp.dot(x1b, c2wb_ref[...], preferred_element_type=f32))
        y2 = _silu(y2 + c2sh_ref[0, :])

        # ---- n Bottlenecks on the cv1 branch (residual add fused, f32) ----
        for i in range(n_bottle):
            bw1_ref, bsh1_ref, bw2_ref, bsh2_ref = b_refs[4 * i:4 * i + 4]
            h = _silu(jnp.dot(y1.astype(bf16), bw1_ref[...],
                              preferred_element_type=f32) + bsh1_ref[0, :])
            hp = _zero_pad_hw(h.astype(bf16).reshape(H2, W2, Cmid), 1, 1, 1, 1)
            hcol = _im2col_3x3(hp, H2, W2)                     # (H2*W2, 9*Cmid)
            h = _silu(jnp.dot(hcol, bw2_ref[...],
                              preferred_element_type=f32) + bsh2_ref[0, :])
            y1 = y1 + h                                        # shortcut add

        # ---- C3.cv3 on the implicit concat [y1, y2]: split-weight dots ----
        out = (jnp.dot(y1.astype(bf16), c3wa_ref[...],
                       preferred_element_type=f32)
               + jnp.dot(y2.astype(bf16), c3wb_ref[...],
                         preferred_element_type=f32))
        out = _silu(out + c3sh_ref[0, :])

        o_ref[0] = out.reshape(H2, W2, Cout)

    return kernel


# ---------------------------------------------------------------------------
# Host-side wrapper (trace-time weight folding / splitting, one pallas_call)
# ---------------------------------------------------------------------------
def _fold_scale_into_w(p):
    """Fold the BN scale into the conv weight: returns (w * scale, shift)."""
    return p["w"] * p["scale"], p["shift"]


def _row_f32(v):
    return v.reshape(1, -1).astype(jnp.float32)


def up_c3_forward(params, x1_nchw, x2_nchw):
    bf16 = jnp.bfloat16

    x1 = jnp.transpose(x1_nchw, (0, 2, 3, 1)).astype(bf16)     # NCHW -> NHWC
    x2 = jnp.transpose(x2_nchw, (0, 2, 3, 1)).astype(bf16)
    N, H1, W1, C1 = x1.shape
    _, H2, W2, C2 = x2.shape
    Hu, Wu = 2 * H1, 2 * W1
    dy, dx = H2 - Hu, W2 - Wu
    assert dy >= 0 and dx >= 0, "skip tensor must be >= 2x the upsampled x1"

    up, c3 = params["up"], params["c3"]
    Cout = up["w"].shape[-1]
    Cmid = c3["cv1"]["w"].shape[-1]
    n_bottle = len(c3["m"])
    assert C2 + Cout == c3["cv1"]["w"].shape[-2]

    # Fold BN scale into weights (trace time), split along Cin to avoid any
    # in-kernel channel concat, cast weights to bf16 (shifts stay f32).
    upw, upsh = _fold_scale_into_w(up)
    c1w, c1sh = _fold_scale_into_w(c3["cv1"])
    c2w, c2sh = _fold_scale_into_w(c3["cv2"])
    c3w, c3sh = _fold_scale_into_w(c3["cv3"])
    c1w, c2w, c3w = c1w[0, 0], c2w[0, 0], c3w[0, 0]

    args = [
        x1, x2,
        upw.reshape(9 * C1, Cout).astype(bf16), _row_f32(upsh),
        c1w[:C2].astype(bf16), c1w[C2:].astype(bf16), _row_f32(c1sh),
        c2w[:C2].astype(bf16), c2w[C2:].astype(bf16), _row_f32(c2sh),
    ]
    for bp in c3["m"]:
        bw1, bsh1 = _fold_scale_into_w(bp["cv1"])
        bw2, bsh2 = _fold_scale_into_w(bp["cv2"])
        args += [bw1[0, 0].astype(bf16), _row_f32(bsh1),
                 bw2.reshape(9 * Cmid, Cmid).astype(bf16), _row_f32(bsh2)]
    args += [c3w[:Cmid].astype(bf16), c3w[Cmid:].astype(bf16), _row_f32(c3sh)]

    def _wspec(a):
        return pl.BlockSpec(a.shape, lambda b: (0,) * a.ndim)

    in_specs = [
        pl.BlockSpec((1, H1, W1, C1), lambda b: (b, 0, 0, 0)),
        pl.BlockSpec((1, H2, W2, C2), lambda b: (b, 0, 0, 0)),
    ] + [_wspec(a) for a in args[2:]]

    kernel = _make_fused_up_c3_kernel(H1, W1, C1, H2, W2, C2, Cout, Cmid,
                                      n_bottle, dy, dx)

    out = pl.pallas_call(
        kernel,
        out_shape=jax.ShapeDtypeStruct((N, H2, W2, Cout), jnp.float32),
        grid=(N,),
        in_specs=in_specs,
        out_specs=pl.BlockSpec((1, H2, W2, Cout), lambda b: (b, 0, 0, 0)),
        compiler_params=pltpu.CompilerParams(
            dimension_semantics=("parallel",),
            vmem_limit_bytes=64 * 1024 * 1024),
    )(*args)

    return jnp.transpose(out, (0, 3, 1, 2))                    # NHWC -> NCHW


# ---------------------------------------------------------------------------
# Parameters (deterministic synthetic init; BN folded to scale/shift)
# ---------------------------------------------------------------------------
def _fold_bn(bias, gamma, beta, mean, var, eps=1e-5):
    s = gamma / jnp.sqrt(var + eps)
    return s, (bias - mean) * s + beta


def _conv_bn_params(key, kh, kw, cin, cout, conv_bias):
    ks = jax.random.split(key, 6)
    fan_in = kh * kw * cin
    w = jax.random.normal(ks[0], (kh, kw, cin, cout), jnp.float32) / jnp.sqrt(fan_in)
    b = (0.1 * jax.random.normal(ks[1], (cout,), jnp.float32)
         if conv_bias else jnp.zeros((cout,), jnp.float32))
    gamma = 1.0 + 0.1 * jax.random.normal(ks[2], (cout,), jnp.float32)
    beta = 0.1 * jax.random.normal(ks[3], (cout,), jnp.float32)
    mean = 0.1 * jax.random.normal(ks[4], (cout,), jnp.float32)
    var = 0.5 + jnp.abs(jax.random.normal(ks[5], (cout,), jnp.float32))
    scale, shift = _fold_bn(b, gamma, beta, mean, var)
    return {"w": w, "scale": scale, "shift": shift}


def init_params(key, in_ch, out_ch, n, e):
    c_ = int(out_ch * e)
    keys = jax.random.split(key, 4 + 2 * n)
    return {
        "up": _conv_bn_params(keys[0], 3, 3, in_ch, out_ch, conv_bias=True),
        "c3": {
            "cv1": _conv_bn_params(keys[1], 1, 1, in_ch, c_, conv_bias=False),
            "cv2": _conv_bn_params(keys[2], 1, 1, in_ch, c_, conv_bias=False),
            "cv3": _conv_bn_params(keys[3], 1, 1, 2 * c_, out_ch, conv_bias=False),
            "m": [
                {
                    "cv1": _conv_bn_params(keys[4 + 2 * i], 1, 1, c_, c_, conv_bias=False),
                    "cv2": _conv_bn_params(keys[5 + 2 * i], 3, 3, c_, c_, conv_bias=False),
                }
                for i in range(n)
            ],
        },
    }


# ---------------------------------------------------------------------------
# Plain-JAX f32 reference (mirrors the PyTorch module semantics)
# ---------------------------------------------------------------------------
def _reference_forward(params, x1_nchw, x2_nchw):
    def conv_bn(x, p, k, act):
        w = p["w"] * p["scale"]
        pad = (k - 1) // 2
        y = jax.lax.conv_general_dilated(
            x, w, (1, 1), [(pad, pad), (pad, pad)],
            dimension_numbers=("NHWC", "HWIO", "NHWC"))
        y = y + p["shift"]
        return jnp.maximum(y, 0.0) if act == "relu" else y * jax.nn.sigmoid(y)

    x1 = jnp.transpose(x1_nchw, (0, 2, 3, 1))
    x2 = jnp.transpose(x2_nchw, (0, 2, 3, 1))
    x1 = jnp.repeat(jnp.repeat(x1, 2, axis=1), 2, axis=2)
    x1 = conv_bn(x1, params["up"], 3, "relu")
    dy = x2.shape[1] - x1.shape[1]
    dx = x2.shape[2] - x1.shape[2]
    x1 = jnp.pad(x1, ((0, 0), (dy // 2, dy - dy // 2),
                      (dx // 2, dx - dx // 2), (0, 0)))
    x = jnp.concatenate([x2, x1], axis=-1)
    c3 = params["c3"]
    y1 = conv_bn(x, c3["cv1"], 1, "silu")
    for bp in c3["m"]:
        t = conv_bn(y1, bp["cv1"], 1, "silu")
        y1 = y1 + conv_bn(t, bp["cv2"], 3, "silu")
    y2 = conv_bn(x, c3["cv2"], 1, "silu")
    y = conv_bn(jnp.concatenate([y1, y2], axis=-1), c3["cv3"], 1, "silu")
    return jnp.transpose(y, (0, 3, 1, 2))


# ---------------------------------------------------------------------------
if __name__ == "__main__":
    N = 2
    in_ch, out_ch = 8, 4        # skip connection x2 carries in_ch - out_ch = 4 ch
    n_bottle, e = 1, 0.5
    H1 = W1 = 8                 # x1 spatial (gets upsampled x2)
    H2 = W2 = 16                # x2 spatial

    key = jax.random.PRNGKey(0)
    k1, k2, kp = jax.random.split(key, 3)
    x1 = jax.random.normal(k1, (N, in_ch, H1, W1), jnp.float32)           # NCHW
    x2 = jax.random.normal(k2, (N, in_ch - out_ch, H2, W2), jnp.float32)  # NCHW

    params = init_params(kp, in_ch, out_ch, n_bottle, e)

    fwd = jax.jit(up_c3_forward)
    y = fwd(params, x1, x2)
    jax.block_until_ready(y)
    assert y.shape == (N, out_ch, H2, W2), y.shape

    # Loose correctness check vs f32 reference (kernel uses bf16 operands).
    y_ref = _reference_forward(params, x1, x2)
    err = float(jnp.max(jnp.abs(y - y_ref)))
    ref_max = float(jnp.max(jnp.abs(y_ref)))
    assert err <= 0.1 * (ref_max + 1.0), f"kernel vs reference max|err|={err}"

    print("KERNEL_OK")
</pallas_src>

<mosaic_0001>
module attributes {stable_mosaic.version = 11 : i64} {
  func.func @kernel(%arg0: i32, %arg1: memref<1x8x8x8xbf16, #tpu.memory_space<vmem>>, %arg2: memref<1x16x16x4xbf16, #tpu.memory_space<vmem>>, %arg3: memref<72x4xbf16, #tpu.memory_space<vmem>>, %arg4: memref<1x4xf32, #tpu.memory_space<vmem>>, %arg5: memref<4x2xbf16, #tpu.memory_space<vmem>>, %arg6: memref<4x2xbf16, #tpu.memory_space<vmem>>, %arg7: memref<1x2xf32, #tpu.memory_space<vmem>>, %arg8: memref<4x2xbf16, #tpu.memory_space<vmem>>, %arg9: memref<4x2xbf16, #tpu.memory_space<vmem>>, %arg10: memref<1x2xf32, #tpu.memory_space<vmem>>, %arg11: memref<2x2xbf16, #tpu.memory_space<vmem>>, %arg12: memref<1x2xf32, #tpu.memory_space<vmem>>, %arg13: memref<18x2xbf16, #tpu.memory_space<vmem>>, %arg14: memref<1x2xf32, #tpu.memory_space<vmem>>, %arg15: memref<2x4xbf16, #tpu.memory_space<vmem>>, %arg16: memref<2x4xbf16, #tpu.memory_space<vmem>>, %arg17: memref<1x4xf32, #tpu.memory_space<vmem>>, %arg18: memref<1x16x16x4xf32, #tpu.memory_space<vmem>>) attributes {dimension_semantics = [#tpu.dimension_semantics<parallel>], iteration_bounds = array<i64: 2>, scalar_prefetch = 0 : i64, scratch_operands = 0 : i64, tpu.core_type = #tpu.core_type<tc>, window_params = [{transform_indices = @transform_0, window_bounds = array<i64: 1, 8, 8, 8>}, {transform_indices = @transform_1, window_bounds = array<i64: 1, 16, 16, 4>}, {pipeline_mode = #tpu.pipeline_mode<synchronous>, transform_indices = @transform_2, window_bounds = array<i64: 72, 4>}, {pipeline_mode = #tpu.pipeline_mode<synchronous>, transform_indices = @transform_3, window_bounds = array<i64: 1, 4>}, {pipeline_mode = #tpu.pipeline_mode<synchronous>, transform_indices = @transform_4, window_bounds = array<i64: 4, 2>}, {pipeline_mode = #tpu.pipeline_mode<synchronous>, transform_indices = @transform_5, window_bounds = array<i64: 4, 2>}, {pipeline_mode = #tpu.pipeline_mode<synchronous>, transform_indices = @transform_6, window_bounds = array<i64: 1, 2>}, {pipeline_mode = #tpu.pipeline_mode<synchronous>, transform_indices = @transform_7, window_bounds = array<i64: 4, 2>}, {pipeline_mode = #tpu.pipeline_mode<synchronous>, transform_indices = @transform_8, window_bounds = array<i64: 4, 2>}, {pipeline_mode = #tpu.pipeline_mode<synchronous>, transform_indices = @transform_9, window_bounds = array<i64: 1, 2>}, {pipeline_mode = #tpu.pipeline_mode<synchronous>, transform_indices = @transform_10, window_bounds = array<i64: 2, 2>}, {pipeline_mode = #tpu.pipeline_mode<synchronous>, transform_indices = @transform_11, window_bounds = array<i64: 1, 2>}, {pipeline_mode = #tpu.pipeline_mode<synchronous>, transform_indices = @transform_12, window_bounds = array<i64: 18, 2>}, {pipeline_mode = #tpu.pipeline_mode<synchronous>, transform_indices = @transform_13, window_bounds = array<i64: 1, 2>}, {pipeline_mode = #tpu.pipeline_mode<synchronous>, transform_indices = @transform_14, window_bounds = array<i64: 2, 4>}, {pipeline_mode = #tpu.pipeline_mode<synchronous>, transform_indices = @transform_15, window_bounds = array<i64: 2, 4>}, {pipeline_mode = #tpu.pipeline_mode<synchronous>, transform_indices = @transform_16, window_bounds = array<i64: 1, 4>}, {transform_indices = @transform_17, window_bounds = array<i64: 1, 16, 16, 4>}]} {
    %c0 = arith.constant 0 : index
    %c0_0 = arith.constant 0 : index
    %c0_1 = arith.constant 0 : index
    %c0_2 = arith.constant 0 : index
    %0 = vector.load %arg1[%c0, %c0_0, %c0_1, %c0_2] : memref<1x8x8x8xbf16, #tpu.memory_space<vmem>>, vector<1x8x8x8xbf16>
    %1 = vector.shape_cast %0 : vector<1x8x8x8xbf16> to vector<8x8x8xbf16>
    %2 = vector.shape_cast %1 : vector<8x8x8xbf16> to vector<64x1x8xbf16>
    %3 = vector.shape_cast %2 : vector<64x1x8xbf16> to vector<64x1x8xbf16>
    %4 = vector.broadcast %3 : vector<64x1x8xbf16> to vector<64x2x8xbf16>
    %5 = vector.shape_cast %4 : vector<64x2x8xbf16> to vector<128x8xbf16>
    %6 = vector.shape_cast %5 : vector<128x8xbf16> to vector<8x1x16x8xbf16>
    %7 = vector.shape_cast %6 : vector<8x1x16x8xbf16> to vector<8x1x16x8xbf16>
    %8 = vector.broadcast %7 : vector<8x1x16x8xbf16> to vector<8x2x16x8xbf16>
    %9 = vector.shape_cast %8 : vector<8x2x16x8xbf16> to vector<16x16x8xbf16>
    %cst = arith.constant 0.000000e+00 : bf16
    %10 = vector.broadcast %cst : bf16 to vector<1x16x8xbf16>
    %cst_3 = arith.constant 0.000000e+00 : bf16
    %11 = vector.broadcast %cst_3 : bf16 to vector<1x16x8xbf16>
    %12 = tpu.concatenate %10, %9, %11 in 0 : vector<1x16x8xbf16>, vector<16x16x8xbf16>, vector<1x16x8xbf16> -> vector<18x16x8xbf16>
    %cst_4 = arith.constant 0.000000e+00 : bf16
    %13 = vector.broadcast %cst_4 : bf16 to vector<18x1x8xbf16>
    %cst_5 = arith.constant 0.000000e+00 : bf16
    %14 = vector.broadcast %cst_5 : bf16 to vector<18x1x8xbf16>
    %15 = tpu.concatenate %13, %12, %14 in 1 : vector<18x1x8xbf16>, vector<18x16x8xbf16>, vector<18x1x8xbf16> -> vector<18x18x8xbf16>
    %16 = vector.extract_strided_slice %15 {offsets = [0, 0, 0], sizes = [16, 16, 8], strides = [1, 1, 1]} : vector<18x18x8xbf16> to vector<16x16x8xbf16>
    %17 = vector.shape_cast %16 : vector<16x16x8xbf16> to vector<256x8xbf16>
    %18 = vector.extract_strided_slice %15 {offsets = [0, 1, 0], sizes = [16, 16, 8], strides = [1, 1, 1]} : vector<18x18x8xbf16> to vector<16x16x8xbf16>
    %19 = vector.shape_cast %18 : vector<16x16x8xbf16> to vector<256x8xbf16>
    %20 = vector.extract_strided_slice %15 {offsets = [0, 2, 0], sizes = [16, 16, 8], strides = [1, 1, 1]} : vector<18x18x8xbf16> to vector<16x16x8xbf16>
    %21 = vector.shape_cast %20 : vector<16x16x8xbf16> to vector<256x8xbf16>
    %22 = vector.extract_strided_slice %15 {offsets = [1, 0, 0], sizes = [16, 16, 8], strides = [1, 1, 1]} : vector<18x18x8xbf16> to vector<16x16x8xbf16>
    %23 = vector.shape_cast %22 : vector<16x16x8xbf16> to vector<256x8xbf16>
    %24 = vector.extract_strided_slice %15 {offsets = [1, 1, 0], sizes = [16, 16, 8], strides = [1, 1, 1]} : vector<18x18x8xbf16> to vector<16x16x8xbf16>
    %25 = vector.shape_cast %24 : vector<16x16x8xbf16> to vector<256x8xbf16>
    %26 = vector.extract_strided_slice %15 {offsets = [1, 2, 0], sizes = [16, 16, 8], strides = [1, 1, 1]} : vector<18x18x8xbf16> to vector<16x16x8xbf16>
    %27 = vector.shape_cast %26 : vector<16x16x8xbf16> to vector<256x8xbf16>
    %28 = vector.extract_strided_slice %15 {offsets = [2, 0, 0], sizes = [16, 16, 8], strides = [1, 1, 1]} : vector<18x18x8xbf16> to vector<16x16x8xbf16>
    %29 = vector.shape_cast %28 : vector<16x16x8xbf16> to vector<256x8xbf16>
    %30 = vector.extract_strided_slice %15 {offsets = [2, 1, 0], sizes = [16, 16, 8], strides = [1, 1, 1]} : vector<18x18x8xbf16> to vector<16x16x8xbf16>
    %31 = vector.shape_cast %30 : vector<16x16x8xbf16> to vector<256x8xbf16>
    %32 = vector.extract_strided_slice %15 {offsets = [2, 2, 0], sizes = [16, 16, 8], strides = [1, 1, 1]} : vector<18x18x8xbf16> to vector<16x16x8xbf16>
    %33 = vector.shape_cast %32 : vector<16x16x8xbf16> to vector<256x8xbf16>
    %34 = tpu.concatenate %17, %19, %21, %23, %25, %27, %29, %31, %33 in 1 : vector<256x8xbf16>, vector<256x8xbf16>, vector<256x8xbf16>, vector<256x8xbf16>, vector<256x8xbf16>, vector<256x8xbf16>, vector<256x8xbf16>, vector<256x8xbf16>, vector<256x8xbf16> -> vector<256x72xbf16>
    %c0_6 = arith.constant 0 : index
    %c0_7 = arith.constant 0 : index
    %35 = vector.load %arg3[%c0_6, %c0_7] : memref<72x4xbf16, #tpu.memory_space<vmem>>, vector<72x4xbf16>
    %cst_8 = arith.constant dense<0.000000e+00> : vector<256x4xf32>
    %36 = tpu.matmul %34, %35, %cst_8 {dimension_numbers = #tpu.dot_dimension_numbers<[1], [0], [0], [1], [0, 0, 1, 1], [], []>} : vector<256x72xbf16>, vector<72x4xbf16>, vector<256x4xf32> -> vector<256x4xf32>
    %c0_9 = arith.constant 0 : index
    %c0_10 = arith.constant 0 : index
    %37 = vector.load %arg4[%c0_9, %c0_10] : memref<1x4xf32, #tpu.memory_space<vmem>>, vector<1x4xf32>
    %38 = vector.shape_cast %37 : vector<1x4xf32> to vector<4xf32>
    %39 = vector.shape_cast %38 : vector<4xf32> to vector<1x4xf32>
    %40 = vector.broadcast %39 : vector<1x4xf32> to vector<256x4xf32>
    %41 = arith.addf %36, %40 : vector<256x4xf32>
    %cst_11 = arith.constant 0.000000e+00 : f32
    %42 = vector.broadcast %cst_11 : f32 to vector<256x4xf32>
    %43 = arith.maximumf %41, %42 : vector<256x4xf32>
    %44 = arith.truncf %43 : vector<256x4xf32> to vector<256x4xbf16>
    %c0_12 = arith.constant 0 : index
    %c0_13 = arith.constant 0 : index
    %c0_14 = arith.constant 0 : index
    %c0_15 = arith.constant 0 : index
    %45 = vector.load %arg2[%c0_12, %c0_13, %c0_14, %c0_15] : memref<1x16x16x4xbf16, #tpu.memory_space<vmem>>, vector<1x16x16x4xbf16>
    %46 = vector.shape_cast %45 : vector<1x16x16x4xbf16> to vector<16x16x4xbf16>
    %47 = vector.shape_cast %46 : vector<16x16x4xbf16> to vector<256x4xbf16>
    %c0_16 = arith.constant 0 : index
    %c0_17 = arith.constant 0 : index
    %48 = vector.load %arg5[%c0_16, %c0_17] : memref<4x2xbf16, #tpu.memory_space<vmem>>, vector<4x2xbf16>
    %cst_18 = arith.constant dense<0.000000e+00> : vector<256x2xf32>
    %49 = tpu.matmul %47, %48, %cst_18 {dimension_numbers = #tpu.dot_dimension_numbers<[1], [0], [0], [1], [0, 0, 1, 1], [], []>} : vector<256x4xbf16>, vector<4x2xbf16>, vector<256x2xf32> -> vector<256x2xf32>
    %c0_19 = arith.constant 0 : index
    %c0_20 = arith.constant 0 : index
    %50 = vector.load %arg6[%c0_19, %c0_20] : memref<4x2xbf16, #tpu.memory_space<vmem>>, vector<4x2xbf16>
    %cst_21 = arith.constant dense<0.000000e+00> : vector<256x2xf32>
    %51 = tpu.matmul %44, %50, %cst_21 {dimension_numbers = #tpu.dot_dimension_numbers<[1], [0], [0], [1], [0, 0, 1, 1], [], []>} : vector<256x4xbf16>, vector<4x2xbf16>, vector<256x2xf32> -> vector<256x2xf32>
    %52 = arith.addf %49, %51 : vector<256x2xf32>
    %c0_22 = arith.constant 0 : index
    %c0_23 = arith.constant 0 : index
    %53 = vector.load %arg7[%c0_22, %c0_23] : memref<1x2xf32, #tpu.memory_space<vmem>>, vector<1x2xf32>
    %54 = vector.shape_cast %53 : vector<1x2xf32> to vector<2xf32>
    %55 = vector.shape_cast %54 : vector<2xf32> to vector<1x2xf32>
    %56 = vector.broadcast %55 : vector<1x2xf32> to vector<256x2xf32>
    %57 = arith.addf %52, %56 : vector<256x2xf32>
    %58 = arith.negf %57 : vector<256x2xf32>
    %59 = math.exp %58 : vector<256x2xf32>
    %cst_24 = arith.constant 1.000000e+00 : f32
    %60 = vector.broadcast %cst_24 : f32 to vector<256x2xf32>
    %61 = arith.addf %60, %59 : vector<256x2xf32>
    %62 = arith.divf %60, %61 : vector<256x2xf32>
    %63 = arith.mulf %57, %62 : vector<256x2xf32>
    %c0_25 = arith.constant 0 : index
    %c0_26 = arith.constant 0 : index
    %64 = vector.load %arg8[%c0_25, %c0_26] : memref<4x2xbf16, #tpu.memory_space<vmem>>, vector<4x2xbf16>
    %cst_27 = arith.constant dense<0.000000e+00> : vector<256x2xf32>
    %65 = tpu.matmul %47, %64, %cst_27 {dimension_numbers = #tpu.dot_dimension_numbers<[1], [0], [0], [1], [0, 0, 1, 1], [], []>} : vector<256x4xbf16>, vector<4x2xbf16>, vector<256x2xf32> -> vector<256x2xf32>
    %c0_28 = arith.constant 0 : index
    %c0_29 = arith.constant 0 : index
    %66 = vector.load %arg9[%c0_28, %c0_29] : memref<4x2xbf16, #tpu.memory_space<vmem>>, vector<4x2xbf16>
    %cst_30 = arith.constant dense<0.000000e+00> : vector<256x2xf32>
    %67 = tpu.matmul %44, %66, %cst_30 {dimension_numbers = #tpu.dot_dimension_numbers<[1], [0], [0], [1], [0, 0, 1, 1], [], []>} : vector<256x4xbf16>, vector<4x2xbf16>, vector<256x2xf32> -> vector<256x2xf32>
    %68 = arith.addf %65, %67 : vector<256x2xf32>
    %c0_31 = arith.constant 0 : index
    %c0_32 = arith.constant 0 : index
    %69 = vector.load %arg10[%c0_31, %c0_32] : memref<1x2xf32, #tpu.memory_space<vmem>>, vector<1x2xf32>
    %70 = vector.shape_cast %69 : vector<1x2xf32> to vector<2xf32>
    %71 = vector.shape_cast %70 : vector<2xf32> to vector<1x2xf32>
    %72 = vector.broadcast %71 : vector<1x2xf32> to vector<256x2xf32>
    %73 = arith.addf %68, %72 : vector<256x2xf32>
    %74 = arith.negf %73 : vector<256x2xf32>
    %75 = math.exp %74 : vector<256x2xf32>
    %cst_33 = arith.constant 1.000000e+00 : f32
    %76 = vector.broadcast %cst_33 : f32 to vector<256x2xf32>
    %77 = arith.addf %76, %75 : vector<256x2xf32>
    %78 = arith.divf %76, %77 : vector<256x2xf32>
    %79 = arith.mulf %73, %78 : vector<256x2xf32>
    %80 = arith.truncf %63 : vector<256x2xf32> to vector<256x2xbf16>
    %c0_34 = arith.constant 0 : index
    %c0_35 = arith.constant 0 : index
    %81 = vector.load %arg11[%c0_34, %c0_35] : memref<2x2xbf16, #tpu.memory_space<vmem>>, vector<2x2xbf16>
    %cst_36 = arith.constant dense<0.000000e+00> : vector<256x2xf32>
    %82 = tpu.matmul %80, %81, %cst_36 {dimension_numbers = #tpu.dot_dimension_numbers<[1], [0], [0], [1], [0, 0, 1, 1], [], []>} : vector<256x2xbf16>, vector<2x2xbf16>, vector<256x2xf32> -> vector<256x2xf32>
    %c0_37 = arith.constant 0 : index
    %c0_38 = arith.constant 0 : index
    %83 = vector.load %arg12[%c0_37, %c0_38] : memref<1x2xf32, #tpu.memory_space<vmem>>, vector<1x2xf32>
    %84 = vector.shape_cast %83 : vector<1x2xf32> to vector<2xf32>
    %85 = vector.shape_cast %84 : vector<2xf32> to vector<1x2xf32>
    %86 = vector.broadcast %85 : vector<1x2xf32> to vector<256x2xf32>
    %87 = arith.addf %82, %86 : vector<256x2xf32>
    %88 = arith.negf %87 : vector<256x2xf32>
    %89 = math.exp %88 : vector<256x2xf32>
    %cst_39 = arith.constant 1.000000e+00 : f32
    %90 = vector.broadcast %cst_39 : f32 to vector<256x2xf32>
    %91 = arith.addf %90, %89 : vector<256x2xf32>
    %92 = arith.divf %90, %91 : vector<256x2xf32>
    %93 = arith.mulf %87, %92 : vector<256x2xf32>
    %94 = arith.truncf %93 : vector<256x2xf32> to vector<256x2xbf16>
    %95 = vector.shape_cast %94 : vector<256x2xbf16> to vector<16x16x2xbf16>
    %cst_40 = arith.constant 0.000000e+00 : bf16
    %96 = vector.broadcast %cst_40 : bf16 to vector<1x16x2xbf16>
    %cst_41 = arith.constant 0.000000e+00 : bf16
    %97 = vector.broadcast %cst_41 : bf16 to vector<1x16x2xbf16>
    %98 = tpu.concatenate %96, %95, %97 in 0 : vector<1x16x2xbf16>, vector<16x16x2xbf16>, vector<1x16x2xbf16> -> vector<18x16x2xbf16>
    %cst_42 = arith.constant 0.000000e+00 : bf16
    %99 = vector.broadcast %cst_42 : bf16 to vector<18x1x2xbf16>
    %cst_43 = arith.constant 0.000000e+00 : bf16
    %100 = vector.broadcast %cst_43 : bf16 to vector<18x1x2xbf16>
    %101 = tpu.concatenate %99, %98, %100 in 1 : vector<18x1x2xbf16>, vector<18x16x2xbf16>, vector<18x1x2xbf16> -> vector<18x18x2xbf16>
    %102 = vector.extract_strided_slice %101 {offsets = [0, 0, 0], sizes = [16, 16, 2], strides = [1, 1, 1]} : vector<18x18x2xbf16> to vector<16x16x2xbf16>
    %103 = vector.shape_cast %102 : vector<16x16x2xbf16> to vector<256x2xbf16>
    %104 = vector.extract_strided_slice %101 {offsets = [0, 1, 0], sizes = [16, 16, 2], strides = [1, 1, 1]} : vector<18x18x2xbf16> to vector<16x16x2xbf16>
    %105 = vector.shape_cast %104 : vector<16x16x2xbf16> to vector<256x2xbf16>
    %106 = vector.extract_strided_slice %101 {offsets = [0, 2, 0], sizes = [16, 16, 2], strides = [1, 1, 1]} : vector<18x18x2xbf16> to vector<16x16x2xbf16>
    %107 = vector.shape_cast %106 : vector<16x16x2xbf16> to vector<256x2xbf16>
    %108 = vector.extract_strided_slice %101 {offsets = [1, 0, 0], sizes = [16, 16, 2], strides = [1, 1, 1]} : vector<18x18x2xbf16> to vector<16x16x2xbf16>
    %109 = vector.shape_cast %108 : vector<16x16x2xbf16> to vector<256x2xbf16>
    %110 = vector.extract_strided_slice %101 {offsets = [1, 1, 0], sizes = [16, 16, 2], strides = [1, 1, 1]} : vector<18x18x2xbf16> to vector<16x16x2xbf16>
    %111 = vector.shape_cast %110 : vector<16x16x2xbf16> to vector<256x2xbf16>
    %112 = vector.extract_strided_slice %101 {offsets = [1, 2, 0], sizes = [16, 16, 2], strides = [1, 1, 1]} : vector<18x18x2xbf16> to vector<16x16x2xbf16>
    %113 = vector.shape_cast %112 : vector<16x16x2xbf16> to vector<256x2xbf16>
    %114 = vector.extract_strided_slice %101 {offsets = [2, 0, 0], sizes = [16, 16, 2], strides = [1, 1, 1]} : vector<18x18x2xbf16> to vector<16x16x2xbf16>
    %115 = vector.shape_cast %114 : vector<16x16x2xbf16> to vector<256x2xbf16>
    %116 = vector.extract_strided_slice %101 {offsets = [2, 1, 0], sizes = [16, 16, 2], strides = [1, 1, 1]} : vector<18x18x2xbf16> to vector<16x16x2xbf16>
    %117 = vector.shape_cast %116 : vector<16x16x2xbf16> to vector<256x2xbf16>
    %118 = vector.extract_strided_slice %101 {offsets = [2, 2, 0], sizes = [16, 16, 2], strides = [1, 1, 1]} : vector<18x18x2xbf16> to vector<16x16x2xbf16>
    %119 = vector.shape_cast %118 : vector<16x16x2xbf16> to vector<256x2xbf16>
    %120 = tpu.concatenate %103, %105, %107, %109, %111, %113, %115, %117, %119 in 1 : vector<256x2xbf16>, vector<256x2xbf16>, vector<256x2xbf16>, vector<256x2xbf16>, vector<256x2xbf16>, vector<256x2xbf16>, vector<256x2xbf16>, vector<256x2xbf16>, vector<256x2xbf16> -> vector<256x18xbf16>
    %c0_44 = arith.constant 0 : index
    %c0_45 = arith.constant 0 : index
    %121 = vector.load %arg13[%c0_44, %c0_45] : memref<18x2xbf16, #tpu.memory_space<vmem>>, vector<18x2xbf16>
    %cst_46 = arith.constant dense<0.000000e+00> : vector<256x2xf32>
    %122 = tpu.matmul %120, %121, %cst_46 {dimension_numbers = #tpu.dot_dimension_numbers<[1], [0], [0], [1], [0, 0, 1, 1], [], []>} : vector<256x18xbf16>, vector<18x2xbf16>, vector<256x2xf32> -> vector<256x2xf32>
    %c0_47 = arith.constant 0 : index
    %c0_48 = arith.constant 0 : index
    %123 = vector.load %arg14[%c0_47, %c0_48] : memref<1x2xf32, #tpu.memory_space<vmem>>, vector<1x2xf32>
    %124 = vector.shape_cast %123 : vector<1x2xf32> to vector<2xf32>
    %125 = vector.shape_cast %124 : vector<2xf32> to vector<1x2xf32>
    %126 = vector.broadcast %125 : vector<1x2xf32> to vector<256x2xf32>
    %127 = arith.addf %122, %126 : vector<256x2xf32>
    %128 = arith.negf %127 : vector<256x2xf32>
    %129 = math.exp %128 : vector<256x2xf32>
    %cst_49 = arith.constant 1.000000e+00 : f32
    %130 = vector.broadcast %cst_49 : f32 to vector<256x2xf32>
    %131 = arith.addf %130, %129 : vector<256x2xf32>
    %132 = arith.divf %130, %131 : vector<256x2xf32>
    %133 = arith.mulf %127, %132 : vector<256x2xf32>
    %134 = arith.addf %63, %133 : vector<256x2xf32>
    %135 = arith.truncf %134 : vector<256x2xf32> to vector<256x2xbf16>
    %c0_50 = arith.constant 0 : index
    %c0_51 = arith.constant 0 : index
    %136 = vector.load %arg15[%c0_50, %c0_51] : memref<2x4xbf16, #tpu.memory_space<vmem>>, vector<2x4xbf16>
    %cst_52 = arith.constant dense<0.000000e+00> : vector<256x4xf32>
    %137 = tpu.matmul %135, %136, %cst_52 {dimension_numbers = #tpu.dot_dimension_numbers<[1], [0], [0], [1], [0, 0, 1, 1], [], []>} : vector<256x2xbf16>, vector<2x4xbf16>, vector<256x4xf32> -> vector<256x4xf32>
    %138 = arith.truncf %79 : vector<256x2xf32> to vector<256x2xbf16>
    %c0_53 = arith.constant 0 : index
    %c0_54 = arith.constant 0 : index
    %139 = vector.load %arg16[%c0_53, %c0_54] : memref<2x4xbf16, #tpu.memory_space<vmem>>, vector<2x4xbf16>
    %cst_55 = arith.constant dense<0.000000e+00> : vector<256x4xf32>
    %140 = tpu.matmul %138, %139, %cst_55 {dimension_numbers = #tpu.dot_dimension_numbers<[1], [0], [0], [1], [0, 0, 1, 1], [], []>} : vector<256x2xbf16>, vector<2x4xbf16>, vector<256x4xf32> -> vector<256x4xf32>
    %141 = arith.addf %137, %140 : vector<256x4xf32>
    %c0_56 = arith.constant 0 : index
    %c0_57 = arith.constant 0 : index
    %142 = vector.load %arg17[%c0_56, %c0_57] : memref<1x4xf32, #tpu.memory_space<vmem>>, vector<1x4xf32>
    %143 = vector.shape_cast %142 : vector<1x4xf32> to vector<4xf32>
    %144 = vector.shape_cast %143 : vector<4xf32> to vector<1x4xf32>
    %145 = vector.broadcast %144 : vector<1x4xf32> to vector<256x4xf32>
    %146 = arith.addf %141, %145 : vector<256x4xf32>
    %147 = arith.negf %146 : vector<256x4xf32>
    %148 = math.exp %147 : vector<256x4xf32>
    %cst_58 = arith.constant 1.000000e+00 : f32
    %149 = vector.broadcast %cst_58 : f32 to vector<256x4xf32>
    %150 = arith.addf %149, %148 : vector<256x4xf32>
    %151 = arith.divf %149, %150 : vector<256x4xf32>
    %152 = arith.mulf %146, %151 : vector<256x4xf32>
    %153 = vector.shape_cast %152 : vector<256x4xf32> to vector<16x16x4xf32>
    %c0_59 = arith.constant 0 : index
    %c0_60 = arith.constant 0 : index
    %c0_61 = arith.constant 0 : index
    %c0_62 = arith.constant 0 : index
    %154 = vector.load %arg18[%c0_59, %c0_60, %c0_61, %c0_62] : memref<1x16x16x4xf32, #tpu.memory_space<vmem>>, vector<1x16x16x4xf32>
    %155 = vector.shape_cast %154 : vector<1x16x16x4xf32> to vector<16x16x4xf32>
    %156 = vector.shape_cast %153 : vector<16x16x4xf32> to vector<1x16x16x4xf32>
    tpu.vector_store %arg18[%c0_59, %c0_60, %c0_61, %c0_62], %156 {strides = array<i32>} : memref<1x16x16x4xf32, #tpu.memory_space<vmem>>, vector<1x16x16x4xf32>,
    return
  }
  func.func @transform_0(%arg0: i32) -> (i32, i32, i32, i32) {
    %c0_i32 = arith.constant 0 : i32
    %c0_i32_0 = arith.constant 0 : i32
    %c0_i32_1 = arith.constant 0 : i32
    %c0_i32_2 = arith.constant 0 : i32
    return %arg0, %c0_i32, %c0_i32_0, %c0_i32_1 : i32, i32, i32, i32
  }
  func.func @transform_1(%arg0: i32) -> (i32, i32, i32, i32) {
    %c0_i32 = arith.constant 0 : i32
    %c0_i32_0 = arith.constant 0 : i32
    %c0_i32_1 = arith.constant 0 : i32
    %c0_i32_2 = arith.constant 0 : i32
    return %arg0, %c0_i32, %c0_i32_0, %c0_i32_1 : i32, i32, i32, i32
  }
  func.func @transform_2(%arg0: i32) -> (i32, i32) {
    %c0_i32 = arith.constant 0 : i32
    %c0_i32_0 = arith.constant 0 : i32
    %c0_i32_1 = arith.constant 0 : i32
    return %c0_i32, %c0_i32_0 : i32, i32
  }
  func.func @transform_3(%arg0: i32) -> (i32, i32) {
    %c0_i32 = arith.constant 0 : i32
    %c0_i32_0 = arith.constant 0 : i32
    %c0_i32_1 = arith.constant 0 : i32
    return %c0_i32, %c0_i32_0 : i32, i32
  }
  func.func @transform_4(%arg0: i32) -> (i32, i32) {
    %c0_i32 = arith.constant 0 : i32
    %c0_i32_0 = arith.constant 0 : i32
    %c0_i32_1 = arith.constant 0 : i32
    return %c0_i32, %c0_i32_0 : i32, i32
  }
  func.func @transform_5(%arg0: i32) -> (i32, i32) {
    %c0_i32 = arith.constant 0 : i32
    %c0_i32_0 = arith.constant 0 : i32
    %c0_i32_1 = arith.constant 0 : i32
    return %c0_i32, %c0_i32_0 : i32, i32
  }
  func.func @transform_6(%arg0: i32) -> (i32, i32) {
    %c0_i32 = arith.constant 0 : i32
    %c0_i32_0 = arith.constant 0 : i32
    %c0_i32_1 = arith.constant 0 : i32
    return %c0_i32, %c0_i32_0 : i32, i32
  }
  func.func @transform_7(%arg0: i32) -> (i32, i32) {
    %c0_i32 = arith.constant 0 : i32
    %c0_i32_0 = arith.constant 0 : i32
    %c0_i32_1 = arith.constant 0 : i32
    return %c0_i32, %c0_i32_0 : i32, i32
  }
  func.func @transform_8(%arg0: i32) -> (i32, i32) {
    %c0_i32 = arith.constant 0 : i32
    %c0_i32_0 = arith.constant 0 : i32
    %c0_i32_1 = arith.constant 0 : i32
    return %c0_i32, %c0_i32_0 : i32, i32
  }
  func.func @transform_9(%arg0: i32) -> (i32, i32) {
    %c0_i32 = arith.constant 0 : i32
    %c0_i32_0 = arith.constant 0 : i32
    %c0_i32_1 = arith.constant 0 : i32
    return %c0_i32, %c0_i32_0 : i32, i32
  }
  func.func @transform_10(%arg0: i32) -> (i32, i32) {
    %c0_i32 = arith.constant 0 : i32
    %c0_i32_0 = arith.constant 0 : i32
    %c0_i32_1 = arith.constant 0 : i32
    return %c0_i32, %c0_i32_0 : i32, i32
  }
  func.func @transform_11(%arg0: i32) -> (i32, i32) {
    %c0_i32 = arith.constant 0 : i32
    %c0_i32_0 = arith.constant 0 : i32
    %c0_i32_1 = arith.constant 0 : i32
    return %c0_i32, %c0_i32_0 : i32, i32
  }
  func.func @transform_12(%arg0: i32) -> (i32, i32) {
    %c0_i32 = arith.constant 0 : i32
    %c0_i32_0 = arith.constant 0 : i32
    %c0_i32_1 = arith.constant 0 : i32
    return %c0_i32, %c0_i32_0 : i32, i32
  }
  func.func @transform_13(%arg0: i32) -> (i32, i32) {
    %c0_i32 = arith.constant 0 : i32
    %c0_i32_0 = arith.constant 0 : i32
    %c0_i32_1 = arith.constant 0 : i32
    return %c0_i32, %c0_i32_0 : i32, i32
  }
  func.func @transform_14(%arg0: i32) -> (i32, i32) {
    %c0_i32 = arith.constant 0 : i32
    %c0_i32_0 = arith.constant 0 : i32
    %c0_i32_1 = arith.constant 0 : i32
    return %c0_i32, %c0_i32_0 : i32, i32
  }
  func.func @transform_15(%arg0: i32) -> (i32, i32) {
    %c0_i32 = arith.constant 0 : i32
    %c0_i32_0 = arith.constant 0 : i32
    %c0_i32_1 = arith.constant 0 : i32
    return %c0_i32, %c0_i32_0 : i32, i32
  }
  func.func @transform_16(%arg0: i32) -> (i32, i32) {
    %c0_i32 = arith.constant 0 : i32
    %c0_i32_0 = arith.constant 0 : i32
    %c0_i32_1 = arith.constant 0 : i32
    return %c0_i32, %c0_i32_0 : i32, i32
  }
  func.func @transform_17(%arg0: i32) -> (i32, i32, i32, i32) {
    %c0_i32 = arith.constant 0 : i32
    %c0_i32_0 = arith.constant 0 : i32
    %c0_i32_1 = arith.constant 0 : i32
    %c0_i32_2 = arith.constant 0 : i32
    return %arg0, %c0_i32, %c0_i32_0, %c0_i32_1 : i32, i32, i32, i32
  }
}

</mosaic_0001>

<bundles_post_ra>
// kernel: up_c3_forward.1
= control target key start
LH: loop header
LB: loop body
LE: loop exit
PB: predicated region body
PF: predicated region fallthrough
CT: control target
= control target key end

     0   :  { %s9528_s24 = smov 0   ;;  %s15659_s0 = inlined_call_operand.vmem [shape: bf16[2,8,8,8], index: 0, kind: input, shape index: {}]   ;;  %s15660_s1 = inlined_call_operand.vmem [shape: bf16[2,16,16,4], index: 1, kind: input, shape index: {}]   ;;  %s15661_s2 = inlined_call_operand.vmem [shape: bf16[72,4], index: 2, kind: input, shape index: {}]   ;;  %s15662_s3 = inlined_call_operand.vmem [shape: f32[1,4], index: 3, kind: input, shape index: {}]   ;;  %s15663_s4 = inlined_call_operand.vmem [shape: bf16[4,2], index: 4, kind: input, shape index: {}]   ;;  %s15664_s5 = inlined_call_operand.vmem [shape: bf16[4,2], index: 5, kind: input, shape index: {}]   ;;  %s15665_s6 = inlined_call_operand.vmem [shape: f32[1,2], index: 6, kind: input, shape index: {}]   ;;  %s15666_s7 = inlined_call_operand.vmem [shape: bf16[4,2], index: 7, kind: input, shape index: {}]   ;;  %s15667_s8 = inlined_call_operand.vmem [shape: bf16[4,2], index: 8, kind: input, shape index: {}]   ;;  %s15668_s9 = inlined_call_operand.vmem [shape: f32[1,2], index: 9, kind: input, shape index: {}]   ;;  %s15669_s10 = inlined_call_operand.vmem [shape: bf16[2,2], index: 10, kind: input, shape index: {}]   ;;  %s15670_s11 = inlined_call_operand.vmem [shape: f32[1,2], index: 11, kind: input, shape index: {}]   ;;  %s15671_s12 = inlined_call_operand.vmem [shape: bf16[18,2], index: 12, kind: input, shape index: {}]   ;;  %s15672_s13 = inlined_call_operand.vmem [shape: f32[1,2], index: 13, kind: input, shape index: {}]   ;;  %s15673_s14 = inlined_call_operand.vmem [shape: bf16[2,4], index: 14, kind: input, shape index: {}]   ;;  %s15674_s15 = inlined_call_operand.vmem [shape: bf16[2,4], index: 15, kind: input, shape index: {}]   ;;  %s15675_s16 = inlined_call_operand.vmem [shape: f32[1,4], index: 16, kind: input, shape index: {}]   ;;  %s15676_s17 = inlined_call_operand.vmem [shape: f32[2,16,16,4], index: 17, kind: output, shape index: {}]  }
   0x1   :  { %15720 = sst [smem:[#allocation40_spill]] %s15659_s0 }
   0x2   :  { %15721 = sst [smem:[#allocation41_spill]] %s15660_s1 }
   0x3 LB: > { %s8275_s25 = sadd.s32 4294967295, %s9421_s24   ;;  %p8279_p0 = scmp.ge.s32.totalorder %s9421_s24, 1  ;;  %s9421_s24 = sphi %s9528_s24, %s27_s24  }
   0x4   : > { %p497_p1 = scmp.lt.s32.totalorder %s9421_s24, 3 }
   0x6   : > { %p498_p2 = pnand %p8279_p0, %p497_p1 }
   0x8   : > { %501 = sbr.rel (%p498_p2) target bundleno = 1899 (0x76b), region = 88 }
   0xd   : > { %p554_p3 = scmp.lt.s32.totalorder %s8275_s25, 1  ;;  %vm15710_vm0 = vcmask 1040384   ;;  %vm1503_vm1 = vsmask.f32 256  ;;  %v9423_v0 = vmov 0   ;;  %v15722_v2 = vmov 0 }
   0xe   : > { %v1368_v1 = vrot.slane %v9423_v0, 7  ;;  %vm9537_vm2 = vmand %vm15710_vm0, %vm1503_vm1  ;;  %vm1764_vm3 = vcmask 1046528   ;;  %s15727_s29 = sld [smem:[#allocation40_spill]]  ;;  %s9424_s30 = smov 16   ;;  %vm599_vm4 = vcmask 1041409   ;;  %vm603_vm5 = vcmask 1042434  }
   0xf   : > { %v15723_v2 = vsel %vm9537_vm2, 4294967295, %v15722_v2  ;;  %s16221_s25 = smov (!%p554_p3, %s8275_s25), 1  ;;  %vm607_vm6 = vcmask 1043459   ;;  %vm1539_vm7 = vsmask.f32 7424  ;;  %s9425_s18 = smov 8  }
  0x10   : > { %15724 = vst [vmem:[#allocation2_spill] sm:$0xff] %v15723_v2  ;;  %v9545_v3 = vsel %vm9537_vm2, 0, %v1368_v1  ;;  %v9549_v4 = vsel %vm9537_vm2, %v1368_v1, 0  ;;  %s8708_s26 = sshll.u32 %s16221_s25, 5  ;;  %s9426_s19 = smov 24   ;;  %vm2423_vm8 = vcmask 1043456  }
  0x11   : > { %15725 = vst [vmem:[#allocation3_spill] sm:$0xff] %v9545_v3  ;;  %v1765_v5 = vrot.slane %v9545_v3, 1  ;;  %v1766_v6 = vrot.slane %v9549_v4, 1  ;;  %v1548_v59 = vshll.u32 %v9549_v4, 16  ;;  %v1541_v63 = vshrl.u32 %v9545_v3, 16  ;;  %s9427_s1 = smov 40  }
  0x12   : > { %v1543_v0 = vshll.u32 %v9545_v3, 16  ;;  %s9428_s20 = smov 32   ;;  %s9429_s21 = smov 48   ;;  %vm15692_vm9 = vcmask 64512   ;;  %vm15691_vm10 = vcmask 130048   ;;  %vm2152_vm11 = vcmask 195584  }
  0x13   : > { %v9555_v7 = vsel %vm1764_vm3, %v1765_v5, %v1766_v6  ;;  %s9430_s22 = smov 64   ;;  %s9431_s23 = smov 56   ;;  %vm2185_vm12 = vcmask 261120   ;;  %vm2218_vm13 = vcmask 326656   ;;  %vm2251_vm14 = vcmask 392192  }
  0x14   : > { %15726 = vst [vmem:[#allocation4_spill] sm:$0xff] %v9555_v7  ;;  %s9560_s0 = scalar_lea.vmem %s15727_s29, %s8708_s26  ;;  %1862 = vrot.lane.b32.xlu0 %v9555_v7, %s9424_s30  ;;  %vm2284_vm15 = vcmask 457728   ;;  %vm2317_vm1 = vcmask 523264   ;;  %s9436_s27 = smov 12  }
  0x15   : > { %v570_v8 = vld [vmem:[%s9560_s0] sm:$0xf]  ;;  %v571_v47 = vld [vmem:[%s9560_s0 + $0x4] sm:$0xf]  ;;  %s9437_s29 = smov 14  }
  0x16   : > { %v586_v9 = vrot.slane %v570_v8, 3  ;;  %v587_v52 = vrot.slane %v571_v47, 3 }
  0x18   : > { %v600_v10 = vsel %vm599_vm4, %v570_v8, %v586_v9  ;;  %v604_v11 = vsel %vm603_vm5, %v570_v8, %v586_v9  ;;  %v608_v13 = vsel %vm607_vm6, %v570_v8, %v586_v9  ;;  %v597_v14 = vsel %vm15710_vm0, %v570_v8, %v586_v9 }
  0x19   : > { %v602_v12 = vrot.slane %v600_v10, 1  ;;  %v606_v15 = vrot.slane %v604_v11, 2  ;;  %v610_v16 = vrot.slane %v608_v13, 3  ;;  %v703_v17 = vunpack.i.h.s16 %v597_v14 }
  0x1a   : > { %v8286_v21 = vpack.i.b16 %v597_v14, %v597_v14  ;;  %v615_v55 = vsel %vm599_vm4, %v571_v47, %v587_v52  ;;  %v618_v56 = vsel %vm603_vm5, %v571_v47, %v587_v52  ;;  %v613_v57 = vsel %vm15710_vm0, %v571_v47, %v587_v52 }
  0x1b   : > { %v705_v18 = vunpack.i.h.s16 %v602_v12  ;;  %v707_v19 = vunpack.i.h.s16 %v606_v15  ;;  %v709_v20 = vunpack.i.h.s16 %v610_v16  ;;  %v767_v22 = vpack.i.b16 %v703_v17, %v703_v17 }
  0x1c   : > { %v8287_v23 = vpack.i.b16 %v602_v12, %v602_v12  ;;  %v8288_v25 = vpack.i.b16 %v606_v15, %v606_v15  ;;  %v8289_v27 = vpack.i.b16 %v610_v16, %v610_v16  ;;  %v830_v29 = vperm.slane %v8286_v21, 0 }
  0x1d   : > { %v769_v24 = vpack.i.b16 %v705_v18, %v705_v18  ;;  %v771_v26 = vpack.i.b16 %v707_v19, %v707_v19  ;;  %v773_v28 = vpack.i.b16 %v709_v20, %v709_v20  ;;  %v831_v30 = vperm.slane %v767_v22, 0 }
  0x1e   : > { %v832_v31 = vperm.slane %v8287_v23, 0  ;;  %v834_v33 = vperm.slane %v8288_v25, 0  ;;  %v836_v35 = vperm.slane %v8289_v27, 0  ;;  %v895_v37 = vpack.i.b16 %v830_v29, %v830_v29 }
  0x1f   : > { %v833_v32 = vperm.slane %v769_v24, 0  ;;  %v835_v34 = vperm.slane %v771_v26, 0  ;;  %v837_v36 = vperm.slane %v773_v28, 0  ;;  %v899_v38 = vpack.i.b16 %v831_v30, %v831_v30 }
  0x20   : > { %v903_v39 = vpack.i.b16 %v832_v31, %v832_v31  ;;  %v911_v41 = vpack.i.b16 %v834_v33, %v834_v33  ;;  %v897_v43 = vperm.slane %v895_v37, 0  ;;  %v919_v46 = vpack.i.b16 %v836_v35, %v836_v35 }
  0x21   : > { %v907_v40 = vpack.i.b16 %v833_v32, %v833_v32  ;;  %v9569_v42 = vpack.i.b16 %v835_v34, %v835_v34  ;;  %v901_v44 = vperm.slane %v899_v38, 0  ;;  %v9572_v49 = vpack.i.b16 %v837_v36, %v837_v36 }
  0x22   : > { %v905_v45 = vperm.slane %v903_v39, 0  ;;  %v913_v50 = vperm.slane %v911_v41, 0  ;;  %1151 = vst [vmem:[#allocation1] ss:$9 sm:$0xff] %v897_v43  ;;  %v921_v53 = vperm.slane %v919_v46, 0  ;;  %v617_v58 = vrot.slane %v615_v55, 1 }
  0x23   : > { %v909_v48 = vperm.slane %v907_v40, 0  ;;  %v917_v51 = vperm.slane %v9569_v42, 0  ;;  %1154 = vst [vmem:[#allocation1 + $0x1] ss:$9 sm:$0xff] %v901_v44  ;;  %v925_v54 = vperm.slane %v9572_v49, 0  ;;  %v620_v60 = vrot.slane %v618_v56, 2 }
  0x24   : > { %1157 = vst [vmem:[#allocation1 + $0x2] ss:$9 sm:$0xff] %v905_v45  ;;  %v621_v61 = vsel %vm607_vm6, %v571_v47, %v587_v52  ;;  %v711_v62 = vunpack.i.h.s16 %v613_v57  ;;  %v713_v5 = vunpack.i.h.s16 %v617_v58  ;;  %v8290_v8 = vpack.i.b16 %v613_v57, %v613_v57  ;;  %v572_v55 = vld [vmem:[%s9560_s0 + $0x8] sm:$0xf] }
  0x25   : > { %1160 = vst [vmem:[#allocation1 + $0x3] ss:$9 sm:$0xff] %v909_v48  ;;  %v623_v1 = vrot.slane %v621_v61, 3  ;;  %v715_v6 = vunpack.i.h.s16 %v620_v60  ;;  %v1545_v10 = vrot.slane %v1543_v0, 1  ;;  %v1550_v11 = vrot.slane %v1548_v59, 1 }
  0x26   : > { %1163 = vst [vmem:[#allocation1 + $0x4] ss:$9 sm:$0xff] %v913_v50  ;;  %v775_v12 = vpack.i.b16 %v711_v62, %v711_v62  ;;  %v8291_v14 = vpack.i.b16 %v617_v58, %v617_v58  ;;  %v777_v17 = vpack.i.b16 %v713_v5, %v713_v5  ;;  %v8292_v18 = vpack.i.b16 %v620_v60, %v620_v60 }
  0x27   : > { %1166 = vst [vmem:[#allocation1 + $0x5] ss:$9 sm:$0xff] %v917_v51  ;;  %v1546_v15 = vor.u32 %v1545_v10, %v1541_v63  ;;  %v717_v16 = vunpack.i.h.s16 %v623_v1  ;;  %v779_v20 = vpack.i.b16 %v715_v6, %v715_v6  ;;  %v838_v21 = vperm.slane %v8290_v8, 0 }
  0x28   : > { %1169 = vst [vmem:[#allocation1 + $0x6] ss:$9 sm:$0xff] %v921_v53  ;;  %v8293_v23 = vpack.i.b16 %v623_v1, %v623_v1  ;;  %v839_v24 = vperm.slane %v775_v12, 0  ;;  %v840_v27 = vperm.slane %v8291_v14, 0  ;;  %v841_v31 = vperm.slane %v777_v17, 0 }
  0x29   : > { %1172 = vst [vmem:[#allocation1 + $0x7] ss:$9 sm:$0xff] %v925_v54  ;;  %v9584_v22 = vsel %vm1539_vm7, %v1546_v15, %v1550_v11  ;;  %v781_v30 = vpack.i.b16 %v717_v16, %v717_v16  ;;  %v842_v32 = vperm.slane %v8292_v18, 0  ;;  %v927_v34 = vpack.i.b16 %v838_v21, %v838_v21 }
  0x2a   : > { %15728 = vst [vmem:[#allocation5_spill] sm:$0xff] %v9584_v22  ;;  %1830 = vrot.lane.b32.xlu0 %v9584_v22, %s9425_s18  ;;  %v843_v38 = vperm.slane %v779_v20, 0  ;;  %v844_v39 = vperm.slane %v8293_v23, 0  ;;  %v9599_v40 = vpack.i.b16 %v839_v24, %v839_v24  ;;  %v935_v41 = vpack.i.b16 %v840_v27, %v840_v27 }
  0x2b   : > { %v9602_v46 = vpack.i.b16 %v841_v31, %v841_v31  ;;  %v929_v47 = vperm.slane %v927_v34, 0  ;;  %v588_v63 = vrot.slane %v572_v55, 3 }
  0x2c   : > { %v9609_v52 = vperm.slane %v935_v41, 0 }
  0x2d   : > { %v941_v56 = vperm.slane %v9602_v46, 0  ;;  %v628_v10 = vsel %vm599_vm4, %v572_v55, %v588_v63  ;;  %v631_v11 = vsel %vm603_vm5, %v572_v55, %v588_v63  ;;  %v626_v16 = vsel %vm15710_vm0, %v572_v55, %v588_v63 }
  0x2e   : > { %v630_v17 = vrot.slane %v628_v10, 1  ;;  %v634_v18 = vsel %vm607_vm6, %v572_v55, %v588_v63  ;;  %v633_v21 = vrot.slane %v631_v11, 2  ;;  %v719_v23 = vunpack.i.h.s16 %v626_v16 }
  0x30   : > { %v1173_v9 = vld [vmem:[#allocation1] sm:$0xff]  ;;  %v721_v27 = vunpack.i.h.s16 %v630_v17  ;;  %v783_v31 = vpack.i.b16 %v719_v23, %v719_v23  ;;  %v8296_v41 = vpack.i.b16 %v633_v21, %v633_v21 }
  0x31   : > { %1174 = vst [vmem:[#allocation1] ss:$9 sm:$0xff] %v897_v43  ;;  %v1372_v13 = vshrl.u32 %v1173_v9, 16  ;;  %v1375_v4 = vshll.u32 %v1173_v9, 16 }
  0x32   : > { %1175 = vst [vmem:[#allocation1 + $0x1] ss:$9 sm:$0xff] %v901_v44  ;;  %v850_v46 = vperm.slane %v8296_v41, 0 }
  0x33   : > { %1176 = vst [vmem:[#allocation1 + $0x2] ss:$9 sm:$0xff] %v905_v45  ;;  %v1374_v19 = vrot.slane %v1372_v13, 7  ;;  %v845_v45 = vperm.slane %v781_v30, 0 }
  0x34   : > { %1177 = vst [vmem:[#allocation1 + $0x3] ss:$9 sm:$0xff] %v909_v48  ;;  %v943_v48 = vpack.i.b16 %v842_v32, %v842_v32 }
  0x35   : > { %1178 = vst [vmem:[#allocation1 + $0x4] ss:$9 sm:$0xff] %v913_v50  ;;  %v1377_v25 = vor.u32 %v1375_v4, %v1374_v19  ;;  %v1523_v26 = vsel %vm9537_vm2, %v1374_v19, 0  ;;  %v933_v50 = vperm.slane %v9599_v40, 0  ;;  %v9614_v57 = vpack.i.b16 %v845_v45, %v845_v45 }
  0x36   : > { %1179 = vst [vmem:[#allocation1 + $0x5] ss:$9 sm:$0xff] %v917_v51  ;;  %v1769_v28 = vrot.slane %v1523_v26, 1  ;;  %v1560_v29 = vshll.u32 %v1523_v26, 16  ;;  %v9606_v51 = vpack.i.b16 %v843_v38, %v843_v38  ;;  %v9616_v59 = vperm.slane %v943_v48, 0 }
  0x37   : > { %1180 = vst [vmem:[#allocation1 + $0x6] ss:$9 sm:$0xff] %v921_v53  ;;  %v9592_v33 = vsel %vm9537_vm2, 0, %v1377_v25  ;;  %v951_v53 = vpack.i.b16 %v844_v39, %v844_v39  ;;  %v957_v5 = vperm.slane %v9614_v57, 0  ;;  %v636_v26 = vrot.slane %v634_v18, 3 }
  0x38   : > { %1181 = vst [vmem:[#allocation1 + $0x7] ss:$9 sm:$0xff] %v925_v54  ;;  %1894 = vrot.lane.b32.xlu1 %v9592_v33, %s9426_s19  ;;  %v1768_v35 = vrot.slane %v9592_v33, 1  ;;  %v1553_v36 = vshrl.u32 %v9592_v33, 16  ;;  %v1555_v37 = vshll.u32 %v9592_v33, 16  ;;  %v1562_v44 = vrot.slane %v1560_v29, 1 }
  0x39   : > { %v949_v62 = vperm.slane %v9606_v51, 0  ;;  %v9622_v0 = vperm.slane %v951_v53, 0  ;;  %v8294_v29 = vpack.i.b16 %v626_v16, %v626_v16  ;;  %v785_v38 = vpack.i.b16 %v721_v27, %v721_v27 }
  0x3a   : > { %v1770_v42 = vsel %vm1764_vm3, %v1768_v35, %v1769_v28  ;;  %v1557_v43 = vrot.slane %v1555_v37, 1  ;;  %v723_v28 = vunpack.i.h.s16 %v633_v21  ;;  %v8295_v37 = vpack.i.b16 %v630_v17, %v630_v17 }
  0x3b   : > { %1958 = vrot.lane.b32.xlu2 %v1770_v42, %s9427_s1  ;;  %1864 = vrot.lane.b32.xlu0 %v1770_v42, %s9424_s30  ;;  %v846_v42 = vperm.slane %v8294_v29, 0  ;;  %v8297_v45 = vpack.i.b16 %v636_v26, %v636_v26 }
  0x3c   : > { %v1558_v49 = vor.u32 %v1557_v43, %v1553_v36  ;;  %v725_v36 = vunpack.i.h.s16 %v636_v26  ;;  %v787_v43 = vpack.i.b16 %v723_v28, %v723_v28  ;;  %v848_v48 = vperm.slane %v8295_v37, 0 }
  0x3d   : > { %v852_v55 = vperm.slane %v8297_v45, 0 }
  0x3e   : > { %v1563_v54 = vsel %vm1539_vm7, %v1558_v49, %v1562_v44  ;;  %v847_v44 = vperm.slane %v783_v31, 0  ;;  %v849_v49 = vperm.slane %v785_v38, 0  ;;  %v967_v51 = vpack.i.b16 %v848_v48, %v848_v48 }
  0x3f   : > { %v1182_v58 = vld [vmem:[#allocation1] sm:$0xff] }
  0x40   : > { %1184 = vst [vmem:[#allocation1] ss:$9 sm:$0xff] %v929_v47  ;;  %1926 = vrot.lane.b32.xlu1 %v1563_v54, %s9428_s20  ;;  %v1378_v60 = vshrl.u32 %v1182_v58, 16  ;;  %v1381_v61 = vshll.u32 %v1182_v58, 16  ;;  %v9669_v53 = vpack.i.b16 %v847_v44, %v847_v44 }
  0x41   : > { %1186 = vst [vmem:[#allocation1 + $0x1] ss:$9 sm:$0xff] %v933_v50 }
  0x42   : > { %1188 = vst [vmem:[#allocation1 + $0x2] ss:$9 sm:$0xff] %v9609_v52  ;;  %v1380_v1 = vrot.slane %v1378_v60, 7 }
  0x43   : > { %1190 = vst [vmem:[#allocation1 + $0x3] ss:$9 sm:$0xff] %v941_v56  ;;  %1832 = vrot.lane.b32.xlu2 %v1563_v54, %s9425_s18 }
  0x44   : > { %1192 = vst [vmem:[#allocation1 + $0x4] ss:$9 sm:$0xff] %v9616_v59  ;;  %v1383_v6 = vor.u32 %v1381_v61, %v1380_v1  ;;  %v1524_v8 = vsel %vm9537_vm2, %v1380_v1, 0  ;;  %v975_v61 = vpack.i.b16 %v850_v46, %v850_v46 }
  0x45   : > { %1194 = vst [vmem:[#allocation1 + $0x5] ss:$9 sm:$0xff] %v949_v62  ;;  %v1772_v9 = vrot.slane %v1524_v8, 1  ;;  %v1572_v15 = vshll.u32 %v1524_v8, 16  ;;  %v983_v8 = vpack.i.b16 %v852_v55, %v852_v55 }
  0x46   : > { %1196 = vst [vmem:[#allocation1 + $0x6] ss:$9 sm:$0xff] %v9622_v0  ;;  %v9639_v12 = vsel %vm9537_vm2, 0, %v1383_v6  ;;  %v969_v6 = vperm.slane %v967_v51, 0 }
  0x47   : > { %1198 = vst [vmem:[#allocation1 + $0x7] ss:$9 sm:$0xff] %v957_v5  ;;  %v1771_v13 = vrot.slane %v9639_v12, 1  ;;  %v1565_v4 = vshrl.u32 %v9639_v12, 16  ;;  %v1567_v14 = vshll.u32 %v9639_v12, 16  ;;  %v1574_v25 = vrot.slane %v1572_v15, 1 }
  0x48   : > { %1896 = vrot.lane.b32.xlu1 %v9639_v12, %s9426_s19  ;;  %v977_v15 = vperm.slane %v975_v61, 0  ;;  %v985_v21 = vperm.slane %v983_v8, 0 }
  0x49   : > { %v1773_v19 = vsel %vm1764_vm3, %v1771_v13, %v1772_v9  ;;  %v1569_v20 = vrot.slane %v1567_v14, 1 }
  0x4a   : > { %1960 = vrot.lane.b32.xlu0 %v1773_v19, %s9427_s1 }
  0x4b   : > { %v1570_v24 = vor.u32 %v1569_v20, %v1565_v4  ;;  %1990 = vrot.lane.b32.xlu2 %v9639_v12, %s9429_s21 }
  0x4d   : > { %v1575_v32 = vsel %vm1539_vm7, %v1570_v24, %v1574_v25 }
  0x4e   : > { %v1199_v30 = vld [vmem:[#allocation1] sm:$0xff] }
  0x4f   : > { %1200 = vst [vmem:[#allocation1] ss:$9 sm:$0xff] %v929_v47  ;;  %v1384_v34 = vshrl.u32 %v1199_v30, 16  ;;  %v1387_v35 = vshll.u32 %v1199_v30, 16  ;;  %v789_v47 = vpack.i.b16 %v725_v36, %v725_v36 }
  0x50   : > { %1201 = vst [vmem:[#allocation1 + $0x1] ss:$9 sm:$0xff] %v933_v50  ;;  %2054 = vrot.lane.b32.xlu1 %v1773_v19, %s9430_s22  ;;  %v959_v50 = vpack.i.b16 %v846_v42, %v846_v42 }
  0x51   : > { %1202 = vst [vmem:[#allocation1 + $0x2] ss:$9 sm:$0xff] %v9609_v52  ;;  %v1386_v39 = vrot.slane %v1384_v34, 7  ;;  %v851_v52 = vperm.slane %v787_v43, 0 }
  0x52   : > { %1203 = vst [vmem:[#allocation1 + $0x3] ss:$9 sm:$0xff] %v941_v56  ;;  %2022 = vrot.lane.b32.xlu0 %v1575_v32, %s9431_s23  ;;  %v853_v56 = vperm.slane %v789_v47, 0  ;;  %v961_v60 = vperm.slane %v959_v50, 0 }
  0x53   : > { %1204 = vst [vmem:[#allocation1 + $0x4] ss:$9 sm:$0xff] %v9616_v59  ;;  %v1389_v40 = vor.u32 %v1387_v35, %v1386_v39  ;;  %1866 = vrot.lane.b32.xlu2 %v1773_v19, %s9424_s30  ;;  %v1525_v58 = vsel %vm9537_vm2, %v1386_v39, 0  ;;  %v9678_v59 = vpack.i.b16 %v849_v49, %v849_v49  ;;  %v9684_v63 = vpack.i.b16 %v851_v52, %v851_v52 }
  0x54   : > { %1205 = vst [vmem:[#allocation1 + $0x5] ss:$9 sm:$0xff] %v949_v62  ;;  %v965_v62 = vperm.slane %v9669_v53, 0  ;;  %v1775_v1 = vrot.slane %v1525_v58, 1  ;;  %v9689_v9 = vpack.i.b16 %v853_v56, %v853_v56  ;;  %v1584_v14 = vshll.u32 %v1525_v58, 16 }
  0x55   : > { %1206 = vst [vmem:[#allocation1 + $0x6] ss:$9 sm:$0xff] %v9622_v0  ;;  %v9673_v54 = vsel %vm9537_vm2, 0, %v1389_v40  ;;  %v973_v10 = vperm.slane %v9678_v59, 0  ;;  %v981_v18 = vperm.slane %v9684_v63, 0 }
  0x56   : > { %1207 = vst [vmem:[#allocation1 + $0x7] ss:$9 sm:$0xff] %v957_v5  ;;  %v1579_v57 = vshll.u32 %v9673_v54, 16  ;;  %v1774_v0 = vrot.slane %v9673_v54, 1  ;;  %v573_v5 = vld [vmem:[%s9560_s0 + $0xc] sm:$0xf] }
  0x57   : > { %v1577_v13 = vshrl.u32 %v9673_v54, 16  ;;  %v589_v17 = vrot.slane %v573_v5, 3  ;;  %v989_v24 = vperm.slane %v9689_v9, 0  ;;  %v1586_v26 = vrot.slane %v1584_v14, 1 }
  0x58   : > { %1834 = vrot.lane.b32.xlu1 %v1575_v32, %s9425_s18  ;;  %v1581_v4 = vrot.slane %v1579_v57, 1  ;;  %v1776_v19 = vsel %vm1764_vm3, %v1774_v0, %v1775_v1 }
  0x59   : > { %v641_v27 = vsel %vm599_vm4, %v573_v5, %v589_v17  ;;  %v644_v29 = vsel %vm603_vm5, %v573_v5, %v589_v17  ;;  %v639_v31 = vsel %vm15710_vm0, %v573_v5, %v589_v17  ;;  %v647_v34 = vsel %vm607_vm6, %v573_v5, %v589_v17 }
  0x5a   : > { %1898 = vrot.lane.b32.xlu0 %v9673_v54, %s9426_s19  ;;  %v1582_v25 = vor.u32 %v1581_v4, %v1577_v13  ;;  %v646_v36 = vrot.slane %v644_v29, 2  ;;  %v649_v37 = vrot.slane %v647_v34, 3  ;;  %v727_v38 = vunpack.i.h.s16 %v639_v31 }
  0x5b   : > { %1928 = vrot.lane.b32.xlu2 %v1575_v32, %s9428_s20  ;;  %v643_v32 = vrot.slane %v641_v27, 1  ;;  %v8298_v43 = vpack.i.b16 %v639_v31, %v639_v31 }
  0x5c   : > { %v1587_v30 = vsel %vm1539_vm7, %v1582_v25, %v1586_v26  ;;  %v731_v42 = vunpack.i.h.s16 %v646_v36  ;;  %v733_v45 = vunpack.i.h.s16 %v649_v37  ;;  %v791_v47 = vpack.i.b16 %v727_v38, %v727_v38 }
  0x5d   : > { %v1208_v11 = vld [vmem:[#allocation1] sm:$0xff]  ;;  %v729_v39 = vunpack.i.h.s16 %v643_v32  ;;  %v8299_v46 = vpack.i.b16 %v643_v32, %v643_v32  ;;  %v8300_v58 = vpack.i.b16 %v646_v36, %v646_v36  ;;  %v854_v57 = vperm.slane %v8298_v43, 0 }
  0x5e   : > { %1210 = vst [vmem:[#allocation1] ss:$9 sm:$0xff] %v961_v60  ;;  %v1390_v16 = vshrl.u32 %v1208_v11, 16  ;;  %v1393_v20 = vshll.u32 %v1208_v11, 16  ;;  %v795_v59 = vpack.i.b16 %v731_v42, %v731_v42  ;;  %v797_v61 = vpack.i.b16 %v733_v45, %v733_v45 }
  0x5f   : > { %1212 = vst [vmem:[#allocation1 + $0x1] ss:$9 sm:$0xff] %v965_v62  ;;  %v793_v50 = vpack.i.b16 %v729_v39, %v729_v39  ;;  %v855_v63 = vperm.slane %v791_v47, 0  ;;  %v856_v1 = vperm.slane %v8299_v46, 0  ;;  %v858_v8 = vperm.slane %v8300_v58, 0 }
  0x60   : > { %1214 = vst [vmem:[#allocation1 + $0x2] ss:$9 sm:$0xff] %v969_v6  ;;  %1992 = vrot.lane.b32.xlu1 %v9673_v54, %s9429_s21  ;;  %v1392_v23 = vrot.slane %v1390_v16, 7  ;;  %v859_v4 = vperm.slane %v795_v59, 0  ;;  %v2358_v59 = vld [vmem:[%s15661_s2 + $0x20] sm:$0xf] }
  0x61   : > { %1216 = vst [vmem:[#allocation1 + $0x3] ss:$9 sm:$0xff] %v973_v10  ;;  %v857_v53 = vperm.slane %v793_v50, 0  ;;  %v995_v16 = vpack.i.b16 %v855_v63, %v855_v63  ;;  %v999_v17 = vpack.i.b16 %v856_v1, %v856_v1  ;;  %v1007_v26 = vpack.i.b16 %v858_v8, %v858_v8 }
  0x62   : > { %1218 = vst [vmem:[#allocation1 + $0x4] ss:$9 sm:$0xff] %v977_v15  ;;  %2056 = vrot.lane.b32.xlu0 %v1776_v19, %s9430_s22  ;;  %v1395_v28 = vor.u32 %v1393_v20, %v1392_v23  ;;  %v1526_v40 = vsel %vm9537_vm2, %v1392_v23, 0 }
  0x63   : > { %1220 = vst [vmem:[#allocation1 + $0x5] ss:$9 sm:$0xff] %v981_v18  ;;  %1962 = vrot.lane.b32.xlu2 %v1776_v19, %s9427_s1  ;;  %v1596_v56 = vshll.u32 %v1526_v40, 16  ;;  %v1778_v20 = vrot.slane %v1526_v40, 1  ;;  %v997_v27 = vperm.slane %v995_v16, 0  ;;  %v1001_v29 = vperm.slane %v999_v17, 0 }
  0x64   : > { %1222 = vst [vmem:[#allocation1 + $0x6] ss:$9 sm:$0xff] %v985_v21  ;;  %v9711_v35 = vsel %vm9537_vm2, 0, %v1395_v28  ;;  %v1011_v28 = vpack.i.b16 %v859_v4, %v859_v4  ;;  %v1009_v39 = vperm.slane %v1007_v26, 0  ;;  %v8714_v4 = vld [vmem:[%s15661_s2 + $0x18] sm:$0xff] }
  0x65   : > { %1224 = vst [vmem:[#allocation1 + $0x7] ss:$9 sm:$0xff] %v989_v24  ;;  %v1591_v41 = vshll.u32 %v9711_v35, 16  ;;  %v1589_v52 = vshrl.u32 %v9711_v35, 16  ;;  %v1598_v5 = vrot.slane %v1596_v56, 1 }
  0x67   : > { %v1593_v55 = vrot.slane %v1591_v41, 1  ;;  %v1013_v41 = vperm.slane %v1011_v28, 0 }
  0x68   : > { %1930 = vrot.lane.b32.xlu1 %v1587_v30, %s9428_s20 }
  0x6a   : > { %1994 = vrot.lane.b32.xlu0 %v9711_v35, %s9429_s21 }
  0x6b   : > { %2024 = vrot.lane.b32.xlu2 %v1587_v30, %s9431_s23 }
  0x6c   : > { %v1225_v44 = vld [vmem:[#allocation1] sm:$0xff] }
  0x6d   : > { %1226 = vst [vmem:[#allocation1] ss:$9 sm:$0xff] %v961_v60  ;;  %v1396_v48 = vshrl.u32 %v1225_v44, 16  ;;  %v1399_v49 = vshll.u32 %v1225_v44, 16  ;;  %v8301_v60 = vpack.i.b16 %v649_v37, %v649_v37 }
  0x6e   : > { %1227 = vst [vmem:[#allocation1 + $0x1] ss:$9 sm:$0xff] %v965_v62  ;;  %v1594_v62 = vor.u32 %v1593_v55, %v1589_v52 }
  0x6f   : > { %1228 = vst [vmem:[#allocation1 + $0x2] ss:$9 sm:$0xff] %v969_v6  ;;  %v1398_v51 = vrot.slane %v1396_v48, 7  ;;  %v860_v14 = vperm.slane %v8301_v60, 0  ;;  %v2380_v60 = vunpack.c.l.b16 %v2358_v59 }
  0x70   : > { %1229 = vst [vmem:[#allocation1 + $0x3] ss:$9 sm:$0xff] %v973_v10  ;;  %1868 = vrot.lane.b32.xlu1 %v1776_v19, %s9424_s30  ;;  %v991_v10 = vpack.i.b16 %v854_v57, %v854_v57  ;;  %v1777_v19 = vrot.slane %v9711_v35, 1 }
  0x71   : > { %1230 = vst [vmem:[#allocation1 + $0x4] ss:$9 sm:$0xff] %v977_v15  ;;  %v1401_v0 = vor.u32 %v1399_v49, %v1398_v51  ;;  %v1527_v11 = vsel %vm9537_vm2, %v1398_v51, 0  ;;  %v861_v15 = vperm.slane %v797_v61, 0 }
  0x72   : > { %1231 = vst [vmem:[#allocation1 + $0x5] ss:$9 sm:$0xff] %v981_v18  ;;  %1836 = vrot.lane.b32.xlu0 %v1587_v30, %s9425_s18  ;;  %v1003_v18 = vpack.i.b16 %v857_v53, %v857_v53  ;;  %v993_v25 = vperm.slane %v991_v10, 0  ;;  %v1015_v30 = vpack.i.b16 %v860_v14, %v860_v14  ;;  %v1779_v31 = vsel %vm1764_vm3, %v1777_v19, %v1778_v20 }
  0x73   : > { %1232 = vst [vmem:[#allocation1 + $0x6] ss:$9 sm:$0xff] %v985_v21  ;;  %v9727_v6 = vsel %vm9537_vm2, 0, %v1401_v0  ;;  %1900 = vrot.lane.b32.xlu2 %v9711_v35, %s9426_s19  ;;  %v1599_v21 = vsel %vm1539_vm7, %v1594_v62, %v1598_v5  ;;  %v1019_v34 = vpack.i.b16 %v861_v15, %v861_v15  ;;  %v1781_v45 = vrot.slane %v1527_v11, 1 }
  0x74   : > { %1233 = vst [vmem:[#allocation1 + $0x7] ss:$9 sm:$0xff] %v989_v24  ;;  %v1603_v13 = vshll.u32 %v9727_v6, 16  ;;  %v1601_v23 = vshrl.u32 %v9727_v6, 16  ;;  %v1608_v24 = vshll.u32 %v1527_v11, 16  ;;  %v1005_v32 = vperm.slane %v1003_v18, 0 }
  0x75   : > { %v1017_v42 = vperm.slane %v1015_v30, 0  ;;  %v1021_v43 = vperm.slane %v1019_v34, 0  ;;  %v1780_v40 = vrot.slane %v9727_v6, 1  ;;  %v2385_v5 = vpack.c.b16 %v2380_v60, %v2380_v60  ;;  %v8713_v18 = vld [vmem:[%s15661_s2 + $0x10] sm:$0xff] }
  0x76   : > { %v1605_v9 = vrot.slane %v1603_v13, 1  ;;  %v1610_v38 = vrot.slane %v1608_v24, 1 }
  0x77   : > { %v9753_v48 = vsel %vm1764_vm3, %v1780_v40, %v1781_v45  ;;  %v2425_v10 = vsel %vm2423_vm8, %v2385_v5, 0  ;;  %vm2390_vm8 = vcmask 588800  }
  0x78   : > { %2026 = vrot.lane.b32.xlu1 %v1599_v21, %s9431_s23  ;;  %v1606_v37 = vor.u32 %v1605_v9, %v1601_v23  ;;  %2430 = vmatpush.bf16.msra.mxu0 %v2425_v10  ;;  %v8712_v23 = vld [vmem:[%s15661_s2 + $0x8] sm:$0xff]  ;;  %v574_v9 = vld [vmem:[%s9560_s0 + $0x10] sm:$0xf] }
  0x79   : > { %v590_v26 = vrot.slane %v574_v9, 3 }
  0x7a   : > { %1932 = vrot.lane.b32.xlu0 %v1599_v21, %s9428_s20  ;;  %v9744_v44 = vsel %vm1539_vm7, %v1606_v37, %v1610_v38 }
  0x7b   : > { %v1234_v36 = vld [vmem:[#allocation1] sm:$0xff]  ;;  %2058 = vrot.lane.b32.xlu2 %v1779_v31, %s9430_s22  ;;  %v654_v30 = vsel %vm599_vm4, %v574_v9, %v590_v26 }
  0x7c   : > { %1236 = vst [vmem:[#allocation1] ss:$9 sm:$0xff] %v993_v25  ;;  %v1402_v47 = vshrl.u32 %v1234_v36, 16  ;;  %v1405_v46 = vshll.u32 %v1234_v36, 16  ;;  %2431 = vmatpush.bf16.msra.mxu0 %v8714_v4  ;;  %v656_v36 = vrot.slane %v654_v30, 1 }
  0x7d   : > { %1238 = vst [vmem:[#allocation1 + $0x1] ss:$9 sm:$0xff] %v997_v27 }
  0x7e   : > { %1240 = vst [vmem:[#allocation1 + $0x2] ss:$9 sm:$0xff] %v1001_v29  ;;  %v1404_v49 = vrot.slane %v1402_v47, 7 }
  0x7f   : > { %1242 = vst [vmem:[#allocation1 + $0x3] ss:$9 sm:$0xff] %v1005_v32 }
  0x80   : > { %1244 = vst [vmem:[#allocation1 + $0x4] ss:$9 sm:$0xff] %v1009_v39  ;;  %1964 = vrot.lane.b32.xlu1 %v1779_v31, %s9427_s1  ;;  %v1407_v50 = vor.u32 %v1405_v46, %v1404_v49  ;;  %v1528_v56 = vsel %vm9537_vm2, %v1404_v49, 0  ;;  %2432 = vmatpush.bf16.msra.mxu0 %v8713_v18 }
  0x81   : > { %1246 = vst [vmem:[#allocation1 + $0x5] ss:$9 sm:$0xff] %v1013_v41  ;;  %v1784_v57 = vrot.slane %v1528_v56, 1  ;;  %v1620_v0 = vshll.u32 %v1528_v56, 16  ;;  %v8303_v56 = vpack.i.b16 %v656_v36, %v656_v36 }
  0x82   : > { %1248 = vst [vmem:[#allocation1 + $0x6] ss:$9 sm:$0xff] %v1017_v42  ;;  %2028 = vrot.lane.b32.xlu0 %v9744_v44, %s9431_s23  ;;  %v9761_v55 = vsel %vm9537_vm2, 0, %v1407_v50 }
  0x83   : > { %1250 = vst [vmem:[#allocation1 + $0x7] ss:$9 sm:$0xff] %v1021_v43  ;;  %1996 = vrot.lane.b32.xlu2 %v9727_v6, %s9429_s21  ;;  %v1615_v51 = vshll.u32 %v9761_v55, 16  ;;  %v1613_v61 = vshrl.u32 %v9761_v55, 16  ;;  %v1783_v1 = vrot.slane %v9761_v55, 1  ;;  %v1622_v13 = vrot.slane %v1620_v0, 1 }
  0x84   : > { %2433 = vmatpush.bf16.msra.mxu0 %v8712_v23 }
  0x85   : > { %v1617_v63 = vrot.slane %v1615_v51, 1  ;;  %v9783_v14 = vsel %vm1764_vm3, %v1783_v1, %v1784_v57 }
  0x86   : > { %v9812_v24 = vpop.permute.xlu0 %1862 }
  0x87   : > { %v1618_v11 = vor.u32 %v1617_v63, %v1613_v61  ;;  %15729 = vst [vmem:[#allocation6_spill] sm:$0xff] %v9812_v24 }
  0x88   : > { %2060 = vrot.lane.b32.xlu1 %v9753_v48, %s9430_s22 }
  0x89   : > { %v9790_v16 = vsel %vm1539_vm7, %v1618_v11, %v1622_v13 }
  0x8a   : > { %v1251_v52 = vld [vmem:[#allocation1] sm:$0xff]  ;;  %1870 = vrot.lane.b32.xlu0 %v1779_v31, %s9424_s30  ;;  %v657_v31 = vsel %vm603_vm5, %v574_v9, %v590_v26 }
  0x8b   : > { %1252 = vst [vmem:[#allocation1] ss:$9 sm:$0xff] %v993_v25  ;;  %1838 = vrot.lane.b32.xlu2 %v1599_v21, %s9425_s18  ;;  %v1408_v58 = vshrl.u32 %v1251_v52, 16  ;;  %v1411_v62 = vshll.u32 %v1251_v52, 16  ;;  %v659_v37 = vrot.slane %v657_v31, 2 }
  0x8c   : > { %1253 = vst [vmem:[#allocation1 + $0x1] ss:$9 sm:$0xff] %v997_v27 }
  0x8d   : > { %1254 = vst [vmem:[#allocation1 + $0x2] ss:$9 sm:$0xff] %v1001_v29  ;;  %v1410_v53 = vrot.slane %v1408_v58, 7  ;;  %v739_v49 = vunpack.i.h.s16 %v659_v37  ;;  %v8304_v58 = vpack.i.b16 %v659_v37, %v659_v37 }
  0x8e   : > { %1255 = vst [vmem:[#allocation1 + $0x3] ss:$9 sm:$0xff] %v1005_v32  ;;  %v660_v32 = vsel %vm607_vm6, %v574_v9, %v590_v26 }
  0x8f   : > { %1256 = vst [vmem:[#allocation1 + $0x4] ss:$9 sm:$0xff] %v1009_v39  ;;  %v1413_v15 = vor.u32 %v1411_v62, %v1410_v53  ;;  %v9805_v20 = vsel %vm9537_vm2, %v1410_v53, 0  ;;  %v662_v38 = vrot.slane %v660_v32, 3  ;;  %v803_v59 = vpack.i.b16 %v739_v49, %v739_v49 }
  0x90   : > { %1257 = vst [vmem:[#allocation1 + $0x5] ss:$9 sm:$0xff] %v1013_v41  ;;  %1902 = vrot.lane.b32.xlu1 %v9727_v6, %s9426_s19  ;;  %v1632_v28 = vshll.u32 %v9805_v20, 16  ;;  %v8711_v41 = vld [vmem:[%s15661_s2] sm:$0xff]  ;;  %v864_v62 = vperm.slane %v8303_v56, 0  ;;  %v866_v10 = vperm.slane %v8304_v58, 0 }
  0x91   : > { %1258 = vst [vmem:[#allocation1 + $0x6] ss:$9 sm:$0xff] %v1017_v42  ;;  %v9794_v17 = vsel %vm9537_vm2, 0, %v1413_v15  ;;  %v652_v42 = vsel %vm15710_vm0, %v574_v9, %v590_v26  ;;  %2434 = vmatpush.bf16.msra.mxu0 %v8711_v41  ;;  %v8305_v61 = vpack.i.b16 %v662_v38, %v662_v38  ;;  %v867_v4 = vperm.slane %v803_v59, 0 }
  0x92   : > { %1259 = vst [vmem:[#allocation1 + $0x7] ss:$9 sm:$0xff] %v1021_v43  ;;  %1966 = vrot.lane.b32.xlu0 %v9753_v48, %s9427_s1  ;;  %v1627_v21 = vshll.u32 %v9794_v17, 16  ;;  %v1625_v27 = vshrl.u32 %v9794_v17, 16  ;;  %v737_v43 = vunpack.i.h.s16 %v656_v36  ;;  %v1634_v40 = vrot.slane %v1632_v28, 1 }
  0x93   : > { %1934 = vrot.lane.b32.xlu2 %v9744_v44, %s9428_s20  ;;  %v735_v45 = vunpack.i.h.s16 %v652_v42  ;;  %v8302_v46 = vpack.i.b16 %v652_v42, %v652_v42  ;;  %v1786_v11 = vrot.slane %v9794_v17, 1  ;;  %v868_v15 = vperm.slane %v8305_v61, 0 }
  0x94   : > { %v1629_v29 = vrot.slane %v1627_v21, 1  ;;  %v801_v51 = vpack.i.b16 %v737_v43, %v737_v43  ;;  %v1787_v26 = vrot.slane %v9805_v20, 1  ;;  %v1039_v28 = vpack.i.b16 %v866_v10, %v866_v10 }
  0x95   : > { %v9777_v8 = vpop.permute.xlu2 %1958  ;;  %v799_v52 = vpack.i.b16 %v735_v45, %v735_v45  ;;  %v862_v0 = vperm.slane %v8302_v46, 0 }
  0x96   : > { %v865_v5 = vperm.slane %v801_v51, 0  ;;  %v9860_v20 = vperm.slane %v1039_v28, 0  ;;  %v9869_v43 = vsel %vm1764_vm3, %v1786_v11, %v1787_v26 }
  0x97   : > { %v863_v1 = vperm.slane %v799_v52, 0  ;;  %v1023_v23 = vpack.i.b16 %v862_v0, %v862_v0 }
  0x98   : > { %1998 = vrot.lane.b32.xlu1 %v9761_v55, %s9429_s21 }
  0x99   : > { %v1260_v25 = vld [vmem:[#allocation1] sm:$0xff]  ;;  %v9845_v9 = vpack.i.b16 %v863_v1, %v863_v1  ;;  %v1025_v30 = vperm.slane %v1023_v23, 0 }
  0x9a   : > { %2062 = vrot.lane.b32.xlu0 %v9783_v14, %s9430_s22  ;;  %v1414_v34 = vshrl.u32 %v1260_v25, 16  ;;  %v1417_v50 = vshll.u32 %v1260_v25, 16  ;;  %v1031_v25 = vpack.i.b16 %v864_v62, %v864_v62  ;;  %1270 = vst [vmem:[#allocation1 + $0x4] ss:$9 sm:$0xff] %v9860_v20 }
  0x9b   : > { %2030 = vrot.lane.b32.xlu2 %v9790_v16, %s9431_s23  ;;  %v1029_v31 = vperm.slane %v9845_v9, 0  ;;  %1262 = vst [vmem:[#allocation1] ss:$9 sm:$0xff] %v1025_v30 }
  0x9c   : > { %v1416_v47 = vrot.slane %v1414_v34, 7  ;;  %v1831_v57 = vpop.permute.xlu0 %1830  ;;  %v1033_v32 = vperm.slane %v1031_v25, 0  ;;  %v1047_v34 = vpack.i.b16 %v868_v15, %v868_v15 }
  0x9d   : > { %v9801_v19 = vpop.permute.xlu2 %1832  ;;  %1264 = vst [vmem:[#allocation1 + $0x1] ss:$9 sm:$0xff] %v1029_v31 }
  0x9e   : > { %v1419_v13 = vor.u32 %v1417_v50, %v1416_v47  ;;  %v9875_v45 = vperm.slane %v1047_v34, 0  ;;  %1266 = vst [vmem:[#allocation1 + $0x2] ss:$9 sm:$0xff] %v1033_v32  ;;  %v1530_v49 = vsel %vm9537_vm2, %v1416_v47, 0  ;;  %v2088_v47 = vsel %vm15692_vm9, %v9545_v3, %v1831_v57 }
  0x9f   : > { %v1644_v52 = vshll.u32 %v1530_v49, 16  ;;  %v1790_v10 = vrot.slane %v1530_v49, 1  ;;  %v2090_v11 = vsel %vm15692_vm9, %v9592_v33, %v9801_v19 }
  0xa0   : > { %1840 = vrot.lane.b32.xlu1 %v9744_v44, %s9425_s18  ;;  %v1630_v44 = vor.u32 %v1629_v29, %v1625_v27  ;;  %v9848_v27 = vpack.i.b16 %v865_v5, %v865_v5  ;;  %v9850_v29 = vpack.i.b16 %v867_v4, %v867_v4  ;;  %v9857_v36 = vsel %vm9537_vm2, 0, %v1419_v13  ;;  %1274 = vst [vmem:[#allocation1 + $0x6] ss:$9 sm:$0xff] %v9875_v45 }
  0xa1   : > { %v1637_v46 = vshrl.u32 %v9857_v36, 16  ;;  %v1646_v58 = vrot.slane %v1644_v52, 1 }
  0xa2   : > { %1904 = vrot.lane.b32.xlu0 %v9761_v55, %s9426_s19  ;;  %v9838_v53 = vsel %vm1539_vm7, %v1630_v44, %v1634_v40  ;;  %v1037_v37 = vperm.slane %v9848_v27, 0  ;;  %v1045_v44 = vperm.slane %v9850_v29, 0  ;;  %v1639_v40 = vshll.u32 %v9857_v36, 16 }
  0xa3   : > { %1872 = vrot.lane.b32.xlu2 %v9753_v48, %s9424_s30  ;;  %v741_v48 = vunpack.i.h.s16 %v662_v38 }
  0xa4   : > { %1268 = vst [vmem:[#allocation1 + $0x3] ss:$9 sm:$0xff] %v1037_v37  ;;  %v1641_v50 = vrot.slane %v1639_v40, 1 }
  0xa5   : > { %v9825_v39 = vpop.permute.xlu2 %1990  ;;  %v805_v63 = vpack.i.b16 %v741_v48, %v741_v48  ;;  %1272 = vst [vmem:[#allocation1 + $0x5] ss:$9 sm:$0xff] %v1045_v44 }
  0xa6   : > { %v1642_v51 = vor.u32 %v1641_v50, %v1637_v46 }
  0xa7   : > { %v869_v21 = vperm.slane %v805_v63, 0 }
  0xa8   : > { %1936 = vrot.lane.b32.xlu1 %v9790_v16, %s9428_s20  ;;  %v9907_v0 = vsel %vm1539_vm7, %v1642_v51, %v1646_v58 }
  0xa9   : > { %v9862_v38 = vpack.i.b16 %v869_v21, %v869_v21 }
  0xaa   : > { %v9833_v60 = vpop.permute.xlu1 %1894  ;;  %2000 = vrot.lane.b32.xlu0 %v9794_v17, %s9429_s21 }
  0xab   : > { %1968 = vrot.lane.b32.xlu2 %v9783_v14, %s9427_s1  ;;  %v1053_v48 = vperm.slane %v9862_v38, 0 }
  0xad   : > { %v9843_v18 = vpop.permute.xlu2 %1866  ;;  %v9864_v41 = vpop.permute.xlu0 %1864  ;;  %1276 = vst [vmem:[#allocation1 + $0x7] ss:$9 sm:$0xff] %v1053_v48 }
  0xae   : > { %v2123_v19 = vsel %vm15691_vm10, %v2090_v11, %v9864_v41 }
  0xb0   : > { %2032 = vrot.lane.b32.xlu1 %v9838_v53, %s9431_s23 }
  0xb2   : > { %v1927_v42 = vpop.permute.xlu1 %1926  ;;  %1842 = vrot.lane.b32.xlu0 %v9790_v16, %s9425_s18 }
  0xb3   : > { %2064 = vrot.lane.b32.xlu2 %v9869_v43, %s9430_s22 }
  0xb4   : > { %v1277_v1 = vld [vmem:[#allocation1] sm:$0xff] }
  0xb5   : > { %v9880_v16 = vpop.permute.xlu2 %1928  ;;  %v1420_v62 = vshrl.u32 %v1277_v1, 16  ;;  %1278 = vst [vmem:[#allocation1] ss:$9 sm:$0xff] %v1025_v30  ;;  %v1423_v15 = vshll.u32 %v1277_v1, 16 }
  0xb6   : > { %1279 = vst [vmem:[#allocation1 + $0x1] ss:$9 sm:$0xff] %v1029_v31 }
  0xb7   : > { %v1422_v4 = vrot.slane %v1420_v62, 7  ;;  %1280 = vst [vmem:[#allocation1 + $0x2] ss:$9 sm:$0xff] %v1033_v32 }
  0xb8   : > { %1874 = vrot.lane.b32.xlu1 %v9783_v14, %s9424_s30  ;;  %v2121_v14 = vsel %vm15691_vm10, %v2088_v47, %v9812_v24  ;;  %1281 = vst [vmem:[#allocation1 + $0x3] ss:$9 sm:$0xff] %v1037_v37 }
  0xb9   : > { %v2154_v57 = vsel %vm2152_vm11, %v2121_v14, %v9833_v60  ;;  %v1789_v60 = vrot.slane %v9857_v36, 1  ;;  %1282 = vst [vmem:[#allocation1 + $0x4] ss:$9 sm:$0xff] %v9860_v20  ;;  %v1425_v27 = vor.u32 %v1423_v15, %v1422_v4  ;;  %v1531_v49 = vsel %vm9537_vm2, %v1422_v4, 0 }
  0xba   : > { %v1897_v56 = vpop.permute.xlu1 %1896  ;;  %1938 = vrot.lane.b32.xlu0 %v9838_v53, %s9428_s20  ;;  %v2187_v63 = vsel %vm2185_vm12, %v2154_v57, %v1927_v42  ;;  %1283 = vst [vmem:[#allocation1 + $0x5] ss:$9 sm:$0xff] %v1045_v44 }
  0xbb   : > { %1906 = vrot.lane.b32.xlu2 %v9794_v17, %s9426_s19  ;;  %v2220_v5 = vsel %vm2218_vm13, %v2187_v63, %v9777_v8  ;;  %v575_v8 = vld [vmem:[%s9560_s0 + $0x14] sm:$0xf]  ;;  %v9929_v25 = vsel %vm1764_vm3, %v1789_v60, %v1790_v10  ;;  %1284 = vst [vmem:[#allocation1 + $0x6] ss:$9 sm:$0xff] %v9875_v45  ;;  %v2156_v31 = vsel %vm2152_vm11, %v2123_v19, %v1897_v56  ;;  %v9955_v38 = vsel %vm9537_vm2, 0, %v1425_v27 }
  0xbc   : > { %v9899_v59 = vpop.permute.xlu0 %1960  ;;  %v2253_v21 = vsel %vm2251_vm14, %v2220_v5, %v9825_v39  ;;  %v591_v33 = vrot.slane %v575_v8, 3  ;;  %1285 = vst [vmem:[#allocation1 + $0x7] ss:$9 sm:$0xff] %v1053_v48  ;;  %v2189_v40 = vsel %vm2185_vm12, %v2156_v31, %v9880_v16  ;;  %v1651_v47 = vshll.u32 %v9955_v38, 16 }
  0xbd   : > { %v9903_v61 = vpop.permute.xlu2 %1962  ;;  %v1792_v63 = vrot.slane %v9955_v38, 1  ;;  %v1649_v5 = vshrl.u32 %v9955_v38, 16 }
  0xbe   : > { %v667_v28 = vsel %vm599_vm4, %v575_v8, %v591_v33  ;;  %v670_v30 = vsel %vm603_vm5, %v575_v8, %v591_v33  ;;  %v673_v29 = vsel %vm607_vm6, %v575_v8, %v591_v33  ;;  %v665_v37 = vsel %vm15710_vm0, %v575_v8, %v591_v33 }
  0xbf   : > { %v669_v32 = vrot.slane %v667_v28, 1  ;;  %v672_v34 = vrot.slane %v670_v30, 2  ;;  %v675_v20 = vrot.slane %v673_v29, 3  ;;  %v743_v41 = vunpack.i.h.s16 %v665_v37 }
  0xc0   : > { %1970 = vrot.lane.b32.xlu1 %v9869_v43, %s9427_s1  ;;  %v8306_v46 = vpack.i.b16 %v665_v37, %v665_v37 }
  0xc1   : > { %v745_v42 = vunpack.i.h.s16 %v669_v32  ;;  %v747_v44 = vunpack.i.h.s16 %v672_v34  ;;  %v749_v48 = vunpack.i.h.s16 %v675_v20  ;;  %v807_v50 = vpack.i.b16 %v743_v41, %v743_v41 }
  0xc2   : > { %v2055_v13 = vpop.permute.xlu1 %2054  ;;  %2034 = vrot.lane.b32.xlu0 %v9907_v0, %s9431_s23  ;;  %v8307_v52 = vpack.i.b16 %v669_v32, %v669_v32  ;;  %v8308_v58 = vpack.i.b16 %v672_v34, %v672_v34  ;;  %v8309_v57 = vpack.i.b16 %v675_v20, %v675_v20  ;;  %v870_v1 = vperm.slane %v8306_v46, 0 }
  0xc3   : > { %2002 = vrot.lane.b32.xlu2 %v9857_v36, %s9429_s21  ;;  %v809_v56 = vpack.i.b16 %v745_v42, %v745_v42  ;;  %v811_v14 = vpack.i.b16 %v747_v44, %v747_v44  ;;  %v871_v62 = vperm.slane %v807_v50, 0  ;;  %v1286_v60 = vld [vmem:[#allocation1] sm:$0xff]  ;;  %v813_v10 = vpack.i.b16 %v749_v48, %v749_v48 }
  0xc4   : > { %v2023_v23 = vpop.permute.xlu0 %2022  ;;  %v872_v11 = vperm.slane %v8307_v52, 0  ;;  %v874_v4 = vperm.slane %v8308_v58, 0  ;;  %v876_v8 = vperm.slane %v8309_v57, 0 }
  0xc5   : > { %v2286_v9 = vsel %vm2284_vm15, %v2253_v21, %v2023_v23  ;;  %v9931_v26 = vpop.permute.xlu2 %2024  ;;  %v875_v15 = vperm.slane %v811_v14, 0  ;;  %v1656_v21 = vshll.u32 %v1531_v49, 16  ;;  %v1055_v23 = vpack.i.b16 %v870_v1, %v870_v1 }
  0xc6   : > { %v2319_v39 = vsel %vm2317_vm1, %v2286_v9, %v2055_v13  ;;  %v873_v13 = vperm.slane %v809_v56, 0  ;;  %v9972_v33 = vpack.i.b16 %v871_v62, %v871_v62  ;;  %v1063_v19 = vpack.i.b16 %v872_v11, %v872_v11 }
  0xc7   : > { %8334 = vmatmul.msk.bf16.vlgmr.msra.gmra.mxu0 %vm2390_vm8, %v2319_v39  ;;  %v1426_v39 = vshrl.u32 %v1286_v60, 16  ;;  %v1071_v28 = vpack.i.b16 %v874_v4, %v874_v4  ;;  %v9978_v30 = vpack.i.b16 %v875_v15, %v875_v15  ;;  %v877_v32 = vperm.slane %v813_v10, 0 }
  0xc8   : > { %2066 = vrot.lane.b32.xlu1 %v9929_v25, %s9430_s22  ;;  %v9976_v27 = vpack.i.b16 %v873_v13, %v873_v13  ;;  %v1057_v34 = vperm.slane %v1055_v23, 0  ;;  %v1079_v29 = vpack.i.b16 %v876_v8, %v876_v8  ;;  %v1061_v41 = vperm.slane %v9972_v33, 0 }
  0xc9   : > { %v1065_v42 = vperm.slane %v1063_v19, 0  ;;  %v1073_v46 = vperm.slane %v1071_v28, 0  ;;  %v1658_v50 = vrot.slane %v1656_v21, 1  ;;  %v1428_v52 = vrot.slane %v1426_v39, 7 }
  0xca   : > { %v9949_v45 = vpop.permute.xlu1 %1834  ;;  %1876 = vrot.lane.b32.xlu0 %v9869_v43, %s9424_s30  ;;  %v2222_v43 = vsel %vm2218_vm13, %v2189_v40, %v9899_v59  ;;  %v1653_v59 = vrot.slane %v1651_v47, 1  ;;  %v1069_v48 = vperm.slane %v9976_v27, 0  ;;  %1288 = vst [vmem:[#allocation1] ss:$9 sm:$0xff] %v1057_v34  ;;  %v1429_v47 = vshll.u32 %v1286_v60, 16 }
  0xcb   : > { %1844 = vrot.lane.b32.xlu2 %v9838_v53, %s9425_s18  ;;  %v1793_v53 = vrot.slane %v1531_v49, 1  ;;  %v1077_v56 = vperm.slane %v9978_v30, 0  ;;  %1290 = vst [vmem:[#allocation1 + $0x1] ss:$9 sm:$0xff] %v1061_v41  ;;  %v1083_v58 = vpack.i.b16 %v877_v32, %v877_v32 }
  0xcc   : > { %v9961_v16 = vpop.permute.xlu0 %1898  ;;  %v1654_v40 = vor.u32 %v1653_v59, %v1649_v5  ;;  %1292 = vst [vmem:[#allocation1 + $0x2] ss:$9 sm:$0xff] %v1065_v42  ;;  %v1431_v62 = vor.u32 %v1429_v47, %v1428_v52 }
  0xcd   : > { %v9966_v51 = vpop.permute.xlu2 %1900  ;;  %1294 = vst [vmem:[#allocation1 + $0x3] ss:$9 sm:$0xff] %v1069_v48  ;;  %v1085_v14 = vperm.slane %v1083_v58, 0 }
  0xce   : > { %1296 = vst [vmem:[#allocation1 + $0x4] ss:$9 sm:$0xff] %v1073_v46  ;;  %v10000_v1 = vsel %vm1539_vm7, %v1654_v40, %v1658_v50  ;;  %v10011_v60 = vsel %vm9537_vm2, 0, %v1431_v62 }
  0xcf   : > { %1298 = vst [vmem:[#allocation1 + $0x5] ss:$9 sm:$0xff] %v1077_v56  ;;  %v1663_v11 = vshll.u32 %v10011_v60, 16  ;;  %v1661_v15 = vshrl.u32 %v10011_v60, 16 }
  0xd0   : > { %1908 = vrot.lane.b32.xlu1 %v9857_v36, %s9426_s19  ;;  %1302 = vst [vmem:[#allocation1 + $0x7] ss:$9 sm:$0xff] %v1085_v14 }
  0xd1   : > { %v1665_v8 = vrot.slane %v1663_v11, 1 }
  0xd2   : > { %v1993_v9 = vpop.permute.xlu1 %1992  ;;  %1972 = vrot.lane.b32.xlu0 %v9929_v25, %s9427_s1 }
  0xd3   : > { %v2255_v31 = vsel %vm2251_vm14, %v2222_v43, %v1993_v9  ;;  %1940 = vrot.lane.b32.xlu2 %v9907_v0, %s9428_s20  ;;  %v1081_v43 = vperm.slane %v1079_v29, 0  ;;  %v1666_v9 = vor.u32 %v1665_v8, %v1661_v15 }
  0xd4   : > { %v2057_v37 = vpop.permute.xlu0 %2056  ;;  %v2288_v20 = vsel %vm2284_vm15, %v2255_v31, %v9931_v26  ;;  %v9993_v26 = vsel %vm1764_vm3, %v1792_v63, %v1793_v53  ;;  %v2092_v53 = vsel %vm15692_vm9, %v9639_v12, %v9949_v45  ;;  %v1532_v12 = vsel %vm9537_vm2, %v1428_v52, 0 }
  0xd5   : > { %v2321_v44 = vsel %vm2317_vm1, %v2288_v20, %v2057_v37  ;;  %v9987_v49 = vpop.permute.xlu2 %2058  ;;  %1300 = vst [vmem:[#allocation1 + $0x6] ss:$9 sm:$0xff] %v1081_v43  ;;  %v2125_v10 = vsel %vm15691_vm10, %v2092_v53, %v9843_v18  ;;  %v1668_v21 = vshll.u32 %v1532_v12, 16  ;;  %v1795_v20 = vrot.slane %v10011_v60, 1 }
  0xd6   : > { %v2158_v45 = vsel %vm2152_vm11, %v2125_v10, %v9961_v16 }
  0xd7   : > { %8335 = vmatmul.msk.bf16.gmra.mxu0 %vm2390_vm8, %v2321_v44  ;;  %v1670_v39 = vrot.slane %v1668_v21, 1 }
  0xd8   : > { %2004 = vrot.lane.b32.xlu1 %v9955_v38, %s9429_s21 }
  0xda   : > { %v1931_v57 = vpop.permute.xlu1 %1930  ;;  %2068 = vrot.lane.b32.xlu0 %v9993_v26, %s9430_s22 }
  0xdb   : > { %2036 = vrot.lane.b32.xlu2 %v10000_v1, %s9431_s23  ;;  %v2191_v18 = vsel %vm2185_vm12, %v2158_v45, %v1931_v57 }
  0xdc   : > { %v1995_v63 = vpop.permute.xlu0 %1994  ;;  %v1303_v59 = vld [vmem:[#allocation1] sm:$0xff]  ;;  %v2224_v16 = vsel %vm2218_vm13, %v2191_v18, %v9903_v61 }
  0xdd   : > { %v10007_v5 = vpop.permute.xlu2 %1996  ;;  %1304 = vst [vmem:[#allocation1] ss:$9 sm:$0xff] %v1057_v34  ;;  %v1435_v33 = vshll.u32 %v1303_v59, 16  ;;  %v2257_v28 = vsel %vm2251_vm14, %v2224_v16, %v1995_v63  ;;  %v10047_v34 = vsel %vm1539_vm7, %v1666_v9, %v1670_v39 }
  0xde   : > { %1305 = vst [vmem:[#allocation1 + $0x1] ss:$9 sm:$0xff] %v1061_v41  ;;  %v1796_v41 = vrot.slane %v1532_v12, 1 }
  0xdf   : > { %1306 = vst [vmem:[#allocation1 + $0x2] ss:$9 sm:$0xff] %v1065_v42 }
  0xe0   : > { %1846 = vrot.lane.b32.xlu1 %v9907_v0, %s9425_s18  ;;  %v1432_v0 = vshrl.u32 %v1303_v59, 16  ;;  %1307 = vst [vmem:[#allocation1 + $0x3] ss:$9 sm:$0xff] %v1069_v48  ;;  %v10070_v50 = vsel %vm1764_vm3, %v1795_v20, %v1796_v41 }
  0xe1   : > { %1308 = vst [vmem:[#allocation1 + $0x4] ss:$9 sm:$0xff] %v1073_v46 }
  0xe2   : > { %v1869_v13 = vpop.permute.xlu1 %1868  ;;  %1910 = vrot.lane.b32.xlu0 %v9955_v38, %s9426_s19  ;;  %v1434_v19 = vrot.slane %v1432_v0, 7  ;;  %1309 = vst [vmem:[#allocation1 + $0x5] ss:$9 sm:$0xff] %v1077_v56 }
  0xe3   : > { %1878 = vrot.lane.b32.xlu2 %v9929_v25, %s9424_s30  ;;  %1310 = vst [vmem:[#allocation1 + $0x6] ss:$9 sm:$0xff] %v1081_v43 }
  0xe4   : > { %v1837_v4 = vpop.permute.xlu0 %1836  ;;  %v1437_v27 = vor.u32 %v1435_v33, %v1434_v19  ;;  %1311 = vst [vmem:[#allocation1 + $0x7] ss:$9 sm:$0xff] %v1085_v14  ;;  %v10062_v44 = vsel %vm9537_vm2, %v1434_v19, 0 }
  0xe5   : > { %v10028_v23 = vpop.permute.xlu2 %1838  ;;  %v2094_v25 = vsel %vm15692_vm9, %v9673_v54, %v1837_v4  ;;  %v1680_v56 = vshll.u32 %v10062_v44, 16 }
  0xe6   : > { %v2127_v54 = vsel %vm15691_vm10, %v2094_v25, %v1869_v13  ;;  %v10051_v29 = vsel %vm9537_vm2, 0, %v1437_v27 }
  0xe7   : > { %v2160_v42 = vsel %vm2152_vm11, %v2127_v54, %v9966_v51  ;;  %v1675_v40 = vshll.u32 %v10051_v29, 16  ;;  %v1673_v47 = vshrl.u32 %v10051_v29, 16  ;;  %v1682_v0 = vrot.slane %v1680_v56, 1 }
  0xe8   : > { %1942 = vrot.lane.b32.xlu1 %v10000_v1, %s9428_s20  ;;  %v1798_v41 = vrot.slane %v10051_v29, 1 }
  0xe9   : > { %v1677_v58 = vrot.slane %v1675_v40, 1 }
  0xea   : > { %v2027_v30 = vpop.permute.xlu1 %2026  ;;  %2006 = vrot.lane.b32.xlu0 %v10011_v60, %s9429_s21 }
  0xeb   : > { %v2290_v61 = vsel %vm2284_vm15, %v2257_v28, %v2027_v30  ;;  %1974 = vrot.lane.b32.xlu2 %v9993_v26, %s9427_s1  ;;  %v1678_v4 = vor.u32 %v1677_v58, %v1673_v47  ;;  %v2096_v28 = vsel %vm15692_vm9, %v9711_v35, %v10028_v23  ;;  %v1312_v54 = vld [vmem:[#allocation1] sm:$0xff] }
  0xec   : > { %v1933_v31 = vpop.permute.xlu0 %1932  ;;  %v2323_v32 = vsel %vm2317_vm1, %v2290_v61, %v9987_v49  ;;  %v576_v49 = vld [vmem:[%s9560_s0 + $0x18] sm:$0xf]  ;;  %v1799_v61 = vrot.slane %v10062_v44, 1 }
  0xed   : > { %8336 = vmatmul.msk.bf16.gmra.mxu0 %vm2390_vm8, %v2323_v32  ;;  %v10053_v37 = vpop.permute.xlu2 %1934  ;;  %v2193_v48 = vsel %vm2185_vm12, %v2160_v42, %v1933_v31  ;;  %v592_v51 = vrot.slane %v576_v49, 3  ;;  %v10099_v20 = vsel %vm1539_vm7, %v1678_v4, %v1682_v0 }
  0xee   : > { %v10121_v4 = vsel %vm1764_vm3, %v1798_v41, %v1799_v61 }
  0xef   : > { %v680_v14 = vsel %vm599_vm4, %v576_v49, %v592_v51  ;;  %v683_v57 = vsel %vm603_vm5, %v576_v49, %v592_v51  ;;  %v678_v13 = vsel %vm15710_vm0, %v576_v49, %v592_v51 }
  0xf0   : > { %2038 = vrot.lane.b32.xlu1 %v10047_v34, %s9431_s23  ;;  %v682_v63 = vrot.slane %v680_v14, 1  ;;  %v685_v53 = vrot.slane %v683_v57, 2  ;;  %v751_v12 = vunpack.i.h.s16 %v678_v13  ;;  %v8310_v15 = vpack.i.b16 %v678_v13, %v678_v13 }
  0xf2   : > { %v1965_v46 = vpop.permute.xlu1 %1964  ;;  %1848 = vrot.lane.b32.xlu0 %v10000_v1, %s9425_s18  ;;  %v686_v1 = vsel %vm607_vm6, %v576_v49, %v592_v51  ;;  %v753_v45 = vunpack.i.h.s16 %v682_v63  ;;  %v755_v59 = vunpack.i.h.s16 %v685_v53  ;;  %v815_v8 = vpack.i.b16 %v751_v12, %v751_v12 }
  0xf3   : > { %v2226_v52 = vsel %vm2218_vm13, %v2193_v48, %v1965_v46  ;;  %2070 = vrot.lane.b32.xlu2 %v10070_v50, %s9430_s22  ;;  %v688_v10 = vrot.slane %v686_v1, 3  ;;  %v8311_v21 = vpack.i.b16 %v682_v63, %v682_v63  ;;  %v878_v27 = vperm.slane %v8310_v15, 0 }
  0xf4   : > { %v2029_v43 = vpop.permute.xlu0 %2028  ;;  %v2259_v11 = vsel %vm2251_vm14, %v2226_v52, %v10007_v5  ;;  %v817_v33 = vpack.i.b16 %v753_v45, %v753_v45  ;;  %v8312_v5 = vpack.i.b16 %v685_v53, %v685_v53  ;;  %v819_v25 = vpack.i.b16 %v755_v59, %v755_v59 }
  0xf5   : > { %v10080_v62 = vpop.permute.xlu2 %2030  ;;  %v757_v18 = vunpack.i.h.s16 %v688_v10  ;;  %v2292_v19 = vsel %vm2284_vm15, %v2259_v11, %v2029_v43  ;;  %v8313_v9 = vpack.i.b16 %v688_v10, %v688_v10  ;;  %v879_v31 = vperm.slane %v815_v8, 0 }
  0xf6   : > { %v880_v32 = vperm.slane %v8311_v21, 0  ;;  %v881_v40 = vperm.slane %v817_v33, 0  ;;  %v882_v49 = vperm.slane %v8312_v5, 0  ;;  %v883_v48 = vperm.slane %v819_v25, 0 }
  0xf7   : > { %v884_v46 = vperm.slane %v8313_v9, 0  ;;  %v1087_v23 = vpack.i.b16 %v878_v27, %v878_v27  ;;  %v1438_v51 = vshrl.u32 %v1312_v54, 16  ;;  %v1091_v44 = vpack.i.b16 %v879_v31, %v879_v31 }
  0xf8   : > { %1880 = vrot.lane.b32.xlu1 %v9993_v26, %s9424_s30  ;;  %v821_v26 = vpack.i.b16 %v757_v18, %v757_v18  ;;  %v1095_v52 = vpack.i.b16 %v880_v32, %v880_v32  ;;  %v10104_v47 = vpack.i.b16 %v881_v40, %v881_v40  ;;  %v1103_v43 = vpack.i.b16 %v882_v49, %v882_v49 }
  0xf9   : > { %v1089_v56 = vperm.slane %v1087_v23, 0  ;;  %v10108_v58 = vpack.i.b16 %v883_v48, %v883_v48  ;;  %v1111_v14 = vpack.i.b16 %v884_v46, %v884_v46  ;;  %v1093_v57 = vperm.slane %v1091_v44, 0 }
  0xfa   : > { %v2061_v16 = vpop.permute.xlu1 %2060  ;;  %1944 = vrot.lane.b32.xlu0 %v10047_v34, %s9428_s20  ;;  %v885_v35 = vperm.slane %v821_v26, 0  ;;  %v1097_v1 = vperm.slane %v1095_v52, 0  ;;  %v1101_v63 = vperm.slane %v10104_v47, 0  ;;  %v1105_v11 = vperm.slane %v1103_v43, 0 }
  0xfb   : > { %v2325_v39 = vsel %vm2317_vm1, %v2292_v19, %v2061_v16  ;;  %1912 = vrot.lane.b32.xlu2 %v10011_v60, %s9426_s19  ;;  %1314 = vst [vmem:[#allocation1] ss:$9 sm:$0xff] %v1089_v56  ;;  %v1109_v12 = vperm.slane %v10108_v58, 0  ;;  %v1113_v18 = vperm.slane %v1111_v14, 0  ;;  %v1440_v0 = vrot.slane %v1438_v51, 7 }
  0xfc   : > { %v1871_v30 = vpop.permute.xlu0 %1870  ;;  %v10111_v53 = vpack.i.b16 %v885_v35, %v885_v35  ;;  %1316 = vst [vmem:[#allocation1 + $0x1] ss:$9 sm:$0xff] %v1093_v57  ;;  %v1441_v15 = vshll.u32 %v1312_v54, 16 }
  0xfd   : > { %8337 = vmatmul.msk.bf16.gmra.mxu0 %vm2390_vm8, %v2325_v39  ;;  %v10102_v42 = vpop.permute.xlu2 %1872  ;;  %v2129_v13 = vsel %vm15691_vm10, %v2096_v28, %v1871_v30  ;;  %1318 = vst [vmem:[#allocation1 + $0x2] ss:$9 sm:$0xff] %v1097_v1 }
  0xfe   : > { %v1117_v21 = vperm.slane %v10111_v53, 0  ;;  %1320 = vst [vmem:[#allocation1 + $0x3] ss:$9 sm:$0xff] %v1101_v63  ;;  %v1443_v19 = vor.u32 %v1441_v15, %v1440_v0  ;;  %v577_v53 = vld [vmem:[%s9560_s0 + $0x1c] sm:$0xf]  ;;  %s15730_s0 = sld [smem:[#allocation41_spill]] }
  0xff   : > { %1322 = vst [vmem:[#allocation1 + $0x4] ss:$9 sm:$0xff] %v1105_v11 }
 0x100   : > { %1976 = vrot.lane.b32.xlu1 %v10070_v50, %s9427_s1  ;;  %1324 = vst [vmem:[#allocation1 + $0x5] ss:$9 sm:$0xff] %v1109_v12  ;;  %v10141_v26 = vsel %vm9537_vm2, 0, %v1443_v19 }
 0x101   : > { %1326 = vst [vmem:[#allocation1 + $0x6] ss:$9 sm:$0xff] %v1113_v18  ;;  %v1685_v30 = vshrl.u32 %v10141_v26, 16  ;;  %v1801_v32 = vrot.slane %v10141_v26, 1 }
 0x102   : > { %v1903_v10 = vpop.permute.xlu1 %1902  ;;  %2040 = vrot.lane.b32.xlu0 %v10099_v20, %s9431_s23  ;;  %1328 = vst [vmem:[#allocation1 + $0x7] ss:$9 sm:$0xff] %v1117_v21 }
 0x103   : > { %2008 = vrot.lane.b32.xlu2 %v10051_v29, %s9429_s21  ;;  %v2162_v45 = vsel %vm2152_vm11, %v2129_v13, %v1903_v10  ;;  %v593_v13 = vrot.slane %v577_v53, 3 }
 0x104   : > { %v1967_v59 = vpop.permute.xlu0 %1966  ;;  %v2195_v33 = vsel %vm2185_vm12, %v2162_v45, %v10053_v37 }
 0x105   : > { %v10123_v8 = vpop.permute.xlu2 %1968  ;;  %v2228_v16 = vsel %vm2218_vm13, %v2195_v33, %v1967_v59  ;;  %v699_v15 = vsel %vm607_vm6, %v577_v53, %v593_v13 }
 0x108   : > { %2072 = vrot.lane.b32.xlu1 %v10121_v4, %s9430_s22 }
 0x109   : > { %v1329_v28 = vld [vmem:[#allocation1] sm:$0xff] }
 0x10a   : > { %v1999_v5 = vpop.permute.xlu1 %1998  ;;  %1882 = vrot.lane.b32.xlu0 %v10070_v50, %s9424_s30  ;;  %v1687_v50 = vshll.u32 %v10141_v26, 16  ;;  %1330 = vst [vmem:[#allocation1] ss:$9 sm:$0xff] %v1089_v56  ;;  %v1444_v31 = vshrl.u32 %v1329_v28, 16  ;;  %v1447_v51 = vshll.u32 %v1329_v28, 16 }
 0x10b   : > { %v2261_v25 = vsel %vm2251_vm14, %v2228_v16, %v1999_v5  ;;  %1850 = vrot.lane.b32.xlu2 %v10047_v34, %s9425_s18  ;;  %v1534_v34 = vsel %vm9537_vm2, %v1440_v0, 0  ;;  %1331 = vst [vmem:[#allocation1 + $0x1] ss:$9 sm:$0xff] %v1093_v57  ;;  %v696_v0 = vsel %vm603_vm5, %v577_v53, %v593_v13  ;;  %vm15711_vm5 = vcmask 31744  }
 0x10c   : > { %v2294_v37 = vsel %vm2284_vm15, %v2261_v25, %v10080_v62  ;;  %v2063_v9 = vpop.permute.xlu0 %2062  ;;  %v1689_v61 = vrot.slane %v1687_v50, 1  ;;  %v1692_v54 = vshll.u32 %v1534_v34, 16  ;;  %v1802_v41 = vrot.slane %v1534_v34, 1  ;;  %1332 = vst [vmem:[#allocation1 + $0x2] ss:$9 sm:$0xff] %v1097_v1 }
 0x10d   : > { %v2327_v39 = vsel %vm2317_vm1, %v2294_v37, %v2063_v9  ;;  %v2065_v27 = vpop.permute.xlu2 %2064  ;;  %1333 = vst [vmem:[#allocation1 + $0x3] ss:$9 sm:$0xff] %v1101_v63  ;;  %v1446_v23 = vrot.slane %v1444_v31, 7  ;;  %v698_v16 = vrot.slane %v696_v0, 2  ;;  %v701_v9 = vrot.slane %v699_v15, 3 }
 0x10e   : > { %8338 = vmatmul.msk.bf16.gmra.mxu0 %vm2390_vm8, %v2327_v39  ;;  %1334 = vst [vmem:[#allocation1 + $0x4] ss:$9 sm:$0xff] %v1105_v11  ;;  %v1690_v46 = vor.u32 %v1689_v61, %v1685_v30  ;;  %v1694_v35 = vrot.slane %v1692_v54, 1  ;;  %v10160_v44 = vsel %vm1764_vm3, %v1801_v32, %v1802_v41 }
 0x10f   : > { %1335 = vst [vmem:[#allocation1 + $0x5] ss:$9 sm:$0xff] %v1109_v12  ;;  %v1449_v56 = vor.u32 %v1447_v51, %v1446_v23  ;;  %v10188_v10 = vsel %vm9537_vm2, %v1446_v23, 0  ;;  %v765_v30 = vunpack.i.h.s16 %v701_v9 }
 0x110   : > { %1914 = vrot.lane.b32.xlu1 %v10051_v29, %s9426_s19  ;;  %1336 = vst [vmem:[#allocation1 + $0x6] ss:$9 sm:$0xff] %v1113_v18  ;;  %v10169_v47 = vsel %vm1539_vm7, %v1690_v46, %v1694_v35  ;;  %v1704_v33 = vshll.u32 %v10188_v10, 16  ;;  %v8316_v46 = vpack.i.b16 %v698_v16, %v698_v16  ;;  %v1805_v35 = vrot.slane %v10188_v10, 1 }
 0x111   : > { %1337 = vst [vmem:[#allocation1 + $0x7] ss:$9 sm:$0xff] %v1117_v21  ;;  %v10179_v57 = vsel %vm9537_vm2, 0, %v1449_v56 }
 0x112   : > { %v1841_v62 = vpop.permute.xlu1 %1840  ;;  %1978 = vrot.lane.b32.xlu0 %v10121_v4, %s9427_s1  ;;  %v1699_v11 = vshll.u32 %v10179_v57, 16  ;;  %v1697_v5 = vshrl.u32 %v10179_v57, 16 }
 0x113   : > { %1946 = vrot.lane.b32.xlu2 %v10099_v20, %s9428_s20  ;;  %v2098_v49 = vsel %vm15692_vm9, %v9727_v6, %v1841_v62  ;;  %v763_v62 = vunpack.i.h.s16 %v698_v16 }
 0x114   : > { %v1905_v40 = vpop.permute.xlu0 %1904  ;;  %v2131_v52 = vsel %vm15691_vm10, %v2098_v49, %v10102_v42  ;;  %v1701_v25 = vrot.slane %v1699_v11, 1 }
 0x115   : > { %v10157_v48 = vpop.permute.xlu2 %1906  ;;  %v2164_v43 = vsel %vm2152_vm11, %v2131_v52, %v1905_v40  ;;  %v1804_v40 = vrot.slane %v10179_v57, 1  ;;  %v827_v51 = vpack.i.b16 %v763_v62, %v763_v62  ;;  %v8317_v52 = vpack.i.b16 %v701_v9, %v701_v9 }
 0x116   : > { %v1702_v61 = vor.u32 %v1701_v25, %v1697_v5 }
 0x118   : > { %2010 = vrot.lane.b32.xlu1 %v10141_v26, %s9429_s21  ;;  %v1338_v63 = vld [vmem:[#allocation1] sm:$0xff] }
 0x119   : > { %v1450_v59 = vshrl.u32 %v1338_v63, 16  ;;  %v1453_v28 = vshll.u32 %v1338_v63, 16 }
 0x11a   : > { %v1937_v6 = vpop.permute.xlu1 %1936  ;;  %2074 = vrot.lane.b32.xlu0 %v10160_v44, %s9430_s22 }
 0x11b   : > { %2042 = vrot.lane.b32.xlu2 %v10169_v47, %s9431_s23  ;;  %v2197_v42 = vsel %vm2185_vm12, %v2164_v43, %v1937_v6  ;;  %v1452_v34 = vrot.slane %v1450_v59, 7  ;;  %v829_v43 = vpack.i.b16 %v765_v30, %v765_v30 }
 0x11c   : > { %v2001_v58 = vpop.permute.xlu0 %2000  ;;  %v2230_v1 = vsel %vm2218_vm13, %v2197_v42, %v10123_v8 }
 0x11d   : > { %v10175_v14 = vpop.permute.xlu2 %2002  ;;  %v2263_v12 = vsel %vm2251_vm14, %v2230_v1, %v2001_v58  ;;  %v1455_v23 = vor.u32 %v1453_v28, %v1452_v34  ;;  %v893_v59 = vperm.slane %v829_v43, 0 }
 0x120   : > { %1852 = vrot.lane.b32.xlu1 %v10099_v20, %s9425_s18  ;;  %v693_v20 = vsel %vm599_vm4, %v577_v53, %v593_v13  ;;  %vm2647_vm4 = vcmask 1041408  }
 0x121   : > { %v695_v19 = vrot.slane %v693_v20, 1 }
 0x122   : > { %v2033_v45 = vpop.permute.xlu1 %2032  ;;  %1916 = vrot.lane.b32.xlu0 %v10141_v26, %s9426_s19 }
 0x123   : > { %v2296_v18 = vsel %vm2284_vm15, %v2263_v12, %v2033_v45  ;;  %1884 = vrot.lane.b32.xlu2 %v10121_v4, %s9424_s30  ;;  %v691_v4 = vsel %vm15710_vm0, %v577_v53, %v593_v13  ;;  %v761_v50 = vunpack.i.h.s16 %v695_v19  ;;  %v8315_v32 = vpack.i.b16 %v695_v19, %v695_v19 }
 0x124   : > { %v1843_v8 = vpop.permute.xlu0 %1842  ;;  %v2329_v21 = vsel %vm2317_vm1, %v2296_v18, %v2065_v27  ;;  %v759_v39 = vunpack.i.h.s16 %v691_v4  ;;  %v1706_v27 = vrot.slane %v1704_v33, 1  ;;  %v8314_v54 = vpack.i.b16 %v691_v4, %v691_v4 }
 0x125   : > { %8339 = vmatmul.msk.bf16.gmra.mxu0 %vm2390_vm8, %v2329_v21  ;;  %v10204_v37 = vpop.permute.xlu2 %1844  ;;  %v825_v49 = vpack.i.b16 %v761_v50, %v761_v50  ;;  %v2100_v6 = vsel %vm15692_vm9, %v9761_v55, %v1843_v8  ;;  %v888_v10 = vperm.slane %v8315_v32, 0  ;;  %v890_v13 = vperm.slane %v8316_v46, 0 }
 0x126   : > { %v823_v31 = vpack.i.b16 %v759_v39, %v759_v39  ;;  %v886_v42 = vperm.slane %v8314_v54, 0  ;;  %v10219_v63 = vsel %vm1539_vm7, %v1702_v61, %v1706_v27  ;;  %v891_v12 = vperm.slane %v827_v51, 0 }
 0x127   : > { %v889_v11 = vperm.slane %v825_v49, 0  ;;  %v892_v45 = vperm.slane %v8317_v52, 0  ;;  %v1127_v55 = vpack.i.b16 %v888_v10, %v888_v10  ;;  %v10233_v8 = vsel %vm9537_vm2, 0, %v1455_v23 }
 0x128   : > { %1948 = vrot.lane.b32.xlu1 %v10169_v47, %s9428_s20  ;;  %v887_v58 = vperm.slane %v823_v31, 0  ;;  %v1119_v18 = vpack.i.b16 %v886_v42, %v886_v42  ;;  %v1135_v21 = vpack.i.b16 %v890_v13, %v890_v13  ;;  %v10235_v33 = vpack.i.b16 %v891_v12, %v891_v12 }
 0x129   : > { %v10225_v0 = vpack.i.b16 %v889_v11, %v889_v11  ;;  %v10238_v5 = vperm.slane %v1127_v55, 0  ;;  %v1143_v25 = vpack.i.b16 %v892_v45, %v892_v45  ;;  %v10246_v39 = vpack.i.b16 %v893_v59, %v893_v59 }
 0x12a   : > { %v1875_v41 = vpop.permute.xlu1 %1874  ;;  %2012 = vrot.lane.b32.xlu0 %v10179_v57, %s9429_s21  ;;  %v10223_v20 = vpack.i.b16 %v887_v58, %v887_v58  ;;  %v1121_v19 = vperm.slane %v1119_v18, 0  ;;  %v1711_v28 = vshll.u32 %v10233_v8, 16  ;;  %v1137_v27 = vperm.slane %v1135_v21, 0 }
 0x12b   : > { %1980 = vrot.lane.b32.xlu2 %v10160_v44, %s9427_s1  ;;  %v2133_v1 = vsel %vm15691_vm10, %v2100_v6, %v1875_v41  ;;  %v1133_v9 = vperm.slane %v10225_v0, 0  ;;  %v1141_v61 = vperm.slane %v10235_v33, 0  ;;  %v1145_v31 = vperm.slane %v1143_v25, 0  ;;  %1344 = vst [vmem:[#allocation1 + $0x2] ss:$9 sm:$0xff] %v10238_v5 }
 0x12c   : > { %v1939_v56 = vpop.permute.xlu0 %1938  ;;  %v2166_v15 = vsel %vm2152_vm11, %v2133_v1, %v10157_v48  ;;  %v1125_v16 = vperm.slane %v10223_v20, 0  ;;  %v10243_v48 = vsel %vm1764_vm3, %v1804_v40, %v1805_v35  ;;  %1340 = vst [vmem:[#allocation1] ss:$9 sm:$0xff] %v1121_v19  ;;  %v1149_v32 = vperm.slane %v10246_v39, 0 }
 0x12d   : > { %v10221_v53 = vpop.permute.xlu2 %1940  ;;  %v2199_v50 = vsel %vm2185_vm12, %v2166_v15, %v1939_v56  ;;  %1346 = vst [vmem:[#allocation1 + $0x3] ss:$9 sm:$0xff] %v1133_v9  ;;  %v1709_v40 = vshrl.u32 %v10233_v8, 16  ;;  %v1713_v49 = vrot.slane %v1711_v28, 1  ;;  %v2597_v56 = vld [vmem:[%s15664_s5] sm:$0x3]  ;;  %v2102_v43 = vsel %vm15692_vm9, %v9794_v17, %v10204_v37 }
 0x12e   : > { %1342 = vst [vmem:[#allocation1 + $0x1] ss:$9 sm:$0xff] %v1125_v16  ;;  %v2649_v42 = vsel %vm2647_vm4, %v2597_v56, 0  ;;  %v1807_v58 = vrot.slane %v10233_v8, 1 }
 0x12f   : > { %1348 = vst [vmem:[#allocation1 + $0x4] ss:$9 sm:$0xff] %v1137_v27  ;;  %8732 = vmatpush.bf16.msra.mxu1 %v2649_v42  ;;  %2658 = vmatpush.bf16.msrb.mxu0 %v2649_v42 }
 0x130   : > { %2044 = vrot.lane.b32.xlu1 %v10219_v63, %s9431_s23  ;;  %1350 = vst [vmem:[#allocation1 + $0x5] ss:$9 sm:$0xff] %v1141_v61  ;;  %8733 = vmatpush.bf16.msra.mxu2 %v2649_v42 }
 0x131   : > { %1352 = vst [vmem:[#allocation1 + $0x6] ss:$9 sm:$0xff] %v1145_v31  ;;  %8734 = vmatpush.bf16.msra.mxu3 %v2649_v42 }
 0x132   : > { %v1971_v4 = vpop.permute.xlu1 %1970  ;;  %1854 = vrot.lane.b32.xlu0 %v10169_v47, %s9425_s18  ;;  %v1536_v47 = vsel %vm9537_vm2, %v1452_v34, 0  ;;  %1354 = vst [vmem:[#allocation1 + $0x7] ss:$9 sm:$0xff] %v1149_v32 }
 0x133   : > { %2076 = vrot.lane.b32.xlu2 %v10243_v48, %s9430_s22  ;;  %v2232_v62 = vsel %vm2218_vm13, %v2199_v50, %v1971_v4  ;;  %v1716_v46 = vshll.u32 %v1536_v47, 16  ;;  %v1808_v1 = vrot.slane %v1536_v47, 1 }
 0x134   : > { %v2035_v30 = vpop.permute.xlu0 %2034  ;;  %v2265_v41 = vsel %vm2251_vm14, %v2232_v62, %v10175_v14  ;;  %v1714_v14 = vor.u32 %v1713_v49, %v1709_v40 }
 0x135   : > { %v10256_v54 = vpop.permute.xlu2 %2036  ;;  %v2298_v34 = vsel %vm2284_vm15, %v2265_v41, %v2035_v30  ;;  %v1718_v51 = vrot.slane %v1716_v46, 1  ;;  %v10297_v59 = vsel %vm1764_vm3, %v1807_v58, %v1808_v1 }
 0x137   : > { %v10275_v6 = vsel %vm1539_vm7, %v1714_v14, %v1718_v51  ;;  %v10342_v14 = vld [vmem:[%s15662_s3] ss:$0 sm:$0xff] }
 0x138   : > { %1886 = vrot.lane.b32.xlu1 %v10160_v44, %s9424_s30 }
 0x139   : > { %v1355_v10 = vld [vmem:[#allocation1] sm:$0xff] }
 0x13a   : > { %v2067_v35 = vpop.permute.xlu1 %2066  ;;  %1950 = vrot.lane.b32.xlu0 %v10219_v63, %s9428_s20  ;;  %v1456_v13 = vshrl.u32 %v1355_v10, 16  ;;  %1356 = vst [vmem:[#allocation1] ss:$9 sm:$0xff] %v1121_v19  ;;  %v1459_v20 = vshll.u32 %v1355_v10, 16 }
 0x13b   : > { %v2331_v23 = vsel %vm2317_vm1, %v2298_v34, %v2067_v35  ;;  %1918 = vrot.lane.b32.xlu2 %v10179_v57, %s9426_s19  ;;  %1357 = vst [vmem:[#allocation1 + $0x1] ss:$9 sm:$0xff] %v1125_v16 }
 0x13c   : > { %8340 = vmatmul.msk.bf16.gmra.mxu0 %vm2390_vm8, %v2331_v23  ;;  %v1877_v52 = vpop.permute.xlu0 %1876  ;;  %1358 = vst [vmem:[#allocation1 + $0x2] ss:$9 sm:$0xff] %v10238_v5  ;;  %v1458_v18 = vrot.slane %v1456_v13, 7 }
 0x13d   : > { %v10272_v44 = vpop.permute.xlu2 %1878  ;;  %v2135_v17 = vsel %vm15691_vm10, %v2102_v43, %v1877_v52  ;;  %1359 = vst [vmem:[#allocation1 + $0x3] ss:$9 sm:$0xff] %v1133_v9 }
 0x13e   : > { %1360 = vst [vmem:[#allocation1 + $0x4] ss:$9 sm:$0xff] %v1137_v27  ;;  %v1461_v15 = vor.u32 %v1459_v20, %v1458_v18 }
 0x13f   : > { %1361 = vst [vmem:[#allocation1 + $0x5] ss:$9 sm:$0xff] %v1141_v61 }
 0x140   : > { %1982 = vrot.lane.b32.xlu1 %v10243_v48, %s9427_s1  ;;  %1362 = vst [vmem:[#allocation1 + $0x6] ss:$9 sm:$0xff] %v1145_v31  ;;  %v10316_v4 = vsel %vm9537_vm2, 0, %v1461_v15 }
 0x141   : > { %1363 = vst [vmem:[#allocation1 + $0x7] ss:$9 sm:$0xff] %v1149_v32  ;;  %v1721_v28 = vshrl.u32 %v10316_v4, 16  ;;  %v1810_v47 = vrot.slane %v10316_v4, 1 }
 0x142   : > { %v1909_v11 = vpop.permute.xlu1 %1908  ;;  %2046 = vrot.lane.b32.xlu0 %v10275_v6, %s9431_s23 }
 0x143   : > { %2014 = vrot.lane.b32.xlu2 %v10233_v8, %s9429_s21  ;;  %v2168_v12 = vsel %vm2152_vm11, %v2135_v17, %v1909_v11 }
 0x144   : > { %v10292_v37 = vpop.f32.mrf.mxu0  ;;  %v1973_v45 = vpop.permute.xlu0 %1972  ;;  %v2201_v0 = vsel %vm2185_vm12, %v2168_v12, %v10221_v53 }
 0x145   : > { %v1975_v55 = vpop.permute.xlu2 %1974  ;;  %v2234_v21 = vsel %vm2218_vm13, %v2201_v0, %v1973_v45 }
 0x148   : > { %2078 = vrot.lane.b32.xlu1 %v10297_v59, %s9430_s22  ;;  %v1364_v39 = vld [vmem:[#allocation1] sm:$0xff] }
 0x149   : > { %v1462_v30 = vshrl.u32 %v1364_v39, 16  ;;  %v1465_v34 = vshll.u32 %v1364_v39, 16 }
 0x14a   : > { %v2005_v33 = vpop.permute.xlu1 %2004  ;;  %1888 = vrot.lane.b32.xlu0 %v10243_v48, %s9424_s30  ;;  %v1723_v48 = vshll.u32 %v10316_v4, 16 }
 0x14b   : > { %v2267_v19 = vsel %vm2251_vm14, %v2234_v21, %v2005_v33  ;;  %1856 = vrot.lane.b32.xlu2 %v10219_v63, %s9425_s18  ;;  %v1537_v63 = vsel %vm9537_vm2, %v1458_v18, 0  ;;  %v1464_v46 = vrot.slane %v1462_v30, 7 }
 0x14c   : > { %v10309_v16 = vpop.f32.mrf.mxu0  ;;  %v2300_v53 = vsel %vm2284_vm15, %v2267_v19, %v10256_v54  ;;  %v2069_v5 = vpop.permute.xlu0 %2068  ;;  %v1725_v27 = vrot.slane %v1723_v48, 1  ;;  %v1728_v62 = vshll.u32 %v1537_v63, 16  ;;  %v1811_v61 = vrot.slane %v1537_v63, 1 }
 0x14d   : > { %v2333_v25 = vsel %vm2317_vm1, %v2300_v53, %v2069_v5  ;;  %v2071_v9 = vpop.permute.xlu2 %2070  ;;  %v1467_v52 = vor.u32 %v1465_v34, %v1464_v46  ;;  %v1538_v15 = vsel %vm9537_vm2, %v1464_v46, 0 }
 0x14e   : > { %8341 = vmatmul.msk.bf16.gmra.mxu0 %vm2390_vm8, %v2333_v25  ;;  %v1726_v40 = vor.u32 %v1725_v27, %v1721_v28  ;;  %v1730_v49 = vrot.slane %v1728_v62, 1  ;;  %v10333_v35 = vsel %vm1764_vm3, %v1810_v47, %v1811_v61  ;;  %v1821_v53 = vshll.u32 %v1538_v15, 16 }
 0x14f   : > { %v1521_v11 = vsel %vm9537_vm2, 0, %v1467_v52  ;;  %v1828_v30 = vrot.slane %v1538_v15, 1 }
 0x150   : > { %1920 = vrot.lane.b32.xlu1 %v10233_v8, %s9426_s19  ;;  %v1731_v51 = vsel %vm1539_vm7, %v1726_v40, %v1730_v49  ;;  %v1816_v18 = vshll.u32 %v1521_v11, 16  ;;  %v1814_v33 = vshrl.u32 %v1521_v11, 16  ;;  %v1823_v48 = vrot.slane %v1821_v53, 1 }
 0x151   : > { %v1827_v62 = vrot.slane %v1521_v11, 1 }
 0x152   : > { %v1847_v50 = vpop.permute.xlu1 %1846  ;;  %1984 = vrot.lane.b32.xlu0 %v10297_v59, %s9427_s1  ;;  %v1818_v19 = vrot.slane %v1816_v18, 1 }
 0x153   : > { %1952 = vrot.lane.b32.xlu2 %v10275_v6, %s9428_s20  ;;  %v2104_v32 = vsel %vm15692_vm9, %v9857_v36, %v1847_v50 }
 0x154   : > { %v2441_v54 = vpop.f32.mrf.mxu0  ;;  %v1911_v31 = vpop.permute.xlu0 %1910  ;;  %v2137_v23 = vsel %vm15691_vm10, %v2104_v32, %v10272_v44  ;;  %v1819_v25 = vor.u32 %v1818_v19, %v1814_v33 }
 0x155   : > { %v1913_v41 = vpop.permute.xlu2 %1912  ;;  %v2442_v56 = vadd.f32 %v10342_v14, %v2441_v54  ;;  %v2170_v43 = vsel %vm2152_vm11, %v2137_v23, %v1911_v31 }
 0x156   : > { %v1824_v28 = vsel %vm1539_vm7, %v1819_v25, %v1823_v48 }
 0x157   : > { %v2518_v13 = vmax.f32 %v2442_v56, 0.0 }
 0x158   : > { %2016 = vrot.lane.b32.xlu1 %v10316_v4, %s9429_s21 }
 0x15a   : > { %v1943_v36 = vpop.permute.xlu1 %1942  ;;  %2080 = vrot.lane.b32.xlu0 %v10333_v35, %s9430_s22 }
 0x15b   : > { %2048 = vrot.lane.b32.xlu2 %v1731_v51, %s9431_s23  ;;  %v2203_v44 = vsel %vm2185_vm12, %v2170_v43, %v1943_v36 }
 0x15c   : > { %v2443_v42 = vpop.f32.mrf.mxu0  ;;  %v2007_v58 = vpop.permute.xlu0 %2006  ;;  %v2236_v12 = vsel %vm2218_vm13, %v2203_v44, %v1975_v55 }
 0x15d   : > { %v2444_v1 = vadd.f32 %v10342_v14, %v2443_v42  ;;  %v2009_v10 = vpop.permute.xlu2 %2008  ;;  %v2269_v20 = vsel %vm2251_vm14, %v2236_v12, %v2007_v58 }
 0x15f   : > { %v2519_v17 = vmax.f32 %v2444_v1, 0.0 }
 0x160   : > { %1858 = vrot.lane.b32.xlu1 %v10275_v6, %s9425_s18 }
 0x161   : > { %v10357_v45 = vpack.c.bf16 %v2519_v17, %v2518_v13 }
 0x162   : > { %v2039_v0 = vpop.permute.xlu1 %2038  ;;  %1922 = vrot.lane.b32.xlu0 %v10316_v4, %s9426_s19 }
 0x163   : > { %8351 = vmatmul.msk.bf16.vlgmr.msra.gmra.mxu1 %vm15711_vm5, %v10357_v45  ;;  %v2302_v55 = vsel %vm2284_vm15, %v2269_v20, %v2039_v0  ;;  %1890 = vrot.lane.b32.xlu2 %v10297_v59, %s9424_s30 }
 0x164   : > { %v1849_v6 = vpop.permute.xlu0 %1848  ;;  %v2335_v21 = vsel %vm2317_vm1, %v2302_v55, %v2071_v9 }
 0x165   : > { %8342 = vmatmul.msk.bf16.gmra.mxu0 %vm2390_vm8, %v2335_v21  ;;  %v1851_v5 = vpop.permute.xlu2 %1850  ;;  %v2106_v59 = vsel %vm15692_vm9, %v9955_v38, %v1849_v6  ;;  %v1829_v38 = vsel %vm1764_vm3, %v1827_v62, %v1828_v30 }
 0x168   : > { %1954 = vrot.lane.b32.xlu1 %v1731_v51, %s9428_s20 }
 0x16a   : > { %v2446_v63 = vpop.f32.mrf.mxu0  ;;  %v1881_v39 = vpop.permute.xlu1 %1880  ;;  %2018 = vrot.lane.b32.xlu0 %v1521_v11, %s9429_s21 }
 0x16b   : > { %1986 = vrot.lane.b32.xlu2 %v10333_v35, %s9427_s1  ;;  %v2139_v50 = vsel %vm15691_vm10, %v2106_v59, %v1881_v39  ;;  %v2447_v61 = vadd.f32 %v10342_v14, %v2446_v63 }
 0x16c   : > { %v1945_v9 = vpop.permute.xlu0 %1944  ;;  %v2172_v47 = vsel %vm2152_vm11, %v2139_v50, %v1913_v41 }
 0x16d   : > { %v1947_v27 = vpop.permute.xlu2 %1946  ;;  %v2205_v32 = vsel %vm2185_vm12, %v2172_v47, %v1945_v9  ;;  %v2520_v41 = vmax.f32 %v2447_v61, 0.0 }
 0x170   : > { %2050 = vrot.lane.b32.xlu1 %v1824_v28, %s9431_s23 }
 0x172   : > { %v2448_v54 = vpop.f32.mrf.mxu0  ;;  %v1977_v31 = vpop.permute.xlu1 %1976  ;;  %1860 = vrot.lane.b32.xlu0 %v1731_v51, %s9425_s18 }
 0x173   : > { %v2449_v40 = vadd.f32 %v10342_v14, %v2448_v54  ;;  %2082 = vrot.lane.b32.xlu2 %v1829_v38, %s9430_s22  ;;  %v2238_v49 = vsel %vm2218_vm13, %v2205_v32, %v1977_v31 }
 0x174   : > { %v2041_v46 = vpop.permute.xlu0 %2040  ;;  %v2271_v36 = vsel %vm2251_vm14, %v2238_v49, %v2009_v10 }
 0x175   : > { %v2521_v34 = vmax.f32 %v2449_v40, 0.0  ;;  %v2043_v23 = vpop.permute.xlu2 %2042  ;;  %v2304_v51 = vsel %vm2284_vm15, %v2271_v36, %v2041_v46 }
 0x177   : > { %v10389_v52 = vpack.c.bf16 %v2521_v34, %v2520_v41 }
 0x178   : > { %1892 = vrot.lane.b32.xlu1 %v10333_v35, %s9424_s30  ;;  %v2108_v35 = vsel %vm15692_vm9, %v10011_v60, %v1851_v5 }
 0x179   : > { %8352 = vmatmul.msk.bf16.gmra.mxu1 %vm15711_vm5, %v10389_v52 }
 0x17a   : > { %v2451_v56 = vpop.f32.mrf.mxu0  ;;  %v2073_v43 = vpop.permute.xlu1 %2072  ;;  %1956 = vrot.lane.b32.xlu0 %v1824_v28, %s9428_s20  ;;  %s9433_s20 = smov 4  }
 0x17b   : > { %v2337_v44 = vsel %vm2317_vm1, %v2304_v51, %v2073_v43  ;;  %1924 = vrot.lane.b32.xlu2 %v1521_v11, %s9426_s19  ;;  %v2452_v1 = vadd.f32 %v10342_v14, %v2451_v56  ;;  %s9434_s19 = smov 6  }
 0x17c   : > { %8343 = vmatmul.msk.bf16.gmra.mxu0 %vm2390_vm8, %v2337_v44  ;;  %v1883_v42 = vpop.permute.xlu0 %1882 }
 0x17d   : > { %v1885_v58 = vpop.permute.xlu2 %1884  ;;  %v2141_v17 = vsel %vm15691_vm10, %v2108_v35, %v1883_v42  ;;  %v2522_v60 = vmax.f32 %v2452_v1, 0.0 }
 0x180   : > { %1988 = vrot.lane.b32.xlu1 %v1829_v38, %s9427_s1  ;;  %s9432_s1 = smov 2  }
 0x182   : > { %v2453_v10 = vpop.f32.mrf.mxu0  ;;  %v1915_v13 = vpop.permute.xlu1 %1914  ;;  %2052 = vrot.lane.b32.xlu0 %v9584_v22, %s9431_s23 }
 0x183   : > { %v2454_v11 = vadd.f32 %v10342_v14, %v2453_v10  ;;  %2020 = vrot.lane.b32.xlu2 %v9545_v3, %s9429_s21  ;;  %v2174_v12 = vsel %vm2152_vm11, %v2141_v17, %v1915_v13  ;;  %s9435_s21 = smov 10  }
 0x184   : > { %v1979_v18 = vpop.permute.xlu0 %1978  ;;  %v2207_v15 = vsel %vm2185_vm12, %v2174_v12, %v1947_v27 }
 0x185   : > { %v2523_v20 = vmax.f32 %v2454_v11, 0.0  ;;  %v1981_v0 = vpop.permute.xlu2 %1980  ;;  %v2240_v6 = vsel %vm2218_vm13, %v2207_v15, %v1979_v18 }
 0x187   : > { %v10412_v55 = vpack.c.bf16 %v2523_v20, %v2522_v60 }
 0x188   : > { %2084 = vrot.lane.b32.xlu1 %v9555_v7, %s9430_s22  ;;  %s8709_s22 = sshll.u32 %s16221_s25, 7 }
 0x189   : > { %8353 = vmatmul.msk.bf16.gmra.mxu1 %vm15711_vm5, %v10412_v55  ;;  %s10535_s28 = scalar_lea.vmem %s15730_s0, %s8709_s22 }
 0x18a   : > { %v2011_v21 = vpop.permute.xlu1 %2010 }
 0x18b   : > { %v2273_v33 = vsel %vm2251_vm14, %v2240_v6, %v2011_v21  ;;  %v2456_v19 = vpop.f32.mrf.mxu0 }
 0x18c   : > { %v2306_v53 = vsel %vm2284_vm15, %v2273_v33, %v2043_v23  ;;  %v2075_v5 = vpop.permute.xlu0 %2074  ;;  %v2457_v63 = vadd.f32 %v10342_v14, %v2456_v19  ;;  %v2596_v33 = vld [vmem:[%s15663_s4] sm:$0x3] }
 0x18d   : > { %v2339_v25 = vsel %vm2317_vm1, %v2306_v53, %v2075_v5  ;;  %v2077_v48 = vpop.permute.xlu2 %2076  ;;  %v2869_v53 = vsel %vm2647_vm4, %v2596_v33, 0 }
 0x18e   : > { %8344 = vmatmul.msk.bf16.gmra.mxu0 %vm2390_vm8, %v2339_v25  ;;  %v2524_v62 = vmax.f32 %v2457_v63, 0.0  ;;  %2878 = vmatpush.bf16.msrb.mxu2 %v2869_v53 }
 0x192   : > { %v1853_v39 = vpop.permute.xlu1 %1852 }
 0x193   : > { %v2110_v59 = vsel %vm15692_vm9, %v10051_v29, %v1853_v39  ;;  %v2458_v9 = vpop.f32.mrf.mxu0 }
 0x194   : > { %v2459_v50 = vadd.f32 %v10342_v14, %v2458_v9  ;;  %v1917_v28 = vpop.permute.xlu0 %1916  ;;  %v2143_v27 = vsel %vm15691_vm10, %v2110_v59, %v1885_v58 }
 0x195   : > { %v1919_v47 = vpop.permute.xlu2 %1918  ;;  %v2176_v61 = vsel %vm2152_vm11, %v2143_v27, %v1917_v28 }
 0x196   : > { %v2525_v30 = vmax.f32 %v2459_v50, 0.0 }
 0x198   : > { %v10429_v54 = vpack.c.bf16 %v2525_v30, %v2524_v62 }
 0x19a   : > { %8354 = vmatmul.msk.bf16.gmra.mxu1 %vm15711_vm5, %v10429_v54  ;;  %v1949_v31 = vpop.permute.xlu1 %1948 }
 0x19b   : > { %v2209_v38 = vsel %vm2185_vm12, %v2176_v61, %v1949_v31 }
 0x19c   : > { %v2013_v29 = vpop.permute.xlu0 %2012  ;;  %v2242_v32 = vsel %vm2218_vm13, %v2209_v38, %v1981_v0 }
 0x19d   : > { %v2275_v40 = vsel %vm2251_vm14, %v2242_v32, %v2013_v29  ;;  %v2015_v49 = vpop.permute.xlu2 %2014 }
 0x1a2   : > { %v2461_v46 = vpop.f32.mrf.mxu0  ;;  %v2045_v41 = vpop.permute.xlu1 %2044 }
 0x1a3   : > { %v2308_v34 = vsel %vm2284_vm15, %v2275_v40, %v2045_v41  ;;  %v2462_v56 = vadd.f32 %v10342_v14, %v2461_v46 }
 0x1a4   : > { %v1855_v23 = vpop.permute.xlu0 %1854  ;;  %v2341_v36 = vsel %vm2317_vm1, %v2308_v34, %v2077_v48 }
 0x1a5   : > { %8345 = vmatmul.msk.bf16.gmra.mxu0 %vm2390_vm8, %v2341_v36  ;;  %v2112_v51 = vsel %vm15692_vm9, %v10141_v26, %v1855_v23  ;;  %v1857_v1 = vpop.permute.xlu2 %1856  ;;  %v2526_v10 = vmax.f32 %v2462_v56, 0.0 }
 0x1a6   : > { %v2114_v25 = vsel %vm15692_vm9, %v10179_v57, %v1857_v1 }
 0x1aa   : > { %v2463_v43 = vpop.f32.mrf.mxu0  ;;  %v1887_v44 = vpop.permute.xlu1 %1886 }
 0x1ab   : > { %v2464_v42 = vadd.f32 %v10342_v14, %v2463_v43  ;;  %v2145_v58 = vsel %vm15691_vm10, %v2112_v51, %v1887_v44 }
 0x1ac   : > { %v1951_v35 = vpop.permute.xlu0 %1950  ;;  %v2178_v17 = vsel %vm2152_vm11, %v2145_v58, %v1919_v47 }
 0x1ad   : > { %v2527_v13 = vmax.f32 %v2464_v42, 0.0  ;;  %v2211_v12 = vsel %vm2185_vm12, %v2178_v17, %v1951_v35  ;;  %v1953_v0 = vpop.permute.xlu2 %1952 }
 0x1af   : > { %v10445_v11 = vpack.c.bf16 %v2527_v13, %v2526_v10 }
 0x1b1   : > { %8355 = vmatmul.msk.bf16.gmra.mxu1 %vm15711_vm5, %v10445_v11 }
 0x1b2   : > { %v1983_v26 = vpop.permute.xlu1 %1982 }
 0x1b3   : > { %v2244_v18 = vsel %vm2218_vm13, %v2211_v12, %v1983_v26 }
 0x1b4   : > { %v2047_v60 = vpop.permute.xlu0 %2046  ;;  %v2277_v20 = vsel %vm2251_vm14, %v2244_v18, %v2015_v49 }
 0x1b5   : > { %v2310_v15 = vsel %vm2284_vm15, %v2277_v20, %v2047_v60  ;;  %v2049_v39 = vpop.permute.xlu2 %2048 }
 0x1b9   : > { %v2466_v6 = vpop.f32.mrf.mxu0 }
 0x1ba   : > { %v2079_v21 = vpop.permute.xlu1 %2078  ;;  %v2467_v48 = vadd.f32 %v10342_v14, %v2466_v6 }
 0x1bb   : > { %v2343_v19 = vsel %vm2317_vm1, %v2310_v15, %v2079_v21 }
 0x1bc   : > { %v1889_v5 = vpop.permute.xlu0 %1888  ;;  %8346 = vmatmul.msk.bf16.gmra.mxu0 %vm2390_vm8, %v2343_v19  ;;  %v2528_v27 = vmax.f32 %v2467_v48, 0.0 }
 0x1bd   : > { %v2147_v63 = vsel %vm15691_vm10, %v2114_v25, %v1889_v5  ;;  %v1891_v38 = vpop.permute.xlu2 %1890 }
 0x1c1   : > { %v2468_v59 = vpop.f32.mrf.mxu0 }
 0x1c2   : > { %v2469_v9 = vadd.f32 %v10342_v14, %v2468_v59  ;;  %v1921_v50 = vpop.permute.xlu1 %1920 }
 0x1c3   : > { %v2180_v28 = vsel %vm2152_vm11, %v2147_v63, %v1921_v50 }
 0x1c4   : > { %v2529_v62 = vmax.f32 %v2469_v9, 0.0  ;;  %v1985_v30 = vpop.permute.xlu0 %1984  ;;  %v2213_v47 = vsel %vm2185_vm12, %v2180_v28, %v1953_v0 }
 0x1c5   : > { %v2246_v57 = vsel %vm2218_vm13, %v2213_v47, %v1985_v30  ;;  %v1987_v43 = vpop.permute.xlu2 %1986 }
 0x1c6   : > { %v10466_v61 = vpack.c.bf16 %v2529_v62, %v2528_v27 }
 0x1c8   : > { %8356 = vmatmul.msk.bf16.vlgmr.msra.gmra.mxu2 %vm15711_vm5, %v10466_v61 }
 0x1ca   : > { %v2017_v31 = vpop.permute.xlu1 %2016 }
 0x1cb   : > { %v2279_v29 = vsel %vm2251_vm14, %v2246_v57, %v2017_v31  ;;  %v2471_v32 = vpop.f32.mrf.mxu0 }
 0x1cc   : > { %v2312_v40 = vsel %vm2284_vm15, %v2279_v29, %v2049_v39  ;;  %v2081_v49 = vpop.permute.xlu0 %2080  ;;  %v2472_v41 = vadd.f32 %v10342_v14, %v2471_v32 }
 0x1cd   : > { %v2345_v46 = vsel %vm2317_vm1, %v2312_v40, %v2081_v49  ;;  %v2083_v12 = vpop.permute.xlu2 %2082  ;;  %v2439_v40 = vadd.f32 %v10342_v14, %v10309_v16  ;;  %v4514_v16 = vld [vmem:[%s15669_s10] sm:$0x1] }
 0x1ce   : > { %8347 = vmatmul.msk.bf16.gmra.mxu0 %vm2390_vm8, %v2345_v46  ;;  %v2530_v42 = vmax.f32 %v2472_v41, 0.0  ;;  %v2437_v46 = vadd.f32 %v10342_v14, %v10292_v37 }
 0x1d2   : > { %v1859_v34 = vpop.permute.xlu1 %1858 }
 0x1d3   : > { %v2116_v23 = vsel %vm15692_vm9, %v10233_v8, %v1859_v34  ;;  %v2473_v36 = vpop.f32.mrf.mxu0 }
 0x1d4   : > { %v2474_v51 = vadd.f32 %v10342_v14, %v2473_v36  ;;  %v1923_v56 = vpop.permute.xlu0 %1922  ;;  %v2149_v44 = vsel %vm15691_vm10, %v2116_v23, %v1891_v38  ;;  %v2517_v23 = vmax.f32 %v2439_v40, 0.0 }
 0x1d5   : > { %v2182_v35 = vsel %vm2152_vm11, %v2149_v44, %v1923_v56  ;;  %v1925_v21 = vpop.permute.xlu2 %1924  ;;  %v4569_v44 = vsel %vm15710_vm0, %v4514_v16, 0  ;;  %v8720_v16 = vld [vmem:[%s10535_s28 + $0x28] sm:$0xff] }
 0x1d6   : > { %v2531_v58 = vmax.f32 %v2474_v51, 0.0  ;;  %v2516_v51 = vmax.f32 %v2437_v46, 0.0  ;;  %4578 = vmatpush.bf16.msra.mxu2 %v4569_v44 }
 0x1d8   : > { %v10481_v1 = vpack.c.bf16 %v2531_v58, %v2530_v42  ;;  %v10517_v56 = vpack.c.bf16 %v2517_v23, %v2516_v51  ;;  %v3637_v23 = vld [vmem:[%s15667_s8] sm:$0x3] }
 0x1d9   : > { %v3639_v51 = vsel %vm2647_vm4, %v3637_v23, 0  ;;  %v10665_v23 = vld [vmem:[%s10535_s28 + $0x60] sm:$0xff] }
 0x1da   : > { %8357 = vmatmul.msk.bf16.gmra.mxu2 %vm15711_vm5, %v10481_v1  ;;  %v1955_v10 = vpop.permute.xlu1 %1954  ;;  %3648 = vmatpush.bf16.msrb.mxu3 %v3639_v51  ;;  %v10672_v51 = vld [vmem:[%s15665_s6] ss:$0 sm:$0xff] }
 0x1db   : > { %v2215_v13 = vsel %vm2185_vm12, %v2182_v35, %v1955_v10 }
 0x1dc   : > { %v2019_v8 = vpop.permute.xlu0 %2018  ;;  %v2248_v17 = vsel %vm2218_vm13, %v2215_v13, %v1987_v43 }
 0x1dd   : > { %v2281_v26 = vsel %vm2251_vm14, %v2248_v17, %v2019_v8  ;;  %v2021_v28 = vpop.permute.xlu2 %2020  ;;  %v8715_v17 = vld [vmem:[%s10535_s28] sm:$0xff] }
 0x1e2   : > { %v2476_v18 = vpop.f32.mrf.mxu0  ;;  %v2051_v60 = vpop.permute.xlu1 %2050 }
 0x1e3   : > { %v2314_v20 = vsel %vm2284_vm15, %v2281_v26, %v2051_v60  ;;  %v2477_v33 = vadd.f32 %v10342_v14, %v2476_v18 }
 0x1e4   : > { %v2347_v0 = vsel %vm2317_vm1, %v2314_v20, %v2083_v12  ;;  %v1861_v15 = vpop.permute.xlu0 %1860 }
 0x1e5   : > { %8348 = vmatmul.msk.bf16.gmra.mxu0 %vm2390_vm8, %v2347_v0  ;;  %v2118_v6 = vsel %vm15692_vm9, %v10316_v4, %v1861_v15  ;;  %v2532_v63 = vmax.f32 %v2477_v33, 0.0  ;;  %v8716_v15 = vld [vmem:[%s10535_s28 + $0x8] sm:$0xff] }
 0x1ea   : > { %v2478_v19 = vpop.f32.mrf.mxu0  ;;  %v1893_v53 = vpop.permute.xlu1 %1892 }
 0x1eb   : > { %v2479_v5 = vadd.f32 %v10342_v14, %v2478_v19  ;;  %v2151_v25 = vsel %vm15691_vm10, %v2118_v6, %v1893_v53 }
 0x1ec   : > { %v1957_v48 = vpop.permute.xlu0 %1956  ;;  %v2184_v59 = vsel %vm2152_vm11, %v2151_v25, %v1925_v21  ;;  %v8717_v25 = vld [vmem:[%s10535_s28 + $0x10] sm:$0xff] }
 0x1ed   : > { %v2533_v39 = vmax.f32 %v2479_v5, 0.0  ;;  %v2217_v50 = vsel %vm2185_vm12, %v2184_v59, %v1957_v48 }
 0x1ef   : > { %v10497_v9 = vpack.c.bf16 %v2533_v39, %v2532_v63 }
 0x1f1   : > { %8358 = vmatmul.msk.bf16.gmra.mxu2 %vm15711_vm5, %v10497_v9 }
 0x1f2   : > { %v1989_v4 = vpop.permute.xlu1 %1988 }
 0x1f3   : > { %v2250_v27 = vsel %vm2218_vm13, %v2217_v50, %v1989_v4 }
 0x1f4   : > { %v2283_v62 = vsel %vm2251_vm14, %v2250_v27, %v2021_v28  ;;  %v2053_v30 = vpop.permute.xlu0 %2052  ;;  %v8718_v27 = vld [vmem:[%s10535_s28 + $0x18] sm:$0xff] }
 0x1f5   : > { %v2316_v47 = vsel %vm2284_vm15, %v2283_v62, %v2053_v30 }
 0x1f9   : > { %v2481_v57 = vpop.f32.mrf.mxu0 }
 0x1fa   : > { %v2085_v31 = vpop.permute.xlu1 %2084  ;;  %v2482_v29 = vadd.f32 %v10342_v14, %v2481_v57 }
 0x1fb   : > { %v2349_v38 = vsel %vm2317_vm1, %v2316_v47, %v2085_v31  ;;  %v8719_v31 = vld [vmem:[%s10535_s28 + $0x20] sm:$0xff] }
 0x1fc   : > { %8349 = vmatmul.msk.bf16.gmra.mxu0 %vm2390_vm8, %v2349_v38  ;;  %v2534_v41 = vmax.f32 %v2482_v29, 0.0 }
 0x201   : > { %v2483_v32 = vpop.f32.mrf.mxu0 }
 0x202   : > { %v2484_v49 = vadd.f32 %v10342_v14, %v2483_v32 }
 0x204   : > { %v2535_v34 = vmax.f32 %v2484_v49, 0.0 }
 0x206   : > { %v10513_v36 = vpack.c.bf16 %v2535_v34, %v2534_v41 }
 0x208   : > { %8359 = vmatmul.msk.bf16.gmra.mxu2 %vm15711_vm5, %v10513_v36 }
 0x20b   : > { %v2486_v43 = vpop.f32.mrf.mxu0 }
 0x20c   : > { %8350 = vmatmul.msk.bf16.vlgmr.msrb.gmra.mxu0 %vm15711_vm5, %v10517_v56  ;;  %v2487_v37 = vadd.f32 %v10342_v14, %v2486_v43 }
 0x20e   : > { %v2536_v35 = vmax.f32 %v2487_v37, 0.0  ;;  %v3636_v37 = vld [vmem:[%s15666_s7] sm:$0x3] }
 0x213   : > { %v2488_v42 = vpop.f32.mrf.mxu0 }
 0x214   : > { %v2489_v58 = vadd.f32 %v10342_v14, %v2488_v42  ;;  %v3731_v42 = vsel %vm2647_vm4, %v3636_v37, 0 }
 0x215   : > { %3740 = vmatpush.bf16.msrb.mxu1 %v3731_v42 }
 0x216   : > { %v2537_v10 = vmax.f32 %v2489_v58, 0.0 }
 0x218   : > { %v10527_v13 = vpack.c.bf16 %v2537_v10, %v2536_v35  ;;  %8494 = vmatmul.msk.bf16.vlgmr.msrb.gmra.mxu1 %vm15711_vm5, %v8715_v17 }
 0x21a   : > { %8360 = vmatmul.msk.bf16.gmra.mxu2 %vm15711_vm5, %v10527_v13 }
 0x222   : > { %v2491_v8 = vpop.f32.mrf.mxu0 }
 0x223   : > { %v2492_v12 = vadd.f32 %v10342_v14, %v2491_v8 }
 0x225   : > { %v2538_v18 = vmax.f32 %v2492_v12, 0.0 }
 0x228   : > { %8495 = vmatmul.msk.bf16.gmra.mxu1 %vm15711_vm5, %v8716_v15 }
 0x22a   : > { %8430 = vmatmul.msk.bf16.vlgmr.msrb.gmra.mxu2 %vm15711_vm5, %v8715_v17  ;;  %v2493_v26 = vpop.f32.mrf.mxu0 }
 0x22b   : > { %v2494_v60 = vadd.f32 %v10342_v14, %v2493_v26 }
 0x22d   : > { %v2539_v20 = vmax.f32 %v2494_v60, 0.0  ;;  %v8721_v60 = vld [vmem:[%s10535_s28 + $0x30] sm:$0xff] }
 0x22f   : > { %v10541_v0 = vpack.c.bf16 %v2539_v20, %v2538_v18 }
 0x231   : > { %8361 = vmatmul.msk.bf16.vlgmr.msra.gmra.mxu3 %vm15711_vm5, %v10541_v0 }
 0x238   : > { %8496 = vmatmul.msk.bf16.gmra.mxu1 %vm15711_vm5, %v8717_v25 }
 0x239   : > { %v2496_v6 = vpop.f32.mrf.mxu0 }
 0x23a   : > { %8431 = vmatmul.msk.bf16.gmra.mxu2 %vm15711_vm5, %v8716_v15  ;;  %v2497_v21 = vadd.f32 %v10342_v14, %v2496_v6 }
 0x23c   : > { %v2540_v19 = vmax.f32 %v2497_v21, 0.0 }
 0x241   : > { %v2498_v33 = vpop.f32.mrf.mxu0 }
 0x242   : > { %v2499_v53 = vadd.f32 %v10342_v14, %v2498_v33  ;;  %v10617_v33 = vld [vmem:[%s10535_s28 + $0x40] sm:$0xff] }
 0x244   : > { %v2541_v5 = vmax.f32 %v2499_v53, 0.0  ;;  %v10625_v53 = vld [vmem:[%s10535_s28 + $0x48] sm:$0xff] }
 0x246   : > { %v10550_v48 = vpack.c.bf16 %v2541_v5, %v2540_v19 }
 0x248   : > { %8362 = vmatmul.msk.bf16.gmra.mxu3 %vm15711_vm5, %v10550_v48  ;;  %8497 = vmatmul.msk.bf16.gmra.mxu1 %vm15711_vm5, %v8718_v27 }
 0x24a   : > { %8432 = vmatmul.msk.bf16.gmra.mxu2 %vm15711_vm5, %v8717_v25 }
 0x24b   : > { %v2501_v63 = vpop.f32.mrf.mxu0  ;;  %v10557_v28 = vpop.f32.mrf.mxu2 }
 0x24c   : > { %v2502_v39 = vadd.f32 %v10342_v14, %v2501_v63 }
 0x24e   : > { %v2542_v50 = vmax.f32 %v2502_v39, 0.0 }
 0x253   : > { %v2503_v59 = vpop.f32.mrf.mxu0  ;;  %v10565_v47 = vpop.f32.mrf.mxu2 }
 0x254   : > { %v2504_v4 = vadd.f32 %v10342_v14, %v2503_v59 }
 0x256   : > { %v2543_v62 = vmax.f32 %v2504_v4, 0.0 }
 0x258   : > { %v10560_v30 = vpack.c.bf16 %v2543_v62, %v2542_v50  ;;  %8498 = vmatmul.msk.bf16.gmra.mxu1 %vm15711_vm5, %v8719_v31  ;;  %v10637_v50 = vld [vmem:[%s10535_s28 + $0x50] sm:$0xff] }
 0x25a   : > { %8433 = vmatmul.msk.bf16.gmra.mxu2 %vm15711_vm5, %v8718_v27  ;;  %8363 = vmatmul.msk.bf16.gmra.mxu3 %vm15711_vm5, %v10560_v30 }
 0x25d   : > { %v10568_v38 = vpop.f32.mrf.mxu2 }
 0x262   : > { %v2506_v57 = vpop.f32.mrf.mxu0 }
 0x263   : > { %v2507_v29 = vadd.f32 %v10342_v14, %v2506_v57  ;;  %v10647_v57 = vld [vmem:[%s10535_s28 + $0x58] sm:$0xff] }
 0x265   : > { %v2544_v40 = vmax.f32 %v2507_v29, 0.0  ;;  %v10575_v34 = vpop.f32.mrf.mxu2 }
 0x268   : > { %8499 = vmatmul.msk.bf16.gmra.mxu1 %vm15711_vm5, %v8720_v16 }
 0x26a   : > { %8434 = vmatmul.msk.bf16.gmra.mxu2 %vm15711_vm5, %v8719_v31  ;;  %v2508_v32 = vpop.f32.mrf.mxu0 }
 0x26b   : > { %v2509_v49 = vadd.f32 %v10342_v14, %v2508_v32 }
 0x26d   : > { %v2545_v46 = vmax.f32 %v2509_v49, 0.0 }
 0x26f   : > { %v10573_v41 = vpack.c.bf16 %v2545_v46, %v2544_v40 }
 0x271   : > { %15731 = vst [vmem:[#allocation7_spill] sm:$0xff] %v10573_v41  ;;  %8364 = vmatmul.msk.bf16.gmra.mxu3 %vm15711_vm5, %v10573_v41 }
 0x274   : > { %v10584_v43 = vpop.f32.mrf.mxu2 }
 0x278   : > { %8500 = vmatmul.msk.bf16.gmra.mxu1 %vm15711_vm5, %v8721_v60 }
 0x279   : > { %v2511_v44 = vpop.f32.mrf.mxu0 }
 0x27a   : > { %8435 = vmatmul.msk.bf16.gmra.mxu2 %vm15711_vm5, %v8720_v16  ;;  %v2512_v58 = vadd.f32 %v10342_v14, %v2511_v44 }
 0x27c   : > { %v2546_v10 = vmax.f32 %v2512_v58, 0.0  ;;  %v10594_v12 = vpop.f32.mrf.mxu2 }
 0x27d   : > { %15732 = vst [vmem:[#allocation8_spill] sm:$0xff] %v10594_v12 }
 0x281   : > { %v2513_v35 = vpop.f32.mrf.mxu0 }
 0x282   : > { %v2514_v8 = vadd.f32 %v10342_v14, %v2513_v35  ;;  %v8722_v14 = vld [vmem:[%s10535_s28 + $0x38] sm:$0xff] }
 0x284   : > { %v2547_v26 = vmax.f32 %v2514_v8, 0.0 }
 0x286   : > { %v10596_v18 = vpack.c.bf16 %v2547_v26, %v2546_v10 }
 0x288   : > { %15733 = vst [vmem:[#allocation9_spill] sm:$0xff] %v10596_v18  ;;  %8365 = vmatmul.msk.bf16.gmra.mxu3 %vm15711_vm5, %v10596_v18 }
 0x289   : > { %v2660_v32 = vpop.f32.mrf.mxu0 }
 0x28a   : > { %8436 = vmatmul.msk.bf16.gmra.mxu2 %vm15711_vm5, %v8721_v60 }
 0x28b   : > { %v10602_v20 = vpop.f32.mrf.mxu2 }
 0x28c   : > { %15734 = vst [vmem:[#allocation10_spill] sm:$0xff] %v10602_v20 }
 0x291   : > { %v2662_v16 = vpop.f32.mrf.mxu0 }
 0x293   : > { %v10605_v17 = vpop.f32.mrf.mxu2 }
 0x294   : > { %15735 = vst [vmem:[#allocation11_spill] sm:$0xff] %v10605_v17 }
 0x298   : > { %8478 = vmatmul.msk.bf16.vlgmr.msrb.gmra.mxu3 %vm15711_vm5, %v10517_v56  ;;  %v2665_v56 = vpop.f32.mrf.mxu1 }
 0x29a   : > { %8437 = vmatmul.msk.bf16.gmra.mxu2 %vm15711_vm5, %v8722_v14 }
 0x29d   : > { %v10611_v6 = vpop.f32.mrf.mxu2 }
 0x29e   : > { %15736 = vst [vmem:[#allocation12_spill] sm:$0xff] %v10611_v6 }
 0x2a0   : > { %v2667_v5 = vpop.f32.mrf.mxu1  ;;  %8501 = vmatmul.msk.bf16.gmra.mxu1 %vm15711_vm5, %v8722_v14 }
 0x2a5   : > { %v10614_v21 = vpop.f32.mrf.mxu2 }
 0x2a6   : > { %15737 = vst [vmem:[#allocation13_spill] sm:$0xff] %v10614_v21 }
 0x2a8   : > { %8479 = vmatmul.msk.bf16.gmra.mxu3 %vm15711_vm5, %v10357_v45  ;;  %v2670_v63 = vpop.f32.mrf.mxu1 }
 0x2aa   : > { %8438 = vmatmul.msk.bf16.gmra.mxu2 %vm15711_vm5, %v10617_v33 }
 0x2ad   : > { %v2880_v15 = vpop.f32.mrf.mxu2 }
 0x2b4   : > { %v10631_v45 = vpop.f32.mrf.mxu3 }
 0x2b5   : > { %v2882_v19 = vpop.f32.mrf.mxu2  ;;  %15738 = vst [vmem:[#allocation14_spill] sm:$0xff] %v10631_v45 }
 0x2b6   : > { %v2883_v37 = vadd.f32 %v2882_v19, %v2662_v16 }
 0x2b8   : > { %8480 = vmatmul.msk.bf16.gmra.mxu3 %vm15711_vm5, %v10389_v52  ;;  %v2672_v52 = vpop.f32.mrf.mxu1  ;;  %v10686_v35 = vadd.f32 %v10672_v51, %v2883_v37  ;;  %8502 = vmatmul.msk.bf16.gmra.mxu1 %vm15711_vm5, %v10617_v33 }
 0x2ba   : > { %8439 = vmatmul.msk.bf16.gmra.mxu2 %vm15711_vm5, %v10625_v53  ;;  %v8447_v26 = vmul.f32 -1.442695, %v10686_v35 }
 0x2bc   : > { %v10634_v59 = vpop.f32.mrf.mxu3 }
 0x2bd   : > { %v2885_v25 = vpop.f32.mrf.mxu2  ;;  %15739 = vst [vmem:[#allocation15_spill] sm:$0xff] %v10634_v59 }
 0x2be   : > { %v2886_v8 = vadd.f32 %v2885_v25, %v2665_v56 }
 0x2c0   : > { %v10649_v31 = vpop.f32.mrf.mxu1  ;;  %v10696_v19 = vadd.f32 %v10672_v51, %v2886_v8 }
 0x2c2   : > { %v8448_v14 = vmul.f32 -1.442695, %v10696_v19 }
 0x2c5   : > { %v2887_v39 = vpop.f32.mrf.mxu2 }
 0x2c8   : > { %8481 = vmatmul.msk.bf16.gmra.mxu3 %vm15711_vm5, %v10412_v55  ;;  %v10658_v40 = vpop.f32.mrf.mxu1  ;;  %8503 = vmatmul.msk.bf16.gmra.mxu1 %vm15711_vm5, %v10625_v53 }
 0x2ca   : > { %8440 = vmatmul.msk.bf16.gmra.mxu2 %vm15711_vm5, %v10637_v50 }
 0x2cb   : > { %v10643_v27 = vpop.f32.mrf.mxu3 }
 0x2cc   : > { %15740 = vst [vmem:[#allocation16_spill] sm:$0xff] %v10643_v27 }
 0x2cd   : > { %v2890_v4 = vpop.f32.mrf.mxu2 }
 0x2d0   : > { %v10676_v44 = vpop.f32.mrf.mxu1 }
 0x2d3   : > { %v10653_v29 = vpop.f32.mrf.mxu3 }
 0x2d4   : > { %15741 = vst [vmem:[#allocation17_spill] sm:$0xff] %v10653_v29 }
 0x2d5   : > { %v2892_v62 = vpop.f32.mrf.mxu2 }
 0x2d6   : > { %v2893_v24 = vadd.f32 %v2892_v62, %v2672_v52 }
 0x2d8   : > { %8482 = vmatmul.msk.bf16.gmra.mxu3 %vm15711_vm5, %v10429_v54  ;;  %v2881_v54 = vadd.f32 %v2880_v15, %v2660_v32  ;;  %v10691_v60 = vpop.f32.mrf.mxu1  ;;  %v10699_v32 = vld [vmem:[%s10535_s28 + $0x68] sm:$0xff]  ;;  %8504 = vmatmul.msk.bf16.gmra.mxu1 %vm15711_vm5, %v10637_v50 }
 0x2da   : > { %8441 = vmatmul.msk.bf16.gmra.mxu2 %vm15711_vm5, %v10647_v57  ;;  %v10679_v42 = vadd.f32 %v10672_v51, %v2881_v54  ;;  %v2888_v54 = vadd.f32 %v2887_v39, %v2667_v5  ;;  %v2891_v39 = vadd.f32 %v2890_v4, %v2670_v63  ;;  %v10730_v63 = vadd.f32 %v10672_v51, %v2893_v24 }
 0x2dc   : > { %v8446_v10 = vmul.f32 -1.442695, %v10679_v42  ;;  %v10709_v25 = vadd.f32 %v10672_v51, %v2888_v54  ;;  %v10726_v3 = vadd.f32 %v10672_v51, %v2891_v39  ;;  %v8451_v39 = vmul.f32 -1.442695, %v10730_v63 }
 0x2dd   : > { %v2895_v55 = vpop.f32.mrf.mxu2  ;;  %v10660_v49 = vpop.f32.mrf.mxu3 }
 0x2de   : > { %15742 = vst [vmem:[#allocation18_spill] sm:$0xff] %v10660_v49  ;;  %8764 = vpow2.f32 %v8446_v10  ;;  %v8450_v33 = vmul.f32 -1.442695, %v10726_v3 }
 0x2df   : > { %8766 = vpow2.f32 %v8447_v26 }
 0x2e0   : > { %v10711_v10 = vpop.f32.mrf.mxu1  ;;  %8768 = vpow2.f32 %v8448_v14  ;;  %v10736_v14 = vld [vmem:[%s10535_s28 + $0x70] sm:$0xff] }
 0x2e4   : > { %v8765_v56 = vpop.eup %8764 }
 0x2e5   : > { %v10662_v46 = vpop.f32.mrf.mxu2  ;;  %v8767_v37 = vpop.eup %8766  ;;  %v10715_v5 = vadd.f32 1.0, %v8765_v56 }
 0x2e6   : > { %v10720_v26 = vadd.f32 1.0, %v8767_v37  ;;  %v8769_v56 = vpop.eup %8768 }
 0x2e7   : > { %8770 = vrcp.f32 %v10715_v5  ;;  %v10740_v62 = vadd.f32 1.0, %v8769_v56  ;;  %vm3129_vm12 = vweird.f32 %v10715_v5 }
 0x2e8   : > { %8483 = vmatmul.msk.bf16.gmra.mxu3 %vm15711_vm5, %v10445_v11  ;;  %v10683_v11 = vpop.f32.mrf.mxu3  ;;  %v10738_v52 = vpop.f32.mrf.mxu1  ;;  %vm3144_vm14 = vweird.f32 %v10720_v26  ;;  %8505 = vmatmul.msk.bf16.gmra.mxu1 %vm15711_vm5, %v10647_v57 }
 0x2e9   : > { %15743 = vst [vmem:[#allocation19_spill] sm:$0xff] %v10683_v11  ;;  %vm3159_vm4 = vweird.f32 %v10740_v62 }
 0x2ea   : > { %8442 = vmatmul.msk.bf16.gmra.mxu2 %vm15711_vm5, %v10665_v23 }
 0x2ed   : > { %v10681_v58 = vpop.f32.mrf.mxu2  ;;  %v10742_v37 = vpop.eup %8770 }
 0x2ee   : > { %v3125_v56 = vmul.f32 %v10742_v37, %v10715_v5  ;;  %vm3130_vm6 = vweird.f32 %v10742_v37 }
 0x2ef   : > { %vm10820_vm13 = vmor %vm3129_vm12, %vm3130_vm6 }
 0x2f4   : > { %v10701_v16 = vpop.f32.mrf.mxu3 }
 0x2f5   : > { %v10693_v15 = vpop.f32.mrf.mxu2  ;;  %15744 = vst [vmem:[#allocation20_spill] sm:$0xff] %v10701_v16 }
 0x2f8   : > { %8484 = vmatmul.msk.bf16.gmra.mxu3 %vm15711_vm5, %v10466_v61  ;;  %v8449_v61 = vmul.f32 -1.442695, %v10709_v25 }
 0x2fa   : > { %8443 = vmatmul.msk.bf16.gmra.mxu2 %vm15711_vm5, %v10699_v32  ;;  %8772 = vpow2.f32 %v8449_v61  ;;  %v2896_v61 = vadd.f32 %v2895_v55, %v10649_v31 }
 0x2fb   : > { %8774 = vrcp.f32 %v10720_v26 }
 0x2fc   : > { %v10722_v54 = vpop.f32.mrf.mxu3  ;;  %8776 = vpow2.f32 %v8450_v33  ;;  %v10760_v31 = vadd.f32 %v10672_v51, %v2896_v61 }
 0x2fd   : > { %v10713_v8 = vpop.f32.mrf.mxu2  ;;  %15745 = vst [vmem:[#allocation21_spill] sm:$0xff] %v10722_v54  ;;  %8778 = vrcp.f32 %v10740_v62  ;;  %v3742_v54 = vpop.f32.mrf.mxu1 }
 0x2fe   : > { %8780 = vpow2.f32 %v8451_v39  ;;  %v8452_v39 = vmul.f32 -1.442695, %v10760_v31 }
 0x300   : > { %v8773_v24 = vpop.eup %8772 }
 0x301   : > { %v10748_v2 = vpop.eup %8774  ;;  %v10757_v22 = vadd.f32 1.0, %v8773_v24 }
 0x302   : > { %v3140_v55 = vmul.f32 %v10748_v2, %v10720_v26  ;;  %v8777_v16 = vpop.eup %8776  ;;  %vm3145_vm11 = vweird.f32 %v10748_v2 }
 0x303   : > { %8782 = vrcp.f32 %v10757_v22  ;;  %v10777_v11 = vadd.f32 1.0, %v8777_v16  ;;  %v10793_v16 = vld [vmem:[%s10535_s28 + $0x78] sm:$0xff]  ;;  %vm10833_vm1 = vmor %vm3144_vm14, %vm3145_vm11  ;;  %v3180_v12 = vand.u32 2147483648, %v10757_v22  ;;  %vm3174_vm14 = vweird.f32 %v10757_v22 }
 0x304   : > { %8784 = vpow2.f32 %v8452_v39  ;;  %15748 = vst [vmem:[#allocation24_spill] sm:$0xff] %v10793_v16  ;;  %v2901_v39 = vadd.f32 %v10681_v58, %v10676_v44  ;;  %v3148_v58 = vand.u32 2147483647, %v10720_v26 }
 0x305   : > { %v10732_v4 = vpop.f32.mrf.mxu2  ;;  %8786 = vrcp.f32 %v10777_v11  ;;  %v10809_v18 = vpop.f32.mrf.mxu1  ;;  %8506 = vmatmul.msk.bf16.gmra.mxu1 %vm15711_vm5, %v10665_v23 }
 0x306   : > { %vm3149_vm8 = vcmp.eq.f32.partialorder %v3148_v58, 8.507059e+37 }
 0x308   : > { %8485 = vmatmul.msk.bf16.gmra.mxu3 %vm15711_vm5, %v10481_v1  ;;  %v2898_v1 = vadd.f32 %v10662_v46, %v10658_v40  ;;  %v10775_v40 = vpop.eup %8778  ;;  %v3141_v46 = vsub.f32 1.0, %v3140_v55 }
 0x309   : > { %v8781_v24 = vpop.eup %8780  ;;  %vm3160_vm6 = vweird.f32 %v10775_v40 }
 0x30a   : > { %8444 = vmatmul.msk.bf16.gmra.mxu2 %vm15711_vm5, %v10736_v14  ;;  %v10773_v61 = vadd.f32 %v10672_v51, %v2898_v1  ;;  %v3142_v27 = vmul.f32 %v10748_v2, %v3141_v46  ;;  %v10786_v1 = vadd.f32 1.0, %v8781_v24  ;;  %v10790_v55 = vpop.eup %8782  ;;  %vm10883_vm11 = vmor %vm3159_vm4, %vm3160_vm6  ;;  %vm3189_vm4 = vweird.f32 %v10777_v11 }
 0x30b   : > { %v10755_v7 = vpop.f32.mrf.mxu3  ;;  %v3170_v21 = vmul.f32 %v10790_v55, %v10757_v22  ;;  %v8785_v44 = vpop.eup %8784  ;;  %vm3175_vm12 = vweird.f32 %v10790_v55 }
 0x30c   : > { %15746 = vst [vmem:[#allocation22_spill] sm:$0xff] %v10755_v7  ;;  %v3126_v7 = vsub.f32 1.0, %v3125_v56  ;;  %v3155_v56 = vmul.f32 %v10775_v40, %v10740_v62  ;;  %v8453_v29 = vmul.f32 -1.442695, %v10773_v61  ;;  %v3143_v24 = vadd.f32 %v10748_v2, %v3142_v27 }
 0x30d   : > { %v10766_v33 = vpop.f32.mrf.mxu2 }
 0x30e   : > { %v3127_v53 = vmul.f32 %v10742_v37, %v3126_v7  ;;  %v3135_v7 = vand.u32 2147483648, %v10715_v5  ;;  %v3156_v46 = vsub.f32 1.0, %v3155_v56  ;;  %8788 = vpow2.f32 %v8453_v29 }
 0x30f   : > { %8790 = vrcp.f32 %v10786_v1  ;;  %v3150_v29 = vand.u32 2147483648, %v10720_v26  ;;  %v10841_v26 = vld [vmem:[%s15668_s9] ss:$0 sm:$0xff] }
 0x310   : > { %v3128_v45 = vadd.f32 %v10742_v37, %v3127_v53  ;;  %v3136_v6 = vor.u32 1.1754944e-38, %v3135_v7  ;;  %v3165_v7 = vand.u32 2147483648, %v10740_v62 }
 0x311   : > { %v3151_v41 = vor.u32 1.1754944e-38, %v3150_v29  ;;  %v3163_v29 = vand.u32 2147483647, %v10740_v62 }
 0x312   : > { %v3132_v56 = vsel %vm10820_vm13, %v10742_v37, %v3128_v45  ;;  %v3147_v45 = vsel %vm10833_vm1, %v10748_v2, %v3143_v24  ;;  %v10848_v37 = vadd.f32 1.0, %v8785_v44  ;;  %vm10906_vm1 = vmor %vm3174_vm14, %vm3175_vm12  ;;  %vm3204_vm14 = vweird.f32 %v10786_v1 }
 0x313   : > { %v10779_v49 = vpop.f32.mrf.mxu3  ;;  %vm3164_vm13 = vcmp.eq.f32.partialorder %v3163_v29, 8.507059e+37 }
 0x314   : > { %15747 = vst [vmem:[#allocation23_spill] sm:$0xff] %v10779_v49  ;;  %v3133_v49 = vand.u32 2147483647, %v10715_v5  ;;  %v10826_v5 = vadd.f32 %v10672_v51, %v2901_v39  ;;  %v10843_v39 = vpop.eup %8786  ;;  %8792 = vrcp.f32 %v10848_v37 }
 0x315   : > { %v10788_v59 = vpop.f32.mrf.mxu2  ;;  %v8789_v27 = vpop.eup %8788  ;;  %v3185_v44 = vmul.f32 %v10843_v39, %v10777_v11  ;;  %vm3190_vm6 = vweird.f32 %v10843_v39 }
 0x316   : > { %vm3134_vm15 = vcmp.eq.f32.partialorder %v3133_v49, 8.507059e+37  ;;  %v3171_v49 = vsub.f32 1.0, %v3170_v21  ;;  %v10853_v20 = vpop.eup %8790  ;;  %v3152_v21 = vsel %vm3149_vm8, %v3151_v41, %v3147_v45  ;;  %v10871_v58 = vadd.f32 1.0, %v8789_v27  ;;  %vm10973_vm12 = vmor %vm3189_vm4, %vm3190_vm6 }
 0x317   : > { %v3200_v41 = vmul.f32 %v10853_v20, %v10786_v1  ;;  %vm3219_vm4 = vweird.f32 %v10848_v37 }
 0x318   : > { %8486 = vmatmul.msk.bf16.gmra.mxu3 %vm15711_vm5, %v10497_v9  ;;  %v2903_v9 = vadd.f32 %v10693_v15, %v10691_v60  ;;  %v3157_v15 = vmul.f32 %v10775_v40, %v3156_v46  ;;  %v8454_v60 = vmul.f32 -1.442695, %v10826_v5 }
 0x31a   : > { %8445 = vmatmul.msk.bf16.gmra.mxu2 %vm15711_vm5, %v10793_v16  ;;  %v10851_v46 = vadd.f32 %v10672_v51, %v2903_v9  ;;  %v3137_v16 = vsel %vm3134_vm15, %v3136_v6, %v3132_v56  ;;  %v3158_v24 = vadd.f32 %v10775_v40, %v3157_v15  ;;  %v3172_v6 = vmul.f32 %v10790_v55, %v3171_v49  ;;  %v3747_v49 = vpop.f32.mrf.mxu1 }
 0x31b   : > { %v3650_v53 = vpop.f32.mrf.mxu3  ;;  %v3166_v56 = vor.u32 1.1754944e-38, %v3165_v7  ;;  %v3178_v15 = vand.u32 2147483647, %v10757_v22  ;;  %8794 = vpow2.f32 %v8454_v60  ;;  %v3186_v7 = vsub.f32 1.0, %v3185_v44 }
 0x31c   : > { %v3743_v17 = vadd.f32 %v3742_v54, %v3650_v53  ;;  %v8455_v50 = vmul.f32 -1.442695, %v10851_v46  ;;  %v3162_v27 = vsel %vm10883_vm11, %v10775_v40, %v3158_v24  ;;  %v3173_v62 = vadd.f32 %v10790_v55, %v3172_v6  ;;  %v10900_v40 = vpop.eup %8792 }
 0x31d   : > { %v10858_v2 = vpop.f32.mrf.mxu2  ;;  %v10898_v60 = vmul.f32 %v3137_v16, %v10679_v42  ;;  %v3167_v24 = vsel %vm3164_vm13, %v3166_v56, %v3162_v27  ;;  %vm4519_vm15 = vcmask 15360   ;;  %vm10910_vm8 = vcmp.eq.f32.partialorder %v3178_v15, 8.507059e+37 }
 0x31e   : > { %v10865_v54 = vadd.f32 %v10841_v26, %v3743_v17  ;;  %v10879_v17 = vmul.f32 %v3152_v21, %v10686_v35  ;;  %v2906_v35 = vadd.f32 %v10713_v8, %v10711_v10  ;;  %v3201_v21 = vsub.f32 1.0, %v3200_v41 }
 0x31f   : > { %v3181_v16 = vor.u32 1.1754944e-38, %v3180_v12  ;;  %v3187_v29 = vmul.f32 %v10843_v39, %v3186_v7  ;;  %v3195_v15 = vand.u32 2147483648, %v10777_v11  ;;  %v3208_v7 = vand.u32 2147483647, %v10786_v1 }
 0x320   : > { %v8510_v9 = vmul.f32 -1.442695, %v10865_v54  ;;  %15753 = vst [vmem:[#allocation25_spill] sm:$0xff] %v10879_v17  ;;  %v4498_v8 = vpack.c.bf16 %v10879_v17, %v10898_v60  ;;  %v10915_v44 = vadd.f32 %v10672_v51, %v2906_v35  ;;  %v3202_v53 = vmul.f32 %v10853_v20, %v3201_v21 }
 0x321   : > { %v8795_v22 = vpop.eup %8794  ;;  %vm3205_vm11 = vweird.f32 %v10853_v20  ;;  %vm3220_vm6 = vweird.f32 %v10900_v40 }
 0x322   : > { %8796 = vpow2.f32 %v8510_v9  ;;  %v10930_v9 = vmul.f32 %v3167_v24, %v10696_v19  ;;  %v8456_v21 = vmul.f32 -1.442695, %v10915_v44  ;;  %v10950_v6 = vadd.f32 1.0, %v8795_v22 }
 0x323   : > { %v3652_v45 = vpop.f32.mrf.mxu3  ;;  %8798 = vrcp.f32 %v10871_v58  ;;  %v3203_v17 = vadd.f32 %v10853_v20, %v3202_v53 }
 0x324   : > { %8800 = vpow2.f32 %v8455_v50  ;;  %v3745_v10 = vadd.f32 %v10809_v18, %v3652_v45  ;;  %v3177_v18 = vsel %vm10906_vm1, %v10790_v55, %v3173_v62  ;;  %15760 = vst [vmem:[#allocation26_spill] sm:$0xff] %v10930_v9  ;;  %v3215_v55 = vmul.f32 %v10900_v40, %v10848_v37  ;;  %vm10987_vm1 = vmor %vm3204_vm14, %vm3205_vm11 }
 0x325   : > { %v10927_v50 = vpop.f32.mrf.mxu2  ;;  %v3182_v62 = vsel %vm10910_vm8, %v3181_v16, %v3177_v18  ;;  %vm10991_vm8 = vcmp.eq.f32.partialorder %v3208_v7, 8.507059e+37  ;;  %vm11053_vm11 = vmor %vm3219_vm4, %vm3220_vm6  ;;  %vm3234_vm14 = vweird.f32 %v10871_v58 }
 0x326   : > { %v10925_v41 = vadd.f32 %v10841_v26, %v3745_v10  ;;  %v3188_v10 = vadd.f32 %v10843_v39, %v3187_v29  ;;  %v3216_v42 = vsub.f32 1.0, %v3215_v55  ;;  %v10967_v29 = vmul.f32 %v3182_v62, %v10709_v25 }
 0x327   : > { %v3196_v25 = vor.u32 1.1754944e-38, %v3195_v15  ;;  %v7219_v15 = vld [vmem:[%s15674_s15] sm:$0x1] }
 0x328   : > { %8487 = vmatmul.msk.bf16.gmra.mxu3 %vm15711_vm5, %v10513_v36  ;;  %v8797_v12 = vpop.eup %8796  ;;  %v3193_v36 = vand.u32 2147483647, %v10777_v11  ;;  %v8511_v19 = vmul.f32 -1.442695, %v10925_v41  ;;  %15761 = vst [vmem:[#allocation27_spill] sm:$0xff] %v10967_v29  ;;  %v3192_v57 = vsel %vm10973_vm12, %v10843_v39, %v3188_v10  ;;  %v3217_v39 = vmul.f32 %v10900_v40, %v3216_v42 }
 0x329   : > { %v10937_v56 = vpop.eup %8798  ;;  %v10941_v45 = vadd.f32 1.0, %v8797_v12  ;;  %v3749_v12 = vpop.f32.mrf.mxu1  ;;  %v3225_v42 = vand.u32 2147483648, %v10848_v37  ;;  %8507 = vmatmul.msk.bf16.gmra.mxu1 %vm15711_vm5, %v10699_v32 }
 0x32a   : > { %8542 = vmatmul.msk.bf16.vlgmr.msra.gmra.mxu2 %vm4519_vm15, %v4498_v8  ;;  %v8801_v35 = vpop.eup %8800  ;;  %v3210_v8 = vand.u32 2147483648, %v10786_v1  ;;  %v3230_v16 = vmul.f32 %v10937_v56, %v10871_v58  ;;  %vm10977_vm13 = vcmp.eq.f32.partialorder %v3193_v36, 8.507059e+37  ;;  %v3207_v1 = vsel %vm10987_vm1, %v10853_v20, %v3203_v17 }
 0x32b   : > { %v3655_v27 = vpop.f32.mrf.mxu3  ;;  %8802 = vrcp.f32 %v10941_v45  ;;  %v10957_v18 = vadd.f32 1.0, %v8801_v35  ;;  %v7269_v17 = vsel %vm15710_vm0, %v7219_v15, 0  ;;  %v3197_v7 = vsel %vm10977_vm13, %v3196_v25, %v3192_v57 }
 0x32c   : > { %v3748_v24 = vadd.f32 %v3747_v49, %v3655_v27  ;;  %v2908_v49 = vadd.f32 %v10732_v4, %v10738_v52  ;;  %8804 = vpow2.f32 %v8511_v19  ;;  %v3211_v36 = vor.u32 1.1754944e-38, %v3210_v8  ;;  %7278 = vmatpush.bf16.msra.mxu0 %v7269_v17 }
 0x32d   : > { %8806 = vpow2.f32 %v8456_v21  ;;  %v3231_v55 = vsub.f32 1.0, %v3230_v16  ;;  %v11010_v62 = vpop.f32.mrf.mxu2  ;;  %v3223_v8 = vand.u32 2147483647, %v10848_v37  ;;  %v3218_v4 = vadd.f32 %v10900_v40, %v3217_v39 }
 0x32e   : > { %v10962_v22 = vadd.f32 %v10841_v26, %v3748_v24  ;;  %8808 = vrcp.f32 %v10950_v6  ;;  %v11007_v27 = vadd.f32 %v10672_v51, %v2908_v49  ;;  %v4499_v24 = vpack.c.bf16 %v10967_v29, %v10930_v9 }
 0x32f   : > { %8810 = vrcp.f32 %v10957_v18  ;;  %v3212_v53 = vsel %vm10991_vm8, %v3211_v36, %v3207_v1  ;;  %v2911_v57 = vadd.f32 %v10766_v33, %v10557_v28  ;;  %v3232_v15 = vmul.f32 %v10937_v56, %v3231_v55 }
 0x330   : > { %v8512_v35 = vmul.f32 -1.442695, %v10962_v22  ;;  %v8457_v17 = vmul.f32 -1.442695, %v11007_v27  ;;  %v3240_v52 = vand.u32 2147483648, %v10871_v58  ;;  %v11047_v1 = vmul.f32 %v3212_v53, %v10730_v63 }
 0x331   : > { %v11003_v19 = vpop.eup %8802  ;;  %vm11057_vm12 = vcmp.eq.f32.partialorder %v3223_v8, 8.507059e+37  ;;  %v3226_v39 = vor.u32 1.1754944e-38, %v3225_v42  ;;  %v3238_v63 = vand.u32 2147483647, %v10871_v58  ;;  %vm3235_vm13 = vweird.f32 %v10937_v56 }
 0x332   : > { %v3987_v21 = vmul.f32 %v11003_v19, %v10941_v45  ;;  %v8805_v10 = vpop.eup %8804  ;;  %8812 = vpow2.f32 %v8512_v35  ;;  %v11070_v35 = vadd.f32 %v10672_v51, %v2911_v57  ;;  %vm11096_vm1 = vmor %vm3234_vm14, %vm3235_vm13  ;;  %vm3992_vm4 = vweird.f32 %v11003_v19 }
 0x333   : > { %v3657_v20 = vpop.f32.mrf.mxu3  ;;  %v8807_v49 = vpop.eup %8806  ;;  %v11028_v25 = vadd.f32 1.0, %v8805_v10  ;;  %vm11108_vm8 = vcmp.eq.f32.partialorder %v3238_v63, 8.507059e+37  ;;  %vm3991_vm6 = vweird.f32 %v10941_v45 }
 0x334   : > { %v3750_v16 = vadd.f32 %v3749_v12, %v3657_v20  ;;  %v11030_v11 = vpop.eup %8808  ;;  %v3988_v29 = vsub.f32 1.0, %v3987_v21  ;;  %v3752_v12 = vpop.f32.mrf.mxu1  ;;  %v11035_v20 = vmul.f32 %v3197_v7, %v10726_v3  ;;  %v11061_v55 = vadd.f32 1.0, %v8807_v49 }
 0x335   : > { %8814 = vrcp.f32 %v11028_v25  ;;  %v11044_v33 = vpop.eup %8810  ;;  %v3245_v37 = vmul.f32 %v11030_v11, %v10950_v6  ;;  %v11074_v7 = vadd.f32 %v10937_v56, %v3232_v15 }
 0x336   : > { %v11040_v28 = vadd.f32 %v10841_v26, %v3750_v16  ;;  %8816 = vpow2.f32 %v8457_v17  ;;  %v3989_v21 = vmul.f32 %v11003_v19, %v3988_v29  ;;  %v3260_v8 = vmul.f32 %v11044_v33, %v10957_v18  ;;  %v11090_v29 = vpop.f32.mrf.mxu2 }
 0x337   : > { %8818 = vrcp.f32 %v11061_v55  ;;  %v3246_v57 = vsub.f32 1.0, %v3245_v37  ;;  %v8458_v17 = vmul.f32 -1.442695, %v11070_v35  ;;  %v3237_v3 = vsel %vm11096_vm1, %v10937_v56, %v11074_v7 }
 0x338   : > { %8488 = vmatmul.msk.bf16.gmra.mxu3 %vm15711_vm5, %v10527_v13  ;;  %v3222_v13 = vsel %vm11053_vm11, %v10900_v40, %v3218_v4  ;;  %v11079_v40 = vor.u32 1.1754944e-38, %v3240_v52  ;;  %v8513_v42 = vmul.f32 -1.442695, %v11040_v28  ;;  %v8813_v16 = vpop.eup %8812  ;;  %v2913_v52 = vadd.f32 %v10788_v59, %v10565_v47 }
 0x339   : > { %v3261_v37 = vsub.f32 1.0, %v3260_v8  ;;  %v3997_v47 = vand.u32 2147483648, %v10941_v45  ;;  %v3995_v56 = vand.u32 2147483647, %v10941_v45  ;;  %v11120_v7 = vadd.f32 1.0, %v8813_v16 }
 0x33a   : > { %8543 = vmatmul.msk.bf16.gmra.mxu2 %vm4519_vm15, %v4499_v24  ;;  %v11086_v24 = vsel %vm11057_vm12, %v3226_v39, %v3222_v13  ;;  %v3990_v39 = vadd.f32 %v11003_v19, %v3989_v21  ;;  %8820 = vpow2.f32 %v8513_v42  ;;  %v3247_v15 = vmul.f32 %v11030_v11, %v3246_v57  ;;  %vm11129_vm12 = vmor %vm3991_vm6, %vm3992_vm4 }
 0x33b   : > { %v3660_v10 = vpop.f32.mrf.mxu3  ;;  %v8815_v53 = vpop.eup %8814  ;;  %vm3250_vm11 = vweird.f32 %v11030_v11  ;;  %8822 = vpow2.f32 %v8458_v17  ;;  %v11125_v23 = vadd.f32 %v10672_v51, %v2913_v52  ;;  %v4012_v45 = vand.u32 2147483648, %v11028_v25 }
 0x33c   : > { %v4002_v13 = vmul.f32 %v8815_v53, %v11028_v25  ;;  %v8817_v59 = vpop.eup %8816  ;;  %v3753_v21 = vadd.f32 %v3752_v12, %v3660_v10  ;;  %v3754_v4 = vpop.f32.mrf.mxu1  ;;  %v3994_v12 = vsel %vm11129_vm12, %v11003_v19, %v3990_v39  ;;  %vm4007_vm13 = vweird.f32 %v8815_v53  ;;  %8508 = vmatmul.msk.bf16.gmra.mxu1 %vm15711_vm5, %v10736_v14 }
 0x33d   : > { %v11134_v42 = vpop.eup %8818  ;;  %v4010_v16 = vand.u32 2147483647, %v11028_v25  ;;  %v3262_v17 = vmul.f32 %v11044_v33, %v3261_v37  ;;  %v11141_v52 = vadd.f32 1.0, %v8817_v59  ;;  %vm3996_vm14 = vcmp.eq.f32.partialorder %v3995_v56, 8.507059e+37 }
 0x33e   : > { %v4003_v63 = vsub.f32 1.0, %v4002_v13  ;;  %v3998_v13 = vor.u32 1.1754944e-38, %v3997_v47  ;;  %v11144_v49 = vadd.f32 %v10841_v26, %v3753_v21  ;;  %vm4006_vm1 = vweird.f32 %v11028_v25  ;;  %v11154_v56 = vpop.f32.mrf.mxu2 }
 0x33f   : > { %8824 = vrcp.f32 %v11120_v7  ;;  %v3275_v39 = vmul.f32 %v11134_v42, %v11061_v55  ;;  %vm4008_vm4 = vmor %vm4006_vm1, %vm4007_vm13  ;;  %v4013_v8 = vor.u32 1.1754944e-38, %v4012_v45  ;;  %v8459_v47 = vmul.f32 -1.442695, %v11125_v23 }
 0x340   : > { %v4004_v10 = vmul.f32 %v8815_v53, %v4003_v63  ;;  %v8821_v19 = vpop.eup %8820  ;;  %v3999_v63 = vsel %vm3996_vm14, %v3998_v13, %v3994_v12  ;;  %v8514_v37 = vmul.f32 -1.442695, %v11144_v49  ;;  %vm4011_vm6 = vcmp.eq.f32.partialorder %v4010_v16, 8.507059e+37 }
 0x341   : > { %v11152_v21 = vadd.f32 1.0, %v8821_v19  ;;  %v8823_v25 = vpop.eup %8822  ;;  %v3268_v45 = vand.u32 2147483647, %v10957_v18  ;;  %v3248_v16 = vadd.f32 %v11030_v11, %v3247_v15  ;;  %v3263_v13 = vadd.f32 %v11044_v33, %v3262_v17 }
 0x342   : > { %v4005_v58 = vadd.f32 %v8815_v53, %v4004_v10  ;;  %v3242_v10 = vsel %vm11108_vm8, %v11079_v40, %v3237_v3  ;;  %8826 = vpow2.f32 %v8514_v37  ;;  %vm3265_vm8 = vweird.f32 %v11044_v33 }
 0x343   : > { %v3662_v57 = vpop.f32.mrf.mxu3  ;;  %8828 = vrcp.f32 %v11141_v52  ;;  %v15780_v40 = vpack.c.bf16 %v11047_v1, %v11035_v20  ;;  %v3276_v3 = vsub.f32 1.0, %v3275_v39  ;;  %v11175_v36 = vadd.f32 1.0, %v8823_v25 }
 0x344   : > { %v4009_v59 = vsel %vm4008_vm4, %v8815_v53, %v4005_v58  ;;  %v3755_v12 = vadd.f32 %v3754_v4, %v3662_v57  ;;  %v4466_v58 = vmul.f32 %v3999_v63, %v10865_v54  ;;  %8830 = vrcp.f32 %v11152_v21 }
 0x345   : > { %v4014_v9 = vsel %vm4011_vm6, %v4013_v8, %v4009_v59  ;;  %8832 = vpow2.f32 %v8459_v47  ;;  %vm3249_vm12 = vweird.f32 %v10950_v6  ;;  %v3270_v15 = vand.u32 2147483648, %v10957_v18 }
 0x346   : > { %v4467_v53 = vmul.f32 %v4014_v9, %v10925_v41  ;;  %v3757_v9 = vpop.f32.mrf.mxu1  ;;  %v11180_v4 = vadd.f32 %v10841_v26, %v3755_v12  ;;  %v11184_v57 = vmul.f32 %v11086_v24, %v10760_v31  ;;  %vm11188_vm13 = vmor %vm3249_vm12, %vm3250_vm11  ;;  %v15783_v19 = vand.u32 2147483647, %v10950_v6 }
 0x347   : > { %vm3264_vm1 = vweird.f32 %v10957_v18  ;;  %v2916_v63 = vadd.f32 %v10858_v2, %v10568_v38  ;;  %v11203_v24 = vmul.f32 %v3242_v10, %v10773_v61  ;;  %v3252_v8 = vsel %vm11188_vm13, %v11030_v11, %v3248_v16  ;;  %v11240_v16 = vpop.f32.mrf.mxu2 }
 0x348   : > { %8489 = vmatmul.msk.bf16.gmra.mxu3 %vm15711_vm5, %v10541_v0  ;;  %v11173_v0 = vpop.eup %8824  ;;  %v7203_v54 = vpack.c.bf16 %v4467_v53, %v4466_v58  ;;  %vm11194_vm14 = vcmp.eq.f32.partialorder %v15783_v19, 8.507059e+37  ;;  %v15787_v37 = vand.u32 2147483648, %v10950_v6  ;;  %vm11212_vm11 = vmor %vm3264_vm1, %vm3265_vm8  ;;  %vm3269_vm4 = vcmp.eq.f32.partialorder %v3268_v45, 8.507059e+37 }
 0x349   : > { %v8827_v31 = vpop.eup %8826  ;;  %15786 = vst [vmem:[#allocation28_spill] sm:$0xff] %v11203_v24  ;;  %v4017_v38 = vmul.f32 %v11173_v0, %v11120_v7  ;;  %v3267_v61 = vsel %vm11212_vm11, %v11044_v33, %v3263_v13  ;;  %v3277_v11 = vmul.f32 %v11134_v42, %v3276_v3  ;;  %8834 = vrcp.f32 %v11175_v36 }
 0x34a   : > { %8544 = vmatmul.msk.bf16.gmra.mxu2 %vm4519_vm15, %v15780_v40  ;;  %8642 = vmatmul.msk.bf16.vlgmr.msra.gmra.mxu0 %vm4519_vm15, %v7203_v54  ;;  %v3256_v47 = vor.u32 1.1754944e-38, %v15787_v37  ;;  %v11218_v2 = vpop.eup %8828  ;;  %v3271_v59 = vor.u32 1.1754944e-38, %v3270_v15  ;;  %v11229_v25 = vadd.f32 1.0, %v8827_v31  ;;  %v8515_v10 = vmul.f32 -1.442695, %v11180_v4 }
 0x34b   : > { %v3665_v41 = vpop.f32.mrf.mxu3  ;;  %v11227_v6 = vpop.eup %8830  ;;  %v3283_v45 = vand.u32 2147483647, %v11061_v55  ;;  %v11236_v53 = vadd.f32 %v10672_v51, %v2916_v63  ;;  %vm3280_vm6 = vweird.f32 %v11134_v42  ;;  %v3285_v40 = vand.u32 2147483648, %v11061_v55 }
 0x34c   : > { %v3758_v12 = vadd.f32 %v3757_v9, %v3665_v41  ;;  %v8833_v58 = vpop.eup %8832  ;;  %v3257_v33 = vsel %vm11194_vm14, %v3256_v47, %v3252_v8  ;;  %v4032_v32 = vmul.f32 %v11227_v6, %v11152_v21  ;;  %v3272_v13 = vsel %vm3269_vm4, %v3271_v59, %v3267_v61 }
 0x34d   : > { %v4018_v3 = vsub.f32 1.0, %v4017_v38  ;;  %v11245_v54 = vadd.f32 %v11134_v42, %v3277_v11  ;;  %v3300_v41 = vand.u32 2147483648, %v11141_v52  ;;  %8836 = vrcp.f32 %v11229_v25 }
 0x34e   : > { %v4033_v9 = vsub.f32 1.0, %v4032_v32  ;;  %v3290_v15 = vmul.f32 %v11218_v2, %v11141_v52  ;;  %v11251_v17 = vadd.f32 1.0, %v8833_v58  ;;  %8838 = vpow2.f32 %v8515_v10  ;;  %v3759_v37 = vpop.f32.mrf.mxu1 }
 0x34f   : > { %v11254_v19 = vadd.f32 %v10841_v26, %v3758_v12  ;;  %v11256_v39 = vpop.eup %8834  ;;  %vm3279_vm8 = vweird.f32 %v11061_v55  ;;  %v8460_v63 = vmul.f32 -1.442695, %v11236_v53  ;;  %v4501_v47 = vpack.c.bf16 %v11203_v24, %v11184_v57 }
 0x350   : > { %v4034_v31 = vmul.f32 %v11227_v6, %v4033_v9  ;;  %v11264_v18 = vmul.f32 %v3257_v33, %v10826_v5  ;;  %v3286_v38 = vor.u32 1.1754944e-38, %v3285_v40  ;;  %v2918_v61 = vadd.f32 %v10927_v50, %v10575_v34  ;;  %vm11274_vm12 = vmor %vm3279_vm8, %vm3280_vm6 }
 0x351   : > { %v4019_v11 = vmul.f32 %v11173_v0, %v4018_v3  ;;  %v11270_v55 = vmul.f32 %v3272_v13, %v10851_v46  ;;  %vm11278_vm13 = vcmp.eq.f32.partialorder %v3283_v45, 8.507059e+37  ;;  %v3298_v5 = vand.u32 2147483647, %v11141_v52 }
 0x352   : > { %15790 = vst [vmem:[#allocation29_spill] sm:$0xff] %v11264_v18  ;;  %v11283_v12 = vor.u32 1.1754944e-38, %v3300_v41  ;;  %v8516_v34 = vmul.f32 -1.442695, %v11254_v19  ;;  %v3282_v46 = vsel %vm11274_vm12, %v11134_v42, %v11245_v54  ;;  %v3291_v50 = vsub.f32 1.0, %v3290_v15  ;;  %v11311_v41 = vpop.f32.mrf.mxu2 }
 0x353   : > { %v3667_v8 = vpop.f32.mrf.mxu3  ;;  %15791 = vst [vmem:[#allocation30_spill] sm:$0xff] %v11270_v55  ;;  %v3305_v58 = vmul.f32 %v11256_v39, %v11175_v36  ;;  %8840 = vrcp.f32 %v11251_v17  ;;  %v11295_v33 = vpop.eup %8836  ;;  %v4035_v45 = vadd.f32 %v11227_v6, %v4034_v31  ;;  %vm4037_vm14 = vweird.f32 %v11227_v6 }
 0x354   : > { %8842 = vpow2.f32 %v8460_v63  ;;  %v3760_v32 = vadd.f32 %v3759_v37, %v3667_v8  ;;  %v8839_v13 = vpop.eup %8838  ;;  %vm3294_vm1 = vweird.f32 %v11141_v52  ;;  %v11301_v42 = vadd.f32 %v10672_v51, %v2918_v61 }
 0x355   : > { %v4020_v40 = vadd.f32 %v11173_v0, %v4019_v11  ;;  %vm4022_vm11 = vweird.f32 %v11173_v0  ;;  %vm4036_vm4 = vweird.f32 %v11152_v21  ;;  %v4040_v3 = vand.u32 2147483647, %v11152_v21 }
 0x356   : > { %v11309_v54 = vadd.f32 1.0, %v8839_v13  ;;  %8844 = vpow2.f32 %v8516_v34  ;;  %v3292_v9 = vmul.f32 %v11218_v2, %v3291_v50  ;;  %vm4021_vm6 = vweird.f32 %v11120_v7  ;;  %vm11319_vm8 = vmor %vm4036_vm4, %vm4037_vm14  ;;  %v3762_v13 = vpop.f32.mrf.mxu1 }
 0x357   : > { %v4025_v15 = vand.u32 2147483647, %v11120_v7  ;;  %v4027_v63 = vand.u32 2147483648, %v11120_v7  ;;  %v4047_v8 = vmul.f32 %v11295_v33, %v11229_v25  ;;  %v11330_v37 = vadd.f32 %v10841_v26, %v3760_v32  ;;  %vm11341_vm4 = vmor %vm4021_vm6, %vm4022_vm11 }
 0x358   : > { %8490 = vmatmul.msk.bf16.gmra.mxu3 %vm15711_vm5, %v10550_v48  ;;  %v4042_v48 = vand.u32 2147483648, %v11152_v21  ;;  %v4039_v21 = vsel %vm11319_vm8, %v11227_v6, %v4035_v45  ;;  %8846 = vrcp.f32 %v11309_v54  ;;  %vm3295_vm12 = vweird.f32 %v11218_v2 }
 0x359   : > { %vm11335_vm14 = vcmp.eq.f32.partialorder %v3298_v5, 8.507059e+37  ;;  %v2921_v61 = vadd.f32 %v11010_v62, %v10584_v43  ;;  %v3306_v50 = vsub.f32 1.0, %v3305_v58  ;;  %v8461_v5 = vmul.f32 -1.442695, %v11301_v42 }
 0x35a   : > { %8545 = vmatmul.msk.bf16.gmra.mxu2 %vm4519_vm15, %v4501_v47  ;;  %v11332_v47 = vpop.eup %8840  ;;  %v4043_v11 = vor.u32 1.1754944e-38, %v4042_v48  ;;  %v4024_v45 = vsel %vm11341_vm4, %v11173_v0, %v4020_v40  ;;  %vm4041_vm8 = vcmp.eq.f32.partialorder %v4040_v3, 8.507059e+37  ;;  %v3287_v43 = vsel %vm11278_vm13, %v3286_v38, %v3282_v46  ;;  %vm11373_vm13 = vmor %vm3294_vm1, %vm3295_vm12 }
 0x35b   : > { %v8843_v34 = vpop.eup %8842  ;;  %v3670_v32 = vpop.f32.mrf.mxu3  ;;  %v3293_v62 = vadd.f32 %v11218_v2, %v3292_v9  ;;  %v4028_v48 = vor.u32 1.1754944e-38, %v4027_v63  ;;  %vm3309_vm11 = vweird.f32 %v11175_v36  ;;  %v3315_v59 = vand.u32 2147483648, %v11175_v36 }
 0x35c   : > { %v4044_v31 = vsel %vm4041_vm8, %v4043_v11, %v4039_v21  ;;  %v8845_v58 = vpop.eup %8844  ;;  %vm4026_vm6 = vcmp.eq.f32.partialorder %v4025_v15, 8.507059e+37  ;;  %v4048_v0 = vsub.f32 1.0, %v4047_v8  ;;  %v8517_v40 = vmul.f32 -1.442695, %v11330_v37 }
 0x35d   : > { %v3313_v3 = vand.u32 2147483647, %v11175_v36  ;;  %v11362_v6 = vadd.f32 1.0, %v8843_v34  ;;  %v4029_v14 = vsel %vm4026_vm6, %v4028_v48, %v4024_v45  ;;  %v11365_v38 = vadd.f32 %v10672_v51, %v2921_v61  ;;  %v15810_v36 = vld [vmem:[#allocation8_spill] sm:$0xff] }
 0x35e   : > { %v11367_v10 = vpop.eup %8846  ;;  %v3307_v9 = vmul.f32 %v11256_v39, %v3306_v50  ;;  %v3320_v15 = vmul.f32 %v11332_v47, %v11251_v17  ;;  %8848 = vpow2.f32 %v8461_v5  ;;  %v4469_v63 = vmul.f32 %v4044_v31, %v11040_v28  ;;  %v11395_v28 = vpop.f32.mrf.mxu2 }
 0x35f   : > { %v11382_v51 = vmul.f32 %v3287_v43, %v10915_v44  ;;  %v3297_v21 = vsel %vm11373_vm13, %v11218_v2, %v3293_v62  ;;  %v4062_v52 = vmul.f32 %v11367_v10, %v11309_v54  ;;  %v11389_v8 = vadd.f32 1.0, %v8845_v58 }
 0x360   : > { %v11391_v61 = vor.u32 1.1754944e-38, %v3315_v59  ;;  %v4468_v11 = vmul.f32 %v4029_v14, %v10962_v22  ;;  %v4049_v34 = vmul.f32 %v11295_v33, %v4048_v0  ;;  %8850 = vpow2.f32 %v8517_v40  ;;  %v3764_v0 = vpop.f32.mrf.mxu1 }
 0x361   : > { %15804 = vst [vmem:[#allocation31_spill] sm:$0xff] %v11382_v51  ;;  %vm3310_vm1 = vweird.f32 %v11256_v39  ;;  %8852 = vrcp.f32 %v11362_v6  ;;  %v8462_v44 = vmul.f32 -1.442695, %v11365_v38  ;;  %v4063_v2 = vsub.f32 1.0, %v4062_v52 }
 0x362   : > { %v3302_v50 = vsel %vm11335_vm14, %v11283_v12, %v3297_v21  ;;  %v3308_v59 = vadd.f32 %v11256_v39, %v3307_v9  ;;  %v3321_v5 = vsub.f32 1.0, %v3320_v15  ;;  %v7204_v22 = vpack.c.bf16 %v4469_v63, %v4468_v11  ;;  %vm11422_vm8 = vmor %vm3309_vm11, %vm3310_vm1 }
 0x363   : > { %vm11404_vm12 = vcmp.eq.f32.partialorder %v3313_v3, 8.507059e+37  ;;  %v4064_v43 = vmul.f32 %v11367_v10, %v4063_v2  ;;  %vm4067_vm4 = vweird.f32 %v11367_v10  ;;  %v4072_v62 = vand.u32 2147483648, %v11309_v54  ;;  %v3672_v58 = vpop.f32.mrf.mxu3 }
 0x364   : > { %8854 = vrcp.f32 %v11389_v8  ;;  %v8849_v12 = vpop.eup %8848  ;;  %v4050_v7 = vadd.f32 %v11295_v33, %v4049_v34  ;;  %vm4052_vm14 = vweird.f32 %v11295_v33  ;;  %v4070_v48 = vand.u32 2147483647, %v11309_v54  ;;  %8643 = vmatmul.msk.bf16.gmra.mxu0 %vm4519_vm15, %v7204_v22 }
 0x365   : > { %v3763_v31 = vadd.f32 %v3762_v13, %v3670_v32  ;;  %8856 = vpow2.f32 %v8462_v44  ;;  %v4065_v3 = vadd.f32 %v11367_v10, %v4064_v43  ;;  %vm4066_vm6 = vweird.f32 %v11309_v54 }
 0x366   : > { %v15809_v32 = vpack.c.bf16 %v11270_v55, %v11264_v18  ;;  %v8851_v13 = vpop.eup %8850  ;;  %v3328_v14 = vand.u32 2147483647, %v11251_v17  ;;  %v2923_v46 = vadd.f32 %v11090_v29, %v15810_v36  ;;  %vm4051_vm11 = vweird.f32 %v11229_v25  ;;  %vm11440_vm13 = vmor %vm4066_vm6, %vm4067_vm4 }
 0x367   : > { %v4055_v9 = vand.u32 2147483647, %v11229_v25  ;;  %v11444_v54 = vpop.eup %8852  ;;  %vm3324_vm1 = vweird.f32 %v11251_v17  ;;  %v11447_v63 = vadd.f32 1.0, %v8849_v12  ;;  %vm11451_vm10 = vmor %vm4051_vm11, %vm4052_vm14  ;;  %v4073_v21 = vor.u32 1.1754944e-38, %v4072_v62  ;;  %v15816_v12 = vld [vmem:[#allocation24_spill] sm:$0xff] }
 0x368   : > { %8491 = vmatmul.msk.bf16.gmra.mxu3 %vm15711_vm5, %v10560_v30  ;;  %v4057_v30 = vand.u32 2147483648, %v11229_v25  ;;  %v4069_v25 = vsel %vm11440_vm13, %v11367_v10, %v4065_v3  ;;  %v11458_v52 = vadd.f32 1.0, %v8851_v13  ;;  %v3312_v11 = vsel %vm11422_vm8, %v11256_v39, %v3308_v59  ;;  %v11479_v59 = vpop.f32.mrf.mxu2  ;;  %8509 = vmatmul.msk.bf16.gmra.mxu1 %vm15711_vm5, %v15816_v12  ;;  %v15819_v13 = vld [vmem:[#allocation10_spill] sm:$0xff]  ;;  %v3767_v15 = vpop.f32.mrf.mxu1 }
 0x369   : > { %v4054_v34 = vsel %vm11451_vm10, %v11295_v33, %v4050_v7  ;;  %vm4071_vm4 = vcmp.eq.f32.partialorder %v4070_v48, 8.507059e+37  ;;  %v11467_v44 = vadd.f32 %v10841_v26, %v3763_v31  ;;  %v3322_v22 = vmul.f32 %v11332_v47, %v3321_v5 }
 0x36a   : > { %8546 = vmatmul.msk.bf16.gmra.mxu2 %vm4519_vm15, %v15809_v32  ;;  %v11469_v2 = vpop.eup %8854  ;;  %v4058_v10 = vor.u32 1.1754944e-38, %v4057_v30  ;;  %v4074_v43 = vsel %vm4071_vm4, %v4073_v21, %v4069_v25  ;;  %8858 = vrcp.f32 %v11458_v52  ;;  %v11474_v62 = vmul.f32 %v3302_v50, %v11007_v27  ;;  %v11488_v27 = vld [vmem:[%s15665_s6] ss:$0 sm:$0xff] }
 0x36b   : > { %v3335_v39 = vmul.f32 %v11444_v54, %v11362_v6  ;;  %vm4056_vm14 = vcmp.eq.f32.partialorder %v4055_v9, 8.507059e+37  ;;  %v8518_v33 = vmul.f32 -1.442695, %v11467_v44  ;;  %v8857_v7 = vpop.eup %8856  ;;  %v3330_v5 = vand.u32 2147483648, %v11251_v17  ;;  %v3675_v9 = vpop.f32.mrf.mxu3 }
 0x36c   : > { %15815 = vst [vmem:[#allocation8_spill] sm:$0xff] %v11474_v62  ;;  %8860 = vrcp.f32 %v11447_v63  ;;  %v11491_v50 = vadd.f32 %v11488_v27, %v2923_v46  ;;  %v4059_v48 = vsel %vm4056_vm14, %v4058_v10, %v4054_v34  ;;  %v3317_v31 = vsel %vm11404_vm12, %v11391_v61, %v3312_v11 }
 0x36d   : > { %v4471_v40 = vmul.f32 %v4074_v43, %v11180_v4  ;;  %v4077_v30 = vmul.f32 %v11469_v2, %v11389_v8  ;;  %8862 = vpow2.f32 %v8518_v33  ;;  %v3323_v3 = vadd.f32 %v11332_v47, %v3322_v22 }
 0x36e   : > { %vm3325_vm10 = vweird.f32 %v11332_v47  ;;  %vm11501_vm8 = vcmp.eq.f32.partialorder %v3328_v14, 8.507059e+37  ;;  %v2926_v36 = vadd.f32 %v11154_v56, %v15819_v13  ;;  %v3336_v46 = vsub.f32 1.0, %v3335_v39 }
 0x36f   : > { %v11507_v45 = vadd.f32 1.0, %v8857_v7  ;;  %v4470_v4 = vmul.f32 %v4059_v48, %v11144_v49  ;;  %v3765_v61 = vadd.f32 %v3764_v0, %v3672_v58  ;;  %v11513_v25 = vmul.f32 %v3317_v31, %v11070_v35  ;;  %vm11520_vm12 = vmor %vm3324_vm1, %vm3325_vm10  ;;  %v15823_v7 = vld [vmem:[#allocation11_spill] sm:$0xff] }
 0x370   : > { %v11510_v29 = vpop.eup %8858  ;;  %v3331_v14 = vor.u32 1.1754944e-38, %v3330_v5  ;;  %v8463_v21 = vmul.f32 -1.442695, %v11491_v50  ;;  %v4503_v11 = vpack.c.bf16 %v11474_v62, %v11382_v51  ;;  %v4078_v49 = vsub.f32 1.0, %v4077_v30  ;;  %v15824_v48 = vld [vmem:[#allocation7_spill] sm:$0xff] }
 0x371   : > { %15820 = vst [vmem:[#allocation24_spill] sm:$0xff] %v11513_v25  ;;  %v4092_v58 = vmul.f32 %v11510_v29, %v11458_v52  ;;  %v11527_v0 = vadd.f32 %v10841_v26, %v3765_v61  ;;  %v7205_v35 = vpack.c.bf16 %v4471_v40, %v4470_v4  ;;  %v3327_v22 = vsel %vm11520_vm12, %v11332_v47, %v3323_v3  ;;  %v11553_v3 = vpop.f32.mrf.mxu2 }
 0x372   : > { %v11529_v34 = vpop.eup %8860  ;;  %vm3339_vm6 = vweird.f32 %v11362_v6  ;;  %v3343_v17 = vand.u32 2147483647, %v11362_v6  ;;  %v11537_v10 = vadd.f32 %v11488_v27, %v2926_v36  ;;  %v3337_v39 = vmul.f32 %v11444_v54, %v3336_v46 }
 0x373   : > { %v8863_v43 = vpop.eup %8862  ;;  %8864 = vrcp.f32 %v11507_v45  ;;  %v4093_v26 = vsub.f32 1.0, %v4092_v58  ;;  %v8519_v33 = vmul.f32 -1.442695, %v11527_v0  ;;  %v3345_v12 = vand.u32 2147483648, %v11362_v6  ;;  %v3769_v58 = vpop.f32.mrf.mxu1 }
 0x374   : > { %8866 = vpow2.f32 %v8463_v21  ;;  %v2928_v47 = vadd.f32 %v11240_v16, %v15823_v7  ;;  %v11545_v5 = vadd.f32 1.0, %v8863_v43  ;;  %v3332_v31 = vsel %vm11501_vm8, %v3331_v14, %v3327_v22  ;;  %8644 = vmatmul.msk.bf16.gmra.mxu0 %vm4519_vm15, %v7205_v35  ;;  %v11598_v43 = vld [vmem:[%s15668_s9] ss:$0 sm:$0xff] }
 0x375   : > { %v4079_v40 = vmul.f32 %v11469_v2, %v4078_v49  ;;  %v4094_v30 = vmul.f32 %v11510_v29, %v4093_v26  ;;  %8868 = vpow2.f32 %v8519_v33  ;;  %vm3340_vm11 = vweird.f32 %v11444_v54  ;;  %v15835_v49 = vld [vmem:[#allocation9_spill] sm:$0xff] }
 0x376   : > { %v3350_v16 = vmul.f32 %v11529_v34, %v11447_v63  ;;  %v8464_v13 = vmul.f32 -1.442695, %v11537_v10  ;;  %8870 = vrcp.f32 %v11545_v5  ;;  %v3338_v32 = vadd.f32 %v11444_v54, %v3337_v39  ;;  %vm11576_vm1 = vmor %vm3339_vm6, %vm3340_vm11 }
 0x377   : > { %v4095_v36 = vadd.f32 %v11510_v29, %v4094_v30  ;;  %vm4097_vm13 = vweird.f32 %v11510_v29  ;;  %v3768_v46 = vadd.f32 %v3767_v15, %v3675_v9  ;;  %v11566_v4 = vmul.f32 %v3332_v31, %v11125_v23  ;;  %v3677_v15 = vpop.f32.mrf.mxu3 }
 0x378   : > { %8492 = vmatmul.msk.bf16.gmra.mxu3 %vm15711_vm5, %v15824_v48  ;;  %v3346_v61 = vor.u32 1.1754944e-38, %v3345_v12  ;;  %v11569_v14 = vadd.f32 %v11488_v27, %v2928_v47  ;;  %v4102_v21 = vand.u32 2147483648, %v11458_v52  ;;  %vm11580_vm4 = vcmp.eq.f32.partialorder %v3343_v17, 8.507059e+37 }
 0x379   : > { %15825 = vst [vmem:[#allocation10_spill] sm:$0xff] %v11566_v4  ;;  %v11572_v56 = vpop.eup %8864  ;;  %v4080_v23 = vadd.f32 %v11469_v2, %v4079_v40  ;;  %vm4082_vm14 = vweird.f32 %v11469_v2  ;;  %vm4096_vm10 = vweird.f32 %v11458_v52  ;;  %v4100_v9 = vand.u32 2147483647, %v11458_v52 }
 0x37a   : > { %8547 = vmatmul.msk.bf16.gmra.mxu2 %vm4519_vm15, %v4503_v11  ;;  %v8867_v35 = vpop.eup %8866  ;;  %v3351_v6 = vsub.f32 1.0, %v3350_v16  ;;  %8872 = vpow2.f32 %v8464_v13  ;;  %v4087_v22 = vand.u32 2147483648, %v11389_v8  ;;  %vm11591_vm8 = vmor %vm4096_vm10, %vm4097_vm13  ;;  %v11601_v52 = vadd.f32 %v11598_v43, %v3768_v46 }
 0x37b   : > { %v8869_v39 = vpop.eup %8868  ;;  %v3342_v26 = vsel %vm11576_vm1, %v11444_v54, %v3338_v32  ;;  %vm4081_vm12 = vweird.f32 %v11389_v8  ;;  %v4085_v33 = vand.u32 2147483647, %v11389_v8  ;;  %v4099_v12 = vsel %vm11591_vm8, %v11510_v29, %v4095_v36  ;;  %v15834_v29 = vld [vmem:[#allocation12_spill] sm:$0xff] }
 0x37c   : > { %v11611_v7 = vpop.eup %8870  ;;  %v3365_v47 = vmul.f32 %v11572_v56, %v11507_v45  ;;  %v8465_v48 = vmul.f32 -1.442695, %v11569_v14  ;;  %vm11618_vm6 = vmor %vm4081_vm12, %vm4082_vm14  ;;  %v4103_v54 = vor.u32 1.1754944e-38, %v4102_v21  ;;  %v3770_v40 = vadd.f32 %v3769_v58, %v3677_v15 }
 0x37d   : > { %v4084_v8 = vsel %vm11618_vm6, %v11469_v2, %v4080_v23  ;;  %v2931_v30 = vadd.f32 %v11311_v41, %v15834_v29  ;;  %vm4101_vm11 = vcmp.eq.f32.partialorder %v4100_v9, 8.507059e+37  ;;  %v11627_v16 = vadd.f32 1.0, %v8869_v39  ;;  %v11636_v2 = vpop.f32.mrf.mxu2 }
 0x37e   : > { %v3352_v13 = vmul.f32 %v11529_v34, %v3351_v6  ;;  %v4088_v32 = vor.u32 1.1754944e-38, %v4087_v22  ;;  %v4104_v36 = vsel %vm4101_vm11, %v4103_v54, %v4099_v12  ;;  %v8520_v46 = vmul.f32 -1.442695, %v11601_v52 }
 0x37f   : > { %v11631_v11 = vadd.f32 1.0, %v8867_v35  ;;  %vm4086_vm13 = vcmp.eq.f32.partialorder %v4085_v33, 8.507059e+37  ;;  %v4107_v21 = vmul.f32 %v11611_v7, %v11545_v5  ;;  %8874 = vrcp.f32 %v11627_v16 }
 0x380   : > { %v8873_v41 = vpop.eup %8872  ;;  %v3366_v23 = vsub.f32 1.0, %v3365_v47  ;;  %8876 = vpow2.f32 %v8465_v48  ;;  %v4089_v9 = vsel %vm4086_vm13, %v4088_v32, %v4084_v8  ;;  %v11639_v15 = vadd.f32 %v11598_v43, %v3770_v40  ;;  %v3680_v32 = vpop.f32.mrf.mxu3 }
 0x381   : > { %v3358_v58 = vand.u32 2147483647, %v11447_v63  ;;  %v3360_v35 = vand.u32 2147483648, %v11447_v63  ;;  %v11644_v6 = vadd.f32 %v11488_v27, %v2931_v30  ;;  %v4473_v22 = vmul.f32 %v4104_v36, %v11330_v37  ;;  %v3772_v36 = vpop.f32.mrf.mxu1 }
 0x382   : > { %v3347_v17 = vsel %vm11580_vm4, %v3346_v61, %v3342_v26  ;;  %vm3354_vm1 = vweird.f32 %v11447_v63  ;;  %vm3355_vm14 = vweird.f32 %v11529_v34  ;;  %8878 = vpow2.f32 %v8520_v46 }
 0x383   : > { %8880 = vrcp.f32 %v11631_v11  ;;  %v11652_v39 = vadd.f32 1.0, %v8873_v41  ;;  %v4472_v33 = vmul.f32 %v4089_v9, %v11254_v19  ;;  %v4108_v12 = vsub.f32 1.0, %v4107_v21  ;;  %vm11681_vm8 = vmor %vm3354_vm1, %vm3355_vm14 }
 0x384   : > { %v3353_v47 = vadd.f32 %v11529_v34, %v3352_v13  ;;  %v3367_v48 = vmul.f32 %v11572_v56, %v3366_v23  ;;  %v8521_v37 = vmul.f32 -1.442695, %v11639_v15  ;;  %v4504_v61 = vpack.c.bf16 %v11566_v4, %v11513_v25 }
 0x385   : > { %v11662_v26 = vpop.eup %8874  ;;  %vm11664_vm4 = vcmp.eq.f32.partialorder %v3358_v58, 8.507059e+37  ;;  %v3361_v19 = vor.u32 1.1754944e-38, %v3360_v35  ;;  %v8466_v54 = vmul.f32 -1.442695, %v11644_v6  ;;  %v7206_v40 = vpack.c.bf16 %v4473_v22, %v4472_v33  ;;  %v15841_v22 = vld [vmem:[#allocation13_spill] sm:$0xff] }
 0x386   : > { %v8877_v8 = vpop.eup %8876  ;;  %v11670_v29 = vmul.f32 %v3347_v17, %v11236_v53  ;;  %vm3369_vm10 = vweird.f32 %v11507_v45  ;;  %v3373_v30 = vand.u32 2147483647, %v11507_v45  ;;  %v4122_v13 = vmul.f32 %v11662_v26, %v11627_v16 }
 0x387   : > { %vm3370_vm12 = vweird.f32 %v11572_v56  ;;  %v3375_v53 = vand.u32 2147483648, %v11507_v45  ;;  %8882 = vrcp.f32 %v11652_v39  ;;  %v4109_v21 = vmul.f32 %v11611_v7, %v4108_v12  ;;  %8645 = vmatmul.msk.bf16.gmra.mxu0 %vm4519_vm15, %v7206_v40  ;;  %v11704_v12 = vpop.f32.mrf.mxu2 }
 0x388   : > { %8493 = vmatmul.msk.bf16.gmra.mxu3 %vm15711_vm5, %v15835_v49  ;;  %15838 = vst [vmem:[#allocation11_spill] sm:$0xff] %v11670_v29  ;;  %v8879_v41 = vpop.eup %8878  ;;  %v3357_v23 = vsel %vm11681_vm8, %v11529_v34, %v3353_v47  ;;  %v11694_v63 = vadd.f32 %v11572_v56, %v3367_v48  ;;  %v4123_v9 = vsub.f32 1.0, %v4122_v13  ;;  %8884 = vpow2.f32 %v8521_v37 }
 0x389   : > { %v11696_v58 = vpop.eup %8880  ;;  %v11698_v35 = vadd.f32 1.0, %v8877_v8  ;;  %8886 = vpow2.f32 %v8466_v54  ;;  %v2933_v17 = vadd.f32 %v11395_v28, %v15841_v22  ;;  %v11702_v33 = vadd.f32 1.0, %v8879_v41 }
 0x38a   : > { %8548 = vmatmul.msk.bf16.gmra.mxu2 %vm4519_vm15, %v4504_v61  ;;  %vm4112_vm6 = vweird.f32 %v11611_v7  ;;  %v4124_v34 = vmul.f32 %v11662_v26, %v4123_v9  ;;  %vm4127_vm11 = vweird.f32 %v11662_v26  ;;  %v4132_v47 = vand.u32 2147483648, %v11627_v16 }
 0x38b   : > { %v4110_v48 = vadd.f32 %v11611_v7, %v4109_v21  ;;  %v4130_v37 = vand.u32 2147483647, %v11627_v16  ;;  %8888 = vrcp.f32 %v11702_v33  ;;  %v3773_v49 = vadd.f32 %v3772_v36, %v3680_v32 }
 0x38c   : > { %v3380_v28 = vmul.f32 %v11696_v58, %v11631_v11  ;;  %v4117_v61 = vand.u32 2147483648, %v11545_v5  ;;  %v4125_v54 = vadd.f32 %v11662_v26, %v4124_v34  ;;  %vm4126_vm13 = vweird.f32 %v11627_v16  ;;  %v3774_v34 = vpop.f32.mrf.mxu1 }
 0x38d   : > { %v11718_v40 = vpop.eup %8882  ;;  %vm11720_vm1 = vcmp.eq.f32.partialorder %v3373_v30, 8.507059e+37  ;;  %v3376_v13 = vor.u32 1.1754944e-38, %v3375_v53  ;;  %vm4111_vm14 = vweird.f32 %v11545_v5  ;;  %v4115_v32 = vand.u32 2147483647, %v11545_v5  ;;  %vm11728_vm8 = vmor %vm4126_vm13, %vm4127_vm11 }
 0x38e   : > { %v8885_v46 = vpop.eup %8884  ;;  %v3362_v16 = vsel %vm11664_vm4, %v3361_v19, %v3357_v23  ;;  %v11735_v30 = vadd.f32 %v11488_v27, %v2933_v17  ;;  %vm11739_vm9 = vmor %vm4111_vm14, %vm4112_vm6  ;;  %v4129_v5 = vsel %vm11728_vm8, %v11662_v26, %v4125_v54  ;;  %v4133_v21 = vor.u32 1.1754944e-38, %v4132_v47  ;;  %v3682_v17 = vpop.f32.mrf.mxu3 }
 0x38f   : > { %v8887_v41 = vpop.eup %8886  ;;  %vm11750_vm4 = vmor %vm3369_vm10, %vm3370_vm12  ;;  %8890 = vrcp.f32 %v11698_v35  ;;  %v4114_v19 = vsel %vm11739_vm9, %v11611_v7, %v4110_v48  ;;  %vm4131_vm6 = vcmp.eq.f32.partialorder %v4130_v37, 8.507059e+37  ;;  %v11759_v23 = vadd.f32 %v11598_v43, %v3773_v49  ;;  %v15850_v7 = vld [vmem:[#allocation14_spill] sm:$0xff]  ;;  %v11781_v53 = vpop.f32.mrf.mxu2 }
 0x390   : > { %v3372_v26 = vsel %vm11750_vm4, %v11572_v56, %v11694_v63  ;;  %v3381_v45 = vsub.f32 1.0, %v3380_v28  ;;  %v4118_v9 = vor.u32 1.1754944e-38, %v4117_v61  ;;  %v4134_v22 = vsel %vm4131_vm6, %v4133_v21, %v4129_v5  ;;  %v15851_v56 = vld [vmem:[#allocation15_spill] sm:$0xff] }
 0x391   : > { %v11765_v47 = vpop.eup %8888  ;;  %v3395_v54 = vmul.f32 %v11718_v40, %v11652_v39  ;;  %vm4116_vm9 = vcmp.eq.f32.partialorder %v4115_v32, 8.507059e+37  ;;  %v2936_v48 = vadd.f32 %v11479_v59, %v15850_v7  ;;  %v11771_v37 = vadd.f32 1.0, %v8885_v46 }
 0x392   : > { %v8467_v49 = vmul.f32 -1.442695, %v11735_v30  ;;  %v4119_v36 = vsel %vm4116_vm9, %v4118_v9, %v4114_v19  ;;  %v2938_v63 = vadd.f32 %v11553_v3, %v15851_v56  ;;  %v4137_v28 = vmul.f32 %v11765_v47, %v11702_v33 }
 0x393   : > { %v4475_v61 = vmul.f32 %v4134_v22, %v11527_v0  ;;  %8892 = vrcp.f32 %v11771_v37  ;;  %v8522_v32 = vmul.f32 -1.442695, %v11759_v23  ;;  %v3775_v59 = vadd.f32 %v3774_v34, %v3682_v17 }
 0x394   : > { %v11784_v46 = vmul.f32 %v3362_v16, %v11301_v42  ;;  %v3390_v5 = vand.u32 2147483648, %v11631_v11  ;;  %v11787_v21 = vadd.f32 1.0, %v8887_v41  ;;  %v4138_v3 = vsub.f32 1.0, %v4137_v28 }
 0x395   : > { %v11789_v31 = vpop.eup %8890  ;;  %v3382_v19 = vmul.f32 %v11696_v58, %v3381_v45  ;;  %v4474_v9 = vmul.f32 %v4119_v36, %v11467_v44  ;;  %v11795_v22 = vadd.f32 %v11488_v27, %v2936_v48  ;;  %v11799_v42 = vsel %vm11720_vm1, %v3376_v13, %v3372_v26  ;;  %v15853_v48 = vld [vmem:[#allocation16_spill] sm:$0xff] }
 0x396   : > { %15852 = vst [vmem:[#allocation7_spill] sm:$0xff] %v11784_v46  ;;  %v3396_v16 = vsub.f32 1.0, %v3395_v54  ;;  %8894 = vpow2.f32 %v8467_v49  ;;  %v4139_v41 = vmul.f32 %v11765_v47, %v4138_v3  ;;  %vm3384_vm10 = vweird.f32 %v11631_v11  ;;  %v11855_v54 = vpop.f32.mrf.mxu1 }
 0x397   : > { %v11804_v17 = vadd.f32 %v11488_v27, %v2938_v63  ;;  %8896 = vpow2.f32 %v8522_v32  ;;  %v11807_v45 = vadd.f32 %v11598_v43, %v3775_v59  ;;  %v7207_v44 = vpack.c.bf16 %v4475_v61, %v4474_v9  ;;  %v15854_v59 = vld [vmem:[#allocation17_spill] sm:$0xff] }
 0x398   : > { %vm3385_vm12 = vweird.f32 %v11696_v58  ;;  %v11810_v34 = vor.u32 1.1754944e-38, %v3390_v5  ;;  %v3410_v8 = vmul.f32 %v11789_v31, %v11698_v35  ;;  %8898 = vrcp.f32 %v11787_v21 }
 0x399   : > { %v8893_v13 = vpop.eup %8892  ;;  %v11816_v26 = vadd.f32 %v11696_v58, %v3382_v19  ;;  %v8468_v7 = vmul.f32 -1.442695, %v11795_v22  ;;  %v2941_v49 = vadd.f32 %v11636_v2, %v15853_v48  ;;  %8646 = vmatmul.msk.bf16.gmra.mxu0 %vm4519_vm15, %v7207_v44  ;;  %v4140_v36 = vadd.f32 %v11765_v47, %v4139_v41  ;;  %v11846_v48 = vpop.f32.mrf.mxu2  ;;  %vm11866_vm4 = vmor %vm3384_vm10, %vm3385_vm12 }
 0x39a   : > { %vm4142_vm11 = vweird.f32 %v11765_v47  ;;  %v4152_v56 = vmul.f32 %v8893_v13, %v11771_v37  ;;  %v8523_v63 = vmul.f32 -1.442695, %v11807_v45  ;;  %v3397_v28 = vmul.f32 %v11718_v40, %v3396_v16 }
 0x39b   : > { %v8469_v61 = vmul.f32 -1.442695, %v11804_v17  ;;  %v4147_v32 = vand.u32 2147483648, %v11702_v33  ;;  %v2943_v5 = vadd.f32 %v11704_v12, %v15854_v59  ;;  %v3411_v3 = vsub.f32 1.0, %v3410_v8  ;;  %v11853_v59 = vpop.f32.mrf.mxu3 }
 0x39c   : > { %v8895_v2 = vpop.eup %8894  ;;  %vm4141_vm13 = vweird.f32 %v11702_v33  ;;  %v4145_v19 = vand.u32 2147483647, %v11702_v33  ;;  %v4153_v9 = vsub.f32 1.0, %v4152_v56  ;;  %vm3399_vm1 = vweird.f32 %v11652_v39 }
 0x39d   : > { %v8897_v41 = vpop.eup %8896  ;;  %8900 = vpow2.f32 %v8468_v7  ;;  %vm11837_vm14 = vmor %vm4141_vm13, %vm4142_vm11  ;;  %v11842_v44 = vadd.f32 %v11488_v27, %v2941_v49  ;;  %v4160_v12 = vand.u32 2147483647, %v11771_v37  ;;  %v4162_v8 = vand.u32 2147483648, %v11771_v37 }
 0x39e   : > { %v11848_v33 = vpop.eup %8898  ;;  %v4144_v7 = vsel %vm11837_vm14, %v11765_v47, %v4140_v36  ;;  %v4154_v56 = vmul.f32 %v8893_v13, %v4153_v9  ;;  %vm4157_vm8 = vweird.f32 %v8893_v13  ;;  %8902 = vpow2.f32 %v8523_v63 }
 0x39f   : > { %v11857_v49 = vadd.f32 1.0, %v8895_v2  ;;  %8904 = vpow2.f32 %v8469_v61  ;;  %v4148_v0 = vor.u32 1.1754944e-38, %v4147_v32  ;;  %v11860_v4 = vadd.f32 %v11488_v27, %v2943_v5 }
 0x3a0   : > { %vm4146_vm6 = vcmp.eq.f32.partialorder %v4145_v19, 8.507059e+37  ;;  %v4155_v36 = vadd.f32 %v8893_v13, %v4154_v56  ;;  %vm4156_vm9 = vweird.f32 %v11771_v37  ;;  %v11871_v63 = vadd.f32 1.0, %v8897_v41 }
 0x3a1   : > { %v3425_v61 = vmul.f32 %v11848_v33, %v11787_v21  ;;  %v4149_v32 = vsel %vm4146_vm6, %v4148_v0, %v4144_v7  ;;  %v8470_v5 = vmul.f32 -1.442695, %v11842_v44  ;;  %vm4158_vm11 = vmor %vm4156_vm9, %vm4157_vm8  ;;  %v4163_v2 = vor.u32 1.1754944e-38, %v4162_v8 }
 0x3a2   : > { %v3387_v9 = vsel %vm11866_vm4, %v11696_v58, %v11816_v26  ;;  %vm3400_vm10 = vweird.f32 %v11718_v40  ;;  %v4159_v19 = vsel %vm4158_vm11, %v8893_v13, %v4155_v36  ;;  %vm4161_vm12 = vcmp.eq.f32.partialorder %v4160_v12, 8.507059e+37 }
 0x3a3   : > { %v8901_v37 = vpop.eup %8900  ;;  %v3398_v41 = vadd.f32 %v11718_v40, %v3397_v28  ;;  %v3412_v16 = vmul.f32 %v11789_v31, %v3411_v3  ;;  %8906 = vrcp.f32 %v11857_v49  ;;  %v4164_v0 = vsel %vm4161_vm12, %v4163_v2, %v4159_v19  ;;  %vm11902_vm14 = vmor %vm3399_vm1, %vm3400_vm10  ;;  %v3687_v2 = vpop.f32.mrf.mxu3 }
 0x3a4   : > { %v8903_v7 = vpop.eup %8902  ;;  %v4476_v8 = vmul.f32 %v4149_v32, %v11601_v52  ;;  %v4477_v56 = vmul.f32 %v4164_v0, %v11639_v15  ;;  %v8471_v47 = vmul.f32 -1.442695, %v11860_v4  ;;  %8908 = vrcp.f32 %v11871_v63  ;;  %v3779_v19 = vpop.f32.mrf.mxu1 }
 0x3a5   : > { %v8905_v58 = vpop.eup %8904  ;;  %v3405_v13 = vand.u32 2147483648, %v11652_v39  ;;  %v3426_v26 = vsub.f32 1.0, %v3425_v61  ;;  %8910 = vpow2.f32 %v8470_v5  ;;  %v11890_v28 = vadd.f32 1.0, %v8903_v7 }
 0x3a6   : > { %v11894_v3 = vmul.f32 %v11799_v42, %v11365_v38  ;;  %v15860_v12 = vand.u32 2147483647, %v11631_v11  ;;  %v3418_v15 = vand.u32 2147483647, %v11698_v35  ;;  %v7208_v36 = vpack.c.bf16 %v4477_v56, %v4476_v8  ;;  %v11913_v42 = vpop.f32.mrf.mxu2 }
 0x3a7   : > { %v3402_v38 = vsel %vm11902_vm14, %v11718_v40, %v3398_v41  ;;  %v3420_v11 = vand.u32 2147483648, %v11698_v35  ;;  %8912 = vrcp.f32 %v11890_v28  ;;  %v3413_v32 = vadd.f32 %v11789_v31, %v3412_v16 }
 0x3a8   : > { %15859 = vst [vmem:[#allocation12_spill] sm:$0xff] %v11894_v3  ;;  %vm3389_vm13 = vcmp.eq.f32.partialorder %v15860_v12, 8.507059e+37  ;;  %vm3415_vm1 = vweird.f32 %v11789_v31  ;;  %v11917_v5 = vadd.f32 1.0, %v8901_v37  ;;  %8914 = vpow2.f32 %v8471_v47 }
 0x3a9   : > { %v3392_v61 = vsel %vm3389_vm13, %v11810_v34, %v3387_v9  ;;  %v11919_v34 = vpop.eup %8906  ;;  %v15863_v9 = vand.u32 2147483647, %v11652_v39  ;;  %v3406_v40 = vor.u32 1.1754944e-38, %v3405_v13  ;;  %v3427_v41 = vmul.f32 %v11848_v33, %v3426_v26  ;;  %8647 = vmatmul.msk.bf16.gmra.mxu0 %vm4519_vm15, %v7208_v36  ;;  %v15867_v39 = vld [vmem:[#allocation18_spill] sm:$0xff] }
 0x3aa   : > { %v11924_v0 = vadd.f32 1.0, %v8905_v58  ;;  %v11927_v16 = vpop.eup %8908  ;;  %v11930_v37 = vmul.f32 %v3392_v61, %v11491_v50  ;;  %vm3414_vm4 = vweird.f32 %v11698_v35  ;;  %vm11933_vm6 = vcmp.eq.f32.partialorder %v3418_v15, 8.507059e+37 }
 0x3ab   : > { %vm3404_vm8 = vcmp.eq.f32.partialorder %v15863_v9, 8.507059e+37  ;;  %v2946_v8 = vadd.f32 %v11781_v53, %v15867_v39  ;;  %v8911_v56 = vpop.eup %8910  ;;  %vm11941_vm9 = vmor %vm3414_vm4, %vm3415_vm1  ;;  %v3421_v13 = vor.u32 1.1754944e-38, %v3420_v11  ;;  %vm3429_vm11 = vweird.f32 %v11787_v21 }
 0x3ac   : > { %15864 = vst [vmem:[#allocation9_spill] sm:$0xff] %v11930_v37  ;;  %v3407_v47 = vsel %vm3404_vm8, %v3406_v40, %v3402_v38  ;;  %v3780_v50 = vadd.f32 %v3779_v19, %v3687_v2  ;;  %v3417_v35 = vsel %vm11941_vm9, %v11789_v31, %v3413_v32  ;;  %vm3430_vm10 = vweird.f32 %v11848_v33  ;;  %v15873_v40 = vld [vmem:[#allocation19_spill] sm:$0xff] }
 0x3ad   : > { %v3435_v53 = vand.u32 2147483648, %v11787_v21  ;;  %8916 = vrcp.f32 %v11917_v5  ;;  %v11952_v26 = vpop.eup %8912  ;;  %v3428_v12 = vadd.f32 %v11848_v33, %v3427_v41  ;;  %v4167_v52 = vmul.f32 %v11927_v16, %v11871_v63  ;;  %vm11982_vm12 = vmor %vm3429_vm11, %vm3430_vm10 }
 0x3ae   : > { %8918 = vrcp.f32 %v11924_v0  ;;  %v3778_v15 = vadd.f32 %v11855_v54, %v11853_v59  ;;  %v8915_v36 = vpop.eup %8914  ;;  %v3440_v31 = vmul.f32 %v11919_v34, %v11857_v49  ;;  %v11962_v61 = vadd.f32 1.0, %v8911_v56 }
 0x3af   : > { %v11965_v38 = vadd.f32 %v11488_v27, %v2946_v8  ;;  %v4182_v11 = vmul.f32 %v11952_v26, %v11890_v28  ;;  %v11970_v32 = vmul.f32 %v3407_v47, %v11537_v10  ;;  %v3422_v2 = vsel %vm11933_vm6, %v3421_v13, %v3417_v35 }
 0x3b0   : > { %v3433_v54 = vand.u32 2147483647, %v11787_v21  ;;  %v11976_v59 = vadd.f32 %v11598_v43, %v3780_v50  ;;  %v3450_v9 = vand.u32 2147483648, %v11857_v49  ;;  %v2948_v41 = vadd.f32 %v11846_v48, %v15873_v40  ;;  %v12003_v50 = vpop.f32.mrf.mxu2 }
 0x3b1   : > { %15870 = vst [vmem:[#allocation13_spill] sm:$0xff] %v11970_v32  ;;  %v4183_v10 = vsub.f32 1.0, %v4182_v11  ;;  %v4505_v7 = vpack.c.bf16 %v11784_v46, %v11670_v29  ;;  %v3432_v39 = vsel %vm11982_vm12, %v11848_v33, %v3428_v12  ;;  %v11994_v8 = vadd.f32 1.0, %v8915_v36 }
 0x3b2   : > { %v4168_v21 = vsub.f32 1.0, %v4167_v52  ;;  %v11997_v56 = vadd.f32 %v11598_v43, %v3778_v15  ;;  %v3436_v58 = vor.u32 1.1754944e-38, %v3435_v53  ;;  %v3441_v13 = vsub.f32 1.0, %v3440_v31  ;;  %v12013_v53 = vpop.f32.mrf.mxu3  ;;  %v12015_v15 = vpop.f32.mrf.mxu1 }
 0x3b3   : > { %v11999_v47 = vpop.eup %8916  ;;  %8920 = vrcp.f32 %v11962_v61  ;;  %v8472_v48 = vmul.f32 -1.442695, %v11965_v38  ;;  %8549 = vmatmul.msk.bf16.gmra.mxu2 %vm4519_vm15, %v4505_v7  ;;  %v12009_v33 = vmul.f32 %v3422_v2, %v11569_v14  ;;  %vm3434_vm13 = vcmp.eq.f32.partialorder %v3433_v54, 8.507059e+37 }
 0x3b4   : > { %v12006_v35 = vpop.eup %8918  ;;  %v4184_v12 = vmul.f32 %v11952_v26, %v4183_v10  ;;  %v8525_v52 = vmul.f32 -1.442695, %v11976_v59  ;;  %v3437_v36 = vsel %vm3434_vm13, %v3436_v58, %v3432_v39  ;;  %vm3444_vm14 = vweird.f32 %v11857_v49 }
 0x3b5   : > { %15874 = vst [vmem:[#allocation14_spill] sm:$0xff] %v12009_v33  ;;  %v3448_v31 = vand.u32 2147483647, %v11857_v49  ;;  %v12020_v11 = vadd.f32 %v11488_v27, %v2948_v41  ;;  %v12022_v19 = vor.u32 1.1754944e-38, %v3450_v9  ;;  %8922 = vrcp.f32 %v11994_v8 }
 0x3b6   : > { %v4169_v14 = vmul.f32 %v11927_v16, %v4168_v21  ;;  %v8524_v2 = vmul.f32 -1.442695, %v11997_v56  ;;  %v3442_v54 = vmul.f32 %v11919_v34, %v3441_v13  ;;  %v3455_v10 = vmul.f32 %v11999_v47, %v11917_v5  ;;  %v15875_v21 = vld [vmem:[#allocation20_spill] sm:$0xff] }
 0x3b7   : > { %v3470_v40 = vmul.f32 %v12006_v35, %v11924_v0  ;;  %8924 = vpow2.f32 %v8472_v48  ;;  %vm3445_vm1 = vweird.f32 %v11919_v34  ;;  %v4185_v9 = vadd.f32 %v11952_v26, %v4184_v12 }
 0x3b8   : > { %vm4187_vm8 = vweird.f32 %v11952_v26  ;;  %8926 = vpow2.f32 %v8525_v52  ;;  %vm4172_vm4 = vweird.f32 %v11927_v16  ;;  %v4192_v7 = vand.u32 2147483648, %v11890_v28  ;;  %vm12081_vm12 = vmor %vm3444_vm14, %vm3445_vm1 }
 0x3b9   : > { %v12035_v41 = vpop.eup %8920  ;;  %v8473_v39 = vmul.f32 -1.442695, %v12020_v11  ;;  %v2951_v58 = vadd.f32 %v11913_v42, %v15875_v21  ;;  %v4170_v13 = vadd.f32 %v11927_v16, %v4169_v14  ;;  %vm4186_vm6 = vweird.f32 %v11890_v28 }
 0x3ba   : > { %v4190_v48 = vand.u32 2147483647, %v11890_v28  ;;  %8928 = vpow2.f32 %v8524_v2  ;;  %v12046_v12 = vadd.f32 %v11919_v34, %v3442_v54  ;;  %v3456_v52 = vsub.f32 1.0, %v3455_v10  ;;  %vm12051_vm9 = vmor %vm4186_vm6, %vm4187_vm8 }
 0x3bb   : > { %v3471_v46 = vsub.f32 1.0, %v3470_v40  ;;  %v4177_v29 = vand.u32 2147483648, %v11871_v63  ;;  %v12055_v42 = vpop.eup %8922  ;;  %v3485_v14 = vmul.f32 %v12035_v41, %v11962_v61  ;;  %vm4171_vm11 = vweird.f32 %v11871_v63 }
 0x3bc   : > { %v4175_v28 = vand.u32 2147483647, %v11871_v63  ;;  %v4189_v2 = vsel %vm12051_vm9, %v11952_v26, %v4185_v9  ;;  %v12065_v10 = vmul.f32 %v3437_v36, %v11644_v6  ;;  %v3463_v40 = vand.u32 2147483647, %v11917_v5  ;;  %vm12071_vm10 = vmor %vm4171_vm11, %vm4172_vm4  ;;  %v12075_v63 = vpop.f32.mrf.mxu2  ;;  %v3692_v36 = vpop.f32.mrf.mxu3 }
 0x3bd   : > { %v8925_v54 = vpop.eup %8924  ;;  %v3465_v21 = vand.u32 2147483648, %v11917_v5  ;;  %v4193_v51 = vor.u32 1.1754944e-38, %v4192_v7  ;;  %vm3459_vm13 = vweird.f32 %v11917_v5  ;;  %v4174_v6 = vsel %vm12071_vm10, %v11927_v16, %v4170_v13  ;;  %v3784_v9 = vpop.f32.mrf.mxu1 }
 0x3be   : > { %15878 = vst [vmem:[#allocation15_spill] sm:$0xff] %v12065_v10  ;;  %v8927_v55 = vpop.eup %8926  ;;  %vm4191_vm8 = vcmp.eq.f32.partialorder %v4190_v48, 8.507059e+37  ;;  %8930 = vpow2.f32 %v8473_v39  ;;  %v12090_v26 = vadd.f32 %v11488_v27, %v2951_v58  ;;  %v3447_v49 = vsel %vm12081_vm12, %v11919_v34, %v12046_v12 }
 0x3bf   : > { %v3457_v7 = vmul.f32 %v11999_v47, %v3456_v52  ;;  %vm3474_vm14 = vweird.f32 %v11924_v0  ;;  %v4178_v18 = vor.u32 1.1754944e-38, %v4177_v29  ;;  %v4194_v24 = vsel %vm4191_vm8, %v4193_v51, %v4189_v2  ;;  %v15885_v52 = vld [vmem:[#allocation21_spill] sm:$0xff] }
 0x3c0   : > { %v8929_v62 = vpop.eup %8928  ;;  %v3472_v16 = vmul.f32 %v12006_v35, %v3471_v46  ;;  %v3486_v39 = vsub.f32 1.0, %v3485_v14  ;;  %vm4176_vm1 = vcmp.eq.f32.partialorder %v4175_v28, 8.507059e+37  ;;  %v12099_v58 = vadd.f32 1.0, %v8925_v54 }
 0x3c1   : > { %vm12101_vm4 = vcmp.eq.f32.partialorder %v3448_v31, 8.507059e+37  ;;  %v4179_v48 = vsel %vm4176_vm1, %v4178_v18, %v4174_v6  ;;  %v12105_v25 = vadd.f32 1.0, %v8927_v55  ;;  %v3785_v34 = vadd.f32 %v3784_v9, %v3692_v36 }
 0x3c2   : > { %v4506_v12 = vpack.c.bf16 %v11930_v37, %v11894_v3  ;;  %v3500_v51 = vmul.f32 %v12055_v42, %v11994_v8  ;;  %v4479_v29 = vmul.f32 %v4194_v24, %v11807_v45  ;;  %v8474_v46 = vmul.f32 -1.442695, %v12090_v26 }
 0x3c3   : > { %v3783_v31 = vadd.f32 %v12015_v15, %v12013_v53  ;;  %vm3460_vm6 = vweird.f32 %v11999_v47  ;;  %v3480_v18 = vand.u32 2147483648, %v11924_v0  ;;  %v12117_v55 = vadd.f32 1.0, %v8929_v62 }
 0x3c4   : > { %v2953_v14 = vadd.f32 %v12003_v50, %v15885_v52  ;;  %8550 = vmatmul.msk.bf16.gmra.mxu2 %vm4519_vm15, %v4506_v12  ;;  %v8931_v28 = vpop.eup %8930  ;;  %v3458_v2 = vadd.f32 %v11999_v47, %v3457_v7  ;;  %v4478_v24 = vmul.f32 %v4179_v48, %v11759_v23  ;;  %8932 = vrcp.f32 %v12099_v58  ;;  %v15886_v50 = vld [vmem:[#allocation5_spill] sm:$0xff]  ;;  %v15887_v23 = vld [vmem:[#allocation4_spill] sm:$0xff]  ;;  %vm12143_vm11 = vmor %vm3459_vm13, %vm3460_vm6  ;;  %v12170_v12 = vpop.f32.mrf.mxu2 }
 0x3c5   : > { %v12126_v45 = vadd.f32 %v11598_v43, %v3785_v34  ;;  %v3473_v53 = vadd.f32 %v12006_v35, %v3472_v16  ;;  %vm3475_vm9 = vweird.f32 %v12006_v35  ;;  %v3487_v15 = vmul.f32 %v12035_v41, %v3486_v39  ;;  %5860 = vrot.lane.b32.xlu2 %v15886_v50, %s9432_s1  ;;  %5892 = vrot.lane.b32.xlu0 %v15887_v23, %s9433_s20 }
 0x3c6   : > { %8934 = vrcp.f32 %v12105_v25  ;;  %v3501_v54 = vsub.f32 1.0, %v3500_v51  ;;  %v12137_v6 = vadd.f32 %v11598_v43, %v3783_v31  ;;  %v7209_v36 = vpack.c.bf16 %v4479_v29, %v4478_v24  ;;  %vm12165_vm12 = vmor %vm3474_vm14, %vm3475_vm9 }
 0x3c7   : > { %8936 = vpow2.f32 %v8474_v46  ;;  %v3478_v7 = vand.u32 2147483647, %v11924_v0  ;;  %v12148_v62 = vadd.f32 1.0, %v8931_v28  ;;  %v12152_v16 = vadd.f32 %v11488_v27, %v2953_v14 }
 0x3c8   : > { %8938 = vrcp.f32 %v12117_v55  ;;  %v3462_v39 = vsel %vm12143_vm11, %v11999_v47, %v3458_v2  ;;  %vm12157_vm10 = vcmp.eq.f32.partialorder %v3463_v40, 8.507059e+37  ;;  %v3466_v5 = vor.u32 1.1754944e-38, %v3465_v21  ;;  %8648 = vmatmul.msk.bf16.gmra.mxu0 %vm4519_vm15, %v7209_v36 }
 0x3c9   : > { %v8527_v27 = vmul.f32 -1.442695, %v12126_v45  ;;  %v3477_v47 = vsel %vm12165_vm12, %v12006_v35, %v3473_v53  ;;  %v3488_v40 = vadd.f32 %v12035_v41, %v3487_v15  ;;  %vm3490_vm13 = vweird.f32 %v12035_v41 }
 0x3ca   : > { %v3495_v0 = vand.u32 2147483648, %v11962_v61  ;;  %v12179_v21 = vpop.eup %8932  ;;  %v3452_v51 = vsel %vm12101_vm4, %v12022_v19, %v3447_v49  ;;  %v3481_v29 = vor.u32 1.1754944e-38, %v3480_v18  ;;  %v3502_v46 = vmul.f32 %v12055_v42, %v3501_v54  ;;  %v15896_v54 = vld [vmem:[#allocation22_spill] sm:$0xff] }
 0x3cb   : > { %v8526_v31 = vmul.f32 -1.442695, %v12137_v6  ;;  %vm3479_vm8 = vcmp.eq.f32.partialorder %v3478_v7, 8.507059e+37  ;;  %vm3489_vm14 = vweird.f32 %v11962_v61  ;;  %8940 = vrcp.f32 %v12148_v62  ;;  %v3695_v7 = vpop.f32.mrf.mxu3 }
 0x3cc   : > { %v12186_v52 = vpop.eup %8934  ;;  %v8475_v35 = vmul.f32 -1.442695, %v12152_v16  ;;  %v3467_v28 = vsel %vm12157_vm10, %v3466_v5, %v3462_v39  ;;  %v3482_v13 = vsel %vm3479_vm8, %v3481_v29, %v3477_v47  ;;  %vm12195_vm1 = vmor %vm3489_vm14, %vm3490_vm13  ;;  %v3493_v49 = vand.u32 2147483647, %v11962_v61  ;;  %v3787_v39 = vpop.f32.mrf.mxu1  ;;  %v12246_v29 = vld [vmem:[%s15665_s6] ss:$0 sm:$0xff] }
 0x3cd   : > { %v8937_v14 = vpop.eup %8936  ;;  %8942 = vpow2.f32 %v8527_v27  ;;  %v3492_v2 = vsel %vm12195_vm1, %v12035_v41, %v3488_v40  ;;  %v3496_v24 = vor.u32 1.1754944e-38, %v3495_v0  ;;  %vm3505_vm4 = vweird.f32 %v12055_v42 }
 0x3ce   : > { %v12200_v18 = vpop.eup %8938  ;;  %v3508_v53 = vand.u32 2147483647, %v11994_v8  ;;  %v3503_v15 = vadd.f32 %v12055_v42, %v3502_v46  ;;  %v4212_v23 = vmul.f32 %v12186_v52, %v12105_v25  ;;  %8944 = vpow2.f32 %v8526_v31  ;;  %v12254_v31 = vld [vmem:[%s15670_s11] ss:$0 sm:$0xff] }
 0x3cf   : > { %v2956_v61 = vadd.f32 %v12075_v63, %v15896_v54  ;;  %v3510_v36 = vand.u32 2147483648, %v11994_v8  ;;  %v3515_v9 = vmul.f32 %v12179_v21, %v12099_v58  ;;  %v12215_v41 = vadd.f32 1.0, %v8937_v14 }
 0x3d0   : > { %8946 = vpow2.f32 %v8475_v35  ;;  %v12218_v48 = vmul.f32 %v3452_v51, %v11735_v30  ;;  %vm3494_vm6 = vcmp.eq.f32.partialorder %v3493_v49, 8.507059e+37  ;;  %vm3504_vm9 = vweird.f32 %v11994_v8  ;;  %v6375_v35 = vld [vmem:[%s15671_s12 + $0x8] sm:$0x1] }
 0x3d1   : > { %v4197_v5 = vmul.f32 %v12200_v18, %v12117_v55  ;;  %v12223_v63 = vpop.eup %8940  ;;  %v12226_v34 = vmul.f32 %v3467_v28, %v11795_v22  ;;  %v3497_v27 = vsel %vm3494_vm6, %v3496_v24, %v3492_v2  ;;  %vm12230_vm11 = vmor %vm3504_vm9, %vm3505_vm4  ;;  %v3525_v30 = vand.u32 2147483648, %v12099_v58 }
 0x3d2   : > { %15897 = vst [vmem:[#allocation16_spill] sm:$0xff] %v12218_v48  ;;  %v4507_v8 = vpack.c.bf16 %v12009_v33, %v11970_v32  ;;  %v12238_v0 = vmul.f32 %v3482_v13, %v11804_v17  ;;  %v3507_v22 = vsel %vm12230_vm11, %v12055_v42, %v3503_v15  ;;  %v4213_v51 = vsub.f32 1.0, %v4212_v23  ;;  %v4580_v17 = vpop.f32.mrf.mxu2 }
 0x3d3   : > { %15898 = vst [vmem:[#allocation17_spill] sm:$0xff] %v12226_v34  ;;  %v8943_v40 = vpop.eup %8942  ;;  %v12249_v46 = vadd.f32 %v12246_v29, %v2956_v61  ;;  %vm3509_vm10 = vcmp.eq.f32.partialorder %v3508_v53, 8.507059e+37  ;;  %v3511_v42 = vor.u32 1.1754944e-38, %v3510_v36  ;;  %v3516_v14 = vsub.f32 1.0, %v3515_v9 }
 0x3d4   : > { %15901 = vst [vmem:[#allocation18_spill] sm:$0xff] %v12238_v0  ;;  %8948 = vrcp.f32 %v12215_v41  ;;  %8551 = vmatmul.msk.bf16.gmra.mxu2 %vm4519_vm15, %v4507_v8  ;;  %v8945_v28 = vpop.eup %8944  ;;  %v12262_v13 = vmul.f32 %v3497_v27, %v11842_v44  ;;  %v3530_v19 = vmul.f32 %v12223_v63, %v12148_v62  ;;  %v4198_v49 = vsub.f32 1.0, %v4197_v5 }
 0x3d5   : > { %v6385_v2 = vunpack.c.l.b16 %v6375_v35  ;;  %v12266_v15 = vsel %vm3509_vm10, %v3511_v42, %v3507_v22  ;;  %v3523_v53 = vand.u32 2147483647, %v12099_v58  ;;  %v12269_v23 = vor.u32 1.1754944e-38, %v3525_v30  ;;  %v3789_v35 = vpop.f32.mrf.mxu1 }
 0x3d6   : > { %15902 = vst [vmem:[#allocation19_spill] sm:$0xff] %v12262_v13  ;;  %v8947_v24 = vpop.eup %8946  ;;  %v12271_v54 = vadd.f32 1.0, %v8943_v40  ;;  %vm3520_vm12 = vweird.f32 %v12179_v21  ;;  %v4214_v61 = vmul.f32 %v12186_v52, %v4213_v51  ;;  %v8476_v44 = vmul.f32 -1.442695, %v12249_v46 }
 0x3d7   : > { %v12277_v36 = vadd.f32 %v12254_v31, %v4580_v17  ;;  %v3517_v9 = vmul.f32 %v12179_v21, %v3516_v14  ;;  %v12281_v27 = vadd.f32 1.0, %v8945_v28  ;;  %v6387_v47 = vpack.c.b16 %v6385_v2, %v6385_v2  ;;  %v3697_v17 = vpop.f32.mrf.mxu3 }
 0x3d8   : > { %vm3519_vm13 = vweird.f32 %v12099_v58  ;;  %v3531_v30 = vsub.f32 1.0, %v3530_v19  ;;  %v4199_v8 = vmul.f32 %v12200_v18, %v4198_v49  ;;  %v4207_v40 = vand.u32 2147483648, %v12117_v55 }
 0x3d9   : > { %v12286_v22 = vadd.f32 1.0, %v8947_v24  ;;  %vm4202_vm8 = vweird.f32 %v12200_v18  ;;  %vm4216_vm14 = vweird.f32 %v12105_v25  ;;  %vm4217_vm1 = vweird.f32 %v12186_v52 }
 0x3da   : > { %v12288_v51 = vpop.eup %8948  ;;  %8950 = vrcp.f32 %v12271_v54  ;;  %v4215_v42 = vadd.f32 %v12186_v52, %v4214_v61  ;;  %v3788_v14 = vadd.f32 %v3787_v39, %v3695_v7  ;;  %v8558_v28 = vmul.f32 -1.442695, %v12277_v36  ;;  %v4582_v7 = vpop.f32.mrf.mxu2  ;;  %vm12311_vm6 = vmor %vm4216_vm14, %vm4217_vm1 }
 0x3db   : > { %8952 = vpow2.f32 %v8476_v44  ;;  %v4220_v19 = vand.u32 2147483647, %v12105_v25  ;;  %v4222_v49 = vand.u32 2147483648, %v12105_v25  ;;  %v6423_v2 = vsel %vm15710_vm0, %v6387_v47, 0 }
 0x3dc   : > { %8954 = vrcp.f32 %v12281_v27  ;;  %v4200_v24 = vadd.f32 %v12200_v18, %v4199_v8  ;;  %v3545_v5 = vmul.f32 %v12288_v51, %v12215_v41  ;;  %6431 = vmatpush.bf16.msra.mxu3 %v6423_v2  ;;  %v3790_v61 = vadd.f32 %v3789_v35, %v3697_v17  ;;  %v15905_v8 = vld [vmem:[#allocation23_spill] sm:$0xff] }
 0x3dd   : > { %8956 = vrcp.f32 %v12286_v22  ;;  %v3518_v39 = vadd.f32 %v12179_v21, %v3517_v9  ;;  %v3540_v44 = vand.u32 2147483648, %v12148_v62  ;;  %vm4201_vm4 = vweird.f32 %v12117_v55 }
 0x3de   : > { %v2958_v33 = vadd.f32 %v12170_v12, %v15905_v8  ;;  %vm12317_vm9 = vcmp.eq.f32.partialorder %v3523_v53, 8.507059e+37  ;;  %vm3534_vm11 = vweird.f32 %v12148_v62  ;;  %v4205_v9 = vand.u32 2147483647, %v12117_v55  ;;  %vm12334_vm10 = vmor %vm4201_vm4, %vm4202_vm8 }
 0x3df   : > { %v4219_v35 = vsel %vm12311_vm6, %v12186_v52, %v4215_v42  ;;  %v12327_v25 = vadd.f32 %v11598_v43, %v3788_v14  ;;  %8958 = vpow2.f32 %v8558_v28  ;;  %v3532_v12 = vmul.f32 %v12223_v63, %v3531_v30  ;;  %v12347_v30 = vld [vmem:[%s15668_s9] ss:$0 sm:$0xff]  ;;  %vm12358_vm8 = vmor %vm3519_vm13, %vm3520_vm12 }
 0x3e0   : > { %v12329_v2 = vpop.eup %8950  ;;  %v4208_v8 = vor.u32 1.1754944e-38, %v4207_v40  ;;  %v4223_v55 = vor.u32 1.1754944e-38, %v4222_v49  ;;  %v12339_v32 = vadd.f32 %v12254_v31, %v4582_v7  ;;  %v4204_v43 = vsel %vm12334_vm10, %v12200_v18, %v4200_v24 }
 0x3e1   : > { %v8953_v52 = vpop.eup %8952  ;;  %v3546_v42 = vsub.f32 1.0, %v3545_v5  ;;  %vm4221_vm14 = vcmp.eq.f32.partialorder %v4220_v19, 8.507059e+37  ;;  %v12350_v14 = vadd.f32 %v12347_v30, %v3790_v61  ;;  %v12363_v5 = vadd.f32 %v12246_v29, %v2958_v33 }
 0x3e2   : > { %v12352_v40 = vpop.eup %8954  ;;  %v4224_v18 = vsel %vm4221_vm14, %v4223_v55, %v4219_v35  ;;  %v8559_v19 = vmul.f32 -1.442695, %v12339_v32  ;;  %v4508_v49 = vpack.c.bf16 %v12218_v48, %v12065_v10  ;;  %v3522_v61 = vsel %vm12358_vm8, %v12179_v21, %v3518_v39 }
 0x3e3   : > { %v12368_v24 = vpop.eup %8956  ;;  %vm4206_vm1 = vcmp.eq.f32.partialorder %v4205_v9, 8.507059e+37  ;;  %v4242_v58 = vmul.f32 %v12329_v2, %v12271_v54  ;;  %v8528_v7 = vmul.f32 -1.442695, %v12327_v25  ;;  %vm3535_vm12 = vweird.f32 %v12223_v63 }
 0x3e4   : > { %v4209_v33 = vsel %vm4206_vm1, %v4208_v8, %v4204_v43  ;;  %v12377_v29 = vadd.f32 1.0, %v8953_v52  ;;  %8960 = vpow2.f32 %v8559_v19  ;;  %8552 = vmatmul.msk.bf16.gmra.mxu2 %vm4519_vm15, %v4508_v49  ;;  %v3533_v35 = vadd.f32 %v12223_v63, %v3532_v12  ;;  %vm12405_vm4 = vmor %vm3534_vm11, %vm3535_vm12  ;;  %v3792_v49 = vpop.f32.mrf.mxu1 }
 0x3e5   : > { %v8959_v47 = vpop.eup %8958  ;;  %v4481_v53 = vmul.f32 %v4224_v18, %v11976_v59  ;;  %v4227_v21 = vmul.f32 %v12352_v40, %v12281_v27  ;;  %v8529_v39 = vmul.f32 -1.442695, %v12350_v14  ;;  %v15912_v9 = vand.u32 2147483647, %v12148_v62 }
 0x3e6   : > { %v3547_v8 = vmul.f32 %v12288_v51, %v3546_v42  ;;  %v3560_v52 = vmul.f32 %v12368_v24, %v12286_v22  ;;  %v8477_v12 = vmul.f32 -1.442695, %v12363_v5  ;;  %v3541_v43 = vor.u32 1.1754944e-38, %v3540_v44  ;;  %v3700_v44 = vpop.f32.mrf.mxu3 }
 0x3e7   : > { %vm12387_vm13 = vcmp.eq.f32.partialorder %v15912_v9, 8.507059e+37  ;;  %v4480_v59 = vmul.f32 %v4209_v33, %v11997_v56  ;;  %v4243_v28 = vsub.f32 1.0, %v4242_v58  ;;  %8962 = vpow2.f32 %v8528_v7  ;;  %v4585_v33 = vpop.f32.mrf.mxu2 }
 0x3e8   : > { %v12399_v18 = vsel %vm12317_vm9, %v12269_v23, %v3522_v61  ;;  %v3555_v19 = vand.u32 2147483648, %v12215_v41  ;;  %8964 = vrcp.f32 %v12377_v29  ;;  %v12411_v56 = vadd.f32 1.0, %v8959_v47 }
 0x3e9   : > { %v3537_v23 = vsel %vm12405_vm4, %v12223_v63, %v3533_v35  ;;  %v4228_v17 = vsub.f32 1.0, %v4227_v21  ;;  %8966 = vpow2.f32 %v8529_v39  ;;  %v7210_v61 = vpack.c.bf16 %v4481_v53, %v4480_v59 }
 0x3ea   : > { %v8961_v62 = vpop.eup %8960  ;;  %v12417_v58 = vadd.f32 %v12288_v51, %v3547_v8  ;;  %vm3550_vm6 = vweird.f32 %v12288_v51  ;;  %v3561_v7 = vsub.f32 1.0, %v3560_v52  ;;  %8968 = vpow2.f32 %v8477_v12 }
 0x3eb   : > { %vm3549_vm9 = vweird.f32 %v12215_v41  ;;  %v3553_v47 = vand.u32 2147483647, %v12215_v41  ;;  %v4244_v9 = vmul.f32 %v12329_v2, %v4243_v28  ;;  %v12423_v42 = vadd.f32 1.0, %v8961_v62  ;;  %8649 = vmatmul.msk.bf16.gmra.mxu0 %vm4519_vm15, %v7210_v61 }
 0x3ec   : > { %v12428_v63 = vsel %vm12387_vm13, %v3541_v43, %v3537_v23  ;;  %v12430_v35 = vor.u32 1.1754944e-38, %v3555_v19  ;;  %8970 = vrcp.f32 %v12411_v56  ;;  %vm12434_vm11 = vmor %vm3549_vm9, %vm3550_vm6  ;;  %vm3564_vm10 = vweird.f32 %v12286_v22  ;;  %v3794_v39 = vpop.f32.mrf.mxu1 }
 0x3ed   : > { %v8963_v21 = vpop.eup %8962  ;;  %v4229_v8 = vmul.f32 %v12352_v40, %v4228_v17  ;;  %8972 = vrcp.f32 %v12423_v42  ;;  %v12443_v55 = vadd.f32 %v12254_v31, %v4585_v33  ;;  %v3552_v12 = vsel %vm12434_vm11, %v12288_v51, %v12417_v58 }
 0x3ee   : > { %v12445_v52 = vpop.eup %8964  ;;  %v3562_v43 = vmul.f32 %v12368_v24, %v3561_v7  ;;  %vm3565_vm14 = vweird.f32 %v12368_v24  ;;  %vm4231_vm8 = vweird.f32 %v12281_v27  ;;  %v4235_v28 = vand.u32 2147483647, %v12281_v27  ;;  %v3702_v33 = vpop.f32.mrf.mxu3 }
 0x3ef   : > { %v8967_v59 = vpop.eup %8966  ;;  %v4237_v19 = vand.u32 2147483648, %v12281_v27  ;;  %v4245_v23 = vadd.f32 %v12329_v2, %v4244_v9  ;;  %vm4247_vm1 = vweird.f32 %v12329_v2  ;;  %vm12458_vm12 = vcmp.eq.f32.partialorder %v3553_v47, 8.507059e+37 }
 0x3f0   : > { %v8969_v17 = vpop.eup %8968  ;;  %v4250_v51 = vand.u32 2147483647, %v12271_v54  ;;  %v4252_v62 = vand.u32 2147483648, %v12271_v54  ;;  %v12464_v58 = vadd.f32 1.0, %v8963_v21  ;;  %v3793_v7 = vadd.f32 %v3792_v49, %v3700_v44  ;;  %v4587_v21 = vpop.f32.mrf.mxu2 }
 0x3f1   : > { %v4230_v53 = vadd.f32 %v12352_v40, %v4229_v8  ;;  %vm4232_vm13 = vweird.f32 %v12352_v40  ;;  %vm4246_vm4 = vweird.f32 %v12271_v54  ;;  %v8560_v47 = vmul.f32 -1.442695, %v12443_v55 }
 0x3f2   : > { %v12470_v9 = vpop.eup %8970  ;;  %v3563_v41 = vadd.f32 %v12368_v24, %v3562_v43  ;;  %v3575_v48 = vmul.f32 %v12445_v52, %v12377_v29  ;;  %vm12477_vm6 = vmor %vm4246_vm4, %vm4247_vm1  ;;  %v12481_v49 = vadd.f32 1.0, %v8967_v59  ;;  %v4509_v54 = vpack.c.bf16 %v12238_v0, %v12226_v34 }
 0x3f3   : > { %v12485_v8 = vpop.eup %8972  ;;  %v4249_v43 = vsel %vm12477_vm6, %v12329_v2, %v4245_v23  ;;  %v12490_v10 = vadd.f32 1.0, %v8969_v17  ;;  %v3795_v37 = vadd.f32 %v3794_v39, %v3702_v33  ;;  %v12493_v3 = vadd.f32 %v12254_v31, %v4587_v21  ;;  %vm12499_vm9 = vmor %vm4231_vm8, %vm4232_vm13 }
 0x3f4   : > { %vm4251_vm11 = vcmp.eq.f32.partialorder %v4250_v51, 8.507059e+37  ;;  %v4253_v0 = vor.u32 1.1754944e-38, %v4252_v62  ;;  %8974 = vrcp.f32 %v12464_v58  ;;  %v12505_v2 = vadd.f32 %v12347_v30, %v3793_v7  ;;  %8553 = vmatmul.msk.bf16.gmra.mxu2 %vm4519_vm15, %v4509_v54  ;;  %vm12518_vm8 = vmor %vm3564_vm10, %vm3565_vm14 }
 0x3f5   : > { %v4234_v23 = vsel %vm12499_vm9, %v12352_v40, %v4230_v53  ;;  %v4804_v27 = vmul.f32 %v12485_v8, %v12423_v42  ;;  %8976 = vpow2.f32 %v8560_v47  ;;  %v8561_v17 = vmul.f32 -1.442695, %v12493_v3 }
 0x3f6   : > { %v4238_v62 = vor.u32 1.1754944e-38, %v4237_v19  ;;  %v4254_v7 = vsel %vm4251_vm11, %v4253_v0, %v4249_v43  ;;  %v4789_v33 = vmul.f32 %v12470_v9, %v12411_v56  ;;  %8978 = vrcp.f32 %v12481_v49 }
 0x3f7   : > { %v3567_v40 = vsel %vm12518_vm8, %v12368_v24, %v3563_v41  ;;  %vm4236_vm1 = vcmp.eq.f32.partialorder %v4235_v28, 8.507059e+37  ;;  %8980 = vrcp.f32 %v12490_v10  ;;  %v12530_v53 = vadd.f32 %v12347_v30, %v3795_v37 }
 0x3f8   : > { %v4239_v39 = vsel %vm4236_vm1, %v4238_v62, %v4234_v23  ;;  %v3576_v47 = vsub.f32 1.0, %v3575_v48  ;;  %v8530_v19 = vmul.f32 -1.442695, %v12505_v2  ;;  %8982 = vpow2.f32 %v8561_v17 }
 0x3f9   : > { %v3557_v0 = vsel %vm12458_vm12, %v12430_v35, %v3552_v12  ;;  %v15927_v44 = vand.u32 2147483648, %v12286_v22  ;;  %v4483_v24 = vmul.f32 %v4254_v7, %v12126_v45  ;;  %v4805_v41 = vsub.f32 1.0, %v4804_v27 }
 0x3fa   : > { %v12539_v28 = vpop.eup %8974  ;;  %v12543_v37 = vmul.f32 %v12266_v15, %v11860_v4  ;;  %v12547_v48 = vmul.f32 %v12399_v18, %v11965_v38  ;;  %v15930_v54 = vand.u32 2147483647, %v12286_v22  ;;  %v4790_v35 = vsub.f32 1.0, %v4789_v33 }
 0x3fb   : > { %v3571_v21 = vor.u32 1.1754944e-38, %v15927_v44  ;;  %v8977_v12 = vpop.eup %8976  ;;  %v4482_v43 = vmul.f32 %v4239_v39, %v12137_v6  ;;  %v3585_v45 = vand.u32 2147483648, %v12377_v29  ;;  %v8531_v59 = vmul.f32 -1.442695, %v12530_v53 }
 0x3fc   : > { %15928 = vst [vmem:[#allocation20_spill] sm:$0xff] %v12543_v37  ;;  %vm3569_vm10 = vcmp.eq.f32.partialorder %v15930_v54, 8.507059e+37  ;;  %v12554_v23 = vpop.eup %8978  ;;  %v12558_v4 = vmul.f32 %v12428_v63, %v12020_v11  ;;  %v12561_v38 = vmul.f32 %v3557_v0, %v12090_v26  ;;  %v3577_v15 = vmul.f32 %v12445_v52, %v3576_v47 }
 0x3fd   : > { %15929 = vst [vmem:[#allocation21_spill] sm:$0xff] %v12547_v48  ;;  %v3572_v61 = vsel %vm3569_vm10, %v3571_v21, %v3567_v40  ;;  %8984 = vpow2.f32 %v8530_v19  ;;  %v12564_v22 = vpop.eup %8980  ;;  %vm3579_vm14 = vweird.f32 %v12377_v29  ;;  %v4257_v6 = vmul.f32 %v12539_v28, %v12464_v58  ;;  %v3705_v40 = vpop.f32.mrf.mxu3 }
 0x3fe   : > { %15931 = vst [vmem:[#allocation5_spill] sm:$0xff] %v12558_v4  ;;  %v4806_v18 = vmul.f32 %v12485_v8, %v4805_v41  ;;  %v7211_v27 = vpack.c.bf16 %v4483_v24, %v4482_v43  ;;  %v8983_v17 = vpop.eup %8982  ;;  %v12571_v11 = vmul.f32 %v3572_v61, %v12152_v16  ;;  %v3583_v26 = vand.u32 2147483647, %v12377_v29  ;;  %v3797_v19 = vpop.f32.mrf.mxu1 }
 0x3ff   : > { %15932 = vst [vmem:[#allocation4_spill] sm:$0xff] %v12561_v38  ;;  %v4791_v63 = vmul.f32 %v12470_v9, %v4790_v35  ;;  %v12575_v51 = vadd.f32 1.0, %v8977_v12  ;;  %v12577_v62 = vor.u32 1.1754944e-38, %v3585_v45  ;;  %v4272_v7 = vmul.f32 %v12554_v23, %v12481_v49 }
 0x400   : > { %15933 = vst [vmem:[#allocation22_spill] sm:$0xff] %v12571_v11  ;;  %8986 = vpow2.f32 %v8531_v59  ;;  %v12581_v33 = vadd.f32 1.0, %v8983_v17  ;;  %8650 = vmatmul.msk.bf16.gmra.mxu0 %vm4519_vm15, %v7211_v27  ;;  %v12585_v16 = vadd.f32 %v12445_v52, %v3577_v15  ;;  %vm3580_vm12 = vweird.f32 %v12445_v52  ;;  %v4590_v15 = vpop.f32.mrf.mxu2 }
 0x401   : > { %v3590_v39 = vmul.f32 %v12564_v22, %v12490_v10  ;;  %v3600_v47 = vand.u32 2147483648, %v12490_v10  ;;  %v4258_v0 = vsub.f32 1.0, %v4257_v6  ;;  %v4807_v44 = vadd.f32 %v12485_v8, %v4806_v18  ;;  %vm12618_vm8 = vmor %vm3579_vm14, %vm3580_vm12 }
 0x402   : > { %vm4809_vm13 = vweird.f32 %v12485_v8  ;;  %v4510_v21 = vpack.c.bf16 %v12543_v37, %v12262_v13  ;;  %v4792_v41 = vadd.f32 %v12470_v9, %v4791_v63  ;;  %vm4794_vm4 = vweird.f32 %v12470_v9 }
 0x403   : > { %v8985_v24 = vpop.eup %8984  ;;  %v4814_v54 = vand.u32 2147483648, %v12423_v42  ;;  %8988 = vrcp.f32 %v12575_v51  ;;  %v4273_v35 = vsub.f32 1.0, %v4272_v7  ;;  %vm4808_vm6 = vweird.f32 %v12423_v42 }
 0x404   : > { %v4812_v12 = vand.u32 2147483647, %v12423_v42  ;;  %8990 = vrcp.f32 %v12581_v33  ;;  %v12603_v43 = vor.u32 1.1754944e-38, %v3600_v47  ;;  %vm4793_vm9 = vweird.f32 %v12411_v56  ;;  %vm12609_vm11 = vmor %vm4808_vm6, %vm4809_vm13  ;;  %8554 = vmatmul.msk.bf16.gmra.mxu2 %vm4519_vm15, %v4510_v21 }
 0x405   : > { %v4799_v45 = vand.u32 2147483648, %v12411_v56  ;;  %v3591_v18 = vsub.f32 1.0, %v3590_v39  ;;  %v4797_v27 = vand.u32 2147483647, %v12411_v56  ;;  %v4811_v17 = vsel %vm12609_vm11, %v12485_v8, %v4807_v44  ;;  %vm12634_vm1 = vmor %vm4793_vm9, %vm4794_vm4 }
 0x406   : > { %v8987_v42 = vpop.eup %8986  ;;  %v12626_v63 = vadd.f32 1.0, %v8985_v24  ;;  %v4815_v39 = vor.u32 1.1754944e-38, %v4814_v54  ;;  %v3798_v21 = vadd.f32 %v3797_v19, %v3705_v40  ;;  %v12639_v56 = vadd.f32 %v12254_v31, %v4590_v15 }
 0x407   : > { %v4259_v8 = vmul.f32 %v12539_v28, %v4258_v0  ;;  %vm4261_vm10 = vweird.f32 %v12464_v58  ;;  %v4796_v44 = vsel %vm12634_vm1, %v12470_v9, %v4792_v41  ;;  %v4274_v24 = vmul.f32 %v12554_v23, %v4273_v35  ;;  %v3707_v9 = vpop.f32.mrf.mxu3 }
 0x408   : > { %vm4813_vm14 = vcmp.eq.f32.partialorder %v4812_v12, 8.507059e+37  ;;  %v4265_v61 = vand.u32 2147483647, %v12464_v58  ;;  %v4800_v54 = vor.u32 1.1754944e-38, %v4799_v45  ;;  %v12650_v19 = vadd.f32 1.0, %v8987_v42  ;;  %v3799_v45 = vpop.f32.mrf.mxu1 }
 0x409   : > { %v12647_v59 = vpop.eup %8988  ;;  %v4816_v40 = vsel %vm4813_vm14, %v4815_v39, %v4811_v17  ;;  %v3592_v0 = vmul.f32 %v12564_v22, %v3591_v18  ;;  %vm3594_vm12 = vweird.f32 %v12490_v10  ;;  %v4267_v47 = vand.u32 2147483648, %v12464_v58 }
 0x40a   : > { %v12652_v15 = vpop.eup %8990  ;;  %vm4798_vm13 = vcmp.eq.f32.partialorder %v4797_v27, 8.507059e+37  ;;  %8992 = vrcp.f32 %v12626_v63  ;;  %vm4262_vm4 = vweird.f32 %v12539_v28  ;;  %v12660_v35 = vadd.f32 %v12347_v30, %v3798_v21 }
 0x40b   : > { %v4801_v41 = vsel %vm4798_vm13, %v4800_v54, %v4796_v44  ;;  %v8562_v12 = vmul.f32 -1.442695, %v12639_v56  ;;  %v4260_v42 = vadd.f32 %v12539_v28, %v4259_v8  ;;  %v4275_v18 = vadd.f32 %v12554_v23, %v4274_v24  ;;  %vm12704_vm13 = vmor %vm4261_vm10, %vm4262_vm4 }
 0x40c   : > { %vm4277_vm6 = vweird.f32 %v12554_v23  ;;  %v5269_v27 = vmul.f32 %v4816_v40, %v12339_v32  ;;  %vm12669_vm9 = vcmp.eq.f32.partialorder %v3583_v26, 8.507059e+37  ;;  %v4819_v39 = vmul.f32 %v12647_v59, %v12575_v51  ;;  %v4592_v26 = vpop.f32.mrf.mxu2 }
 0x40d   : > { %8994 = vrcp.f32 %v12650_v19  ;;  %v4834_v21 = vmul.f32 %v12652_v15, %v12581_v33  ;;  %v3800_v8 = vadd.f32 %v3799_v45, %v3707_v9  ;;  %v5268_v44 = vmul.f32 %v4801_v41, %v12277_v36 }
 0x40e   : > { %vm4276_vm11 = vweird.f32 %v12481_v49  ;;  %v4280_v32 = vand.u32 2147483647, %v12481_v49  ;;  %v4282_v29 = vand.u32 2147483648, %v12481_v49  ;;  %v8532_v54 = vmul.f32 -1.442695, %v12660_v35 }
 0x40f   : > { %vm12682_vm1 = vmor %vm4276_vm11, %vm4277_vm6  ;;  %8996 = vpow2.f32 %v8562_v12  ;;  %v12688_v40 = vadd.f32 %v12347_v30, %v3800_v8  ;;  %v12691_v9 = vadd.f32 %v12254_v31, %v4592_v26  ;;  %v3593_v41 = vadd.f32 %v12564_v22, %v3592_v0 }
 0x410   : > { %v12693_v36 = vpop.eup %8992  ;;  %vm3595_vm14 = vweird.f32 %v12564_v22  ;;  %v4268_v49 = vor.u32 1.1754944e-38, %v4267_v47  ;;  %v4279_v45 = vsel %vm12682_vm1, %v12554_v23, %v4275_v18  ;;  %v5301_v8 = vpack.c.bf16 %v5269_v27, %v5269_v27 }
 0x411   : > { %v4820_v26 = vsub.f32 1.0, %v4819_v39  ;;  %v4835_v7 = vsub.f32 1.0, %v4834_v21  ;;  %v8533_v0 = vmul.f32 -1.442695, %v12688_v40  ;;  %v4264_v47 = vsel %vm12704_vm13, %v12539_v28, %v4260_v42  ;;  %vm12717_vm10 = vmor %vm3594_vm12, %vm3595_vm14 }
 0x412   : > { %vm4281_vm6 = vcmp.eq.f32.partialorder %v4280_v32, 8.507059e+37  ;;  %v4283_v24 = vor.u32 1.1754944e-38, %v4282_v29  ;;  %v8563_v23 = vmul.f32 -1.442695, %v12691_v9  ;;  %v5300_v27 = vpack.c.bf16 %v5268_v44, %v5268_v44 }
 0x413   : > { %v12713_v18 = vpop.eup %8994  ;;  %v4287_v39 = vmul.f32 %v12693_v36, %v12626_v63  ;;  %8998 = vpow2.f32 %v8532_v54  ;;  %v4511_v28 = vpack.c.bf16 %v12558_v4, %v12547_v48  ;;  %v3597_v42 = vsel %vm12717_vm10, %v12564_v22, %v3593_v41 }
 0x414   : > { %vm4266_vm4 = vcmp.eq.f32.partialorder %v4265_v61, 8.507059e+37  ;;  %v4284_v21 = vsel %vm4281_vm6, %v4283_v24, %v4279_v45  ;;  %9000 = vpow2.f32 %v8533_v0  ;;  %v5365_v12 = vunpack.c.l.b16 %v5301_v8 }
 0x415   : > { %v8997_v32 = vpop.eup %8996  ;;  %v4269_v29 = vsel %vm4266_vm4, %v4268_v49, %v4264_v47  ;;  %v4821_v37 = vmul.f32 %v12647_v59, %v4820_v26  ;;  %v4836_v44 = vmul.f32 %v12652_v15, %v4835_v7  ;;  %8555 = vmatmul.msk.bf16.gmra.mxu2 %vm4519_vm15, %v4511_v28  ;;  %v15948_v54 = vsel %vm12618_vm8, %v12445_v52, %v12585_v16  ;;  %v3802_v28 = vpop.f32.mrf.mxu1 }
 0x416   : > { %v12739_v22 = vsel %vm12669_vm9, %v12577_v62, %v15948_v54  ;;  %v15949_v61 = vand.u32 2147483647, %v12490_v10  ;;  %v4302_v41 = vmul.f32 %v12713_v18, %v12650_v19  ;;  %9002 = vpow2.f32 %v8563_v23 }
 0x417   : > { %v5364_v49 = vunpack.c.l.b16 %v5300_v27  ;;  %v4485_v6 = vmul.f32 %v4284_v21, %v12350_v14  ;;  %v4288_v45 = vsub.f32 1.0, %v4287_v39  ;;  %v4484_v52 = vmul.f32 %v4269_v29, %v12327_v25  ;;  %v3710_v29 = vpop.f32.mrf.mxu3 }
 0x418   : > { %vm3599_vm12 = vcmp.eq.f32.partialorder %v15949_v61, 8.507059e+37  ;;  %vm4823_vm8 = vweird.f32 %v12575_v51  ;;  %vm4824_vm9 = vweird.f32 %v12647_v59  ;;  %v12752_v62 = vadd.f32 1.0, %v8997_v32 }
 0x419   : > { %v12746_v7 = vsel %vm3599_vm12, %v12603_v43, %v3597_v42  ;;  %v8999_v10 = vpop.eup %8998  ;;  %v12754_v16 = vpack.c.b16 %v5365_v12, %v5364_v49  ;;  %v4822_v17 = vadd.f32 %v12647_v59, %v4821_v37  ;;  %v4837_v43 = vadd.f32 %v12652_v15, %v4836_v44  ;;  %vm12763_vm1 = vmor %vm4823_vm8, %vm4824_vm9 }
 0x41a   : > { %vm4839_vm11 = vweird.f32 %v12652_v15  ;;  %v9001_v8 = vpop.eup %9000  ;;  %v4827_v14 = vand.u32 2147483647, %v12575_v51  ;;  %v4829_v25 = vand.u32 2147483648, %v12575_v51  ;;  %v4303_v26 = vsub.f32 1.0, %v4302_v41 }
 0x41b   : > { %v4844_v0 = vand.u32 2147483648, %v12581_v33  ;;  %v4289_v47 = vmul.f32 %v12693_v36, %v4288_v45  ;;  %vm4838_vm14 = vweird.f32 %v12581_v33  ;;  %v4842_v37 = vand.u32 2147483647, %v12581_v33 }
 0x41c   : > { %v7212_v23 = vpack.c.bf16 %v4485_v6, %v4484_v52  ;;  %v9003_v58 = vpop.eup %9002  ;;  %vm4291_vm13 = vweird.f32 %v12626_v63  ;;  %v4295_v27 = vand.u32 2147483647, %v12626_v63  ;;  %vm12771_vm6 = vmor %vm4838_vm14, %vm4839_vm11  ;;  %v12775_v39 = vadd.f32 1.0, %v8999_v10 }
 0x41d   : > { %9004 = vrcp.f32 %v12752_v62  ;;  %v5413_v42 = vshrl.u32 %v12754_v16, 16  ;;  %v4826_v33 = vsel %vm12763_vm1, %v12647_v59, %v4822_v17  ;;  %v4841_v21 = vsel %vm12771_vm6, %v12652_v15, %v4837_v43  ;;  %v4595_v59 = vpop.f32.mrf.mxu2 }
 0x41e   : > { %v12785_v32 = vadd.f32 1.0, %v9001_v8  ;;  %8651 = vmatmul.msk.bf16.gmra.mxu0 %vm4519_vm15, %v7212_v23  ;;  %v4830_v12 = vor.u32 1.1754944e-38, %v4829_v25  ;;  %v4304_v44 = vmul.f32 %v12713_v18, %v4303_v26  ;;  %v4845_v54 = vor.u32 1.1754944e-38, %v4844_v0 }
 0x41f   : > { %v12789_v61 = vadd.f32 1.0, %v9003_v58  ;;  %v4290_v41 = vadd.f32 %v12693_v36, %v4289_v47  ;;  %vm4292_vm10 = vweird.f32 %v12693_v36  ;;  %vm4828_vm4 = vcmp.eq.f32.partialorder %v4827_v14, 8.507059e+37  ;;  %v3804_v58 = vpop.f32.mrf.mxu1 }
 0x420   : > { %vm4843_vm12 = vcmp.eq.f32.partialorder %v4842_v37, 8.507059e+37  ;;  %v4297_v15 = vand.u32 2147483648, %v12626_v63  ;;  %v4831_v49 = vsel %vm4828_vm4, %v4830_v12, %v4826_v33  ;;  %9006 = vrcp.f32 %v12775_v39  ;;  %vm12804_vm9 = vmor %vm4291_vm13, %vm4292_vm10 }
 0x421   : > { %v4846_v6 = vsel %vm4843_vm12, %v4845_v54, %v4841_v21  ;;  %v12795_v45 = vrot.slane %v5413_v42, 7  ;;  %vm4307_vm8 = vweird.f32 %v12713_v18  ;;  %v4312_v52 = vand.u32 2147483648, %v12650_v19 }
 0x422   : > { %9008 = vrcp.f32 %v12785_v32  ;;  %v4305_v43 = vadd.f32 %v12713_v18, %v4304_v44  ;;  %v3803_v8 = vadd.f32 %v3802_v28, %v3710_v29  ;;  %v12811_v14 = vadd.f32 %v12254_v31, %v4595_v59  ;;  %v3712_v29 = vpop.f32.mrf.mxu3 }
 0x423   : > { %v12800_v10 = vpop.eup %9004  ;;  %9010 = vrcp.f32 %v12789_v61  ;;  %v4294_v25 = vsel %vm12804_vm9, %v12693_v36, %v4290_v41  ;;  %v5270_v26 = vmul.f32 %v4831_v49, %v12443_v55  ;;  %v5271_v63 = vmul.f32 %v4846_v6, %v12493_v3 }
 0x424   : > { %v4512_v0 = vpack.c.bf16 %v12571_v11, %v12561_v38  ;;  %v5416_v47 = vshll.u32 %v12754_v16, 16  ;;  %v4298_v24 = vor.u32 1.1754944e-38, %v4297_v15  ;;  %vm4306_vm11 = vweird.f32 %v12650_v19 }
 0x425   : > { %v4310_v37 = vand.u32 2147483647, %v12650_v19  ;;  %v12825_v23 = vmul.f32 %v12739_v22, %v12249_v46  ;;  %vm4296_vm1 = vcmp.eq.f32.partialorder %v4295_v27, 8.507059e+37  ;;  %vm12829_vm14 = vmor %vm4306_vm11, %vm4307_vm8  ;;  %v4849_v3 = vmul.f32 %v12800_v10, %v12752_v62  ;;  %v4597_v15 = vpop.f32.mrf.mxu2 }
 0x426   : > { %v8564_v36 = vmul.f32 -1.442695, %v12811_v14  ;;  %8556 = vmatmul.msk.bf16.gmra.mxu2 %vm4519_vm15, %v4512_v0  ;;  %v12837_v16 = vpop.eup %9006  ;;  %v4299_v19 = vsel %vm4296_vm1, %v4298_v24, %v4294_v25  ;;  %v4309_v46 = vsel %vm12829_vm14, %v12713_v18, %v4305_v43  ;;  %v12843_v22 = vadd.f32 %v12347_v30, %v3803_v8 }
 0x427   : > { %15956 = vst [vmem:[#allocation23_spill] sm:$0xff] %v12825_v23  ;;  %v5418_v27 = vor.u32 %v5416_v47, %v12795_v45  ;;  %v12850_v28 = vmul.f32 %v12746_v7, %v12363_v5  ;;  %v5302_v42 = vpack.c.bf16 %v5270_v26, %v5270_v26  ;;  %v4313_v33 = vor.u32 1.1754944e-38, %v4312_v52 }
 0x428   : > { %v12846_v51 = vpop.eup %9008  ;;  %v5303_v21 = vpack.c.bf16 %v5271_v63, %v5271_v63  ;;  %vm4311_vm13 = vcmp.eq.f32.partialorder %v4310_v37, 8.507059e+37  ;;  %9012 = vpow2.f32 %v8564_v36  ;;  %v3805_v54 = vadd.f32 %v3804_v58, %v3712_v29 }
 0x429   : > { %15959 = vst [vmem:[#allocation32_spill] sm:$0xff] %v12850_v28  ;;  %v12852_v12 = vpop.eup %9010  ;;  %v12856_v44 = vsel %vm9537_vm2, 0, %v5418_v27  ;;  %v4486_v41 = vmul.f32 %v4299_v19, %v12505_v2  ;;  %v4314_v59 = vsel %vm4311_vm13, %v4313_v33, %v4309_v46  ;;  %v4317_v5 = vmul.f32 %v12837_v16, %v12775_v39 }
 0x42a   : > { %v4850_v7 = vsub.f32 1.0, %v4849_v3  ;;  %5924 = vrot.lane.b32.xlu1 %v12856_v44, %s9434_s19  ;;  %v4332_v49 = vmul.f32 %v12846_v51, %v12785_v32  ;;  %v8534_v6 = vmul.f32 -1.442695, %v12843_v22  ;;  %v12867_v52 = vadd.f32 %v12347_v30, %v3805_v54 }
 0x42b   : > { %v12870_v2 = vadd.f32 %v12254_v31, %v4597_v15  ;;  %v5366_v17 = vunpack.c.l.b16 %v5302_v42  ;;  %v5367_v43 = vunpack.c.l.b16 %v5303_v21  ;;  %v4327_v8 = vand.u32 2147483648, %v12775_v39 }
 0x42c   : > { %v4864_v25 = vmul.f32 %v12852_v12, %v12789_v61  ;;  %v4487_v26 = vmul.f32 %v4314_v59, %v12530_v53  ;;  %v4325_v63 = vand.u32 2147483647, %v12775_v39  ;;  %v4857_v0 = vand.u32 2147483647, %v12752_v62 }
 0x42d   : > { %v8565_v47 = vmul.f32 -1.442695, %v12870_v2  ;;  %v4318_v24 = vsub.f32 1.0, %v4317_v5  ;;  %v4851_v37 = vmul.f32 %v12800_v10, %v4850_v7  ;;  %v8535_v31 = vmul.f32 -1.442695, %v12867_v52 }
 0x42e   : > { %v12884_v55 = vsel %vm9537_vm2, %v12795_v45, 0  ;;  %v9013_v3 = vpop.eup %9012  ;;  %vm4853_vm6 = vweird.f32 %v12752_v62  ;;  %v4859_v53 = vand.u32 2147483648, %v12752_v62  ;;  %v4333_v36 = vsub.f32 1.0, %v4332_v49  ;;  %v3807_v62 = vpop.f32.mrf.mxu1 }
 0x42f   : > { %9014 = vpow2.f32 %v8534_v6  ;;  %v12888_v19 = vpack.c.b16 %v5367_v43, %v5366_v17  ;;  %vm4321_vm10 = vweird.f32 %v12775_v39  ;;  %v12891_v46 = vor.u32 1.1754944e-38, %v4327_v8 }
 0x430   : > { %v4865_v58 = vsub.f32 1.0, %v4864_v25  ;;  %v4513_v27 = vpack.c.bf16 %v12850_v28, %v12825_v23  ;;  %vm4854_vm4 = vweird.f32 %v12800_v10  ;;  %vm12896_vm12 = vcmp.eq.f32.partialorder %v4857_v0, 8.507059e+37 }
 0x431   : > { %9016 = vpow2.f32 %v8565_v47  ;;  %v5798_v42 = vrot.slane %v12856_v44, 1  ;;  %v5799_v33 = vrot.slane %v12884_v55, 1  ;;  %v4319_v21 = vmul.f32 %v12837_v16, %v4318_v24  ;;  %vm12923_vm11 = vmor %vm4853_vm6, %vm4854_vm4 }
 0x432   : > { %v4852_v29 = vadd.f32 %v12800_v10, %v4851_v37  ;;  %v12904_v54 = vadd.f32 1.0, %v9013_v3  ;;  %9018 = vpow2.f32 %v8535_v31  ;;  %v4860_v59 = vor.u32 1.1754944e-38, %v4859_v53  ;;  %v3715_v37 = vpop.f32.mrf.mxu3 }
 0x433   : > { %v4334_v5 = vmul.f32 %v12846_v51, %v4333_v36  ;;  %v5800_v7 = vsel %vm1764_vm3, %v5798_v42, %v5799_v33  ;;  %v7213_v15 = vpack.c.bf16 %v4487_v26, %v4486_v41  ;;  %v5420_v49 = vshrl.u32 %v12888_v19, 16 }
 0x434   : > { %vm4322_vm8 = vweird.f32 %v12837_v16  ;;  %vm12910_vm9 = vcmp.eq.f32.partialorder %v4325_v63, 8.507059e+37  ;;  %v4866_v17 = vmul.f32 %v12852_v12, %v4865_v58  ;;  %5894 = vrot.lane.b32.xlu2 %v5800_v7, %s9433_s20  ;;  %5988 = vrot.lane.b32.xlu0 %v5800_v7, %s9435_s21  ;;  %v5591_v43 = vshll.u32 %v12856_v44, 16 }
 0x435   : > { %v9015_v8 = vpop.eup %9014  ;;  %v5423_v41 = vshll.u32 %v12888_v19, 16  ;;  %vm4336_vm1 = vweird.f32 %v12785_v32  ;;  %v4340_v26 = vand.u32 2147483647, %v12785_v32  ;;  %v4342_v63 = vand.u32 2147483648, %v12785_v32  ;;  %8652 = vmatmul.msk.bf16.gmra.mxu0 %vm4519_vm15, %v7213_v15  ;;  %vm12951_vm6 = vmor %vm4321_vm10, %vm4322_vm8 }
 0x436   : > { %v4320_v0 = vadd.f32 %v12837_v16, %v4319_v21  ;;  %v4856_v47 = vsel %vm12923_vm11, %v12800_v10, %v4852_v29  ;;  %9020 = vrcp.f32 %v12904_v54  ;;  %v5593_v24 = vrot.slane %v5591_v43, 1  ;;  %8557 = vmatmul.msk.bf16.gmra.mxu2 %vm4519_vm15, %v4513_v27  ;;  %v4600_v29 = vpop.f32.mrf.mxu2 }
 0x437   : > { %v9017_v31 = vpop.eup %9016  ;;  %v4335_v3 = vadd.f32 %v12846_v51, %v4334_v5  ;;  %vm4337_vm14 = vweird.f32 %v12846_v51  ;;  %v5589_v53 = vshrl.u32 %v12856_v44, 16  ;;  %v5596_v36 = vshll.u32 %v12884_v55, 16 }
 0x438   : > { %v9019_v19 = vpop.eup %9018  ;;  %v4867_v58 = vadd.f32 %v12852_v12, %v4866_v17  ;;  %vm4869_vm13 = vweird.f32 %v12852_v12  ;;  %v12943_v10 = vadd.f32 1.0, %v9015_v8  ;;  %v12945_v42 = vadd.f32 1.0, %v9017_v31  ;;  %vm12966_vm10 = vmor %vm4336_vm1, %vm4337_vm14 }
 0x439   : > { %v5422_v33 = vrot.slane %v5420_v49, 7  ;;  %vm4868_vm4 = vweird.f32 %v12789_v61  ;;  %v4874_v55 = vand.u32 2147483648, %v12789_v61  ;;  %v5594_v21 = vor.u32 %v5593_v24, %v5589_v53 }
 0x43a   : > { %v4324_v5 = vsel %vm12951_vm6, %v12837_v16, %v4320_v0  ;;  %v4861_v7 = vsel %vm12896_vm12, %v4860_v59, %v4856_v47  ;;  %v4872_v15 = vand.u32 2147483647, %v12789_v61  ;;  %v3808_v49 = vadd.f32 %v3807_v62, %v3715_v37  ;;  %vm12976_vm8 = vmor %vm4868_vm4, %vm4869_vm13  ;;  %v3717_v24 = vpop.f32.mrf.mxu3 }
 0x43b   : > { %v4339_v17 = vsel %vm12966_vm10, %v12846_v51, %v4335_v3  ;;  %v12980_v45 = vadd.f32 1.0, %v9019_v19  ;;  %9022 = vrcp.f32 %v12945_v42  ;;  %v5598_v32 = vrot.slane %v5596_v36, 1 }
 0x43c   : > { %v12983_v59 = vpop.eup %9020  ;;  %vm4341_vm12 = vcmp.eq.f32.partialorder %v4340_v26, 8.507059e+37  ;;  %v4343_v61 = vor.u32 1.1754944e-38, %v4342_v63  ;;  %v4871_v43 = vsel %vm12976_vm8, %v12852_v12, %v4867_v58  ;;  %9024 = vrcp.f32 %v12943_v10  ;;  %v13001_v12 = vld [vmem:[%s15670_s11] ss:$0 sm:$0xff]  ;;  %v3809_v63 = vpop.f32.mrf.mxu1 }
 0x43d   : > { %v4329_v51 = vsel %vm12910_vm9, %v12891_v46, %v4324_v5  ;;  %v5272_v8 = vmul.f32 %v4861_v7, %v12639_v56  ;;  %v4875_v25 = vor.u32 1.1754944e-38, %v4874_v55  ;;  %v5599_v0 = vsel %vm1539_vm7, %v5594_v21, %v5598_v32 }
 0x43e   : > { %v4344_v47 = vsel %vm4341_vm12, %v4343_v61, %v4339_v17  ;;  %vm4873_vm11 = vcmp.eq.f32.partialorder %v4872_v15, 8.507059e+37  ;;  %5862 = vrot.lane.b32.xlu1 %v5599_v0, %s9432_s1  ;;  %v12996_v26 = vadd.f32 %v12347_v30, %v3808_v49  ;;  %v13004_v6 = vadd.f32 %v13001_v12, %v4600_v29  ;;  %5956 = vrot.lane.b32.xlu2 %v5599_v0, %s9425_s18  ;;  %v4602_v58 = vpop.f32.mrf.mxu2 }
 0x43f   : > { %v4876_v56 = vsel %vm4873_vm11, %v4875_v25, %v4871_v43  ;;  %v4879_v46 = vmul.f32 %v12983_v59, %v12904_v54  ;;  %9026 = vrcp.f32 %v12980_v45  ;;  %v5425_v62 = vor.u32 %v5423_v41, %v5422_v33 }
 0x440   : > { %v8536_v37 = vmul.f32 -1.442695, %v12996_v26  ;;  %v4488_v3 = vmul.f32 %v4329_v51, %v12660_v35  ;;  %v8566_v53 = vmul.f32 -1.442695, %v13004_v6  ;;  %v3810_v19 = vadd.f32 %v3809_v63, %v3717_v24 }
 0x441   : > { %v13011_v31 = vpop.eup %9022  ;;  %v13017_v36 = vsel %vm9537_vm2, 0, %v5425_v62  ;;  %v5304_v55 = vpack.c.bf16 %v5272_v8, %v5272_v8  ;;  %v4489_v41 = vmul.f32 %v4344_v47, %v12688_v40  ;;  %v5273_v21 = vmul.f32 %v4876_v56, %v12691_v9 }
 0x442   : > { %v13019_v27 = vpop.eup %9024  ;;  %v4894_v29 = vmul.f32 %v13011_v31, %v12945_v42  ;;  %5926 = vrot.lane.b32.xlu0 %v13017_v36, %s9434_s19  ;;  %v4880_v35 = vsub.f32 1.0, %v4879_v46  ;;  %9028 = vpow2.f32 %v8536_v37  ;;  %v13028_v5 = vadd.f32 %v12347_v30, %v3810_v19  ;;  %v3720_v25 = vpop.f32.mrf.mxu3 }
 0x443   : > { %v13031_v7 = vadd.f32 %v13001_v12, %v4602_v58  ;;  %v4887_v39 = vand.u32 2147483647, %v12904_v54  ;;  %9030 = vpow2.f32 %v8566_v53  ;;  %v13036_v40 = vsel %vm9537_vm2, %v5422_v33, 0 }
 0x444   : > { %v4895_v15 = vsub.f32 1.0, %v4894_v29  ;;  %v4347_v49 = vmul.f32 %v13019_v27, %v12943_v10  ;;  %v8537_v17 = vmul.f32 -1.442695, %v13028_v5  ;;  %v5801_v16 = vrot.slane %v13017_v36, 1  ;;  %v3812_v8 = vpop.f32.mrf.mxu1 }
 0x445   : > { %v13038_v9 = vpop.eup %9026  ;;  %v8567_v30 = vmul.f32 -1.442695, %v13031_v7  ;;  %v5305_v32 = vpack.c.bf16 %v5273_v21, %v5273_v21  ;;  %v4889_v61 = vand.u32 2147483648, %v12904_v54  ;;  %v5802_v33 = vrot.slane %v13036_v40, 1  ;;  %v13071_v21 = vld [vmem:[%s15668_s9] ss:$0 sm:$0xff] }
 0x446   : > { %6020 = vrot.lane.b32.xlu1 %v13017_v36, %s9436_s27  ;;  %v7214_v43 = vpack.c.bf16 %v4489_v41, %v4488_v3  ;;  %v4881_v51 = vmul.f32 %v12983_v59, %v4880_v35  ;;  %9032 = vpow2.f32 %v8537_v17  ;;  %v4362_v0 = vmul.f32 %v13038_v9, %v12980_v45 }
 0x447   : > { %v4896_v47 = vmul.f32 %v13011_v31, %v4895_v15  ;;  %9034 = vpow2.f32 %v8567_v30  ;;  %v5803_v56 = vsel %vm1764_vm3, %v5801_v16, %v5802_v33  ;;  %v5368_v63 = vunpack.c.l.b16 %v5304_v55 }
 0x448   : > { %8653 = vmatmul.msk.bf16.gmra.mxu0 %vm4519_vm15, %v7214_v43  ;;  %v9029_v46 = vpop.eup %9028  ;;  %v4348_v62 = vsub.f32 1.0, %v4347_v49  ;;  %v4357_v24 = vand.u32 2147483648, %v12943_v10  ;;  %5990 = vrot.lane.b32.xlu2 %v5803_v56, %s9435_s21  ;;  %v3813_v37 = vadd.f32 %v3812_v8, %v3720_v25  ;;  %v5369_v53 = vunpack.c.l.b16 %v5305_v32 }
 0x449   : > { %v9031_v3 = vpop.eup %9030  ;;  %vm4883_vm9 = vweird.f32 %v12904_v54  ;;  %vm13058_vm1 = vcmp.eq.f32.partialorder %v4887_v39, 8.507059e+37  ;;  %v4890_v58 = vor.u32 1.1754944e-38, %v4889_v61  ;;  %vm4351_vm14 = vweird.f32 %v12943_v10  ;;  %v4605_v61 = vpop.f32.mrf.mxu2 }
 0x44a   : > { %6084 = vrot.lane.b32.xlu0 %v5803_v56, %s9424_s30  ;;  %v4882_v55 = vadd.f32 %v12983_v59, %v4881_v51  ;;  %vm4884_vm13 = vweird.f32 %v12983_v59  ;;  %v13066_v41 = vadd.f32 1.0, %v9029_v46  ;;  %v13074_v29 = vadd.f32 %v13071_v21, %v3813_v37  ;;  %v13117_v46 = vpop.f32.mrf.mxu0 }
 0x44b   : > { %v4363_v35 = vsub.f32 1.0, %v4362_v0  ;;  %v4897_v39 = vadd.f32 %v13011_v31, %v4896_v47  ;;  %vm4899_vm6 = vweird.f32 %v13011_v31  ;;  %v5603_v15 = vshll.u32 %v13017_v36, 16  ;;  %vm13091_vm10 = vmor %vm4883_vm9, %vm4884_vm13  ;;  %15979 = vst [vmem:[#allocation2_spill] sm:$0xff] %v13117_v46 }
 0x44c   : > { %v9033_v49 = vpop.eup %9032  ;;  %v4349_v17 = vmul.f32 %v13019_v27, %v4348_v62  ;;  %v4902_v30 = vand.u32 2147483647, %v12945_v42  ;;  %v4904_v16 = vand.u32 2147483648, %v12945_v42  ;;  %v13082_v32 = vadd.f32 1.0, %v9031_v3 }
 0x44d   : > { %v9035_v33 = vpop.eup %9034  ;;  %v13084_v43 = vpack.c.b16 %v5369_v53, %v5368_v63  ;;  %vm4352_vm4 = vweird.f32 %v13019_v27  ;;  %vm4898_vm8 = vweird.f32 %v12945_v42  ;;  %v13096_v8 = vadd.f32 1.0, %v9033_v49 }
 0x44e   : > { %5896 = vrot.lane.b32.xlu1 %v5803_v56, %s9433_s20  ;;  %v4886_v25 = vsel %vm13091_vm10, %v12983_v59, %v4882_v55  ;;  %vm13104_vm12 = vmor %vm4898_vm8, %vm4899_vm6  ;;  %9036 = vrcp.f32 %v13066_v41  ;;  %v13109_v54 = vadd.f32 1.0, %v9035_v33  ;;  %v8538_v42 = vmul.f32 -1.442695, %v13074_v29 }
 0x44f   : > { %v4364_v47 = vmul.f32 %v13038_v9, %v4363_v35  ;;  %v4901_v56 = vsel %vm13104_vm12, %v13011_v31, %v4897_v39  ;;  %9038 = vrcp.f32 %v13096_v8  ;;  %v5605_v59 = vrot.slane %v5603_v15, 1  ;;  %vm13131_vm9 = vmor %vm4351_vm14, %vm4352_vm4  ;;  %v3722_v15 = vpop.f32.mrf.mxu3 }
 0x450   : > { %v4350_v63 = vadd.f32 %v13019_v27, %v4349_v17  ;;  %vm4903_vm11 = vcmp.eq.f32.partialorder %v4902_v30, 8.507059e+37  ;;  %v4905_v62 = vor.u32 1.1754944e-38, %v4904_v16  ;;  %9040 = vrcp.f32 %v13082_v32 }
 0x451   : > { %v4891_v37 = vsel %vm13058_vm1, %v4890_v58, %v4886_v25  ;;  %9042 = vrcp.f32 %v13109_v54  ;;  %v5601_v3 = vshrl.u32 %v13017_v36, 16  ;;  %v5608_v31 = vshll.u32 %v13036_v40, 16  ;;  %v3814_v58 = vpop.f32.mrf.mxu1 }
 0x452   : > { %v4355_v53 = vand.u32 2147483647, %v12943_v10  ;;  %v4358_v55 = vor.u32 1.1754944e-38, %v4357_v24  ;;  %v4906_v35 = vsel %vm4903_vm11, %v4905_v62, %v4901_v56  ;;  %9044 = vpow2.f32 %v8538_v42 }
 0x453   : > { %v4365_v19 = vadd.f32 %v13038_v9, %v4364_v47  ;;  %vm4366_vm1 = vweird.f32 %v12980_v45  ;;  %vm4367_vm13 = vweird.f32 %v13038_v9  ;;  %v5606_v40 = vor.u32 %v5605_v59, %v5601_v3 }
 0x454   : > { %v13138_v24 = vpop.eup %9036  ;;  %v4354_v49 = vsel %vm13131_vm9, %v13019_v27, %v4350_v63  ;;  %v5274_v10 = vmul.f32 %v4891_v37, %v12811_v14  ;;  %v4372_v17 = vand.u32 2147483648, %v12980_v45  ;;  %v13146_v30 = vadd.f32 %v13001_v12, %v4605_v61  ;;  %vm13159_vm6 = vmor %vm4366_vm1, %vm4367_vm13  ;;  %v4607_v61 = vpop.f32.mrf.mxu2 }
 0x455   : > { %v13148_v16 = vpop.eup %9038  ;;  %v5427_v33 = vshrl.u32 %v13084_v43, 16  ;;  %v4370_v51 = vand.u32 2147483647, %v12980_v45  ;;  %v5275_v25 = vmul.f32 %v4906_v35, %v12870_v2  ;;  %v5610_v0 = vrot.slane %v5608_v31, 1  ;;  %v13178_v35 = vpop.f32.mrf.mxu0 }
 0x456   : > { %v13153_v42 = vpop.eup %9040  ;;  %vm4356_vm14 = vcmp.eq.f32.partialorder %v4355_v53, 8.507059e+37  ;;  %v3815_v27 = vadd.f32 %v3814_v58, %v3722_v15  ;;  %v4369_v2 = vsel %vm13159_vm6, %v13038_v9, %v4365_v19  ;;  %v4392_v59 = vmul.f32 %v13148_v16, %v13096_v8  ;;  %15984 = vst [vmem:[#allocation33_spill] sm:$0xff] %v13178_v35 }
 0x457   : > { %v13163_v47 = vpop.eup %9042  ;;  %v4359_v56 = vsel %vm4356_vm14, %v4358_v55, %v4354_v49  ;;  %v5611_v63 = vsel %vm1539_vm7, %v5606_v40, %v5610_v0  ;;  %v5306_v45 = vpack.c.bf16 %v5274_v10, %v5274_v10  ;;  %v4373_v37 = vor.u32 1.1754944e-38, %v4372_v17 }
 0x458   : > { %v9045_v62 = vpop.eup %9044  ;;  %v4377_v3 = vmul.f32 %v13138_v24, %v13066_v41  ;;  %v8568_v31 = vmul.f32 -1.442695, %v13146_v30  ;;  %6052 = vrot.lane.b32.xlu2 %v5611_v63, %s9437_s29  ;;  %5864 = vrot.lane.b32.xlu0 %v5611_v63, %s9432_s1  ;;  %v5429_v53 = vrot.slane %v5427_v33, 7  ;;  %v5430_v9 = vshll.u32 %v13084_v43, 16 }
 0x459   : > { %vm4371_vm4 = vcmp.eq.f32.partialorder %v4370_v51, 8.507059e+37  ;;  %v5307_v55 = vpack.c.bf16 %v5275_v25, %v5275_v25  ;;  %5958 = vrot.lane.b32.xlu1 %v5611_v63, %s9425_s18  ;;  %v4490_v39 = vmul.f32 %v4359_v56, %v12843_v22  ;;  %v4924_v40 = vmul.f32 %v13163_v47, %v13109_v54 }
 0x45a   : > { %v4374_v19 = vsel %vm4371_vm4, %v4373_v37, %v4369_v2  ;;  %v13184_v58 = vadd.f32 %v13071_v21, %v3815_v27  ;;  %v4909_v15 = vmul.f32 %v13153_v42, %v13082_v32  ;;  %v4393_v49 = vsub.f32 1.0, %v4392_v59 }
 0x45b   : > { %v13188_v43 = vadd.f32 1.0, %v9045_v62  ;;  %v13191_v10 = vadd.f32 %v13001_v12, %v4607_v61  ;;  %v5370_v17 = vunpack.c.l.b16 %v5306_v45  ;;  %v4378_v33 = vsub.f32 1.0, %v4377_v3 }
 0x45c   : > { %v4387_v22 = vand.u32 2147483648, %v13066_v41  ;;  %9046 = vpow2.f32 %v8568_v31  ;;  %v4491_v51 = vmul.f32 %v4374_v19, %v12867_v52  ;;  %v5371_v25 = vunpack.c.l.b16 %v5307_v55  ;;  %v13208_v3 = vpop.f32.mrf.mxu2  ;;  %v3817_v55 = vpop.f32.mrf.mxu1 }
 0x45d   : > { %v4385_v0 = vand.u32 2147483647, %v13066_v41  ;;  %v4917_v14 = vand.u32 2147483647, %v13082_v32  ;;  %vm4381_vm10 = vweird.f32 %v13066_v41  ;;  %v4925_v56 = vsub.f32 1.0, %v4924_v40  ;;  %v3725_v19 = vpop.f32.mrf.mxu3 }
 0x45e   : > { %v8539_v61 = vmul.f32 -1.442695, %v13184_v58  ;;  %v5432_v2 = vor.u32 %v5430_v9, %v5429_v53  ;;  %v4910_v59 = vsub.f32 1.0, %v4909_v15  ;;  %v4394_v63 = vmul.f32 %v13148_v16, %v4393_v49 }
 0x45f   : > { %9048 = vrcp.f32 %v13188_v43  ;;  %v8569_v52 = vmul.f32 -1.442695, %v13191_v10  ;;  %v4379_v62 = vmul.f32 %v13138_v24, %v4378_v33  ;;  %v13204_v45 = vor.u32 1.1754944e-38, %v4387_v22 }
 0x460   : > { %vm4396_vm8 = vweird.f32 %v13096_v8  ;;  %v4400_v37 = vand.u32 2147483647, %v13096_v8  ;;  %v13210_v31 = vpack.c.b16 %v5371_v25, %v5370_v17  ;;  %vm4382_vm12 = vweird.f32 %v13138_v24 }
 0x461   : > { %vm4913_vm11 = vweird.f32 %v13082_v32  ;;  %v4402_v9 = vand.u32 2147483648, %v13096_v8  ;;  %vm4928_vm9 = vweird.f32 %v13109_v54  ;;  %vm13216_vm1 = vcmp.eq.f32.partialorder %v4385_v0, 8.507059e+37  ;;  %v13232_v0 = vpop.f32.mrf.mxu0  ;;  %vm13273_vm5 = vmor %vm4381_vm10, %vm4382_vm12 }
 0x462   : > { %v9047_v40 = vpop.eup %9046  ;;  %vm4397_vm13 = vweird.f32 %v13148_v16  ;;  %v4926_v49 = vmul.f32 %v13163_v47, %v4925_v56  ;;  %9050 = vpow2.f32 %v8539_v61  ;;  %v13224_v17 = vsel %vm9537_vm2, 0, %v5432_v2  ;;  %15987 = vst [vmem:[#allocation34_spill] sm:$0xff] %v13232_v0 }
 0x463   : > { %v4911_v33 = vmul.f32 %v13153_v42, %v4910_v59  ;;  %v4395_v22 = vadd.f32 %v13148_v16, %v4394_v63  ;;  %9052 = vpow2.f32 %v8569_v52  ;;  %5928 = vrot.lane.b32.xlu2 %v13224_v17, %s9434_s19  ;;  %v7215_v25 = vpack.c.bf16 %v4491_v51, %v4490_v39  ;;  %6022 = vrot.lane.b32.xlu0 %v13224_v17, %s9436_s27  ;;  %vm13256_vm6 = vmor %vm4396_vm8, %vm4397_vm13 }
 0x464   : > { %v4380_v56 = vadd.f32 %v13138_v24, %v4379_v62  ;;  %v13237_v61 = vsel %vm9537_vm2, %v5429_v53, 0  ;;  %v5804_v2 = vrot.slane %v13224_v17, 1  ;;  %v3818_v59 = vadd.f32 %v3817_v55, %v3725_v19 }
 0x465   : > { %v13240_v63 = vpop.eup %9048  ;;  %vm13242_vm14 = vcmp.eq.f32.partialorder %v4917_v14, 8.507059e+37  ;;  %v4932_v39 = vand.u32 2147483647, %v13109_v54  ;;  %v4934_v51 = vand.u32 2147483648, %v13109_v54  ;;  %v13248_v27 = vadd.f32 1.0, %v9047_v40  ;;  %8654 = vmatmul.msk.bf16.gmra.mxu0 %vm4519_vm15, %v7215_v25 }
 0x466   : > { %v5805_v53 = vrot.slane %v13237_v61, 1  ;;  %vm13260_vm4 = vcmp.eq.f32.partialorder %v4400_v37, 8.507059e+37  ;;  %v4927_v55 = vadd.f32 %v13163_v47, %v4926_v49  ;;  %vm4929_vm0 = vweird.f32 %v13163_v47 }
 0x467   : > { %v13267_v19 = vadd.f32 %v13071_v21, %v3818_v59  ;;  %v4912_v37 = vadd.f32 %v13153_v42, %v4911_v33  ;;  %vm4914_vm8 = vweird.f32 %v13153_v42  ;;  %v4399_v40 = vsel %vm13256_vm6, %v13148_v16, %v4395_v22  ;;  %vm13295_vm10 = vmor %vm4928_vm9, %vm4929_vm0 }
 0x468   : > { %v5806_v49 = vsel %vm1764_vm3, %v5804_v2, %v5805_v53  ;;  %v9051_v25 = vpop.eup %9050  ;;  %v4384_v59 = vsel %vm13273_vm5, %v13138_v24, %v4380_v56  ;;  %v4403_v41 = vor.u32 1.1754944e-38, %v4402_v9  ;;  %v4407_v28 = vmul.f32 %v13240_v63, %v13188_v43  ;;  %vm13306_vm5 = vmor %vm4913_vm11, %vm4914_vm8 }
 0x469   : > { %5992 = vrot.lane.b32.xlu1 %v5806_v49, %s9435_s21  ;;  %v8540_v33 = vmul.f32 -1.442695, %v13267_v19  ;;  %v9053_v23 = vpop.eup %9052  ;;  %v5434_v11 = vshrl.u32 %v13210_v31, 16  ;;  %v4935_v24 = vor.u32 1.1754944e-38, %v4934_v51  ;;  %9054 = vrcp.f32 %v13248_v27  ;;  %v4612_v51 = vpop.f32.mrf.mxu2 }
 0x46a   : > { %v13300_v9 = vadd.f32 1.0, %v9051_v25  ;;  %v4404_v54 = vsel %vm13260_vm4, %v4403_v41, %v4399_v40  ;;  %v4931_v56 = vsel %vm13295_vm10, %v13163_v47, %v4927_v55  ;;  %v13315_v2 = vadd.f32 1.0, %v9053_v23  ;;  %v3727_v40 = vpop.f32.mrf.mxu3  ;;  %v13334_v25 = vpop.f32.mrf.mxu0 }
 0x46b   : > { %9056 = vpow2.f32 %v8540_v33  ;;  %v4389_v53 = vsel %vm13216_vm1, %v13204_v45, %v4384_v59  ;;  %v4916_v62 = vsel %vm13306_vm5, %v13153_v42, %v4912_v37  ;;  %6086 = vrot.lane.b32.xlu2 %v5806_v49, %s9424_s30  ;;  %5898 = vrot.lane.b32.xlu0 %v5806_v49, %s9433_s20  ;;  %v5615_v47 = vshll.u32 %v13224_v17, 16  ;;  %v3819_v37 = vpop.f32.mrf.mxu1  ;;  %16001 = vst [vmem:[#allocation35_spill] sm:$0xff] %v13334_v25 }
 0x46c   : > { %9058 = vrcp.f32 %v13300_v9  ;;  %v16000_v23 = vand.u32 2147483648, %v13082_v32  ;;  %vm4933_vm0 = vcmp.eq.f32.partialorder %v4932_v39, 8.507059e+37  ;;  %v4408_v55 = vsub.f32 1.0, %v4407_v28 }
 0x46d   : > { %9060 = vrcp.f32 %v13315_v2  ;;  %v13330_v45 = vrot.slane %v5434_v11, 7  ;;  %v5437_v15 = vshll.u32 %v13210_v31, 16  ;;  %v4493_v42 = vmul.f32 %v4404_v54, %v13028_v5 }
 0x46e   : > { %v4920_v14 = vor.u32 1.1754944e-38, %v16000_v23  ;;  %v4936_v8 = vsel %vm4933_vm0, %v4935_v24, %v4931_v56  ;;  %v4492_v49 = vmul.f32 %v4389_v53, %v12996_v26  ;;  %vm4411_vm12 = vweird.f32 %v13188_v43 }
 0x46f   : > { %v4415_v28 = vand.u32 2147483647, %v13188_v43  ;;  %v13341_v11 = vpop.eup %9054  ;;  %v5620_v31 = vshll.u32 %v13237_v61, 16  ;;  %v13346_v5 = vadd.f32 %v13001_v12, %v13208_v3  ;;  %v5613_v39 = vshrl.u32 %v13224_v17, 16 }
 0x470   : > { %v4921_v32 = vsel %vm13242_vm14, %v4920_v14, %v4916_v62  ;;  %v5617_v59 = vrot.slane %v5615_v47, 1  ;;  %v5277_v26 = vmul.f32 %v4936_v8, %v13031_v7  ;;  %v4409_v52 = vmul.f32 %v13240_v63, %v4408_v55 }
 0x471   : > { %v9057_v41 = vpop.eup %9056  ;;  %v4417_v33 = vand.u32 2147483648, %v13188_v43  ;;  %v3820_v16 = vadd.f32 %v3819_v37, %v3727_v40  ;;  %v5276_v22 = vmul.f32 %v4921_v32, %v13004_v6  ;;  %v7216_v56 = vpack.c.bf16 %v4493_v42, %v4492_v49  ;;  %v13372_v37 = vpop.f32.mrf.mxu2 }
 0x472   : > { %v9059_v24 = vpop.eup %9058  ;;  %v13353_v54 = vadd.f32 1.0, %v9057_v41  ;;  %v5618_v61 = vor.u32 %v5617_v59, %v5613_v39  ;;  %v4939_v53 = vmul.f32 %v13341_v11, %v13248_v27  ;;  %v13364_v47 = vadd.f32 %v13001_v12, %v4612_v51 }
 0x473   : > { %v13355_v3 = vpop.eup %9060  ;;  %v4422_v62 = vmul.f32 %v9059_v24, %v13300_v9  ;;  %v13361_v7 = vadd.f32 %v13071_v21, %v3820_v16  ;;  %v8570_v23 = vmul.f32 -1.442695, %v13346_v5  ;;  %v5622_v14 = vrot.slane %v5620_v31, 1 }
 0x474   : > { %v4954_v6 = vmul.f32 %v13355_v3, %v13315_v2  ;;  %9062 = vrcp.f32 %v13353_v54  ;;  %v5309_v55 = vpack.c.bf16 %v5277_v26, %v5277_v26  ;;  %v4410_v42 = vadd.f32 %v13240_v63, %v4409_v52  ;;  %v13392_v52 = vpop.f32.mrf.mxu0 }
 0x475   : > { %vm4412_vm11 = vweird.f32 %v13240_v63  ;;  %v4423_v8 = vsub.f32 1.0, %v4422_v62  ;;  %v4432_v21 = vand.u32 2147483648, %v13300_v9  ;;  %v5623_v51 = vsel %vm1539_vm7, %v5618_v61, %v5622_v14  ;;  %8655 = vmatmul.msk.bf16.gmra.mxu0 %vm4519_vm15, %v7216_v56  ;;  %16004 = vst [vmem:[#allocation36_spill] sm:$0xff] %v13392_v52 }
 0x476   : > { %v8541_v40 = vmul.f32 -1.442695, %v13361_v7  ;;  %v5439_v49 = vor.u32 %v5437_v15, %v13330_v45  ;;  %vm4427_vm9 = vweird.f32 %v9059_v24  ;;  %v4430_v31 = vand.u32 2147483647, %v13300_v9  ;;  %6054 = vrot.lane.b32.xlu1 %v5623_v51, %s9437_s29  ;;  %5866 = vrot.lane.b32.xlu2 %v5623_v51, %s9432_s1  ;;  %vm13387_vm1 = vmor %vm4411_vm12, %vm4412_vm11 }
 0x477   : > { %v4424_v32 = vmul.f32 %v9059_v24, %v4423_v8  ;;  %v8571_v39 = vmul.f32 -1.442695, %v13364_v47  ;;  %v5308_v59 = vpack.c.bf16 %v5276_v22, %v5276_v22  ;;  %v4940_v15 = vsub.f32 1.0, %v4939_v53  ;;  %5960 = vrot.lane.b32.xlu0 %v5623_v51, %s9425_s18 }
 0x478   : > { %v4955_v26 = vsub.f32 1.0, %v4954_v6  ;;  %9064 = vpow2.f32 %v8570_v23  ;;  %v4414_v16 = vsel %vm13387_vm1, %v13240_v63, %v4410_v42  ;;  %vm4426_vm13 = vweird.f32 %v13300_v9 }
 0x479   : > { %v4425_v22 = vadd.f32 %v9059_v24, %v4424_v32  ;;  %9066 = vpow2.f32 %v8541_v40  ;;  %v4418_v61 = vor.u32 1.1754944e-38, %v4417_v33  ;;  %vm4428_vm14 = vmor %vm4426_vm13, %vm4427_vm9  ;;  %v4433_v56 = vor.u32 1.1754944e-38, %v4432_v21  ;;  %v4617_v32 = vpop.f32.mrf.mxu2 }
 0x47a   : > { %v13398_v43 = vpop.eup %9062  ;;  %9068 = vpow2.f32 %v8571_v39  ;;  %v13403_v53 = vsel %vm9537_vm2, 0, %v5439_v49  ;;  %v5373_v62 = vunpack.c.l.b16 %v5309_v55  ;;  %vm4416_vm6 = vcmp.eq.f32.partialorder %v4415_v28, 8.507059e+37 }
 0x47b   : > { %v4429_v6 = vsel %vm4428_vm14, %v9059_v24, %v4425_v22  ;;  %vm4431_vm4 = vcmp.eq.f32.partialorder %v4430_v31, 8.507059e+37  ;;  %v4419_v63 = vsel %vm4416_vm6, %v4418_v61, %v4414_v16  ;;  %v4956_v9 = vmul.f32 %v13355_v3, %v4955_v26 }
 0x47c   : > { %v4434_v23 = vsel %vm4431_vm4, %v4433_v56, %v4429_v6  ;;  %v13409_v33 = vsel %vm9537_vm2, %v13330_v45, 0  ;;  %v5372_v14 = vunpack.c.l.b16 %v5308_v59  ;;  %v4941_v42 = vmul.f32 %v13341_v11, %v4940_v15  ;;  %v13439_v61 = vpop.f32.mrf.mxu0 }
 0x47d   : > { %v4437_v8 = vmul.f32 %v13398_v43, %v13353_v54  ;;  %v5807_v55 = vrot.slane %v13403_v53, 1  ;;  %v4495_v24 = vmul.f32 %v4434_v23, %v13184_v58  ;;  %v5808_v21 = vrot.slane %v13409_v33, 1  ;;  %16005 = vst [vmem:[#allocation37_spill] sm:$0xff] %v13439_v61 }
 0x47e   : > { %v9065_v28 = vpop.eup %9064  ;;  %v13417_v40 = vpack.c.b16 %v5373_v62, %v5372_v14  ;;  %v4494_v49 = vmul.f32 %v4419_v63, %v13074_v29  ;;  %vm4944_vm8 = vweird.f32 %v13341_v11  ;;  %v4949_v45 = vand.u32 2147483648, %v13248_v27  ;;  %5930 = vrot.lane.b32.xlu1 %v13403_v53, %s9434_s19  ;;  %6024 = vrot.lane.b32.xlu2 %v13403_v53, %s9436_s27 }
 0x47f   : > { %v9067_v51 = vpop.eup %9066  ;;  %v4957_v58 = vadd.f32 %v13355_v3, %v4956_v9  ;;  %vm4959_vm10 = vweird.f32 %v13355_v3  ;;  %v5809_v29 = vsel %vm1764_vm3, %v5807_v55, %v5808_v21  ;;  %v4942_v59 = vadd.f32 %v13341_v11, %v4941_v42 }
 0x480   : > { %v9069_v31 = vpop.eup %9068  ;;  %v13428_v39 = vadd.f32 1.0, %v9067_v51  ;;  %v4964_v41 = vand.u32 2147483648, %v13315_v2  ;;  %v4438_v15 = vsub.f32 1.0, %v4437_v8  ;;  %5994 = vrot.lane.b32.xlu0 %v5809_v29, %s9435_s21  ;;  %vm4958_vm5 = vweird.f32 %v13315_v2 }
 0x481   : > { %v13433_v26 = vadd.f32 1.0, %v9069_v31  ;;  %v4962_v16 = vand.u32 2147483647, %v13315_v2  ;;  %v7217_v22 = vpack.c.bf16 %v4495_v24, %v4494_v49  ;;  %vm4943_vm0 = vweird.f32 %v13248_v27  ;;  %vm13442_vm12 = vmor %vm4958_vm5, %vm4959_vm10  ;;  %v13484_v31 = vpop.f32.mrf.mxu2 }
 0x482   : > { %9070 = vrcp.f32 %v13428_v39  ;;  %v13446_v62 = vadd.f32 1.0, %v9065_v28  ;;  %v13449_v6 = vadd.f32 %v13001_v12, %v4617_v32  ;;  %v5441_v63 = vshrl.u32 %v13417_v40, 16  ;;  %vm13462_vm11 = vmor %vm4943_vm0, %vm4944_vm8 }
 0x483   : > { %v4947_v2 = vand.u32 2147483647, %v13248_v27  ;;  %v4961_v23 = vsel %vm13442_vm12, %v13355_v3, %v4957_v58  ;;  %v13458_v9 = vadd.f32 %v13001_v12, %v13372_v37  ;;  %v4965_v42 = vor.u32 1.1754944e-38, %v4964_v41 }
 0x484   : > { %v4439_v8 = vmul.f32 %v13398_v43, %v4438_v15  ;;  %9072 = vrcp.f32 %v13433_v26  ;;  %v4946_v27 = vsel %vm13462_vm11, %v13341_v11, %v4942_v59  ;;  %v4950_v3 = vor.u32 1.1754944e-38, %v4949_v45 }
 0x485   : > { %vm4963_vm9 = vcmp.eq.f32.partialorder %v4962_v16, 8.507059e+37  ;;  %8656 = vmatmul.msk.bf16.gmra.mxu0 %vm4519_vm15, %v7217_v22  ;;  %9074 = vrcp.f32 %v13446_v62  ;;  %v8573_v55 = vmul.f32 -1.442695, %v13449_v6  ;;  %v5627_v28 = vshll.u32 %v13403_v53, 16  ;;  %v13527_v22 = vpop.permute.xlu2 %5860 }
 0x486   : > { %v4966_v37 = vsel %vm4963_vm9, %v4965_v42, %v4961_v23  ;;  %6088 = vrot.lane.b32.xlu1 %v5809_v29, %s9424_s30  ;;  %5900 = vrot.lane.b32.xlu2 %v5809_v29, %s9433_s20  ;;  %v13477_v21 = vrot.slane %v5441_v63, 7  ;;  %v5444_v11 = vshll.u32 %v13417_v40, 16  ;;  %vm4948_vm1 = vcmp.eq.f32.partialorder %v4947_v2, 8.507059e+37 }
 0x487   : > { %v8572_v51 = vmul.f32 -1.442695, %v13458_v9  ;;  %v4951_v49 = vsel %vm4948_vm1, %v4950_v3, %v4946_v27  ;;  %v4440_v45 = vadd.f32 %v13398_v43, %v4439_v8  ;;  %vm4442_vm13 = vweird.f32 %v13398_v43 }
 0x488   : > { %v9071_v24 = vpop.eup %9070  ;;  %v5279_v58 = vmul.f32 %v4966_v37, %v13191_v10  ;;  %vm4441_vm14 = vweird.f32 %v13353_v54  ;;  %v4445_v29 = vand.u32 2147483647, %v13353_v54  ;;  %v4447_v40 = vand.u32 2147483648, %v13353_v54  ;;  %v13502_v54 = vpop.f32.mrf.mxu0 }
 0x489   : > { %v4452_v32 = vmul.f32 %v9071_v24, %v13428_v39  ;;  %9076 = vpow2.f32 %v8573_v55  ;;  %v5625_v15 = vshrl.u32 %v13403_v53, 16  ;;  %v5629_v16 = vrot.slane %v5627_v28, 1  ;;  %vm13493_vm6 = vmor %vm4441_vm14, %vm4442_vm13  ;;  %16012 = vst [vmem:[#allocation38_spill] sm:$0xff] %v13502_v54 }
 0x48a   : > { %v13490_v59 = vpop.eup %9072  ;;  %v4460_v56 = vand.u32 2147483647, %v13428_v39  ;;  %v4462_v10 = vand.u32 2147483648, %v13428_v39  ;;  %9078 = vpow2.f32 %v8572_v51  ;;  %v5632_v63 = vshll.u32 %v13409_v33, 16 }
 0x48b   : > { %v4453_v41 = vsub.f32 1.0, %v4452_v32  ;;  %v13500_v2 = vpop.eup %9074  ;;  %v4444_v23 = vsel %vm13493_vm6, %v13398_v43, %v4440_v45  ;;  %vm4457_vm4 = vweird.f32 %v9071_v24  ;;  %v5630_v42 = vor.u32 %v5629_v16, %v5625_v15 }
 0x48c   : > { %v5446_v8 = vor.u32 %v5444_v11, %v13477_v21  ;;  %v5278_v27 = vmul.f32 %v4951_v49, %v13146_v30  ;;  %v4448_v3 = vor.u32 1.1754944e-38, %v4447_v40  ;;  %v4984_v37 = vmul.f32 %v13490_v59, %v13433_v26  ;;  %v8731_v11 = vld [vmem:[%s15671_s12] sm:$0xff] }
 0x48d   : > { %v4454_v14 = vmul.f32 %v9071_v24, %v4453_v41  ;;  %vm4446_vm8 = vcmp.eq.f32.partialorder %v4445_v29, 8.507059e+37  ;;  %vm4456_vm10 = vweird.f32 %v13428_v39  ;;  %v5634_v55 = vrot.slane %v5632_v63, 1  ;;  %6432 = vmatpush.bf16.msra.mxu3 %v8731_v11 }
 0x48e   : > { %v4449_v28 = vsel %vm4446_vm8, %v4448_v3, %v4444_v23  ;;  %v4969_v43 = vmul.f32 %v13500_v2, %v13446_v62  ;;  %vm4458_vm5 = vmor %vm4456_vm10, %vm4457_vm4  ;;  %v4463_v51 = vor.u32 1.1754944e-38, %v4462_v10  ;;  %v5311_v49 = vpack.c.bf16 %v5279_v58, %v5279_v58  ;;  %v4622_v58 = vpop.f32.mrf.mxu2 }
 0x48f   : > { %v4455_v33 = vadd.f32 %v9071_v24, %v4454_v14  ;;  %v9077_v30 = vpop.eup %9076  ;;  %vm4461_vm0 = vcmp.eq.f32.partialorder %v4460_v56, 8.507059e+37  ;;  %v5635_v32 = vsel %vm1539_vm7, %v5630_v42, %v5634_v55  ;;  %v4985_v39 = vsub.f32 1.0, %v4984_v37 }
 0x490   : > { %v9079_v29 = vpop.eup %9078  ;;  %6056 = vrot.lane.b32.xlu0 %v5635_v32, %s9437_s29  ;;  %5868 = vrot.lane.b32.xlu1 %v5635_v32, %s9432_s1  ;;  %v5310_v41 = vpack.c.bf16 %v5278_v27, %v5278_v27  ;;  %v4496_v15 = vmul.f32 %v4449_v28, %v13267_v19  ;;  %v4970_v56 = vsub.f32 1.0, %v4969_v43  ;;  %v13529_v10 = vadd.f32 1.0, %v9077_v30  ;;  %v13539_v3 = vpop.f32.mrf.mxu0 }
 0x491   : > { %v4459_v45 = vsel %vm4458_vm5, %v9071_v24, %v4455_v33  ;;  %5962 = vrot.lane.b32.xlu2 %v5635_v32, %s9425_s18  ;;  %v13525_v24 = vsel %vm9537_vm2, 0, %v5446_v8  ;;  %v5375_v63 = vunpack.c.l.b16 %v5311_v49  ;;  %v13531_v23 = vadd.f32 1.0, %v9079_v29  ;;  %16013 = vst [vmem:[#allocation39_spill] sm:$0xff] %v13539_v3  ;;  %v13563_v49 = vpop.permute.xlu2 %5894 }
 0x492   : > { %v4464_v40 = vsel %vm4461_vm0, %v4463_v51, %v4459_v45  ;;  %v5576_v19 = vsel %vm9537_vm2, %v13477_v21, 0  ;;  %v4986_v14 = vmul.f32 %v13490_v59, %v4985_v39  ;;  %v5810_v42 = vrot.slane %v13525_v24, 1 }
 0x493   : > { %v4497_v16 = vmul.f32 %v4464_v40, %v13361_v7  ;;  %v5639_v8 = vshll.u32 %v13525_v24, 16  ;;  %v5374_v27 = vunpack.c.l.b16 %v5310_v41  ;;  %v4971_v37 = vmul.f32 %v13500_v2, %v4970_v56 }
 0x494   : > { %9080 = vrcp.f32 %v13529_v10  ;;  %v5811_v33 = vrot.slane %v5576_v19, 1  ;;  %vm4989_vm12 = vweird.f32 %v13490_v59  ;;  %v4987_v21 = vadd.f32 %v13490_v59, %v4986_v14 }
 0x495   : > { %v7218_v7 = vpack.c.bf16 %v4497_v16, %v4496_v15  ;;  %v5401_v55 = vpack.c.b16 %v5375_v63, %v5374_v27  ;;  %9082 = vrcp.f32 %v13531_v23  ;;  %v13552_v28 = vadd.f32 %v13001_v12, %v4622_v58 }
 0x496   : > { %v5812_v43 = vsel %vm1764_vm3, %v5810_v42, %v5811_v33  ;;  %v5641_v51 = vrot.slane %v5639_v8, 1  ;;  %vm4974_vm11 = vweird.f32 %v13500_v2  ;;  %vm4988_vm9 = vweird.f32 %v13433_v26 }
 0x497   : > { %8657 = vmatmul.msk.bf16.gmra.mxu0 %vm4519_vm15, %v7218_v7  ;;  %v4994_v11 = vand.u32 2147483648, %v13433_v26  ;;  %v13560_v30 = vadd.f32 %v13001_v12, %v13484_v31  ;;  %v4972_v45 = vadd.f32 %v13500_v2, %v4971_v37  ;;  %v4992_v32 = vand.u32 2147483647, %v13433_v26  ;;  %vm13573_vm13 = vmor %vm4988_vm9, %vm4989_vm12  ;;  %v13577_v31 = vpop.f32.mrf.mxu2 }
 0x498   : > { %5932 = vrot.lane.b32.xlu0 %v13525_v24, %s9434_s19  ;;  %6026 = vrot.lane.b32.xlu1 %v13525_v24, %s9436_s27  ;;  %v5637_v29 = vshrl.u32 %v13525_v24, 16  ;;  %v5644_v40 = vshll.u32 %v5576_v19, 16  ;;  %vm4973_vm1 = vweird.f32 %v13446_v62  ;;  %v4977_v39 = vand.u32 2147483647, %v13446_v62 }
 0x499   : > { %5996 = vrot.lane.b32.xlu2 %v5812_v43, %s9435_s21  ;;  %v4979_v41 = vand.u32 2147483648, %v13446_v62  ;;  %v5448_v26 = vshrl.u32 %v5401_v55, 16  ;;  %v4991_v16 = vsel %vm13573_vm13, %v13490_v59, %v4987_v21  ;;  %v8575_v58 = vmul.f32 -1.442695, %v13552_v28  ;;  %vm13589_vm14 = vmor %vm4973_vm1, %vm4974_vm11 }
 0x49a   : > { %v13579_v15 = vpop.eup %9080  ;;  %v5642_v56 = vor.u32 %v5641_v51, %v5637_v29  ;;  %v4995_v19 = vor.u32 1.1754944e-38, %v4994_v11  ;;  %v8574_v7 = vmul.f32 -1.442695, %v13560_v30  ;;  %v4976_v14 = vsel %vm13589_vm14, %v13500_v2, %v4972_v45  ;;  %v13605_v51 = vpop.permute.xlu2 %5956 }
 0x49b   : > { %v13585_v63 = vpop.eup %9082  ;;  %vm4993_vm6 = vcmp.eq.f32.partialorder %v4992_v32, 8.507059e+37  ;;  %v5646_v59 = vrot.slane %v5644_v40, 1  ;;  %vm4978_vm4 = vcmp.eq.f32.partialorder %v4977_v39, 8.507059e+37  ;;  %v4980_v42 = vor.u32 1.1754944e-38, %v4979_v41 }
 0x49c   : > { %v4996_v8 = vsel %vm4993_vm6, %v4995_v19, %v4991_v16  ;;  %v5014_v27 = vmul.f32 %v13579_v15, %v13529_v10  ;;  %v5450_v37 = vrot.slane %v5448_v26, 7  ;;  %v4999_v33 = vmul.f32 %v13585_v63, %v13531_v23 }
 0x49d   : > { %9084 = vpow2.f32 %v8575_v58  ;;  %v5647_v21 = vsel %vm1539_vm7, %v5642_v56, %v5646_v59  ;;  %v4981_v2 = vsel %vm4978_vm4, %v4980_v42, %v4976_v14  ;;  %v5451_v11 = vshll.u32 %v5401_v55, 16 }
 0x49e   : > { %9086 = vpow2.f32 %v8574_v7  ;;  %v5281_v45 = vmul.f32 %v4996_v8, %v13364_v47  ;;  %v5015_v32 = vsub.f32 1.0, %v5014_v27  ;;  %v5280_v40 = vmul.f32 %v4981_v2, %v13346_v5  ;;  %v5893_v2 = vpop.permute.xlu0 %5892 }
 0x49f   : > { %v5453_v29 = vor.u32 %v5451_v11, %v5450_v37  ;;  %v5000_v39 = vsub.f32 1.0, %v4999_v33  ;;  %v4627_v41 = vpop.f32.mrf.mxu2  ;;  %v5009_v19 = vand.u32 2147483648, %v13531_v23  ;;  %v5577_v14 = vsel %vm9537_vm2, %v5450_v37, 0 }
 0x4a0   : > { %6090 = vrot.lane.b32.xlu0 %v5812_v43, %s9424_s30  ;;  %5902 = vrot.lane.b32.xlu1 %v5812_v43, %s9433_s20  ;;  %v5313_v26 = vpack.c.bf16 %v5281_v45, %v5281_v45  ;;  %v5016_v16 = vmul.f32 %v13579_v15, %v5015_v32  ;;  %v5312_v58 = vpack.c.bf16 %v5280_v40, %v5280_v40  ;;  %vm5019_vm8 = vweird.f32 %v13579_v15  ;;  %v5925_v40 = vpop.permute.xlu1 %5924 }
 0x4a1   : > { %6058 = vrot.lane.b32.xlu2 %v5647_v21, %s9437_s29  ;;  %v5001_v56 = vmul.f32 %v13585_v63, %v5000_v39  ;;  %v13615_v47 = vsel %vm9537_vm2, 0, %v5453_v29  ;;  %vm5004_vm10 = vweird.f32 %v13585_v63  ;;  %vm5018_vm5 = vweird.f32 %v13529_v10 }
 0x4a2   : > { %v13621_v5 = vpop.permute.xlu2 %5990  ;;  %v5377_v62 = vunpack.c.l.b16 %v5313_v26  ;;  %v5017_v59 = vadd.f32 %v13579_v15, %v5016_v16  ;;  %v5813_v42 = vrot.slane %v13615_v47, 1  ;;  %v5651_v8 = vshll.u32 %v13615_v47, 16  ;;  %vm13642_vm12 = vmor %vm5018_vm5, %vm5019_vm8 }
 0x4a3   : > { %v9085_v12 = vpop.eup %9084  ;;  %v5376_v27 = vunpack.c.l.b16 %v5312_v58  ;;  %v5002_v33 = vadd.f32 %v13585_v63, %v5001_v56  ;;  %v5022_v37 = vand.u32 2147483647, %v13529_v10  ;;  %v5814_v11 = vrot.slane %v5577_v14, 1 }
 0x4a4   : > { %v9087_v43 = vpop.eup %9086  ;;  %v13617_v55 = vadd.f32 1.0, %v9085_v12  ;;  %vm5003_vm0 = vweird.f32 %v13531_v23  ;;  %v5007_v32 = vand.u32 2147483647, %v13531_v23  ;;  %v13657_v23 = vld [vmem:[%s15670_s11] ss:$0 sm:$0xff]  ;;  %v5653_v16 = vrot.slane %v5651_v8, 1 }
 0x4a5   : > { %v13624_v7 = vadd.f32 1.0, %v9087_v43  ;;  %v5402_v45 = vpack.c.b16 %v5377_v62, %v5376_v27  ;;  %vm13647_vm11 = vmor %vm5003_vm0, %vm5004_vm10  ;;  %v13660_v12 = vadd.f32 %v13657_v23, %v4627_v41  ;;  %v5815_v26 = vsel %vm1764_vm3, %v5813_v42, %v5814_v11 }
 0x4a6   : > { %9088 = vrcp.f32 %v13617_v55  ;;  %v5006_v58 = vsel %vm13647_vm11, %v13585_v63, %v5002_v33  ;;  %v5010_v41 = vor.u32 1.1754944e-38, %v5009_v19  ;;  %vm5023_vm9 = vcmp.eq.f32.partialorder %v5022_v37, 8.507059e+37  ;;  %v5989_v39 = vpop.permute.xlu0 %5988 }
 0x4a7   : > { %9090 = vrcp.f32 %v13624_v7  ;;  %v13663_v43 = vpop.f32.mrf.mxu2  ;;  %v5649_v62 = vshrl.u32 %v13615_v47, 16  ;;  %vm5008_vm1 = vcmp.eq.f32.partialorder %v5007_v32, 8.507059e+37  ;;  %v8577_v33 = vmul.f32 -1.442695, %v13660_v12 }
 0x4a8   : > { %5870 = vrot.lane.b32.xlu0 %v5647_v21, %s9432_s1  ;;  %5964 = vrot.lane.b32.xlu1 %v5647_v21, %s9425_s18  ;;  %v5024_v21 = vand.u32 2147483648, %v13529_v10  ;;  %v5021_v10 = vsel %vm13642_vm12, %v13579_v15, %v5017_v59  ;;  %v13670_v15 = vadd.f32 %v13657_v23, %v13577_v31  ;;  %v5656_v59 = vshll.u32 %v5577_v14, 16 }
 0x4a9   : > { %5934 = vrot.lane.b32.xlu2 %v13615_v47, %s9434_s19  ;;  %v5455_v31 = vshrl.u32 %v5402_v45, 16  ;;  %v5011_v27 = vsel %vm5008_vm1, %v5010_v41, %v5006_v58  ;;  %9092 = vpow2.f32 %v8577_v33  ;;  %v16022_v41 = vld [vmem:[#allocation3_spill] sm:$0xff]  ;;  %vm6178_vm13 = vcmask 48128  }
 0x4aa   : > { %v5025_v56 = vor.u32 1.1754944e-38, %v5024_v21  ;;  %v5654_v21 = vor.u32 %v5653_v16, %v5649_v62  ;;  %v8576_v19 = vmul.f32 -1.442695, %v13670_v15  ;;  %v5658_v29 = vrot.slane %v5656_v59, 1 }
 0x4ab   : > { %v5282_v14 = vmul.f32 %v5011_v27, %v13458_v9  ;;  %v5458_v9 = vshll.u32 %v5402_v45, 16  ;;  %v7202_v27 = vld [vmem:[%s15673_s14] sm:$0x1]  ;;  %vm16023_vm14 = vcmask 31744   ;;  %vm16024_vm6 = vcmask 1040384  }
 0x4ac   : > { %v5026_v42 = vsel %vm5023_vm9, %v5025_v56, %v5021_v10  ;;  %v13679_v8 = vpop.eup %9088  ;;  %v5457_v56 = vrot.slane %v5455_v31, 7  ;;  %v5659_v58 = vsel %vm1539_vm7, %v5654_v21, %v5658_v29  ;;  %9094 = vpow2.f32 %v8576_v19 }
 0x4ad   : > { %v13682_v11 = vpop.eup %9090  ;;  %v5283_v37 = vmul.f32 %v5026_v42, %v13449_v6  ;;  %v5044_v32 = vmul.f32 %v13679_v8, %v13617_v55  ;;  %v6115_v6 = vsel %vm4519_vm15, %v16022_v41, %v13527_v22  ;;  %v5314_v42 = vpack.c.bf16 %v5282_v14, %v5282_v14 }
 0x4ae   : > { %v5029_v16 = vmul.f32 %v13682_v11, %v13624_v7  ;;  %v5460_v33 = vor.u32 %v5458_v9, %v5457_v56  ;;  %v6147_v22 = vsel %vm16023_vm14, %v6115_v6, %v5893_v2  ;;  %v7409_v21 = vsel %vm16024_vm6, %v7202_v27, 0 }
 0x4af   : > { %v5315_v62 = vpack.c.bf16 %v5283_v37, %v5283_v37  ;;  %v4632_v59 = vpop.f32.mrf.mxu2  ;;  %v5045_v31 = vsub.f32 1.0, %v5044_v32  ;;  %v6180_v19 = vsel %vm6178_vm13, %v6147_v22, %v5925_v40  ;;  %7418 = vmatpush.bf16.msra.mxu1 %v7409_v21  ;;  %v9093_v37 = vpop.eup %9092  ;;  %v5378_v14 = vunpack.c.l.b16 %v5314_v42 }
 0x4b0   : > { %6028 = vrot.lane.b32.xlu0 %v13615_v47, %s9436_s27  ;;  %5998 = vrot.lane.b32.xlu1 %v5815_v26, %s9435_s21  ;;  %v13689_v10 = vpop.permute.xlu1 %5862  ;;  %vm5033_vm4 = vweird.f32 %v13624_v7  ;;  %v5039_v32 = vand.u32 2147483648, %v13624_v7  ;;  %vm5048_vm8 = vweird.f32 %v13617_v55  ;;  %vm6243_vm10 = vcmask 80896  }
 0x4b1   : > { %6092 = vrot.lane.b32.xlu2 %v5815_v26, %s9424_s30  ;;  %v5379_v29 = vunpack.c.l.b16 %v5315_v62  ;;  %v5046_v9 = vmul.f32 %v13679_v8, %v5045_v31  ;;  %vm16025_vm5 = vcmask 64512   ;;  %v13719_v6 = vsel %vm9537_vm2, 0, %v5460_v33 }
 0x4b2   : > { %v13677_v63 = vpop.permute.xlu2 %6052  ;;  %v9095_v38 = vpop.eup %9094  ;;  %v6212_v40 = vsel %vm16025_vm5, %v6180_v19, %v13605_v51  ;;  %v13722_v27 = vadd.f32 1.0, %v9093_v37  ;;  %v13725_v31 = vadd.f32 %v13657_v23, %v4632_v59  ;;  %vm6276_vm0 = vcmask 97280  }
 0x4b3   : > { %v5403_v22 = vpack.c.b16 %v5379_v29, %v5378_v14  ;;  %v5054_v51 = vand.u32 2147483648, %v13617_v55  ;;  %v13731_v21 = vadd.f32 1.0, %v9095_v38  ;;  %v5578_v33 = vsel %vm9537_vm2, %v5457_v56, 0 }
 0x4b4   : > { %v13712_v2 = vpop.permute.xlu0 %5926  ;;  %v5047_v59 = vadd.f32 %v13679_v8, %v5046_v9  ;;  %vm5049_vm12 = vweird.f32 %v13679_v8  ;;  %v5816_v38 = vrot.slane %v13719_v6, 1  ;;  %v5663_v29 = vshll.u32 %v13719_v6, 16 }
 0x4b5   : > { %vm6309_vm11 = vcmask 113664   ;;  %vm5034_vm9 = vweird.f32 %v13682_v11  ;;  %9096 = vrcp.f32 %v13722_v27  ;;  %v5462_v14 = vshrl.u32 %v5403_v22, 16  ;;  %vm13758_vm1 = vmor %vm5048_vm8, %vm5049_vm12 }
 0x4b6   : > { %v5040_v9 = vor.u32 1.1754944e-38, %v5039_v32  ;;  %9098 = vrcp.f32 %v13731_v21  ;;  %vm13773_vm14 = vmor %vm5033_vm4, %vm5034_vm9  ;;  %v5055_v13 = vor.u32 1.1754944e-38, %v5054_v51  ;;  %v5665_v3 = vrot.slane %v5663_v29, 1 }
 0x4b7   : > { %v13744_v19 = vpop.f32.mrf.mxu2  ;;  %vm16030_vm6 = vcmask 130048   ;;  %vm6389_vm4 = vcmask 146432   ;;  %v5661_v51 = vshrl.u32 %v13719_v6, 16 }
 0x4b8   : > { %5904 = vrot.lane.b32.xlu0 %v5815_v26, %s9433_s20  ;;  %6060 = vrot.lane.b32.xlu1 %v5659_v58, %s9437_s29  ;;  %v5030_v26 = vsub.f32 1.0, %v5029_v16  ;;  %v5052_v16 = vand.u32 2147483647, %v13617_v55  ;;  %v6021_v62 = vpop.permute.xlu1 %6020 }
 0x4b9   : > { %5872 = vrot.lane.b32.xlu2 %v5659_v58, %s9432_s1  ;;  %v5666_v29 = vor.u32 %v5665_v3, %v5661_v51 }
 0x4ba   : > { %v5031_v42 = vmul.f32 %v13682_v11, %v5030_v26  ;;  %v6245_v26 = vsel %vm6243_vm10, %v6212_v40, %v5989_v39  ;;  %v5037_v39 = vand.u32 2147483647, %v13624_v7  ;;  %vm5053_vm8 = vcmp.eq.f32.partialorder %v5052_v16, 8.507059e+37 }
 0x4bb   : > { %v6278_v37 = vsel %vm6276_vm0, %v6245_v26, %v6021_v62  ;;  %v5817_v62 = vrot.slane %v5578_v33, 1  ;;  %v5051_v26 = vsel %vm13758_vm1, %v13679_v8, %v5047_v59  ;;  %v5464_v7 = vrot.slane %v5462_v14, 7 }
 0x4bc   : > { %v5032_v56 = vadd.f32 %v13682_v11, %v5031_v42  ;;  %v6085_v32 = vpop.permute.xlu0 %6084  ;;  %v6311_v48 = vsel %vm6309_vm11, %v6278_v37, %v13677_v63  ;;  %v5056_v63 = vsel %vm5053_vm8, %v5055_v13, %v5051_v26  ;;  %vm5038_vm5 = vcmp.eq.f32.partialorder %v5037_v39, 8.507059e+37 }
 0x4bd   : > { %v13706_v45 = vpop.permute.xlu2 %5928  ;;  %v5818_v34 = vsel %vm1764_vm3, %v5816_v38, %v5817_v62  ;;  %v6343_v8 = vsel %vm16030_vm6, %v6311_v48, %v6085_v32  ;;  %v5668_v38 = vshll.u32 %v5578_v33, 16  ;;  %v13789_v48 = vpop.eup %9096  ;;  %v5285_v13 = vmul.f32 %v5056_v63, %v13552_v28 }
 0x4be   : > { %v5036_v59 = vsel %vm13773_vm14, %v13682_v11, %v5032_v56  ;;  %8594 = vmatmul.msk.bf16.vlgmr.msra.gmra.mxu3 %vm6389_vm4, %v6343_v8  ;;  %v5465_v11 = vshll.u32 %v5403_v22, 16  ;;  %v13791_v56 = vpop.eup %9098  ;;  %v5579_v51 = vsel %vm9537_vm2, %v5464_v7, 0  ;;  %vm5079_vm12 = vweird.f32 %v13789_v48 }
 0x4bf   : > { %v5041_v16 = vsel %vm5038_vm5, %v5040_v9, %v5036_v59  ;;  %v4637_v33 = vpop.f32.mrf.mxu2  ;;  %v5670_v14 = vrot.slane %v5668_v38, 1  ;;  %v5059_v39 = vmul.f32 %v13791_v56, %v13731_v21  ;;  %v5317_v9 = vpack.c.bf16 %v5285_v13, %v5285_v13 }
 0x4c0   : > { %5966 = vrot.lane.b32.xlu0 %v5659_v58, %s9425_s18  ;;  %5936 = vrot.lane.b32.xlu1 %v13719_v6, %s9434_s19  ;;  %v13741_v58 = vadd.f32 %v13657_v23, %v13663_v43  ;;  %v8579_v43 = vmul.f32 -1.442695, %v13725_v31  ;;  %v13786_v37 = vpop.permute.xlu1 %5896  ;;  %v5284_v62 = vmul.f32 %v5041_v16, %v13560_v30  ;;  %vm5064_vm9 = vweird.f32 %v13791_v56 }
 0x4c1   : > { %6030 = vrot.lane.b32.xlu2 %v13719_v6, %s9436_s27  ;;  %v5060_v8 = vsub.f32 1.0, %v5059_v39  ;;  %v5381_v38 = vunpack.c.l.b16 %v5317_v9  ;;  %vm5078_vm1 = vweird.f32 %v13722_v27  ;;  %vm5063_vm6 = vweird.f32 %v13731_v21 }
 0x4c2   : > { %v8578_v4 = vmul.f32 -1.442695, %v13741_v58  ;;  %9100 = vpow2.f32 %v8579_v43  ;;  %v5467_v43 = vor.u32 %v5465_v11, %v5464_v7  ;;  %v5316_v55 = vpack.c.bf16 %v5284_v62, %v5284_v62  ;;  %vm13855_vm14 = vmor %vm5078_vm1, %vm5079_vm12 }
 0x4c3   : > { %v13830_v7 = vadd.f32 %v13657_v23, %v4637_v33  ;;  %v5084_v33 = vand.u32 2147483648, %v13722_v27  ;;  %vm13870_vm8 = vmor %vm5063_vm6, %vm5064_vm9  ;;  %vm16035_vm9 = vcmask 31744   ;;  %vm16036_vm1 = vcmask 64512  }
 0x4c4   : > { %9102 = vpow2.f32 %v8578_v4  ;;  %v5671_v4 = vsel %vm1539_vm7, %v5666_v29, %v5670_v14  ;;  %v13811_v30 = vsel %vm9537_vm2, 0, %v5467_v43  ;;  %v5380_v13 = vunpack.c.l.b16 %v5316_v55 }
 0x4c5   : > { %v13762_v42 = vpop.permute.xlu2 %6086  ;;  %v5819_v11 = vrot.slane %v13811_v30, 1  ;;  %v5675_v16 = vshll.u32 %v13811_v30, 16  ;;  %v13825_v43 = vadd.f32 %v13657_v23, %v13744_v19  ;;  %v5061_v14 = vmul.f32 %v13791_v56, %v5060_v8 }
 0x4c6   : > { %v5404_v39 = vpack.c.b16 %v5381_v38, %v5380_v13  ;;  %v5673_v8 = vshrl.u32 %v13811_v30, 16  ;;  %v5680_v38 = vshll.u32 %v5579_v51, 16  ;;  %v8581_v13 = vmul.f32 -1.442695, %v13830_v7 }
 0x4c7   : > { %v5085_v25 = vor.u32 1.1754944e-38, %v5084_v33  ;;  %vm16037_vm6 = vcmask 130048  }
 0x4c8   : > { %6000 = vrot.lane.b32.xlu0 %v5818_v34, %s9435_s21  ;;  %6094 = vrot.lane.b32.xlu1 %v5818_v34, %s9424_s30  ;;  %v9101_v40 = vpop.eup %9100 }
 0x4c9   : > { %5906 = vrot.lane.b32.xlu2 %v5818_v34, %s9433_s20  ;;  %v5074_v34 = vmul.f32 %v13789_v48, %v13722_v27  ;;  %v13806_v32 = vadd.f32 1.0, %v9101_v40  ;;  %v13832_v40 = vpop.f32.mrf.mxu2 }
 0x4ca   : > { %v9103_v3 = vpop.eup %9102  ;;  %v13804_v28 = vpop.permute.xlu0 %5864 }
 0x4cb   : > { %v5075_v26 = vsub.f32 1.0, %v5074_v34  ;;  %v13813_v59 = vadd.f32 1.0, %v9103_v3  ;;  %v13815_v63 = vpop.permute.xlu1 %5958  ;;  %9104 = vrcp.f32 %v13806_v32  ;;  %v5820_v34 = vrot.slane %v5579_v51, 1 }
 0x4cc   : > { %v5069_v3 = vand.u32 2147483648, %v13731_v21  ;;  %v5067_v51 = vand.u32 2147483647, %v13731_v21  ;;  %v6117_v21 = vsel %vm4519_vm15, %v12856_v44, %v13689_v10 }
 0x4cd   : > { %v5076_v29 = vmul.f32 %v13789_v48, %v5075_v26  ;;  %9106 = vrcp.f32 %v13813_v59  ;;  %v5821_v19 = vsel %vm1764_vm3, %v5819_v11, %v5820_v34  ;;  %v8580_v26 = vmul.f32 -1.442695, %v13825_v43 }
 0x4ce   : > { %v5469_v34 = vshrl.u32 %v5404_v39, 16  ;;  %vm5068_vm12 = vcmp.eq.f32.partialorder %v5067_v51, 8.507059e+37  ;;  %v6149_v44 = vsel %vm16035_vm9, %v6117_v21, %v13563_v49  ;;  %vm5093_vm9 = vweird.f32 %v13813_v59 }
 0x4cf   : > { %v5077_v9 = vadd.f32 %v13789_v48, %v5076_v29  ;;  %v5082_v29 = vand.u32 2147483647, %v13722_v27  ;;  %9108 = vpow2.f32 %v8580_v26 }
 0x4d0   : > { %v13800_v22 = vpop.permute.xlu2 %5866  ;;  %6062 = vrot.lane.b32.xlu0 %v5671_v4, %s9437_s29  ;;  %5874 = vrot.lane.b32.xlu1 %v5671_v4, %s9432_s1  ;;  %9110 = vpow2.f32 %v8581_v13 }
 0x4d1   : > { %5968 = vrot.lane.b32.xlu2 %v5671_v4, %s9425_s18  ;;  %v5677_v4 = vrot.slane %v5675_v16, 1  ;;  %v13849_v11 = vpop.eup %9104  ;;  %v5062_v16 = vadd.f32 %v13791_v56, %v5061_v14  ;;  %v5081_v14 = vsel %vm13855_vm14, %v13789_v48, %v5077_v9  ;;  %v5070_v48 = vor.u32 1.1754944e-38, %v5069_v3  ;;  %v4642_v0 = vpop.f32.mrf.mxu2 }
 0x4d2   : > { %vm5083_vm5 = vcmp.eq.f32.partialorder %v5082_v29, 8.507059e+37  ;;  %v5471_v9 = vrot.slane %v5469_v34, 7 }
 0x4d3   : > { %v5678_v61 = vor.u32 %v5677_v4, %v5673_v8  ;;  %v13859_v52 = vpop.eup %9106  ;;  %v5104_v4 = vmul.f32 %v13849_v11, %v13806_v32  ;;  %v5682_v8 = vrot.slane %v5680_v38, 1  ;;  %v5066_v54 = vsel %vm13870_vm8, %v13791_v56, %v5062_v16 }
 0x4d4   : > { %v5086_v33 = vsel %vm5083_vm5, %v5085_v25, %v5081_v14  ;;  %v5089_v35 = vmul.f32 %v13859_v52, %v13813_v59  ;;  %v5472_v56 = vshll.u32 %v5404_v39, 16  ;;  %v5071_v25 = vsel %vm5068_vm12, %v5070_v48, %v5066_v54 }
 0x4d5   : > { %v6023_v55 = vpop.permute.xlu0 %6022  ;;  %v5683_v26 = vsel %vm1539_vm7, %v5678_v61, %v5682_v8  ;;  %v5105_v3 = vsub.f32 1.0, %v5104_v4  ;;  %v6182_v38 = vsel %vm6178_vm13, %v6149_v44, %v13712_v2  ;;  %v5287_v16 = vmul.f32 %v5086_v33, %v13660_v12 }
 0x4d6   : > { %v6214_v61 = vsel %vm16036_vm1, %v6182_v38, %v13815_v63  ;;  %v5474_v29 = vor.u32 %v5472_v56, %v5471_v9  ;;  %v5090_v13 = vsub.f32 1.0, %v5089_v35  ;;  %v5286_v51 = vmul.f32 %v5071_v25, %v13670_v15 }
 0x4d7   : > { %v5106_v39 = vmul.f32 %v13849_v11, %v5105_v3  ;;  %v6247_v14 = vsel %vm6243_vm10, %v6214_v61, %v13621_v5  ;;  %v5319_v4 = vpack.c.bf16 %v5287_v16, %v5287_v16  ;;  %vm5094_vm14 = vweird.f32 %v13859_v52 }
 0x4d8   : > { %v13834_v62 = vpop.permute.xlu2 %6024  ;;  %5938 = vrot.lane.b32.xlu0 %v13811_v30, %s9434_s19  ;;  %6032 = vrot.lane.b32.xlu1 %v13811_v30, %s9436_s27  ;;  %v6280_v12 = vsel %vm6276_vm0, %v6247_v14, %v6023_v55  ;;  %v5091_v63 = vmul.f32 %v13859_v52, %v5090_v13  ;;  %v13914_v15 = vsel %vm9537_vm2, 0, %v5474_v29  ;;  %v5318_v5 = vpack.c.bf16 %v5286_v51, %v5286_v51  ;;  %vm13955_vm1 = vmor %vm5093_vm9, %vm5094_vm14 }
 0x4d9   : > { %6002 = vrot.lane.b32.xlu2 %v5821_v19, %s9435_s21  ;;  %v5099_v55 = vand.u32 2147483648, %v13813_v59  ;;  %v5107_v48 = vadd.f32 %v13849_v11, %v5106_v39  ;;  %vm5109_vm8 = vweird.f32 %v13849_v11  ;;  %v5114_v33 = vand.u32 2147483648, %v13806_v32  ;;  %v13929_v56 = vpop.f32.mrf.mxu2 }
 0x4da   : > { %v5383_v44 = vunpack.c.l.b16 %v5319_v4  ;;  %v5687_v3 = vshll.u32 %v13914_v15, 16  ;;  %v5092_v38 = vadd.f32 %v13859_v52, %v5091_v63  ;;  %vm5108_vm5 = vweird.f32 %v13806_v32 }
 0x4db   : > { %v13866_v27 = vpop.permute.xlu1 %5992  ;;  %v5112_v16 = vand.u32 2147483647, %v13806_v32  ;;  %vm13941_vm12 = vmor %vm5108_vm5, %vm5109_vm8  ;;  %v5097_v13 = vand.u32 2147483647, %v13813_v59  ;;  %vm16042_vm8 = vcmask 31744   ;;  %vm16043_vm5 = vcmask 64512  }
 0x4dc   : > { %v5111_v32 = vsel %vm13941_vm12, %v13849_v11, %v5107_v48  ;;  %v5096_v11 = vsel %vm13955_vm1, %v13859_v52, %v5092_v38 }
 0x4dd   : > { %v13897_v49 = vpop.permute.xlu0 %5898  ;;  %vm5098_vm14 = vcmp.eq.f32.partialorder %v5097_v13, 8.507059e+37 }
 0x4e0   : > { %6096 = vrot.lane.b32.xlu0 %v5821_v19, %s9424_s30  ;;  %5908 = vrot.lane.b32.xlu1 %v5821_v19, %s9433_s20  ;;  %v13890_v10 = vpop.permute.xlu2 %5900  ;;  %v9109_v19 = vpop.eup %9108 }
 0x4e1   : > { %6064 = vrot.lane.b32.xlu2 %v5683_v26, %s9437_s29  ;;  %v9111_v34 = vpop.eup %9110  ;;  %v13903_v2 = vadd.f32 1.0, %v9109_v19  ;;  %v13946_v19 = vadd.f32 %v13657_v23, %v4642_v0  ;;  %v13961_v0 = vadd.f32 %v13657_v23, %v13832_v40 }
 0x4e2   : > { %v13907_v8 = vadd.f32 1.0, %v9111_v34  ;;  %v5115_v34 = vor.u32 1.1754944e-38, %v5114_v33 }
 0x4e3   : > { %9112 = vrcp.f32 %v13903_v2  ;;  %v8582_v33 = vmul.f32 -1.442695, %v13961_v0  ;;  %vm5123_vm12 = vweird.f32 %v13903_v2 }
 0x4e4   : > { %9114 = vrcp.f32 %v13907_v8  ;;  %vm5138_vm1 = vweird.f32 %v13907_v8 }
 0x4e8   : > { %v6055_v21 = vpop.permute.xlu1 %6054  ;;  %5876 = vrot.lane.b32.xlu0 %v5683_v26, %s9432_s1  ;;  %5970 = vrot.lane.b32.xlu1 %v5683_v26, %s9425_s18  ;;  %v5580_v26 = vsel %vm9537_vm2, %v5471_v9, 0  ;;  %v5382_v9 = vunpack.c.l.b16 %v5318_v5  ;;  %v5685_v5 = vshrl.u32 %v13914_v15, 16 }
 0x4e9   : > { %v6313_v35 = vsel %vm6309_vm11, %v6280_v12, %v6055_v21  ;;  %5940 = vrot.lane.b32.xlu2 %v13914_v15, %s9434_s19  ;;  %v5823_v29 = vrot.slane %v5580_v26, 1  ;;  %v5961_v51 = vpop.permute.xlu0 %5960  ;;  %v5689_v12 = vrot.slane %v5687_v3, 1  ;;  %v5100_v21 = vor.u32 1.1754944e-38, %v5099_v55  ;;  %v13972_v63 = vpop.eup %9112 }
 0x4ea   : > { %v6345_v54 = vsel %vm16037_vm6, %v6313_v35, %v13762_v42  ;;  %v5822_v42 = vrot.slane %v13914_v15, 1  ;;  %v5405_v39 = vpack.c.b16 %v5383_v44, %v5382_v9  ;;  %vm5113_vm6 = vcmp.eq.f32.partialorder %v5112_v16, 8.507059e+37  ;;  %v13977_v48 = vpop.eup %9114  ;;  %v4647_v9 = vpop.f32.mrf.mxu2 }
 0x4eb   : > { %8595 = vmatmul.msk.bf16.gmra.mxu3 %vm6389_vm4, %v6345_v54  ;;  %v13931_v25 = vpop.permute.xlu2 %5962  ;;  %v5116_v40 = vsel %vm5113_vm6, %v5115_v34, %v5111_v32  ;;  %v8583_v35 = vmul.f32 -1.442695, %v13946_v19  ;;  %v5692_v54 = vshll.u32 %v5580_v26, 16  ;;  %v5101_v55 = vsel %vm5098_vm14, %v5100_v21, %v5096_v11 }
 0x4ec   : > { %v5824_v4 = vsel %vm1764_vm3, %v5822_v42, %v5823_v29  ;;  %v5476_v52 = vshrl.u32 %v5405_v39, 16  ;;  %v5690_v42 = vor.u32 %v5689_v12, %v5685_v5  ;;  %v5289_v3 = vmul.f32 %v5116_v40, %v13725_v31 }
 0x4ed   : > { %v5119_v38 = vmul.f32 %v13972_v63, %v13903_v2  ;;  %v5134_v16 = vmul.f32 %v13977_v48, %v13907_v8  ;;  %9116 = vpow2.f32 %v8583_v35  ;;  %v6119_v26 = vsel %vm4519_vm15, %v13017_v36, %v13804_v28 }
 0x4ee   : > { %v5694_v61 = vrot.slane %v5692_v54, 1  ;;  %v5288_v29 = vmul.f32 %v5101_v55, %v13741_v58  ;;  %v5478_v13 = vrot.slane %v5476_v52, 7  ;;  %9118 = vpow2.f32 %v8582_v33 }
 0x4ef   : > { %v5321_v31 = vpack.c.bf16 %v5289_v3, %v5289_v3  ;;  %v6151_v34 = vsel %vm16042_vm8, %v6119_v26, %v13786_v37  ;;  %v5479_v36 = vshll.u32 %v5405_v39, 16  ;;  %v5120_v28 = vsub.f32 1.0, %v5119_v38 }
 0x4f0   : > { %v13964_v59 = vpop.permute.xlu1 %5930  ;;  %6034 = vrot.lane.b32.xlu0 %v13914_v15, %s9436_s27  ;;  %6004 = vrot.lane.b32.xlu1 %v5824_v4, %s9435_s21  ;;  %v5695_v32 = vsel %vm1539_vm7, %v5690_v42, %v5694_v61  ;;  %v5135_v11 = vsub.f32 1.0, %v5134_v16  ;;  %v5320_v58 = vpack.c.bf16 %v5288_v29, %v5288_v29  ;;  %v6184_v35 = vsel %vm6178_vm13, %v6151_v34, %v13706_v45 }
 0x4f1   : > { %6098 = vrot.lane.b32.xlu2 %v5824_v4, %s9424_s30  ;;  %v5481_v40 = vor.u32 %v5479_v36, %v5478_v13  ;;  %v5385_v37 = vunpack.c.l.b16 %v5321_v31  ;;  %v5121_v52 = vmul.f32 %v13972_v63, %v5120_v28  ;;  %v5127_v33 = vand.u32 2147483647, %v13903_v2 }
 0x4f2   : > { %v13996_v14 = vpop.permute.xlu0 %5994  ;;  %v5136_v39 = vmul.f32 %v13977_v48, %v5135_v11  ;;  %v5384_v55 = vunpack.c.l.b16 %v5320_v58  ;;  %v5129_v42 = vand.u32 2147483648, %v13903_v2  ;;  %vm5124_vm9 = vweird.f32 %v13972_v63 }
 0x4f3   : > { %v13980_v44 = vpop.permute.xlu2 %5996  ;;  %v9117_v21 = vpop.eup %9116  ;;  %v14013_v45 = vadd.f32 %v13657_v23, %v4647_v9  ;;  %v14021_v16 = vsel %vm9537_vm2, 0, %v5481_v40  ;;  %v5142_v61 = vand.u32 2147483647, %v13907_v8  ;;  %v5122_v9 = vadd.f32 %v13972_v63, %v5121_v52  ;;  %vm14053_vm14 = vmor %vm5123_vm12, %vm5124_vm9 }
 0x4f4   : > { %v9119_v54 = vpop.eup %9118  ;;  %v14009_v3 = vadd.f32 1.0, %v9117_v21  ;;  %v14023_v26 = vpack.c.b16 %v5385_v37, %v5384_v55  ;;  %vm5139_vm6 = vweird.f32 %v13977_v48  ;;  %v14037_v31 = vadd.f32 %v13657_v23, %v13929_v56 }
 0x4f5   : > { %v14027_v29 = vadd.f32 1.0, %v9119_v54  ;;  %v5144_v34 = vand.u32 2147483648, %v13907_v8  ;;  %v5581_v11 = vsel %vm9537_vm2, %v5478_v13, 0  ;;  %v8585_v58 = vmul.f32 -1.442695, %v14013_v45  ;;  %vm14068_vm8 = vmor %vm5138_vm1, %vm5139_vm6 }
 0x4f6   : > { %9120 = vrcp.f32 %v14009_v3  ;;  %v5483_v13 = vshrl.u32 %v14023_v26, 16  ;;  %v8584_v52 = vmul.f32 -1.442695, %v14037_v31  ;;  %v5826_v8 = vrot.slane %v5581_v11, 1 }
 0x4f7   : > { %9122 = vrcp.f32 %v14027_v29  ;;  %vm5128_vm12 = vcmp.eq.f32.partialorder %v5127_v33, 8.507059e+37  ;;  %v5145_v55 = vor.u32 1.1754944e-38, %v5144_v34  ;;  %vm5143_vm9 = vcmp.eq.f32.partialorder %v5142_v61, 8.507059e+37 }
 0x4f8   : > { %5910 = vrot.lane.b32.xlu0 %v5824_v4, %s9433_s20  ;;  %6066 = vrot.lane.b32.xlu1 %v5695_v32, %s9437_s29  ;;  %v6089_v12 = vpop.permute.xlu1 %6088  ;;  %v6216_v4 = vsel %vm16043_vm5, %v6184_v35, %v5961_v51  ;;  %v14015_v51 = vpop.f32.mrf.mxu2  ;;  %v5699_v35 = vshll.u32 %v14021_v16, 16  ;;  %vm16048_vm5 = vcmask 130048   ;;  %9124 = vpow2.f32 %v8585_v58 }
 0x4f9   : > { %5878 = vrot.lane.b32.xlu2 %v5695_v32, %s9432_s1  ;;  %v6249_v38 = vsel %vm6243_vm10, %v6216_v4, %v13866_v27  ;;  %v5137_v27 = vadd.f32 %v13977_v48, %v5136_v39  ;;  %v5126_v4 = vsel %vm14053_vm14, %v13972_v63, %v5122_v9  ;;  %v5130_v39 = vor.u32 1.1754944e-38, %v5129_v42  ;;  %vm16051_vm14 = vmmov %vm16048_vm5 }
 0x4fa   : > { %v6282_v36 = vsel %vm6276_vm0, %v6249_v38, %v13834_v62  ;;  %v5825_v62 = vrot.slane %v14021_v16, 1  ;;  %v5701_v38 = vrot.slane %v5699_v35, 1  ;;  %v5485_v63 = vrot.slane %v5483_v13, 7 }
 0x4fb   : > { %v14001_v5 = vpop.permute.xlu2 %6058  ;;  %v5141_v54 = vsel %vm14068_vm8, %v13977_v48, %v5137_v27  ;;  %v5131_v9 = vsel %vm5128_vm12, %v5130_v39, %v5126_v4  ;;  %v6121_v48 = vsel %vm4519_vm15, %v13224_v17, %v13800_v22  ;;  %9126 = vpow2.f32 %v8584_v52 }
 0x4fc   : > { %vm16049_vm1 = vcmask 31744   ;;  %v5697_v61 = vshrl.u32 %v14021_v16, 16  ;;  %v5704_v27 = vshll.u32 %v5581_v11, 16  ;;  %v5486_v58 = vshll.u32 %v14023_v26, 16 }
 0x4fd   : > { %v6153_v33 = vsel %vm16049_vm1, %v6121_v48, %v13897_v49  ;;  %v5290_v11 = vmul.f32 %v5131_v9, %v13825_v43  ;;  %vm16050_vm6 = vcmask 64512   ;;  %v14131_v9 = vadd.f32 %v13657_v23, %v14015_v51 }
 0x4fe   : > { %v6186_v56 = vsel %vm6178_vm13, %v6153_v33, %v13964_v59  ;;  %v5702_v35 = vor.u32 %v5701_v38, %v5697_v61  ;;  %v5488_v2 = vor.u32 %v5486_v58, %v5485_v63  ;;  %v5706_v4 = vrot.slane %v5704_v27, 1 }
 0x4ff   : > { %v5582_v58 = vsel %vm9537_vm2, %v5485_v63, 0  ;;  %v5159_v63 = vand.u32 2147483648, %v14027_v29  ;;  %vm5168_vm12 = vweird.f32 %v14009_v3 }
 0x500   : > { %5972 = vrot.lane.b32.xlu0 %v5695_v32, %s9425_s18  ;;  %5942 = vrot.lane.b32.xlu1 %v14021_v16, %s9434_s19  ;;  %v4652_v42 = vpop.f32.mrf.mxu2  ;;  %v5707_v39 = vsel %vm1539_vm7, %v5702_v35, %v5706_v4 }
 0x501   : > { %6036 = vrot.lane.b32.xlu2 %v14021_v16, %s9436_s27 }
 0x502   : > { %v6057_v32 = vpop.permute.xlu0 %6056  ;;  %v14045_v28 = vpop.permute.xlu1 %5868 }
 0x503   : > { %v6315_v21 = vsel %vm6309_vm11, %v6282_v36, %v6057_v32  ;;  %v14059_v40 = vpop.permute.xlu2 %5934  ;;  %v14083_v32 = vpop.eup %9120  ;;  %v5146_v36 = vsel %vm5143_vm9, %v5145_v55, %v5141_v54  ;;  %v14118_v55 = vadd.f32 %v13657_v23, %v4652_v42  ;;  %vm5153_vm9 = vweird.f32 %v14027_v29 }
 0x504   : > { %v6347_v37 = vsel %vm16048_vm5, %v6315_v21, %v6089_v12  ;;  %v5827_v12 = vsel %vm1764_vm3, %v5825_v62, %v5826_v8  ;;  %v14094_v34 = vpop.eup %9122  ;;  %v5291_v21 = vmul.f32 %v5146_v36, %v13830_v7  ;;  %v5164_v49 = vmul.f32 %v14083_v32, %v14009_v3 }
 0x505   : > { %8596 = vmatmul.msk.bf16.gmra.mxu3 %vm6389_vm4, %v6347_v37  ;;  %v9125_v13 = vpop.eup %9124  ;;  %v5149_v59 = vmul.f32 %v14094_v34, %v14027_v29  ;;  %v6218_v37 = vsel %vm16050_vm6, %v6186_v56, %v13931_v25  ;;  %v5322_v25 = vpack.c.bf16 %v5290_v11, %v5290_v11  ;;  %v8587_v51 = vmul.f32 -1.442695, %v14118_v55 }
 0x506   : > { %v6251_v7 = vsel %vm6243_vm10, %v6218_v37, %v13996_v14  ;;  %v9127_v26 = vpop.eup %9126  ;;  %v5323_v54 = vpack.c.bf16 %v5291_v21, %v5291_v21  ;;  %v5165_v52 = vsub.f32 1.0, %v5164_v49  ;;  %v14115_v43 = vadd.f32 1.0, %v9125_v13 }
 0x507   : > { %v14125_v14 = vsel %vm9537_vm2, 0, %v5488_v2  ;;  %v14127_v38 = vadd.f32 1.0, %v9127_v26  ;;  %v5386_v49 = vunpack.c.l.b16 %v5322_v25  ;;  %v8586_v11 = vmul.f32 -1.442695, %v14131_v9 }
 0x508   : > { %6006 = vrot.lane.b32.xlu0 %v5827_v12, %s9435_s21  ;;  %6100 = vrot.lane.b32.xlu1 %v5827_v12, %s9424_s30  ;;  %v5387_v42 = vunpack.c.l.b16 %v5323_v54  ;;  %v5166_v61 = vmul.f32 %v14083_v32, %v5165_v52  ;;  %v14138_v27 = vpop.f32.mrf.mxu2  ;;  %9128 = vrcp.f32 %v14115_v43  ;;  %v5711_v21 = vshll.u32 %v14125_v14, 16 }
 0x509   : > { %5912 = vrot.lane.b32.xlu2 %v5827_v12, %s9433_s20  ;;  %v5150_v12 = vsub.f32 1.0, %v5149_v59  ;;  %9130 = vrcp.f32 %v14127_v38  ;;  %v5829_v13 = vrot.slane %v5582_v58, 1  ;;  %vm5169_vm8 = vweird.f32 %v14083_v32 }
 0x50a   : > { %v14098_v17 = vpop.permute.xlu0 %5932  ;;  %v6027_v22 = vpop.permute.xlu1 %6026  ;;  %v5407_v2 = vpack.c.b16 %v5387_v42, %v5386_v49  ;;  %v5167_v59 = vadd.f32 %v14083_v32, %v5166_v61  ;;  %9132 = vpow2.f32 %v8587_v51  ;;  %v5713_v4 = vrot.slane %v5711_v21, 1  ;;  %vm14176_vm1 = vmor %vm5168_vm12, %vm5169_vm8 }
 0x50b   : > { %v14104_v62 = vpop.permute.xlu2 %6092  ;;  %v6284_v8 = vsel %vm6276_vm0, %v6251_v7, %v6027_v22  ;;  %v5151_v35 = vmul.f32 %v14094_v34, %v5150_v12  ;;  %vm5154_vm5 = vweird.f32 %v14094_v34  ;;  %v5174_v26 = vand.u32 2147483648, %v14009_v3 }
 0x50c   : > { %v6317_v48 = vsel %vm6309_vm11, %v6284_v8, %v14001_v5  ;;  %v5828_v5 = vrot.slane %v14125_v14, 1  ;;  %v5172_v52 = vand.u32 2147483647, %v14009_v3  ;;  %9134 = vpow2.f32 %v8586_v11  ;;  %vm14186_vm6 = vmor %vm5153_vm9, %vm5154_vm5 }
 0x50d   : > { %v5152_v7 = vadd.f32 %v14094_v34, %v5151_v35  ;;  %v5709_v25 = vshrl.u32 %v14125_v14, 16  ;;  %v5716_v12 = vshll.u32 %v5582_v58, 16  ;;  %v5490_v61 = vshrl.u32 %v5407_v2, 16 }
 0x50e   : > { %v5830_v37 = vsel %vm1764_vm3, %v5828_v5, %v5829_v13  ;;  %v14166_v54 = vpop.eup %9128  ;;  %v5175_v5 = vor.u32 1.1754944e-38, %v5174_v26  ;;  %v5160_v11 = vor.u32 1.1754944e-38, %v5159_v63  ;;  %v6123_v26 = vsel %vm4519_vm15, %v13403_v53, %v14045_v28 }
 0x50f   : > { %v14182_v3 = vpop.eup %9130  ;;  %v5714_v58 = vor.u32 %v5713_v4, %v5709_v25  ;;  %v5156_v51 = vsel %vm14186_vm6, %v14094_v34, %v5152_v7  ;;  %v5194_v21 = vmul.f32 %v14166_v54, %v14115_v43  ;;  %v5718_v13 = vrot.slane %v5716_v12, 1 }
 0x510   : > { %6068 = vrot.lane.b32.xlu0 %v5707_v39, %s9437_s29  ;;  %5880 = vrot.lane.b32.xlu1 %v5707_v39, %s9432_s1  ;;  %v4657_v49 = vpop.f32.mrf.mxu2  ;;  %v9133_v35 = vpop.eup %9132  ;;  %vm16056_vm5 = vcmask 31744   ;;  %vm16057_vm12 = vcmask 64512   ;;  %vm5184_vm9 = vweird.f32 %v14182_v3  ;;  %vm5199_vm6 = vweird.f32 %v14166_v54 }
 0x511   : > { %5974 = vrot.lane.b32.xlu2 %v5707_v39, %s9425_s18  ;;  %v14201_v25 = vadd.f32 %v13657_v23, %v4657_v49  ;;  %v5719_v34 = vsel %vm1539_vm7, %v5714_v58, %v5718_v13  ;;  %v5195_v63 = vsub.f32 1.0, %v5194_v21  ;;  %v14206_v7 = vadd.f32 1.0, %v9133_v35 }
 0x512   : > { %v6091_v36 = vpop.permute.xlu0 %6090  ;;  %v14135_v33 = vpop.permute.xlu1 %5902  ;;  %v6155_v28 = vsel %vm16056_vm5, %v6123_v26, %v13890_v10  ;;  %v5202_v10 = vand.u32 2147483647, %v14115_v43  ;;  %v5204_v49 = vand.u32 2147483648, %v14115_v43  ;;  %vm5183_vm5 = vweird.f32 %v14127_v38 }
 0x513   : > { %v6349_v56 = vsel %vm16051_vm14, %v6317_v48, %v6091_v36  ;;  %v14141_v22 = vpop.permute.xlu2 %5872  ;;  %v5157_v36 = vand.u32 2147483647, %v14027_v29  ;;  %v5171_v29 = vsel %vm14176_vm1, %v14083_v32, %v5167_v59  ;;  %vm5173_vm14 = vcmp.eq.f32.partialorder %v5172_v52, 8.507059e+37  ;;  %v9135_v32 = vpop.eup %9134 }
 0x514   : > { %v5176_v46 = vsel %vm5173_vm14, %v5175_v5, %v5171_v29  ;;  %v5179_v48 = vmul.f32 %v14182_v3, %v14127_v38  ;;  %v5492_v59 = vrot.slane %v5490_v61, 7  ;;  %v5493_v52 = vshll.u32 %v5407_v2, 16 }
 0x515   : > { %8597 = vmatmul.msk.bf16.gmra.mxu3 %vm6389_vm4, %v6349_v56  ;;  %vm5158_vm8 = vcmp.eq.f32.partialorder %v5157_v36, 8.507059e+37  ;;  %v5293_v12 = vmul.f32 %v5176_v46, %v13946_v19  ;;  %v14215_v36 = vadd.f32 %v13657_v23, %v14138_v27  ;;  %v14220_v58 = vadd.f32 1.0, %v9135_v32 }
 0x516   : > { %v5161_v4 = vsel %vm5158_vm8, %v5160_v11, %v5156_v51  ;;  %v5180_v29 = vsub.f32 1.0, %v5179_v48  ;;  %v5495_v53 = vor.u32 %v5493_v52, %v5492_v59  ;;  %v8589_v46 = vmul.f32 -1.442695, %v14201_v25 }
 0x517   : > { %v5292_v56 = vmul.f32 %v5161_v4, %v13961_v0  ;;  %v5196_v19 = vmul.f32 %v14166_v54, %v5195_v63  ;;  %9136 = vrcp.f32 %v14206_v7  ;;  %v6188_v23 = vsel %vm6178_vm13, %v6155_v28, %v14098_v17 }
 0x518   : > { %5944 = vrot.lane.b32.xlu0 %v14125_v14, %s9434_s19  ;;  %6038 = vrot.lane.b32.xlu1 %v14125_v14, %s9436_s27  ;;  %v5325_v27 = vpack.c.bf16 %v5293_v12, %v5293_v12  ;;  %v8588_v0 = vmul.f32 -1.442695, %v14215_v36  ;;  %v5181_v21 = vmul.f32 %v14182_v3, %v5180_v29  ;;  %9138 = vrcp.f32 %v14220_v58 }
 0x519   : > { %6008 = vrot.lane.b32.xlu2 %v5830_v37, %s9435_s21  ;;  %v5324_v5 = vpack.c.bf16 %v5292_v56, %v5292_v56  ;;  %vm5198_vm1 = vweird.f32 %v14115_v43  ;;  %9140 = vpow2.f32 %v8589_v46  ;;  %v14242_v17 = vsel %vm9537_vm2, 0, %v5495_v53 }
 0x51a   : > { %v14169_v8 = vpop.permute.xlu0 %5870  ;;  %v5965_v39 = vpop.permute.xlu1 %5964  ;;  %v5389_v11 = vunpack.c.l.b16 %v5325_v27  ;;  %9142 = vpow2.f32 %v8588_v0  ;;  %v5583_v4 = vsel %vm9537_vm2, %v5492_v59, 0  ;;  %v5182_v63 = vadd.f32 %v14182_v3, %v5181_v21  ;;  %vm14269_vm14 = vmor %vm5198_vm1, %vm5199_vm6 }
 0x51b   : > { %v14180_v42 = vpop.permute.xlu2 %6030  ;;  %v6220_v2 = vsel %vm16057_vm12, %v6188_v23, %v5965_v39  ;;  %v5197_v39 = vadd.f32 %v14166_v54, %v5196_v19  ;;  %v5831_v52 = vrot.slane %v14242_v17, 1  ;;  %v5723_v12 = vshll.u32 %v14242_v17, 16  ;;  %vm14285_vm12 = vmor %vm5183_vm5, %vm5184_vm9 }
 0x51c   : > { %v6253_v35 = vsel %vm6243_vm10, %v6220_v2, %v13980_v44  ;;  %v5388_v56 = vunpack.c.l.b16 %v5324_v5  ;;  %vm16060_vm8 = vcmask 130048   ;;  %v5187_v28 = vand.u32 2147483647, %v14127_v38 }
 0x51d   : > { %v5201_v46 = vsel %vm14269_vm14, %v14166_v54, %v5197_v39  ;;  %v5832_v43 = vrot.slane %v5583_v4, 1  ;;  %vm5203_vm1 = vcmp.eq.f32.partialorder %v5202_v10, 8.507059e+37  ;;  %v5725_v2 = vrot.slane %v5723_v12, 1 }
 0x51e   : > { %v5408_v23 = vpack.c.b16 %v5389_v11, %v5388_v56  ;;  %vm5188_vm9 = vcmp.eq.f32.partialorder %v5187_v28, 8.507059e+37  ;;  %v5728_v10 = vshll.u32 %v5583_v4, 16  ;;  %v6125_v4 = vsel %vm4519_vm15, %v13525_v24, %v14169_v8 }
 0x51f   : > { %v5833_v54 = vsel %vm1764_vm3, %v5831_v52, %v5832_v43  ;;  %vm16063_vm6 = vcmask 31744   ;;  %vm5228_vm5 = vweird.f32 %v14206_v7 }
 0x520   : > { %6102 = vrot.lane.b32.xlu0 %v5830_v37, %s9424_s30  ;;  %5914 = vrot.lane.b32.xlu1 %v5830_v37, %s9433_s20  ;;  %v5497_v11 = vshrl.u32 %v5408_v23, 16  ;;  %v5730_v28 = vrot.slane %v5728_v10, 1  ;;  %v5500_v27 = vshll.u32 %v5408_v23, 16 }
 0x521   : > { %6070 = vrot.lane.b32.xlu2 %v5719_v34, %s9437_s29 }
 0x522   : > { %v6029_v61 = vpop.permute.xlu0 %6028  ;;  %v14217_v37 = vpop.permute.xlu1 %5998 }
 0x523   : > { %v14222_v51 = vpop.permute.xlu2 %5906  ;;  %v6286_v13 = vsel %vm6276_vm0, %v6253_v35, %v6029_v61  ;;  %v5189_v61 = vand.u32 2147483648, %v14127_v38  ;;  %v5186_v38 = vsel %vm14285_vm12, %v14182_v3, %v5182_v63  ;;  %v5721_v3 = vshrl.u32 %v14242_v17, 16 }
 0x524   : > { %vm16064_vm12 = vcmask 64512  }
 0x525   : > { %v5190_v21 = vor.u32 1.1754944e-38, %v5189_v61  ;;  %v5726_v61 = vor.u32 %v5725_v2, %v5721_v3 }
 0x528   : > { %5882 = vrot.lane.b32.xlu0 %v5719_v34, %s9432_s1  ;;  %5976 = vrot.lane.b32.xlu1 %v5719_v34, %s9425_s18  ;;  %v14256_v34 = vpop.eup %9136 }
 0x529   : > { %5946 = vrot.lane.b32.xlu2 %v14242_v17, %s9434_s19  ;;  %v14275_v53 = vpop.eup %9138  ;;  %v5224_v0 = vmul.f32 %v14256_v34, %v14206_v7  ;;  %vm5229_vm14 = vweird.f32 %v14256_v34 }
 0x52a   : > { %v14252_v48 = vpop.permute.xlu0 %5904  ;;  %v6061_v32 = vpop.permute.xlu1 %6060  ;;  %v5209_v35 = vmul.f32 %v14275_v53, %v14220_v58 }
 0x52b   : > { %v6319_v26 = vsel %vm6309_vm11, %v6286_v13, %v6061_v32  ;;  %v14260_v44 = vpop.permute.xlu2 %5968  ;;  %v9141_v19 = vpop.eup %9140  ;;  %v5191_v13 = vsel %vm5188_vm9, %v5190_v21, %v5186_v38  ;;  %v5225_v32 = vsub.f32 1.0, %v5224_v0  ;;  %vm5213_vm9 = vweird.f32 %v14220_v58 }
 0x52c   : > { %v6351_v29 = vsel %vm16060_vm8, %v6319_v26, %v14104_v62  ;;  %v5205_v62 = vor.u32 1.1754944e-38, %v5204_v49  ;;  %v9143_v5 = vpop.eup %9142  ;;  %v14300_v49 = vadd.f32 1.0, %v9141_v19  ;;  %v5210_v59 = vsub.f32 1.0, %v5209_v35 }
 0x52d   : > { %8598 = vmatmul.msk.bf16.gmra.mxu3 %vm6389_vm4, %v6351_v29  ;;  %v14307_v12 = vadd.f32 1.0, %v9143_v5  ;;  %v5294_v29 = vmul.f32 %v5191_v13, %v14037_v31  ;;  %v5226_v43 = vmul.f32 %v14256_v34, %v5225_v32  ;;  %v6157_v31 = vsel %vm16063_vm6, %v6125_v4, %v14135_v33 }
 0x52e   : > { %v5206_v39 = vsel %vm5203_vm1, %v5205_v62, %v5201_v46  ;;  %9144 = vrcp.f32 %v14300_v49  ;;  %v5499_v46 = vrot.slane %v5497_v11, 7  ;;  %v5211_v62 = vmul.f32 %v14275_v53, %v5210_v59  ;;  %vm14347_vm1 = vmor %vm5228_vm5, %vm5229_vm14 }
 0x52f   : > { %v5295_v52 = vmul.f32 %v5206_v39, %v14013_v45  ;;  %9146 = vrcp.f32 %v14307_v12  ;;  %v5731_v45 = vsel %vm1539_vm7, %v5726_v61, %v5730_v28  ;;  %v5326_v24 = vpack.c.bf16 %v5294_v29, %v5294_v29  ;;  %v14410_v61 = vld [vmem:[%s15672_s13] ss:$0 sm:$0xff] }
 0x530   : > { %6040 = vrot.lane.b32.xlu0 %v14242_v17, %s9436_s27  ;;  %6010 = vrot.lane.b32.xlu1 %v5833_v54, %s9435_s21  ;;  %v5502_v8 = vor.u32 %v5500_v27, %v5499_v46  ;;  %v5227_v0 = vadd.f32 %v14256_v34, %v5226_v43  ;;  %vm5214_vm8 = vweird.f32 %v14275_v53  ;;  %v5234_v33 = vand.u32 2147483648, %v14206_v7 }
 0x531   : > { %6104 = vrot.lane.b32.xlu2 %v5833_v54, %s9424_s30  ;;  %v5327_v19 = vpack.c.bf16 %v5295_v52, %v5295_v52  ;;  %v5212_v39 = vadd.f32 %v14275_v53, %v5211_v62  ;;  %v5232_v35 = vand.u32 2147483647, %v14206_v7  ;;  %v5390_v11 = vunpack.c.l.b16 %v5326_v24  ;;  %vm14359_vm6 = vmor %vm5213_vm9, %vm5214_vm8 }
 0x532   : > { %v5967_v63 = vpop.permute.xlu0 %5966  ;;  %v14304_v26 = vpop.permute.xlu1 %5936  ;;  %v5217_v13 = vand.u32 2147483647, %v14220_v58  ;;  %v5219_v32 = vand.u32 2147483648, %v14220_v58  ;;  %v5231_v7 = vsel %vm14347_vm1, %v14256_v34, %v5227_v0  ;;  %v5235_v59 = vor.u32 1.1754944e-38, %v5234_v33 }
 0x533   : > { %v14309_v56 = vpop.permute.xlu2 %6002  ;;  %v5391_v5 = vunpack.c.l.b16 %v5327_v19  ;;  %v14367_v58 = vsel %vm9537_vm2, 0, %v5502_v8  ;;  %v5216_v34 = vsel %vm14359_vm6, %v14275_v53, %v5212_v39  ;;  %vm5233_vm14 = vcmp.eq.f32.partialorder %v5232_v35, 8.507059e+37 }
 0x534   : > { %v14329_v2 = vpop.eup %9144  ;;  %vm5218_vm8 = vcmp.eq.f32.partialorder %v5217_v13, 8.507059e+37  ;;  %v5220_v28 = vor.u32 1.1754944e-38, %v5219_v32  ;;  %v5584_v62 = vsel %vm9537_vm2, %v5499_v46, 0  ;;  %vm16069_vm5 = vcmask 130048  }
 0x535   : > { %v14341_v10 = vpop.eup %9146  ;;  %v5409_v52 = vpack.c.b16 %v5391_v5, %v5390_v11  ;;  %v5735_v5 = vshll.u32 %v14367_v58, 16  ;;  %v5835_v39 = vrot.slane %v5584_v62, 1  ;;  %vm16070_vm1 = vcmask 31744  }
 0x536   : > { %v5239_v4 = vmul.f32 %v14341_v10, %v14307_v12  ;;  %v5221_v24 = vsel %vm5218_vm8, %v5220_v28, %v5216_v34  ;;  %vm5259_vm9 = vweird.f32 %v14329_v2  ;;  %vm5244_vm6 = vweird.f32 %v14341_v10 }
 0x537   : > { %v5296_v46 = vmul.f32 %v5221_v24, %v14131_v9  ;;  %v5737_v13 = vrot.slane %v5735_v5, 1  ;;  %v5507_v9 = vshll.u32 %v5409_v52, 16  ;;  %v5264_v34 = vand.u32 2147483648, %v14300_v49 }
 0x538   : > { %5916 = vrot.lane.b32.xlu0 %v5833_v54, %s9433_s20  ;;  %6072 = vrot.lane.b32.xlu1 %v5731_v45, %s9437_s29  ;;  %v6190_v54 = vsel %vm6178_vm13, %v6157_v31, %v14059_v40  ;;  %v5504_v31 = vshrl.u32 %v5409_v52, 16  ;;  %v5247_v5 = vand.u32 2147483647, %v14307_v12 }
 0x539   : > { %5884 = vrot.lane.b32.xlu2 %v5731_v45, %s9432_s1  ;;  %v6222_v3 = vsel %vm16064_vm12, %v6190_v54, %v5967_v63  ;;  %v5254_v63 = vmul.f32 %v14329_v2, %v14300_v49  ;;  %v5240_v54 = vsub.f32 1.0, %v5239_v4  ;;  %vm5243_vm12 = vweird.f32 %v14307_v12 }
 0x53a   : > { %v14327_v38 = vpop.permute.xlu0 %6000  ;;  %v6095_v23 = vpop.permute.xlu1 %6094  ;;  %v6255_v29 = vsel %vm6243_vm10, %v6222_v3, %v14217_v37  ;;  %v5236_v37 = vsel %vm5233_vm14, %v5235_v59, %v5231_v7  ;;  %v5506_v3 = vrot.slane %v5504_v31, 7  ;;  %vm5258_vm14 = vweird.f32 %v14300_v49 }
 0x53b   : > { %v14335_v21 = vpop.permute.xlu2 %6064  ;;  %v5255_v43 = vsub.f32 1.0, %v5254_v63  ;;  %v6288_v53 = vsel %vm6276_vm0, %v6255_v29, %v14180_v42  ;;  %v5297_v33 = vmul.f32 %v5236_v37, %v14118_v55  ;;  %v5241_v40 = vmul.f32 %v14341_v10, %v5240_v54  ;;  %vm14428_vm8 = vmor %vm5258_vm14, %vm5259_vm9 }
 0x53c   : > { %v6127_v55 = vsel %vm4519_vm15, %v13615_v47, %v14141_v22  ;;  %v5740_v63 = vshll.u32 %v5584_v62, 16  ;;  %v5328_v47 = vpack.c.bf16 %v5296_v46, %v5296_v46  ;;  %v5265_v54 = vor.u32 1.1754944e-38, %v5264_v34 }
 0x53d   : > { %v5256_v35 = vmul.f32 %v14329_v2, %v5255_v43  ;;  %v5329_v32 = vpack.c.bf16 %v5297_v33, %v5297_v33  ;;  %v6159_v7 = vsel %vm16070_vm1, %v6127_v55, %v14252_v48  ;;  %v5509_v48 = vor.u32 %v5507_v9, %v5506_v3  ;;  %vm14447_vm1 = vmor %vm5243_vm12, %vm5244_vm6 }
 0x53e   : > { %v6192_v52 = vsel %vm6178_vm13, %v6159_v7, %v14304_v26  ;;  %v5242_v43 = vadd.f32 %v14341_v10, %v5241_v40  ;;  %v5249_v26 = vand.u32 2147483648, %v14307_v12  ;;  %v5742_v31 = vrot.slane %v5740_v63, 1 }
 0x53f   : > { %v5257_v22 = vadd.f32 %v14329_v2, %v5256_v35  ;;  %v5393_v37 = vunpack.c.l.b16 %v5329_v32  ;;  %v14461_v12 = vsel %vm9537_vm2, 0, %v5509_v48  ;;  %vm5248_vm12 = vcmp.eq.f32.partialorder %v5247_v5, 8.507059e+37 }
 0x540   : > { %5978 = vrot.lane.b32.xlu0 %v5731_v45, %s9425_s18  ;;  %5948 = vrot.lane.b32.xlu1 %v14367_v58, %s9434_s19  ;;  %v5834_v45 = vrot.slane %v14367_v58, 1  ;;  %v5585_v40 = vsel %vm9537_vm2, %v5506_v3, 0  ;;  %vm16076_vm6 = vcmask 130048   ;;  %v5837_v7 = vrot.slane %v14461_v12, 1 }
 0x541   : > { %6042 = vrot.lane.b32.xlu2 %v14367_v58, %s9436_s27  ;;  %vm16077_vm14 = vcmask 31744  }
 0x542   : > { %v6063_v19 = vpop.permute.xlu0 %6062  ;;  %v14381_v27 = vpop.permute.xlu1 %5874  ;;  %v5836_v11 = vsel %vm1764_vm3, %v5834_v45, %v5835_v39 }
 0x543   : > { %v6321_v8 = vsel %vm6309_vm11, %v6288_v53, %v6063_v19  ;;  %v14387_v0 = vpop.permute.xlu2 %5940  ;;  %v5262_v19 = vand.u32 2147483647, %v14300_v49  ;;  %v6434_v53 = vpop.f32.mrf.mxu3  ;;  %v5261_v49 = vsel %vm14428_vm8, %v14329_v2, %v5257_v22  ;;  %v5250_v2 = vor.u32 1.1754944e-38, %v5249_v26 }
 0x544   : > { %v6353_v42 = vsel %vm16069_vm5, %v6321_v8, %v6095_v23  ;;  %v5733_v23 = vshrl.u32 %v14367_v58, 16  ;;  %vm16073_vm5 = vcmask 64512   ;;  %v14435_v24 = vadd.f32 %v14410_v61, %v6434_v53 }
 0x545   : > { %8599 = vmatmul.msk.bf16.gmra.mxu3 %vm6389_vm4, %v6353_v42  ;;  %v6224_v45 = vsel %vm16073_vm5, %v6192_v52, %v14260_v44  ;;  %v5392_v8 = vunpack.c.l.b16 %v5328_v47  ;;  %vm5263_vm9 = vcmp.eq.f32.partialorder %v5262_v19, 8.507059e+37  ;;  %v5747_v52 = vshll.u32 %v14461_v12, 16  ;;  %vm16078_vm8 = vmmov %vm16073_vm5 }
 0x546   : > { %v5738_v28 = vor.u32 %v5737_v13, %v5733_v23  ;;  %v6257_v33 = vsel %vm6243_vm10, %v6224_v45, %v14327_v38  ;;  %v8610_v46 = vmul.f32 -1.442695, %v14435_v24  ;;  %v5246_v38 = vsel %vm14447_vm1, %v14341_v10, %v5242_v43 }
 0x547   : > { %v5410_v35 = vpack.c.b16 %v5393_v37, %v5392_v8  ;;  %v5251_v55 = vsel %vm5248_vm12, %v5250_v2, %v5246_v38  ;;  %vm16081_vm12 = vmmov %vm16076_vm6 }
 0x548   : > { %6012 = vrot.lane.b32.xlu0 %v5836_v11, %s9435_s21  ;;  %6106 = vrot.lane.b32.xlu1 %v5836_v11, %s9424_s30  ;;  %v5743_v39 = vsel %vm1539_vm7, %v5738_v28, %v5742_v31  ;;  %9148 = vpow2.f32 %v8610_v46  ;;  %v5298_v3 = vmul.f32 %v5251_v55, %v14215_v36  ;;  %v5745_v36 = vshrl.u32 %v14461_v12, 16 }
 0x549   : > { %5918 = vrot.lane.b32.xlu2 %v5836_v11, %s9433_s20  ;;  %v5266_v11 = vsel %vm5263_vm9, %v5265_v54, %v5261_v49  ;;  %v5511_v63 = vshrl.u32 %v5410_v35, 16  ;;  %v5514_v53 = vshll.u32 %v5410_v35, 16  ;;  %v5752_v31 = vshll.u32 %v5585_v40, 16 }
 0x54a   : > { %v14416_v59 = vpop.permute.xlu0 %5938  ;;  %v6033_v29 = vpop.permute.xlu1 %6032  ;;  %v5299_v47 = vmul.f32 %v5266_v11, %v14201_v25  ;;  %v5749_v25 = vrot.slane %v5747_v52, 1  ;;  %v5330_v26 = vpack.c.bf16 %v5298_v3, %v5298_v3  ;;  %v6129_v11 = vsel %vm4519_vm15, %v13719_v6, %v14381_v27 }
 0x54b   : > { %v14420_v4 = vpop.permute.xlu2 %6098  ;;  %v6290_v42 = vsel %vm6276_vm0, %v6257_v33, %v6033_v29  ;;  %v6436_v22 = vpop.f32.mrf.mxu3  ;;  %v5513_v37 = vrot.slane %v5511_v63, 7  ;;  %v5754_v54 = vrot.slane %v5752_v31, 1  ;;  %v6161_v6 = vsel %vm16077_vm14, %v6129_v11, %v14222_v51 }
 0x54c   : > { %v6323_v32 = vsel %vm6309_vm11, %v6290_v42, %v14335_v21  ;;  %v5838_v21 = vrot.slane %v5585_v40, 1  ;;  %v14478_v29 = vadd.f32 %v14410_v61, %v6436_v22  ;;  %v5331_v43 = vpack.c.bf16 %v5299_v47, %v5299_v47 }
 0x54d   : > { %v5516_v5 = vor.u32 %v5514_v53, %v5513_v37  ;;  %v5750_v33 = vor.u32 %v5749_v25, %v5745_v36  ;;  %v5394_v44 = vunpack.c.l.b16 %v5330_v26  ;;  %v6194_v27 = vsel %vm6178_vm13, %v6161_v6, %v14416_v59 }
 0x54e   : > { %v9149_v48 = vpop.eup %9148  ;;  %v5839_v34 = vsel %vm1764_vm3, %v5837_v7, %v5838_v21  ;;  %v8611_v28 = vmul.f32 -1.442695, %v14478_v29  ;;  %v5395_v49 = vunpack.c.l.b16 %v5331_v43  ;;  %v5586_v7 = vsel %vm9537_vm2, %v5513_v37, 0 }
 0x54f   : > { %v14483_v19 = vadd.f32 1.0, %v9149_v48  ;;  %v5755_v35 = vsel %vm1539_vm7, %v5750_v33, %v5754_v54  ;;  %v14503_v2 = vsel %vm9537_vm2, 0, %v5516_v5  ;;  %v5764_v21 = vshll.u32 %v5586_v7, 16 }
 0x550   : > { %6074 = vrot.lane.b32.xlu0 %v5743_v39, %s9437_s29  ;;  %5886 = vrot.lane.b32.xlu1 %v5743_v39, %s9432_s1  ;;  %9150 = vpow2.f32 %v8611_v28  ;;  %v5411_v46 = vpack.c.b16 %v5395_v49, %v5394_v44  ;;  %v5759_v63 = vshll.u32 %v14503_v2, 16  ;;  %v5757_v51 = vshrl.u32 %v14503_v2, 16 }
 0x551   : > { %5980 = vrot.lane.b32.xlu2 %v5743_v39, %s9425_s18  ;;  %9152 = vrcp.f32 %v14483_v19  ;;  %v6653_v37 = vand.u32 2147483648, %v14483_v19  ;;  %vm6647_vm1 = vweird.f32 %v14483_v19  ;;  %v6651_v59 = vand.u32 2147483647, %v14483_v19 }
 0x552   : > { %v6097_v13 = vpop.permute.xlu0 %6096  ;;  %v14466_v10 = vpop.permute.xlu1 %5908  ;;  %v5518_v47 = vshrl.u32 %v5411_v46, 16  ;;  %v5761_v48 = vrot.slane %v5759_v63, 1  ;;  %v5521_v36 = vshll.u32 %v5411_v46, 16  ;;  %v5766_v5 = vrot.slane %v5764_v21, 1 }
 0x553   : > { %v6355_v23 = vsel %vm16076_vm6, %v6323_v32, %v6097_v13  ;;  %v14471_v9 = vpop.permute.xlu2 %5878  ;;  %vm6652_vm6 = vcmp.eq.f32.partialorder %v6651_v59, 8.507059e+37 }
 0x554   : > { %v5520_v28 = vrot.slane %v5518_v47, 7  ;;  %v5762_v54 = vor.u32 %v5761_v48, %v5757_v51  ;;  %v5841_v47 = vrot.slane %v5586_v7, 1 }
 0x555   : > { %8600 = vmatmul.msk.bf16.gmra.mxu3 %vm6389_vm4, %v6355_v23 }
 0x556   : > { %v9151_v42 = vpop.eup %9150  ;;  %v5523_v11 = vor.u32 %v5521_v36, %v5520_v28  ;;  %v16082_v36 = vld [vmem:[#allocation25_spill] sm:$0xff] }
 0x557   : > { %v9153_v39 = vpop.eup %9152  ;;  %v14496_v38 = vadd.f32 1.0, %v9151_v42  ;;  %v6654_v42 = vor.u32 1.1754944e-38, %v6653_v37 }
 0x558   : > { %5950 = vrot.lane.b32.xlu0 %v14461_v12, %s9434_s19  ;;  %6044 = vrot.lane.b32.xlu1 %v14461_v12, %s9436_s27  ;;  %v6643_v13 = vmul.f32 %v9153_v39, %v14483_v19  ;;  %vm6648_vm5 = vweird.f32 %v9153_v39  ;;  %v5840_v19 = vrot.slane %v14503_v2, 1  ;;  %v14566_v7 = vsel %vm9537_vm2, 0, %v5523_v11 }
 0x559   : > { %6014 = vrot.lane.b32.xlu2 %v5839_v34, %s9435_s21  ;;  %9154 = vrcp.f32 %v14496_v38  ;;  %vm14534_vm9 = vmor %vm6647_vm1, %vm6648_vm5  ;;  %v6668_v46 = vand.u32 2147483648, %v14496_v38  ;;  %v5844_v18 = vshrl.u32 %v14566_v7, 16 }
 0x55a   : > { %v14492_v62 = vpop.permute.xlu0 %5876  ;;  %v5971_v45 = vpop.permute.xlu1 %5970  ;;  %v6644_v55 = vsub.f32 1.0, %v6643_v13 }
 0x55b   : > { %v14494_v8 = vpop.permute.xlu2 %6036  ;;  %v6226_v52 = vsel %vm16078_vm8, %v6194_v27, %v5971_v45  ;;  %vm6662_vm8 = vweird.f32 %v14496_v38  ;;  %v5767_v27 = vsel %vm1539_vm7, %v5762_v54, %v5766_v5  ;;  %v6131_v53 = vsel %vm4519_vm15, %v13811_v30, %v14492_v62 }
 0x55c   : > { %v6645_v22 = vmul.f32 %v9153_v39, %v6644_v55  ;;  %v6259_v25 = vsel %vm6243_vm10, %v6226_v52, %v14309_v56  ;;  %v14562_v52 = vsel %vm1764_vm3, %v5840_v19, %v5841_v47  ;;  %v5857_v54 = vrot.slane %v14566_v7, 1 }
 0x55e   : > { %v6646_v3 = vadd.f32 %v9153_v39, %v6645_v22 }
 0x560   : > { %6108 = vrot.lane.b32.xlu0 %v5839_v34, %s9424_s30  ;;  %5920 = vrot.lane.b32.xlu1 %v5839_v34, %s9433_s20  ;;  %v9155_v34 = vpop.eup %9154  ;;  %v6650_v49 = vsel %vm14534_vm9, %v9153_v39, %v6646_v3  ;;  %vm16083_vm9 = vcmask 31744  }
 0x561   : > { %6076 = vrot.lane.b32.xlu2 %v5755_v35, %s9437_s29  ;;  %v6658_v43 = vmul.f32 %v9155_v34, %v14496_v38  ;;  %vm6663_vm14 = vweird.f32 %v9155_v34  ;;  %v6655_v55 = vsel %vm6652_vm6, %v6654_v42, %v6650_v49  ;;  %v6163_v49 = vsel %vm16083_vm9, %v6131_v53, %v14466_v10 }
 0x562   : > { %v6035_v32 = vpop.permute.xlu0 %6034  ;;  %v14511_v40 = vpop.permute.xlu1 %6004  ;;  %vm6664_vm5 = vmor %vm6662_vm8, %vm6663_vm14  ;;  %v6196_v42 = vsel %vm6178_vm13, %v6163_v49, %v14387_v0 }
 0x563   : > { %v14513_v23 = vpop.permute.xlu2 %5912  ;;  %v6292_v26 = vsel %vm6276_vm0, %v6259_v25, %v6035_v32  ;;  %v6659_v56 = vsub.f32 1.0, %v6658_v43  ;;  %v6666_v32 = vand.u32 2147483647, %v14496_v38  ;;  %v7122_v38 = vmul.f32 %v6655_v55, %v14435_v24 }
 0x564   : > { %v5846_v43 = vshll.u32 %v14566_v7, 16 }
 0x565   : > { %v6660_v13 = vmul.f32 %v9155_v34, %v6659_v56  ;;  %vm6667_vm1 = vcmp.eq.f32.partialorder %v6666_v32, 8.507059e+37  ;;  %v7154_v25 = vadd.f32 %v7122_v38, %v10898_v60 }
 0x566   : > { %v5848_v5 = vrot.slane %v5846_v43, 1 }
 0x567   : > { %v6661_v6 = vadd.f32 %v9155_v34, %v6660_v13 }
 0x568   : > { %5888 = vrot.lane.b32.xlu0 %v5755_v35, %s9432_s1  ;;  %5982 = vrot.lane.b32.xlu1 %v5755_v35, %s9425_s18  ;;  %v5849_v10 = vor.u32 %v5848_v5, %v5844_v18 }
 0x569   : > { %5952 = vrot.lane.b32.xlu2 %v14503_v2, %s9434_s19  ;;  %v6665_v21 = vsel %vm6664_vm5, %v9155_v34, %v6661_v6 }
 0x56a   : > { %v14539_v45 = vpop.permute.xlu0 %5910  ;;  %v6067_v31 = vpop.permute.xlu1 %6066 }
 0x56b   : > { %v6325_v33 = vsel %vm6309_vm11, %v6292_v26, %v6067_v31  ;;  %v14545_v44 = vpop.permute.xlu2 %5974  ;;  %v5587_v31 = vsel %vm9537_vm2, %v5520_v28, 0  ;;  %vm16084_vm2 = vcmask 64512  }
 0x56c   : > { %v6357_v35 = vsel %vm16081_vm12, %v6325_v33, %v14420_v4  ;;  %v6669_v4 = vor.u32 1.1754944e-38, %v6668_v46  ;;  %v5851_v62 = vshll.u32 %v5587_v31, 16  ;;  %vm16087_vm8 = vmmov %vm16084_vm2 }
 0x56d   : > { %8601 = vmatmul.msk.bf16.gmra.mxu3 %vm6389_vm4, %v6357_v35  ;;  %v5858_v35 = vrot.slane %v5587_v31, 1 }
 0x56e   : > { %v6439_v39 = vpop.f32.mrf.mxu3  ;;  %v6670_v3 = vsel %vm6667_vm1, %v6669_v4, %v6665_v21  ;;  %v5853_v11 = vrot.slane %v5851_v62, 1 }
 0x56f   : > { %v14553_v63 = vadd.f32 %v14410_v61, %v6439_v39  ;;  %v7123_v51 = vmul.f32 %v6670_v3, %v14478_v29  ;;  %v5859_v13 = vsel %vm1764_vm3, %v5857_v54, %v5858_v35  ;;  %vm16085_vm3 = vmmov %vm16081_vm12 }
 0x570   : > { %6046 = vrot.lane.b32.xlu0 %v14503_v2, %s9436_s27  ;;  %6078 = vrot.lane.b32.xlu1 %v5767_v27, %s9437_s29  ;;  %v5854_v32 = vsel %vm1539_vm7, %v5849_v10, %v5853_v11  ;;  %vm16086_vm7 = vmmov %vm16083_vm9 }
 0x571   : > { %v8612_v22 = vmul.f32 -1.442695, %v14553_v63  ;;  %6110 = vrot.lane.b32.xlu2 %v14562_v52, %s9424_s30  ;;  %v7155_v24 = vadd.f32 %v7123_v51, %v16082_v36 }
 0x572   : > { %v5973_v48 = vpop.permute.xlu0 %5972  ;;  %v14571_v37 = vpop.permute.xlu1 %5942 }
 0x573   : > { %9156 = vpow2.f32 %v8612_v22  ;;  %v14574_v59 = vpop.permute.xlu2 %6008  ;;  %v7186_v29 = vpack.c.bf16 %v7155_v24, %v7154_v25  ;;  %v6228_v46 = vsel %vm16084_vm2, %v6196_v42, %v5973_v48 }
 0x574   : > { %v6261_v55 = vsel %vm6243_vm10, %v6228_v46, %v14511_v40 }
 0x575   : > { %8658 = vmatmul.msk.bf16.vlgmr.msra.gmra.mxu1 %vm4519_vm15, %v7186_v29  ;;  %v6294_v38 = vsel %vm6276_vm0, %v6261_v55, %v14494_v8 }
 0x576   : > { %v6441_v34 = vpop.f32.mrf.mxu3 }
 0x577   : > { %v14583_v26 = vadd.f32 %v14410_v61, %v6441_v34 }
 0x578   : > { %5984 = vrot.lane.b32.xlu0 %v5767_v27, %s9425_s18  ;;  %6016 = vrot.lane.b32.xlu1 %v14562_v52, %s9435_s21 }
 0x579   : > { %v9157_v19 = vpop.eup %9156  ;;  %v8613_v60 = vmul.f32 -1.442695, %v14583_v26  ;;  %6048 = vrot.lane.b32.xlu2 %v14566_v7, %s9436_s27 }
 0x57a   : > { %v14593_v30 = vadd.f32 1.0, %v9157_v19  ;;  %v6007_v28 = vpop.permute.xlu0 %6006  ;;  %v6101_v56 = vpop.permute.xlu1 %6100 }
 0x57b   : > { %9158 = vpow2.f32 %v8613_v60  ;;  %v14600_v33 = vpop.permute.xlu2 %6070 }
 0x57c   : > { %9160 = vrcp.f32 %v14593_v30  ;;  %v6683_v24 = vand.u32 2147483648, %v14593_v30  ;;  %vm6677_vm6 = vweird.f32 %v14593_v30 }
 0x57e   : > { %v6684_v19 = vor.u32 1.1754944e-38, %v6683_v24 }
 0x580   : > { %6112 = vrot.lane.b32.xlu1 %v5859_v13, %s9424_s30  ;;  %6080 = vrot.lane.b32.xlu0 %v5854_v32, %s9437_s29 }
 0x581   : > { %v9159_v39 = vpop.eup %9158  ;;  %5890 = vrot.lane.b32.xlu2 %v5767_v27, %s9432_s1  ;;  %v6133_v27 = vsel %vm4519_vm15, %v13914_v15, %v14471_v9  ;;  %v6681_v9 = vand.u32 2147483647, %v14593_v30 }
 0x582   : > { %v9161_v47 = vpop.eup %9160  ;;  %v6613_v6 = vadd.f32 1.0, %v9159_v39  ;;  %v6069_v4 = vpop.permute.xlu0 %6068  ;;  %v6165_v43 = vsel %vm16086_vm7, %v6133_v27, %v14539_v45  ;;  %vm16088_vm7 = vcmask 130048  }
 0x583   : > { %v6673_v0 = vmul.f32 %v9161_v47, %v14593_v30  ;;  %v14614_v22 = vpop.permute.xlu1 %5880  ;;  %v14618_v21 = vpop.permute.xlu2 %5946  ;;  %v6327_v3 = vsel %vm6309_vm11, %v6294_v38, %v6069_v4  ;;  %vm6678_vm12 = vweird.f32 %v9161_v47  ;;  %v6198_v34 = vsel %vm6178_vm13, %v6165_v43, %v14571_v37  ;;  %v16090_v4 = vld [vmem:[#allocation27_spill] sm:$0xff] }
 0x584   : > { %9162 = vrcp.f32 %v6613_v6  ;;  %v6359_v48 = vsel %vm16085_vm3, %v6327_v3, %v6101_v56  ;;  %vm6679_vm14 = vmor %vm6677_vm6, %vm6678_vm12  ;;  %v6230_v5 = vsel %vm16087_vm8, %v6198_v34, %v14545_v44  ;;  %v6698_v60 = vand.u32 2147483648, %v6613_v6 }
 0x585   : > { %v6674_v40 = vsub.f32 1.0, %v6673_v0  ;;  %8602 = vmatmul.msk.bf16.gmra.mxu3 %vm6389_vm4, %v6359_v48  ;;  %v6263_v49 = vsel %vm6243_vm10, %v6230_v5, %v6007_v28  ;;  %vm6682_vm5 = vcmp.eq.f32.partialorder %v6681_v9, 8.507059e+37  ;;  %v6696_v18 = vand.u32 2147483647, %v6613_v6 }
 0x586   : > { %vm6692_vm9 = vweird.f32 %v6613_v6  ;;  %v6699_v44 = vor.u32 1.1754944e-38, %v6698_v60  ;;  %v6135_v34 = vsel %vm4519_vm15, %v14021_v16, %v14614_v22  ;;  %vm16091_vm12 = vcmask 31744  }
 0x587   : > { %v6675_v51 = vmul.f32 %v9161_v47, %v6674_v40  ;;  %vm6697_vm3 = vcmp.eq.f32.partialorder %v6696_v18, 8.507059e+37  ;;  %v6167_v5 = vsel %vm16091_vm12, %v6135_v34, %v14513_v23 }
 0x588   : > { %v6444_v8 = vpop.f32.mrf.mxu3  ;;  %5954 = vrot.lane.b32.xlu1 %v14566_v7, %s9434_s19  ;;  %5922 = vrot.lane.b32.xlu0 %v14562_v52, %s9433_s20  ;;  %s8710_s19 = sshll.u32 %s16221_s25, 8 }
 0x589   : > { %v6676_v25 = vadd.f32 %v9161_v47, %v6675_v51  ;;  %v14636_v15 = vadd.f32 %v14410_v61, %v6444_v8  ;;  %5986 = vrot.lane.b32.xlu2 %v5854_v32, %s9425_s18 }
 0x58a   : > { %v9163_v36 = vpop.eup %9162  ;;  %v14641_v7 = vpop.permute.xlu0 %5944 }
 0x58b   : > { %v6688_v45 = vmul.f32 %v9163_v36, %v6613_v6  ;;  %v6039_v53 = vpop.permute.xlu1 %6038  ;;  %v8614_v52 = vmul.f32 -1.442695, %v14636_v15  ;;  %v14644_v31 = vpop.permute.xlu2 %6104  ;;  %v6680_v29 = vsel %vm6679_vm14, %v9161_v47, %v6676_v25  ;;  %vm6693_vm1 = vweird.f32 %v9163_v36 }
 0x58c   : > { %v6685_v62 = vsel %vm6682_vm5, %v6684_v19, %v6680_v29  ;;  %v6296_v56 = vsel %vm6276_vm0, %v6263_v49, %v6039_v53  ;;  %vm6694_vm2 = vmor %vm6692_vm9, %vm6693_vm1  ;;  %v6200_v16 = vsel %vm6178_vm13, %v6167_v5, %v14641_v7 }
 0x58d   : > { %v6689_v37 = vsub.f32 1.0, %v6688_v45  ;;  %9164 = vpow2.f32 %v8614_v52  ;;  %v7124_v42 = vmul.f32 %v6685_v62, %v14553_v63  ;;  %v6329_v11 = vsel %vm6309_vm11, %v6296_v56, %v14600_v33  ;;  %v16089_v63 = vld [vmem:[#allocation26_spill] sm:$0xff] }
 0x58f   : > { %v6690_v30 = vmul.f32 %v9163_v36, %v6689_v37  ;;  %v7156_v0 = vadd.f32 %v7124_v42, %v16089_v63 }
 0x590   : > { %v6446_v10 = vpop.f32.mrf.mxu3  ;;  %6018 = vrot.lane.b32.xlu0 %v5859_v13, %s9435_s21  ;;  %6050 = vrot.lane.b32.xlu1 %v16022_v41, %s9436_s27  ;;  %s14925_s27 = scalar_lea.vmem %s15676_s17, %s8710_s19 }
 0x591   : > { %v6691_v54 = vadd.f32 %v9163_v36, %v6690_v30  ;;  %v14654_v28 = vadd.f32 %v14410_v61, %v6446_v10  ;;  %6082 = vrot.lane.b32.xlu2 %v15886_v50, %s9437_s29 }
 0x592   : > { %v6103_v35 = vpop.permute.xlu0 %6102 }
 0x593   : > { %v6695_v46 = vsel %vm6694_vm2, %v9163_v36, %v6691_v54  ;;  %v14661_v13 = vpop.permute.xlu1 %5914  ;;  %v9165_v32 = vpop.eup %9164  ;;  %v8615_v39 = vmul.f32 -1.442695, %v14654_v28  ;;  %v6361_v55 = vsel %vm16088_vm7, %v6329_v11, %v6103_v35 }
 0x594   : > { %v6700_v41 = vsel %vm6697_vm3, %v6699_v44, %v6695_v46  ;;  %v6614_v6 = vadd.f32 1.0, %v9165_v32  ;;  %v14666_v50 = vpop.permute.xlu2 %5884 }
 0x595   : > { %v7125_v47 = vmul.f32 %v6700_v41, %v14583_v26  ;;  %9166 = vpow2.f32 %v8615_v39  ;;  %8603 = vmatmul.msk.bf16.gmra.mxu3 %vm6389_vm4, %v6361_v55 }
 0x596   : > { %9168 = vrcp.f32 %v6614_v6  ;;  %v6713_v30 = vand.u32 2147483648, %v6614_v6  ;;  %vm6707_vm14 = vweird.f32 %v6614_v6  ;;  %v6711_v62 = vand.u32 2147483647, %v6614_v6 }
 0x597   : > { %v7157_v38 = vadd.f32 %v7125_v47, %v16090_v4 }
 0x598   : > { %v6449_v33 = vpop.f32.mrf.mxu3  ;;  %v6714_v44 = vor.u32 1.1754944e-38, %v6713_v30  ;;  %vm6712_vm9 = vcmp.eq.f32.partialorder %v6711_v62, 8.507059e+37 }
 0x599   : > { %v7187_v40 = vpack.c.bf16 %v7157_v38, %v7156_v0  ;;  %v14672_v3 = vadd.f32 %v14410_v61, %v6449_v33 }
 0x59a   : > { %v14674_v48 = vpop.permute.xlu0 %5882 }
 0x59b   : > { %v5977_v51 = vpop.permute.xlu1 %5976  ;;  %8659 = vmatmul.msk.bf16.gmra.mxu1 %vm4519_vm15, %v7187_v40  ;;  %v9167_v26 = vpop.eup %9166  ;;  %v8616_v27 = vmul.f32 -1.442695, %v14672_v3 }
 0x59c   : > { %v9169_v43 = vpop.eup %9168  ;;  %v6615_v25 = vadd.f32 1.0, %v9167_v26  ;;  %v14678_v24 = vpop.permute.xlu2 %6042  ;;  %v6232_v56 = vsel %vm16087_vm8, %v6200_v16, %v5977_v51 }
 0x59d   : > { %v6703_v8 = vmul.f32 %v9169_v43, %v6614_v6  ;;  %9170 = vpow2.f32 %v8616_v27  ;;  %vm6708_vm6 = vweird.f32 %v9169_v43  ;;  %v6265_v35 = vsel %vm6243_vm10, %v6232_v56, %v14574_v59 }
 0x59e   : > { %9172 = vrcp.f32 %v6615_v25  ;;  %vm14697_vm5 = vmor %vm6707_vm14, %vm6708_vm6  ;;  %v6728_v42 = vand.u32 2147483648, %v6615_v25  ;;  %v6726_v7 = vand.u32 2147483647, %v6615_v25  ;;  %vm6722_vm2 = vweird.f32 %v6615_v25 }
 0x59f   : > { %v6704_v36 = vsub.f32 1.0, %v6703_v8 }
 0x5a0   : > { %v6451_v9 = vpop.f32.mrf.mxu3  ;;  %v6729_v4 = vor.u32 1.1754944e-38, %v6728_v42  ;;  %vm6727_vm12 = vcmp.eq.f32.partialorder %v6726_v7, 8.507059e+37 }
 0x5a1   : > { %v6705_v45 = vmul.f32 %v9169_v43, %v6704_v36  ;;  %v14684_v53 = vadd.f32 %v14410_v61, %v6451_v9 }
 0x5a2   : > { %v6041_v52 = vpop.permute.xlu0 %6040 }
 0x5a3   : > { %v14686_v29 = vpop.permute.xlu1 %6010  ;;  %v9171_v37 = vpop.eup %9170  ;;  %v8617_v19 = vmul.f32 -1.442695, %v14684_v53  ;;  %v6706_v49 = vadd.f32 %v9169_v43, %v6705_v45  ;;  %v6298_v32 = vsel %vm6276_vm0, %v6265_v35, %v6041_v52 }
 0x5a4   : > { %v9173_v60 = vpop.eup %9172  ;;  %v14691_v18 = vadd.f32 1.0, %v9171_v37  ;;  %v14705_v11 = vpop.permute.xlu2 %5918 }
 0x5a5   : > { %v6718_v22 = vmul.f32 %v9173_v60, %v6615_v25  ;;  %9174 = vpow2.f32 %v8617_v19  ;;  %v6710_v10 = vsel %vm14697_vm5, %v9169_v43, %v6706_v49  ;;  %vm6723_vm1 = vweird.f32 %v9173_v60 }
 0x5a6   : > { %9176 = vrcp.f32 %v14691_v18  ;;  %v6715_v47 = vsel %vm6712_vm9, %v6714_v44, %v6710_v10  ;;  %vm6724_vm3 = vmor %vm6722_vm2, %vm6723_vm1  ;;  %v6741_v5 = vand.u32 2147483647, %v14691_v18  ;;  %vm6737_vm14 = vweird.f32 %v14691_v18 }
 0x5a7   : > { %v6719_v54 = vsub.f32 1.0, %v6718_v22  ;;  %v7126_v51 = vmul.f32 %v6715_v47, %v14636_v15  ;;  %vm16094_vm1 = vcmask 31744  }
 0x5a8   : > { %vm6742_vm5 = vcmp.eq.f32.partialorder %v6741_v5, 8.507059e+37 }
 0x5a9   : > { %v6720_v46 = vmul.f32 %v9173_v60, %v6719_v54 }
 0x5aa   : > { %v14708_v41 = vpop.permute.xlu0 %5916 }
 0x5ab   : > { %v6073_v39 = vpop.permute.xlu1 %6072  ;;  %v9175_v55 = vpop.eup %9174  ;;  %v6721_v6 = vadd.f32 %v9173_v60, %v6720_v46 }
 0x5ac   : > { %v6331_v63 = vsel %vm6309_vm11, %v6298_v32, %v6073_v39  ;;  %v9177_v0 = vpop.eup %9176  ;;  %v6617_v38 = vadd.f32 1.0, %v9175_v55  ;;  %v14724_v15 = vpop.permute.xlu2 %5980 }
 0x5ad   : > { %v6363_v59 = vsel %vm16088_vm7, %v6331_v63, %v14644_v31  ;;  %v6725_v33 = vsel %vm6724_vm3, %v9173_v60, %v6721_v6  ;;  %v6733_v40 = vmul.f32 %v9177_v0, %v14691_v18  ;;  %v7158_v31 = vadd.f32 %v7126_v51, %v11035_v20 }
 0x5ae   : > { %8604 = vmatmul.msk.bf16.gmra.mxu3 %vm6389_vm4, %v6363_v59  ;;  %v6730_v26 = vsel %vm6727_vm12, %v6729_v4, %v6725_v33  ;;  %9178 = vrcp.f32 %v6617_v38  ;;  %vm6738_vm6 = vweird.f32 %v9177_v0  ;;  %v6137_v20 = vsel %vm4519_vm15, %v14125_v14, %v14674_v48  ;;  %v16096_v4 = vld [vmem:[#allocation28_spill] sm:$0xff] }
 0x5af   : > { %v7127_v27 = vmul.f32 %v6730_v26, %v14654_v28  ;;  %v6734_v43 = vsub.f32 1.0, %v6733_v40  ;;  %vm6739_vm8 = vmor %vm6737_vm14, %vm6738_vm6  ;;  %v6169_v22 = vsel %vm16094_vm1, %v6137_v20, %v14661_v13  ;;  %v6758_v62 = vand.u32 2147483648, %v6617_v38 }
 0x5b0   : > { %v6454_v25 = vpop.f32.mrf.mxu3  ;;  %vm6752_vm2 = vweird.f32 %v6617_v38  ;;  %v6202_v46 = vsel %vm6178_vm13, %v6169_v22, %v14618_v21  ;;  %vm16095_vm7 = vcmask 64512   ;;  %vm16097_vm6 = vcmask 130048   ;;  %vm16098_vm14 = vmmov %vm16094_vm1 }
 0x5b1   : > { %v7159_v8 = vadd.f32 %v7127_v27, %v11047_v1  ;;  %v6735_v36 = vmul.f32 %v9177_v0, %v6734_v43  ;;  %v14719_v34 = vadd.f32 %v14410_v61, %v6454_v25  ;;  %v6743_v1 = vand.u32 2147483648, %v14691_v18  ;;  %vm16099_vm1 = vmmov %vm16095_vm7 }
 0x5b2   : > { %v5979_v9 = vpop.permute.xlu0 %5978  ;;  %v6756_v18 = vand.u32 2147483647, %v6617_v38  ;;  %v6759_v13 = vor.u32 1.1754944e-38, %v6758_v62 }
 0x5b3   : > { %v14722_v45 = vpop.permute.xlu1 %5948  ;;  %v6736_v52 = vadd.f32 %v9177_v0, %v6735_v36  ;;  %v8618_v37 = vmul.f32 -1.442695, %v14719_v34  ;;  %v7188_v19 = vpack.c.bf16 %v7159_v8, %v7158_v31  ;;  %v6744_v16 = vor.u32 1.1754944e-38, %v6743_v1 }
 0x5b4   : > { %v9179_v28 = vpop.eup %9178  ;;  %v6234_v32 = vsel %vm16095_vm7, %v6202_v46, %v5979_v9  ;;  %vm6757_vm12 = vcmp.eq.f32.partialorder %v6756_v18, 8.507059e+37  ;;  %v14744_v47 = vpop.permute.xlu2 %6014 }
 0x5b5   : > { %v6748_v60 = vmul.f32 %v9179_v28, %v6617_v38  ;;  %9180 = vpow2.f32 %v8618_v37  ;;  %8660 = vmatmul.msk.bf16.gmra.mxu1 %vm4519_vm15, %v7188_v19  ;;  %v6740_v49 = vsel %vm6739_vm8, %v9177_v0, %v6736_v52  ;;  %vm6753_vm9 = vweird.f32 %v9179_v28 }
 0x5b6   : > { %v6745_v14 = vsel %vm6742_vm5, %v6744_v16, %v6740_v49  ;;  %vm6754_vm3 = vmor %vm6752_vm2, %vm6753_vm9  ;;  %v6267_v21 = vsel %vm6243_vm10, %v6234_v32, %v14686_v29 }
 0x5b7   : > { %v6749_v30 = vsub.f32 1.0, %v6748_v60  ;;  %v7128_v39 = vmul.f32 %v6745_v14, %v14672_v3  ;;  %v6300_v3 = vsel %vm6276_vm0, %v6267_v21, %v14678_v24  ;;  %v6139_v24 = vsel %vm4519_vm15, %v14242_v17, %v14666_v50 }
 0x5b8   : > { %v6456_v56 = vpop.f32.mrf.mxu3  ;;  %v6171_v36 = vsel %vm16098_vm14, %v6139_v24, %v14708_v41 }
 0x5b9   : > { %v6750_v23 = vmul.f32 %v9179_v28, %v6749_v30  ;;  %v14737_v54 = vadd.f32 %v14410_v61, %v6456_v56  ;;  %v7160_v0 = vadd.f32 %v7128_v39, %v11184_v57  ;;  %v6204_v52 = vsel %vm6178_vm13, %v6171_v36, %v14722_v45 }
 0x5ba   : > { %v6013_v48 = vpop.permute.xlu0 %6012  ;;  %v6236_v41 = vsel %vm16099_vm1, %v6204_v52, %v14724_v15 }
 0x5bb   : > { %v6107_v10 = vpop.permute.xlu1 %6106  ;;  %v9181_v44 = vpop.eup %9180  ;;  %v6751_v42 = vadd.f32 %v9179_v28, %v6750_v23  ;;  %v8619_v7 = vmul.f32 -1.442695, %v14737_v54  ;;  %v6269_v60 = vsel %vm6243_vm10, %v6236_v41, %v6013_v48 }
 0x5bc   : > { %v6618_v35 = vadd.f32 1.0, %v9181_v44  ;;  %v6077_v29 = vpop.permute.xlu2 %6076 }
 0x5bd   : > { %v6755_v55 = vsel %vm6754_vm3, %v9179_v28, %v6751_v42  ;;  %9182 = vpow2.f32 %v8619_v7 }
 0x5be   : > { %v6760_v6 = vsel %vm6757_vm12, %v6759_v13, %v6755_v55  ;;  %9184 = vrcp.f32 %v6618_v35  ;;  %v6771_v17 = vand.u32 2147483647, %v6618_v35  ;;  %v6773_v50 = vand.u32 2147483648, %v6618_v35  ;;  %vm16100_vm12 = vmmov %vm16097_vm6 }
 0x5bf   : > { %v7129_v63 = vmul.f32 %v6760_v6, %v14684_v53  ;;  %vm6767_vm5 = vweird.f32 %v6618_v35 }
 0x5c0   : > { %vm6772_vm2 = vcmp.eq.f32.partialorder %v6771_v17, 8.507059e+37  ;;  %v6774_v16 = vor.u32 1.1754944e-38, %v6773_v50 }
 0x5c1   : > { %v7161_v38 = vadd.f32 %v7129_v63, %v16096_v4 }
 0x5c2   : > { %v6075_v59 = vpop.permute.xlu0 %6074 }
 0x5c3   : > { %v14753_v33 = vpop.permute.xlu1 %5886  ;;  %v9183_v40 = vpop.eup %9182  ;;  %v6333_v51 = vsel %vm6309_vm11, %v6300_v3, %v6075_v59  ;;  %v7189_v26 = vpack.c.bf16 %v7161_v38, %v7160_v0  ;;  %v16101_v0 = vld [vmem:[#allocation29_spill] sm:$0xff]  ;;  %v16102_v38 = vld [vmem:[#allocation30_spill] sm:$0xff] }
 0x5c4   : > { %v9185_v27 = vpop.eup %9184  ;;  %v6619_v43 = vadd.f32 1.0, %v9183_v40  ;;  %v6365_v53 = vsel %vm16097_vm6, %v6333_v51, %v6107_v10  ;;  %v14776_v18 = vpop.permute.xlu2 %5952 }
 0x5c5   : > { %v6763_v25 = vmul.f32 %v9185_v27, %v6618_v35  ;;  %8605 = vmatmul.msk.bf16.gmra.mxu3 %vm6389_vm4, %v6365_v53  ;;  %8661 = vmatmul.msk.bf16.gmra.mxu1 %vm4519_vm15, %v7189_v26  ;;  %vm6768_vm8 = vweird.f32 %v9185_v27 }
 0x5c6   : > { %9186 = vrcp.f32 %v6619_v43  ;;  %vm6769_vm9 = vmor %vm6767_vm5, %vm6768_vm8  ;;  %v6788_v22 = vand.u32 2147483648, %v6619_v43  ;;  %v6786_v23 = vand.u32 2147483647, %v6619_v43  ;;  %vm6782_vm7 = vweird.f32 %v6619_v43 }
 0x5c7   : > { %v6764_v57 = vsub.f32 1.0, %v6763_v25  ;;  %vm16103_vm8 = vcmask 31744   ;;  %vm16104_vm5 = vmmov %vm16099_vm1 }
 0x5c8   : > { %v6459_v8 = vpop.f32.mrf.mxu3  ;;  %v6789_v35 = vor.u32 1.1754944e-38, %v6788_v22  ;;  %vm6787_vm14 = vcmp.eq.f32.partialorder %v6786_v23, 8.507059e+37 }
 0x5c9   : > { %v6765_v31 = vmul.f32 %v9185_v27, %v6764_v57  ;;  %v14765_v9 = vadd.f32 %v14410_v61, %v6459_v8 }
 0x5ca   : > { %v14769_v37 = vpop.permute.xlu0 %5950 }
 0x5cb   : > { %v6045_v28 = vpop.permute.xlu1 %6044  ;;  %v6766_v5 = vadd.f32 %v9185_v27, %v6765_v31  ;;  %v8620_v1 = vmul.f32 -1.442695, %v14765_v9 }
 0x5cc   : > { %v9187_v19 = vpop.eup %9186  ;;  %v6302_v30 = vsel %vm6276_vm0, %v6269_v60, %v6045_v28 }
 0x5cd   : > { %v6778_v20 = vmul.f32 %v9187_v19, %v6619_v43  ;;  %9188 = vpow2.f32 %v8620_v1  ;;  %v6770_v45 = vsel %vm6769_vm9, %v9185_v27, %v6766_v5  ;;  %vm6783_vm3 = vweird.f32 %v9187_v19  ;;  %v6111_v43 = vpop.permute.xlu2 %6110 }
 0x5ce   : > { %v6775_v15 = vsel %vm6772_vm2, %v6774_v16, %v6770_v45  ;;  %v6335_v48 = vsel %vm6309_vm11, %v6302_v30, %v6077_v29  ;;  %vm6784_vm6 = vmor %vm6782_vm7, %vm6783_vm3 }
 0x5cf   : > { %v6779_v49 = vsub.f32 1.0, %v6778_v20  ;;  %v7130_v39 = vmul.f32 %v6775_v15, %v14719_v34  ;;  %v6141_v34 = vsel %vm4519_vm15, %v14367_v58, %v14753_v33  ;;  %vm16105_vm3 = vmmov %vm16100_vm12 }
 0x5d0   : > { %v6461_v62 = vpop.f32.mrf.mxu3  ;;  %v6173_v29 = vsel %vm16103_vm8, %v6141_v34, %v14705_v11  ;;  %vm16106_vm7 = vmmov %vm16103_vm8 }
 0x5d1   : > { %v6780_v56 = vmul.f32 %v9187_v19, %v6779_v49  ;;  %v14779_v14 = vadd.f32 %v14410_v61, %v6461_v62  ;;  %v7162_v4 = vadd.f32 %v7130_v39, %v16101_v0  ;;  %v6206_v24 = vsel %vm6178_vm13, %v6173_v29, %v14769_v37 }
 0x5d2   : > { %v6109_v10 = vpop.permute.xlu0 %6108 }
 0x5d3   : > { %v14782_v44 = vpop.permute.xlu1 %5920  ;;  %v9189_v42 = vpop.eup %9188  ;;  %v6781_v46 = vadd.f32 %v9187_v19, %v6780_v56  ;;  %v8621_v7 = vmul.f32 -1.442695, %v14779_v14  ;;  %v6367_v13 = vsel %vm16100_vm12, %v6335_v48, %v6109_v10 }
 0x5d4   : > { %v6620_v32 = vadd.f32 1.0, %v9189_v42 }
 0x5d5   : > { %v6785_v55 = vsel %vm6784_vm6, %v9187_v19, %v6781_v46  ;;  %9190 = vpow2.f32 %v8621_v7  ;;  %8606 = vmatmul.msk.bf16.gmra.mxu3 %vm6389_vm4, %v6367_v13  ;;  %v6049_v45 = vpop.permute.xlu2 %6048 }
 0x5d6   : > { %v6790_v6 = vsel %vm6787_vm14, %v6789_v35, %v6785_v55  ;;  %9192 = vrcp.f32 %v6620_v32  ;;  %vm6797_vm9 = vweird.f32 %v6620_v32  ;;  %v6803_v50 = vand.u32 2147483648, %v6620_v32 }
 0x5d7   : > { %v7131_v63 = vmul.f32 %v6790_v6, %v14737_v54  ;;  %v6801_v41 = vand.u32 2147483647, %v6620_v32 }
 0x5d8   : > { %v6464_v21 = vpop.f32.mrf.mxu3  ;;  %v6804_v22 = vor.u32 1.1754944e-38, %v6803_v50 }
 0x5d9   : > { %v7163_v59 = vadd.f32 %v7131_v63, %v16102_v38  ;;  %v14792_v3 = vadd.f32 %v14410_v61, %v6464_v21  ;;  %vm6802_vm12 = vcmp.eq.f32.partialorder %v6801_v41, 8.507059e+37 }
 0x5da   : > { %v5889_v40 = vpop.permute.xlu0 %5888 }
 0x5db   : > { %v5983_v51 = vpop.permute.xlu1 %5982  ;;  %v9191_v26 = vpop.eup %9190  ;;  %v7190_v27 = vpack.c.bf16 %v7163_v59, %v7162_v4  ;;  %v8622_v53 = vmul.f32 -1.442695, %v14792_v3  ;;  %v16107_v59 = vld [vmem:[#allocation31_spill] sm:$0xff] }
 0x5dc   : > { %v9193_v54 = vpop.eup %9192  ;;  %v6621_v25 = vadd.f32 1.0, %v9191_v26  ;;  %v6238_v33 = vsel %vm16104_vm5, %v6206_v24, %v5983_v51 }
 0x5dd   : > { %v6793_v57 = vmul.f32 %v9193_v54, %v6620_v32  ;;  %9194 = vpow2.f32 %v8622_v53  ;;  %8662 = vmatmul.msk.bf16.gmra.mxu1 %vm4519_vm15, %v7190_v27  ;;  %v6271_v28 = vsel %vm6243_vm10, %v6238_v33, %v14744_v47  ;;  %vm6798_vm1 = vweird.f32 %v9193_v54 }
 0x5de   : > { %9196 = vrcp.f32 %v6621_v25  ;;  %v6143_v47 = vsel %vm4519_vm15, %v14461_v12, %v5889_v40  ;;  %vm6799_vm2 = vmor %vm6797_vm9, %vm6798_vm1  ;;  %v6818_v62 = vand.u32 2147483648, %v6621_v25  ;;  %v6816_v15 = vand.u32 2147483647, %v6621_v25  ;;  %v16108_v40 = vld [vmem:[#allocation8_spill] sm:$0xff] }
 0x5df   : > { %v6794_v58 = vsub.f32 1.0, %v6793_v57  ;;  %v6175_v56 = vsel %vm16106_vm7, %v6143_v47, %v14782_v44  ;;  %vm6812_vm14 = vweird.f32 %v6621_v25 }
 0x5e0   : > { %v6466_v8 = vpop.f32.mrf.mxu3  ;;  %v6208_v7 = vsel %vm6178_vm13, %v6175_v56, %v14776_v18  ;;  %v6819_v35 = vor.u32 1.1754944e-38, %v6818_v62  ;;  %vm6817_vm1 = vcmp.eq.f32.partialorder %v6816_v15, 8.507059e+37  ;;  %v5891_v18 = vpop.permute.xlu2 %5890 }
 0x5e1   : > { %v6795_v36 = vmul.f32 %v9193_v54, %v6794_v58  ;;  %v14805_v31 = vadd.f32 %v14410_v61, %v6466_v8  ;;  %v6145_v62 = vsel %vm4519_vm15, %v14503_v2, %v5891_v18 }
 0x5e2   : > { %v6047_v52 = vpop.permute.xlu0 %6046 }
 0x5e3   : > { %v6079_v11 = vpop.permute.xlu1 %6078  ;;  %v9195_v5 = vpop.eup %9194  ;;  %v6796_v1 = vadd.f32 %v9193_v54, %v6795_v36  ;;  %v8623_v19 = vmul.f32 -1.442695, %v14805_v31  ;;  %v6304_v37 = vsel %vm6276_vm0, %v6271_v28, %v6047_v52 }
 0x5e4   : > { %v9197_v17 = vpop.eup %9196  ;;  %v14811_v20 = vadd.f32 1.0, %v9195_v5  ;;  %v6337_v61 = vsel %vm6309_vm11, %v6304_v37, %v6079_v11 }
 0x5e5   : > { %v6808_v60 = vmul.f32 %v9197_v17, %v6621_v25  ;;  %9198 = vpow2.f32 %v8623_v19  ;;  %v6800_v49 = vsel %vm6799_vm2, %v9193_v54, %v6796_v1  ;;  %v6369_v16 = vsel %vm16105_vm3, %v6337_v61, %v6111_v43 }
 0x5e6   : > { %9200 = vrcp.f32 %v14811_v20  ;;  %8607 = vmatmul.msk.bf16.gmra.mxu3 %vm6389_vm4, %v6369_v16  ;;  %vm6813_vm6 = vweird.f32 %v9197_v17  ;;  %v6805_v12 = vsel %vm6802_vm12, %v6804_v22, %v6800_v49  ;;  %v6831_v58 = vand.u32 2147483647, %v14811_v20 }
 0x5e7   : > { %v6809_v30 = vsub.f32 1.0, %v6808_v60  ;;  %vm6814_vm8 = vmor %vm6812_vm14, %vm6813_vm6  ;;  %v7132_v39 = vmul.f32 %v6805_v12, %v14765_v9  ;;  %v14836_v9 = vld [vmem:[%s15672_s13] ss:$0 sm:$0xff]  ;;  %v6833_v33 = vand.u32 2147483648, %v14811_v20  ;;  %vm6827_vm2 = vweird.f32 %v14811_v20 }
 0x5e8   : > { %vm6832_vm12 = vcmp.eq.f32.partialorder %v6831_v58, 8.507059e+37  ;;  %v5987_v60 = vpop.permute.xlu2 %5986 }
 0x5e9   : > { %v6810_v23 = vmul.f32 %v9197_v17, %v6809_v30  ;;  %v7164_v34 = vadd.f32 %v7132_v39, %v16107_v59  ;;  %v6834_v1 = vor.u32 1.1754944e-38, %v6833_v33  ;;  %v16114_v39 = vld [vmem:[#allocation24_spill] sm:$0xff] }
 0x5ea   : > { %v5985_v10 = vpop.permute.xlu0 %5984 }
 0x5eb   : > { %v6017_v48 = vpop.permute.xlu1 %6016  ;;  %v9199_v42 = vpop.eup %9198  ;;  %v6811_v46 = vadd.f32 %v9197_v17, %v6810_v23  ;;  %v6240_v44 = vsel %vm16104_vm5, %v6208_v7, %v5985_v10  ;;  %vm16112_vm5 = vcmask 31744  }
 0x5ec   : > { %v9201_v13 = vpop.eup %9200  ;;  %v14823_v32 = vadd.f32 1.0, %v9199_v42  ;;  %v6273_v4 = vsel %vm6243_vm10, %v6240_v44, %v6017_v48 }
 0x5ed   : > { %v6815_v55 = vsel %vm6814_vm8, %v9197_v17, %v6811_v46  ;;  %v6823_v6 = vmul.f32 %v9201_v13, %v14811_v20  ;;  %vm6828_vm9 = vweird.f32 %v9201_v13  ;;  %v6306_v43 = vsel %vm6276_vm0, %v6273_v4, %v6049_v45  ;;  %v16111_v17 = vld [vmem:[#allocation2_spill] sm:$0xff]  ;;  %v14863_v20 = vld [vmem:[%s15675_s16] ss:$0 sm:$0xff] }
 0x5ee   : > { %v6820_v63 = vsel %vm6817_vm1, %v6819_v35, %v6815_v55  ;;  %9202 = vrcp.f32 %v14823_v32  ;;  %vm14851_vm7 = vmor %vm6827_vm2, %vm6828_vm9  ;;  %v6848_v19 = vand.u32 2147483648, %v14823_v32  ;;  %v6846_v41 = vand.u32 2147483647, %v14823_v32 }
 0x5ef   : > { %v7133_v21 = vmul.f32 %v6820_v63, %v14779_v14  ;;  %v6824_v0 = vsub.f32 1.0, %v6823_v6  ;;  %vm6842_vm14 = vweird.f32 %v14823_v32  ;;  %v16115_v6 = vld [vmem:[#allocation10_spill] sm:$0xff]  ;;  %vm16116_vm9 = vcmask 64512  }
 0x5f0   : > { %v6469_v38 = vpop.f32.mrf.mxu3  ;;  %v6849_v15 = vor.u32 1.1754944e-38, %v6848_v19  ;;  %vm6847_vm1 = vcmp.eq.f32.partialorder %v6846_v41, 8.507059e+37 }
 0x5f1   : > { %v7165_v51 = vadd.f32 %v7133_v21, %v16108_v40  ;;  %v6825_v26 = vmul.f32 %v9201_v13, %v6824_v0  ;;  %v14839_v27 = vadd.f32 %v14836_v9, %v6469_v38  ;;  %v6083_v21 = vpop.permute.xlu2 %6082 }
 0x5f2   : > { %v6081_v53 = vpop.permute.xlu0 %6080  ;;  %v7420_v5 = vpop.f32.mrf.mxu1 }
 0x5f3   : > { %v6113_v14 = vpop.permute.xlu1 %6112  ;;  %v7191_v54 = vpack.c.bf16 %v7165_v51, %v7164_v34  ;;  %v6826_v25 = vadd.f32 %v9201_v13, %v6825_v26  ;;  %v8624_v57 = vmul.f32 -1.442695, %v14839_v27  ;;  %v6339_v29 = vsel %vm6309_vm11, %v6306_v43, %v6081_v53 }
 0x5f4   : > { %v9203_v24 = vpop.eup %9202  ;;  %v6371_v36 = vsel %vm16105_vm3, %v6339_v29, %v6113_v14  ;;  %v7421_v50 = vadd.f32 %v7420_v5, %v16111_v17 }
 0x5f5   : > { %v6838_v8 = vmul.f32 %v9203_v24, %v14823_v32  ;;  %9204 = vpow2.f32 %v8624_v57  ;;  %8663 = vmatmul.msk.bf16.gmra.mxu1 %vm4519_vm15, %v7191_v54  ;;  %v6830_v28 = vsel %vm14851_vm7, %v9201_v13, %v6826_v25  ;;  %vm6843_vm6 = vweird.f32 %v9203_v24  ;;  %v16113_v32 = vld [vmem:[#allocation33_spill] sm:$0xff]  ;;  %v16117_v57 = vld [vmem:[#allocation6_spill] sm:$0xff] }
 0x5f6   : > { %8608 = vmatmul.msk.bf16.gmra.mxu3 %vm6389_vm4, %v6371_v36  ;;  %v6835_v47 = vsel %vm6832_vm12, %v6834_v1, %v6830_v28  ;;  %v14870_v16 = vadd.f32 %v14863_v20, %v7421_v50  ;;  %vm6844_vm8 = vmor %vm6842_vm14, %vm6843_vm6 }
 0x5f7   : > { %v6839_v11 = vsub.f32 1.0, %v6838_v8  ;;  %v7134_v42 = vmul.f32 %v6835_v47, %v14792_v3 }
 0x5f8   : > { %v6471_v37 = vpop.f32.mrf.mxu3  ;;  %v8674_v48 = vmul.f32 -1.442695, %v14870_v16 }
 0x5f9   : > { %v6840_v61 = vmul.f32 %v9203_v24, %v6839_v11  ;;  %v14867_v45 = vadd.f32 %v14836_v9, %v6471_v37  ;;  %v7166_v55 = vadd.f32 %v7134_v42, %v16114_v39 }
 0x5fa   : > { %v5923_v30 = vpop.permute.xlu0 %5922  ;;  %v7422_v35 = vpop.f32.mrf.mxu1 }
 0x5fb   : > { %v5955_v49 = vpop.permute.xlu1 %5954  ;;  %v9205_v22 = vpop.eup %9204  ;;  %v6841_v56 = vadd.f32 %v9203_v24, %v6840_v61  ;;  %v8625_v23 = vmul.f32 -1.442695, %v14867_v45  ;;  %v6177_v10 = vsel %vm16112_vm5, %v6145_v62, %v5923_v30  ;;  %v7423_v44 = vadd.f32 %v7422_v35, %v16113_v32 }
 0x5fc   : > { %v6624_v12 = vadd.f32 1.0, %v9205_v22  ;;  %v6210_v13 = vsel %vm6178_vm13, %v6177_v10, %v5955_v49  ;;  %vm16118_vm13 = vmmov %vm16105_vm3 }
 0x5fd   : > { %v6845_v46 = vsel %vm6844_vm8, %v9203_v24, %v6841_v56  ;;  %9206 = vpow2.f32 %v8625_v23  ;;  %v6242_v3 = vsel %vm16116_vm9, %v6210_v13, %v5987_v60  ;;  %v14886_v4 = vadd.f32 %v14863_v20, %v7423_v44 }
 0x5fe   : > { %v6850_v7 = vsel %vm6847_vm1, %v6849_v15, %v6845_v46  ;;  %9208 = vrcp.f32 %v6624_v12  ;;  %v6863_v52 = vand.u32 2147483648, %v6624_v12  ;;  %v6861_v5 = vand.u32 2147483647, %v6624_v12 }
 0x5ff   : > { %v7135_v2 = vmul.f32 %v6850_v7, %v14805_v31  ;;  %9210 = vpow2.f32 %v8674_v48  ;;  %v8675_v26 = vmul.f32 -1.442695, %v14886_v4  ;;  %vm16124_vm1 = vcmask 31744  }
 0x600   : > { %v6864_v60 = vor.u32 1.1754944e-38, %v6863_v52 }
 0x601   : > { %v7167_v63 = vadd.f32 %v7135_v2, %v16115_v6 }
 0x602   : > { %v6019_v0 = vpop.permute.xlu0 %6018 }
 0x603   : > { %v6051_v18 = vpop.permute.xlu1 %6050  ;;  %v9207_v38 = vpop.eup %9206  ;;  %v7192_v31 = vpack.c.bf16 %v7167_v63, %v7166_v55  ;;  %v6275_v59 = vsel %vm6243_vm10, %v6242_v3, %v6019_v0  ;;  %v16121_v3 = vld [vmem:[#allocation11_spill] sm:$0xff] }
 0x604   : > { %v9209_v34 = vpop.eup %9208  ;;  %v6625_v40 = vadd.f32 1.0, %v9207_v38  ;;  %v6308_v51 = vsel %vm6276_vm0, %v6275_v59, %v6051_v18  ;;  %vm6857_vm0 = vweird.f32 %v6624_v12  ;;  %v16122_v18 = vld [vmem:[#allocation7_spill] sm:$0xff]  ;;  %v16123_v59 = vld [vmem:[#allocation34_spill] sm:$0xff] }
 0x605   : > { %v9211_v14 = vpop.eup %9210  ;;  %v6853_v43 = vmul.f32 %v9209_v34, %v6624_v12  ;;  %v6341_v53 = vsel %vm6309_vm11, %v6308_v51, %v6083_v21  ;;  %8664 = vmatmul.msk.bf16.gmra.mxu1 %vm4519_vm15, %v7192_v31  ;;  %vm6858_vm10 = vweird.f32 %v9209_v34 }
 0x606   : > { %9212 = vrcp.f32 %v6625_v40  ;;  %v7632_v25 = vadd.f32 1.0, %v9211_v14  ;;  %v6372_v29 = vsel %vm16118_vm13, %v6341_v53, %v16117_v57  ;;  %vm14900_vm11 = vmor %vm6857_vm0, %vm6858_vm10  ;;  %v6878_v41 = vand.u32 2147483648, %v6625_v40 }
 0x607   : > { %v6854_v54 = vsub.f32 1.0, %v6853_v43  ;;  %9214 = vpow2.f32 %v8675_v26  ;;  %8609 = vmatmul.msk.bf16.gmra.mxu3 %vm6389_vm4, %v6372_v29  ;;  %vm6862_vm4 = vcmp.eq.f32.partialorder %v6861_v5, 8.507059e+37  ;;  %v6876_v30 = vand.u32 2147483647, %v6625_v40 }
 0x608   : > { %9216 = vrcp.f32 %v7632_v25  ;;  %v6474_v58 = vpop.f32.mrf.mxu3  ;;  %vm6872_vm3 = vweird.f32 %v6625_v40  ;;  %v6879_v12 = vor.u32 1.1754944e-38, %v6878_v41  ;;  %v7675_v10 = vand.u32 2147483648, %v7632_v25 }
 0x609   : > { %v6855_v24 = vmul.f32 %v9209_v34, %v6854_v54  ;;  %v14897_v33 = vadd.f32 %v14836_v9, %v6474_v58  ;;  %v7673_v46 = vand.u32 2147483647, %v7632_v25  ;;  %vm6877_vm6 = vcmp.eq.f32.partialorder %v6876_v30, 8.507059e+37 }
 0x60a   : > { %vm7669_vm14 = vweird.f32 %v7632_v25  ;;  %v7676_v6 = vor.u32 1.1754944e-38, %v7675_v10 }
 0x60b   : > { %v6856_v8 = vadd.f32 %v9209_v34, %v6855_v24  ;;  %v8626_v28 = vmul.f32 -1.442695, %v14897_v33  ;;  %vm7674_vm5 = vcmp.eq.f32.partialorder %v7673_v46, 8.507059e+37 }
 0x60c   : > { %v9213_v36 = vpop.eup %9212 }
 0x60d   : > { %v9215_v11 = vpop.eup %9214  ;;  %v6868_v1 = vmul.f32 %v9213_v36, %v6625_v40  ;;  %9218 = vpow2.f32 %v8626_v28  ;;  %v6860_v50 = vsel %vm14900_vm11, %v9209_v34, %v6856_v8  ;;  %vm6873_vm2 = vweird.f32 %v9213_v36 }
 0x60e   : > { %v14904_v37 = vadd.f32 1.0, %v9215_v11  ;;  %v9217_v17 = vpop.eup %9216  ;;  %v6865_v62 = vsel %vm6862_vm4, %v6864_v60, %v6860_v50  ;;  %vm6874_vm7 = vmor %vm6872_vm3, %vm6873_vm2 }
 0x60f   : > { %v6869_v61 = vsub.f32 1.0, %v6868_v1  ;;  %v7665_v47 = vmul.f32 %v9217_v17, %v7632_v25  ;;  %vm7670_vm12 = vweird.f32 %v9217_v17  ;;  %v7136_v2 = vmul.f32 %v6865_v62, %v14839_v27  ;;  %v16125_v1 = vld [vmem:[#allocation35_spill] sm:$0xff]  ;;  %vm16126_vm4 = vmmov %vm16124_vm1 }
 0x610   : > { %9220 = vrcp.f32 %v14904_v37  ;;  %v6476_v22 = vpop.f32.mrf.mxu3  ;;  %vm7671_vm8 = vmor %vm7669_vm14, %vm7670_vm12  ;;  %v7688_v43 = vand.u32 2147483647, %v14904_v37  ;;  %v7690_v53 = vand.u32 2147483648, %v14904_v37  ;;  %vm7684_vm13 = vweird.f32 %v14904_v37 }
 0x611   : > { %v6870_v49 = vmul.f32 %v9213_v36, %v6869_v61  ;;  %v7666_v56 = vsub.f32 1.0, %v7665_v47  ;;  %v14910_v23 = vadd.f32 %v14836_v9, %v6476_v22  ;;  %v7168_v0 = vadd.f32 %v7136_v2, %v16121_v3 }
 0x612   : > { %vm7689_vm0 = vcmp.eq.f32.partialorder %v7688_v43, 8.507059e+37  ;;  %v7691_v52 = vor.u32 1.1754944e-38, %v7690_v53 }
 0x613   : > { %v6871_v15 = vadd.f32 %v9213_v36, %v6870_v49  ;;  %v9219_v48 = vpop.eup %9218  ;;  %v7667_v42 = vmul.f32 %v9217_v17, %v7666_v56  ;;  %v8627_v7 = vmul.f32 -1.442695, %v14910_v23 }
 0x614   : > { %v14914_v35 = vadd.f32 1.0, %v9219_v48 }
 0x615   : > { %v6875_v13 = vsel %vm6874_vm7, %v9213_v36, %v6871_v15  ;;  %v7668_v39 = vadd.f32 %v9217_v17, %v7667_v42  ;;  %9222 = vpow2.f32 %v8627_v7 }
 0x616   : > { %v9221_v32 = vpop.eup %9220  ;;  %v6880_v44 = vsel %vm6877_vm6, %v6879_v12, %v6875_v13  ;;  %9224 = vrcp.f32 %v14914_v35  ;;  %v6893_v30 = vand.u32 2147483648, %v14914_v35  ;;  %vm6887_vm2 = vweird.f32 %v14914_v35 }
 0x617   : > { %v7137_v55 = vmul.f32 %v6880_v44, %v14867_v45  ;;  %v7672_v21 = vsel %vm7671_vm8, %v9217_v17, %v7668_v39  ;;  %v7680_v27 = vmul.f32 %v9221_v32, %v14904_v37  ;;  %vm7685_vm9 = vweird.f32 %v9221_v32 }
 0x618   : > { %v7425_v63 = vpop.f32.mrf.mxu1  ;;  %v7677_v45 = vsel %vm7674_vm5, %v7676_v6, %v7672_v21  ;;  %v6479_v31 = vpop.f32.mrf.mxu3  ;;  %vm7686_vm10 = vmor %vm7684_vm13, %vm7685_vm9  ;;  %v6894_v42 = vor.u32 1.1754944e-38, %v6893_v30 }
 0x619   : > { %v7169_v38 = vadd.f32 %v7137_v55, %v16122_v18  ;;  %v7426_v34 = vadd.f32 %v7425_v63, %v16123_v59  ;;  %v8144_v40 = vmul.f32 %v7677_v45, %v14870_v16  ;;  %v7681_v51 = vsub.f32 1.0, %v7680_v27 }
 0x61a   : > { %v14930_v26 = vadd.f32 %v14836_v9, %v6479_v31 }
 0x61b   : > { %v7193_v14 = vpack.c.bf16 %v7169_v38, %v7168_v0  ;;  %v14935_v54 = vadd.f32 %v14863_v20, %v7426_v34  ;;  %v9223_v25 = vpop.eup %9222  ;;  %8176 = vst.msk [vmem:[%s14925_s27] sm:$0xff] %vm16124_vm1, %v8144_v40  ;;  %v7682_v57 = vmul.f32 %v9221_v32, %v7681_v51  ;;  %v16127_v40 = vld [vmem:[#allocation12_spill] sm:$0xff] }
 0x61c   : > { %v8628_v29 = vmul.f32 -1.442695, %v14930_v26  ;;  %v9225_v16 = vpop.eup %9224  ;;  %v6627_v24 = vadd.f32 1.0, %v9223_v25  ;;  %v16128_v25 = vld [vmem:[#allocation9_spill] sm:$0xff] }
 0x61d   : > { %v8676_v58 = vmul.f32 -1.442695, %v14935_v54  ;;  %8665 = vmatmul.msk.bf16.gmra.mxu1 %vm4519_vm15, %v7193_v14  ;;  %v6883_v8 = vmul.f32 %v9225_v16, %v14914_v35  ;;  %v7683_v36 = vadd.f32 %v9221_v32, %v7682_v57  ;;  %vm6888_vm11 = vweird.f32 %v9225_v16 }
 0x61e   : > { %9226 = vpow2.f32 %v8628_v29  ;;  %vm6889_vm3 = vmor %vm6887_vm2, %vm6888_vm11  ;;  %v6906_v2 = vand.u32 2147483647, %v6627_v24  ;;  %v6908_v13 = vand.u32 2147483648, %v6627_v24  ;;  %vm6902_vm6 = vweird.f32 %v6627_v24 }
 0x61f   : > { %9228 = vrcp.f32 %v6627_v24  ;;  %v6884_v11 = vsub.f32 1.0, %v6883_v8  ;;  %v7687_v5 = vsel %vm7686_vm10, %v9221_v32, %v7683_v36 }
 0x620   : > { %v7427_v28 = vpop.f32.mrf.mxu1  ;;  %9230 = vpow2.f32 %v8676_v58  ;;  %v7692_v17 = vsel %vm7689_vm0, %v7691_v52, %v7687_v5  ;;  %v6481_v50 = vpop.f32.mrf.mxu3  ;;  %v6909_v63 = vor.u32 1.1754944e-38, %v6908_v13  ;;  %vm6907_vm8 = vcmp.eq.f32.partialorder %v6906_v2, 8.507059e+37 }
 0x621   : > { %v7428_v19 = vadd.f32 %v7427_v28, %v16125_v1  ;;  %v6885_v61 = vmul.f32 %v9225_v16, %v6884_v11  ;;  %v8145_v41 = vmul.f32 %v7692_v17, %v14886_v4  ;;  %v14947_v60 = vadd.f32 %v14836_v9, %v6481_v50  ;;  %v16129_v11 = vld [vmem:[#allocation36_spill] sm:$0xff] }
 0x622   : > { %v6891_v4 = vand.u32 2147483647, %v14914_v35 }
 0x623   : > { %v14950_v37 = vadd.f32 %v14863_v20, %v7428_v19  ;;  %v6886_v49 = vadd.f32 %v9225_v16, %v6885_v61  ;;  %8177 = vst.msk [vmem:[%s14925_s27 + $0x8] sm:$0xff] %vm16126_vm4, %v8145_v41  ;;  %v8629_v22 = vmul.f32 -1.442695, %v14947_v60 }
 0x624   : > { %v9227_v47 = vpop.eup %9226  ;;  %vm6892_vm7 = vcmp.eq.f32.partialorder %v6891_v4, 8.507059e+37 }
 0x625   : > { %v9229_v62 = vpop.eup %9228  ;;  %v14958_v56 = vadd.f32 1.0, %v9227_v47  ;;  %v8677_v15 = vmul.f32 -1.442695, %v14950_v37  ;;  %9232 = vpow2.f32 %v8629_v22  ;;  %v6890_v48 = vsel %vm6889_vm3, %v9225_v16, %v6886_v49 }
 0x626   : > { %v9231_v12 = vpop.eup %9230  ;;  %v6898_v10 = vmul.f32 %v9229_v62, %v6627_v24  ;;  %v6895_v35 = vsel %vm6892_vm7, %v6894_v42, %v6890_v48  ;;  %vm6903_vm12 = vweird.f32 %v9229_v62 }
 0x627   : > { %9234 = vrcp.f32 %v14958_v56  ;;  %v14962_v7 = vadd.f32 1.0, %v9231_v12  ;;  %v7138_v6 = vmul.f32 %v6895_v35, %v14897_v33  ;;  %vm6904_vm14 = vmor %vm6902_vm6, %vm6903_vm12  ;;  %vm6917_vm5 = vweird.f32 %v14958_v56 }
 0x628   : > { %v6899_v46 = vsub.f32 1.0, %v6898_v10  ;;  %9236 = vpow2.f32 %v8677_v15  ;;  %v6921_v33 = vand.u32 2147483647, %v14958_v56  ;;  %v6923_v14 = vand.u32 2147483648, %v14958_v56 }
 0x629   : > { %9238 = vrcp.f32 %v14962_v7  ;;  %v7170_v51 = vadd.f32 %v7138_v6, %v16127_v40  ;;  %v7705_v24 = vand.u32 2147483648, %v14962_v7  ;;  %vm7699_vm10 = vweird.f32 %v14962_v7 }
 0x62a   : > { %v6900_v32 = vmul.f32 %v9229_v62, %v6899_v46  ;;  %vm14994_vm9 = vcmp.eq.f32.partialorder %v6921_v33, 8.507059e+37  ;;  %v6924_v61 = vor.u32 1.1754944e-38, %v6923_v14  ;;  %vm16137_vm12 = vcmask 31744  }
 0x62b   : > { %v9233_v44 = vpop.eup %9232  ;;  %v7706_v30 = vor.u32 1.1754944e-38, %v7705_v24 }
 0x62c   : > { %v6901_v39 = vadd.f32 %v9229_v62, %v6900_v32  ;;  %v14968_v21 = vadd.f32 1.0, %v9233_v44 }
 0x62d   : > { %v14965_v55 = vpop.eup %9234 }
 0x62e   : > { %v6905_v27 = vsel %vm6904_vm14, %v9229_v62, %v6901_v39  ;;  %v6913_v3 = vmul.f32 %v14965_v55, %v14958_v56  ;;  %v9237_v0 = vpop.eup %9236  ;;  %9240 = vrcp.f32 %v14968_v21  ;;  %vm6918_vm1 = vweird.f32 %v14965_v55 }
 0x62f   : > { %v6910_v18 = vsel %vm6907_vm8, %v6909_v63, %v6905_v27  ;;  %v9239_v38 = vpop.eup %9238  ;;  %v14976_v59 = vadd.f32 1.0, %v9237_v0  ;;  %v6936_v58 = vand.u32 2147483647, %v14968_v21  ;;  %v6938_v50 = vand.u32 2147483648, %v14968_v21  ;;  %vm15006_vm0 = vmor %vm6917_vm5, %vm6918_vm1 }
 0x630   : > { %v7139_v45 = vmul.f32 %v6910_v18, %v14910_v23  ;;  %v6914_v31 = vsub.f32 1.0, %v6913_v3  ;;  %v7695_v43 = vmul.f32 %v9239_v38, %v14962_v7  ;;  %v7703_v23 = vand.u32 2147483647, %v14962_v7  ;;  %v16136_v3 = vld [vmem:[#allocation37_spill] sm:$0xff] }
 0x631   : > { %v6484_v34 = vpop.f32.mrf.mxu3  ;;  %9242 = vrcp.f32 %v14976_v59  ;;  %vm7700_vm13 = vweird.f32 %v9239_v38  ;;  %vm6932_vm2 = vweird.f32 %v14968_v21  ;;  %vm15017_vm3 = vcmp.eq.f32.partialorder %v6936_v58, 8.507059e+37 }
 0x632   : > { %v14982_v53 = vadd.f32 %v14836_v9, %v6484_v34  ;;  %v7171_v57 = vadd.f32 %v7139_v45, %v16128_v25  ;;  %v6915_v29 = vmul.f32 %v14965_v55, %v6914_v31  ;;  %v7696_v16 = vsub.f32 1.0, %v7695_v43  ;;  %v7430_v8 = vpop.f32.mrf.mxu1  ;;  %vm7701_vm4 = vmor %vm7699_vm10, %vm7700_vm13  ;;  %v16138_v25 = vld [vmem:[#allocation13_spill] sm:$0xff] }
 0x633   : > { %v7431_v5 = vadd.f32 %v7430_v8, %v16129_v11  ;;  %vm7704_vm11 = vcmp.eq.f32.partialorder %v7703_v23, 8.507059e+37  ;;  %v6939_v48 = vor.u32 1.1754944e-38, %v6938_v50  ;;  %v7720_v63 = vand.u32 2147483648, %v14976_v59 }
 0x634   : > { %v7194_v36 = vpack.c.bf16 %v7171_v57, %v7170_v51  ;;  %v6916_v52 = vadd.f32 %v14965_v55, %v6915_v29  ;;  %v8630_v28 = vmul.f32 -1.442695, %v14982_v53  ;;  %v9241_v1 = vpop.eup %9240  ;;  %v7697_v17 = vmul.f32 %v9239_v38, %v7696_v16  ;;  %v16139_v29 = vld [vmem:[#allocation14_spill] sm:$0xff] }
 0x635   : > { %v6928_v41 = vmul.f32 %v9241_v1, %v14968_v21  ;;  %v15011_v22 = vadd.f32 %v14863_v20, %v7431_v5  ;;  %vm6933_vm7 = vweird.f32 %v9241_v1  ;;  %vm7714_vm8 = vweird.f32 %v14976_v59 }
 0x636   : > { %9244 = vpow2.f32 %v8630_v28  ;;  %8666 = vmatmul.msk.bf16.gmra.mxu1 %vm4519_vm15, %v7194_v36  ;;  %v7698_v49 = vadd.f32 %v9239_v38, %v7697_v17  ;;  %v6920_v4 = vsel %vm15006_vm0, %v14965_v55, %v6916_v52  ;;  %vm6934_vm6 = vmor %vm6932_vm2, %vm6933_vm7  ;;  %v7721_v51 = vor.u32 1.1754944e-38, %v7720_v63  ;;  %v16140_v36 = vld [vmem:[#allocation38_spill] sm:$0xff] }
 0x637   : > { %v9243_v62 = vpop.eup %9242  ;;  %v6929_v15 = vsub.f32 1.0, %v6928_v41  ;;  %v8678_v46 = vmul.f32 -1.442695, %v15011_v22  ;;  %v6925_v35 = vsel %vm14994_vm9, %v6924_v61, %v6920_v4  ;;  %vm16141_vm9 = vmmov %vm16137_vm12 }
 0x638   : > { %v7702_v10 = vsel %vm7701_vm4, %v9239_v38, %v7698_v49  ;;  %v7710_v42 = vmul.f32 %v9243_v62, %v14976_v59  ;;  %vm7715_vm14 = vweird.f32 %v9243_v62  ;;  %v7140_v45 = vmul.f32 %v6925_v35, %v14930_v26 }
 0x639   : > { %v6486_v12 = vpop.f32.mrf.mxu3  ;;  %v7707_v7 = vsel %vm7704_vm11, %v7706_v30, %v7702_v10  ;;  %v6930_v2 = vmul.f32 %v9241_v1, %v6929_v15  ;;  %9246 = vpow2.f32 %v8678_v46  ;;  %vm7716_vm5 = vmor %vm7714_vm8, %vm7715_vm14 }
 0x63a   : > { %v15024_v13 = vadd.f32 %v14836_v9, %v6486_v12  ;;  %v8146_v32 = vmul.f32 %v7707_v7, %v14935_v54  ;;  %v7711_v44 = vsub.f32 1.0, %v7710_v42  ;;  %v7432_v39 = vpop.f32.mrf.mxu1  ;;  %v7718_v54 = vand.u32 2147483647, %v14976_v59 }
 0x63b   : > { %v6931_v6 = vadd.f32 %v9241_v1, %v6930_v2  ;;  %v7433_v0 = vadd.f32 %v7432_v39, %v16136_v3  ;;  %v7172_v57 = vadd.f32 %v7140_v45, %v16138_v25 }
 0x63c   : > { %v9245_v55 = vpop.eup %9244  ;;  %v8631_v27 = vmul.f32 -1.442695, %v15024_v13  ;;  %8178 = vst.msk [vmem:[%s14925_s27 + $0x10] sm:$0xff] %vm16137_vm12, %v8146_v32  ;;  %v7712_v18 = vmul.f32 %v9243_v62, %v7711_v44  ;;  %vm7719_vm1 = vcmp.eq.f32.partialorder %v7718_v54, 8.507059e+37  ;;  %v16146_v44 = vld [vmem:[#allocation39_spill] sm:$0xff] }
 0x63d   : > { %v6630_v38 = vadd.f32 1.0, %v9245_v55  ;;  %v6935_v31 = vsel %vm6934_vm6, %v9241_v1, %v6931_v6  ;;  %v15039_v33 = vadd.f32 %v14863_v20, %v7433_v0 }
 0x63e   : > { %9248 = vpow2.f32 %v8631_v27  ;;  %v6940_v34 = vsel %vm15017_vm3, %v6939_v48, %v6935_v31  ;;  %v7713_v40 = vadd.f32 %v9243_v62, %v7712_v18 }
 0x63f   : > { %9250 = vrcp.f32 %v6630_v38  ;;  %v7141_v21 = vmul.f32 %v6940_v34, %v14947_v60  ;;  %v8679_v14 = vmul.f32 -1.442695, %v15039_v33  ;;  %v9247_v26 = vpop.eup %9246  ;;  %v6951_v50 = vand.u32 2147483647, %v6630_v38 }
 0x640   : > { %v7717_v43 = vsel %vm7716_vm5, %v9243_v62, %v7713_v40  ;;  %v15049_v58 = vadd.f32 1.0, %v9247_v26  ;;  %v6953_v49 = vand.u32 2147483648, %v6630_v38  ;;  %vm6947_vm10 = vweird.f32 %v6630_v38 }
 0x641   : > { %v7173_v23 = vadd.f32 %v7141_v21, %v16139_v29  ;;  %v7722_v16 = vsel %vm7719_vm1, %v7721_v51, %v7717_v43  ;;  %9252 = vpow2.f32 %v8679_v14  ;;  %vm15073_vm0 = vcmp.eq.f32.partialorder %v6951_v50, 8.507059e+37  ;;  %vm16151_vm1 = vmmov %vm16141_vm9 }
 0x642   : > { %v8147_v24 = vmul.f32 %v7722_v16, %v14950_v37  ;;  %v7435_v59 = vpop.f32.mrf.mxu1  ;;  %9254 = vrcp.f32 %v15049_v58  ;;  %v7733_v30 = vand.u32 2147483647, %v15049_v58  ;;  %v7735_v15 = vand.u32 2147483648, %v15049_v58 }
 0x643   : > { %v7195_v8 = vpack.c.bf16 %v7173_v23, %v7172_v57  ;;  %v7436_v52 = vadd.f32 %v7435_v59, %v16140_v36  ;;  %v6954_v35 = vor.u32 1.1754944e-38, %v6953_v49  ;;  %vm7729_vm4 = vweird.f32 %v15049_v58 }
 0x644   : > { %v9249_v60 = vpop.eup %9248  ;;  %8179 = vst.msk [vmem:[%s14925_s27 + $0x18] sm:$0xff] %vm16141_vm9, %v8147_v24  ;;  %vm15086_vm2 = vcmp.eq.f32.partialorder %v7733_v30, 8.507059e+37  ;;  %v7736_v63 = vor.u32 1.1754944e-38, %v7735_v15  ;;  %v16152_v30 = vld [vmem:[#allocation15_spill] sm:$0xff]  ;;  %v16153_v15 = vld [vmem:[#allocation16_spill] sm:$0xff] }
 0x645   : > { %v9251_v28 = vpop.eup %9250  ;;  %v15055_v5 = vadd.f32 1.0, %v9249_v60  ;;  %v15058_v1 = vadd.f32 %v14863_v20, %v7436_v52 }
 0x646   : > { %v6943_v11 = vmul.f32 %v9251_v28, %v6630_v38  ;;  %8667 = vmatmul.msk.bf16.gmra.mxu1 %vm4519_vm15, %v7195_v8  ;;  %vm6948_vm13 = vweird.f32 %v9251_v28 }
 0x647   : > { %9256 = vrcp.f32 %v15055_v5  ;;  %v9253_v17 = vpop.eup %9252  ;;  %v8680_v61 = vmul.f32 -1.442695, %v15058_v1  ;;  %v6966_v46 = vand.u32 2147483647, %v15055_v5  ;;  %vm15078_vm11 = vmor %vm6947_vm10, %vm6948_vm13  ;;  %v6968_v0 = vand.u32 2147483648, %v15055_v5 }
 0x648   : > { %v6944_v37 = vsub.f32 1.0, %v6943_v11  ;;  %v6489_v19 = vpop.f32.mrf.mxu3  ;;  %v15067_v62 = vadd.f32 1.0, %v9253_v17  ;;  %v9255_v4 = vpop.eup %9254  ;;  %vm6962_vm7 = vweird.f32 %v15055_v5 }
 0x649   : > { %v15064_v41 = vadd.f32 %v14836_v9, %v6489_v19  ;;  %9258 = vpow2.f32 %v8680_v61  ;;  %v7725_v48 = vmul.f32 %v9255_v4, %v15049_v58  ;;  %vm7730_vm3 = vweird.f32 %v9255_v4  ;;  %v7300_v17 = vpop.f32.mrf.mxu0 }
 0x64a   : > { %v6945_v47 = vmul.f32 %v9251_v28, %v6944_v37  ;;  %v7437_v12 = vpop.f32.mrf.mxu1  ;;  %9260 = vrcp.f32 %v15067_v62  ;;  %vm15096_vm12 = vcmp.eq.f32.partialorder %v6966_v46, 8.507059e+37  ;;  %vm7731_vm6 = vmor %vm7729_vm4, %vm7730_vm3  ;;  %v6969_v16 = vor.u32 1.1754944e-38, %v6968_v0 }
 0x64b   : > { %v8632_v56 = vmul.f32 -1.442695, %v15064_v41  ;;  %v7726_v32 = vsub.f32 1.0, %v7725_v48  ;;  %v7438_v39 = vadd.f32 %v7437_v12, %v16146_v44  ;;  %v7748_v24 = vand.u32 2147483647, %v15067_v62 }
 0x64c   : > { %v6946_v10 = vadd.f32 %v9251_v28, %v6945_v47  ;;  %v7750_v58 = vand.u32 2147483648, %v15067_v62  ;;  %vm7744_vm9 = vweird.f32 %v15067_v62 }
 0x64d   : > { %9262 = vpow2.f32 %v8632_v56  ;;  %v9257_v7 = vpop.eup %9256  ;;  %v7727_v3 = vmul.f32 %v9255_v4, %v7726_v32  ;;  %v15093_v18 = vadd.f32 %v14863_v20, %v7438_v39  ;;  %vm7749_vm10 = vcmp.eq.f32.partialorder %v7748_v24, 8.507059e+37 }
 0x64e   : > { %v6950_v55 = vsel %vm15078_vm11, %v9251_v28, %v6946_v10  ;;  %v6958_v27 = vmul.f32 %v9257_v7, %v15055_v5  ;;  %vm6963_vm14 = vweird.f32 %v9257_v7  ;;  %v7751_v47 = vor.u32 1.1754944e-38, %v7750_v58 }
 0x64f   : > { %v9259_v38 = vpop.eup %9258  ;;  %v6955_v21 = vsel %vm15073_vm0, %v6954_v35, %v6950_v55  ;;  %v7728_v51 = vadd.f32 %v9255_v4, %v7727_v3  ;;  %v8681_v26 = vmul.f32 -1.442695, %v15093_v18  ;;  %vm6964_vm8 = vmor %vm6962_vm7, %vm6963_vm14 }
 0x650   : > { %v6491_v54 = vpop.f32.mrf.mxu3  ;;  %v6959_v45 = vsub.f32 1.0, %v6958_v27  ;;  %v9261_v40 = vpop.eup %9260  ;;  %v15105_v14 = vadd.f32 1.0, %v9259_v38  ;;  %v7142_v36 = vmul.f32 %v6955_v21, %v14982_v53  ;;  %vm16154_vm0 = vmmov %vm16151_vm1 }
 0x651   : > { %v15101_v34 = vadd.f32 %v14836_v9, %v6491_v54  ;;  %v7740_v57 = vmul.f32 %v9261_v40, %v15067_v62  ;;  %v7732_v23 = vsel %vm7731_vm6, %v9255_v4, %v7728_v51  ;;  %vm7745_vm5 = vweird.f32 %v9261_v40  ;;  %v7302_v21 = vpop.f32.mrf.mxu0  ;;  %vm16155_vm6 = vmmov %vm16154_vm0 }
 0x652   : > { %v6960_v25 = vmul.f32 %v9257_v7, %v6959_v45  ;;  %9264 = vrcp.f32 %v15105_v14  ;;  %v7737_v59 = vsel %vm15086_vm2, %v7736_v63, %v7732_v23  ;;  %vm7746_vm13 = vmor %vm7744_vm9, %vm7745_vm5  ;;  %v7174_v4 = vadd.f32 %v7142_v36, %v16152_v30 }
 0x653   : > { %v9263_v43 = vpop.eup %9262  ;;  %v8633_v29 = vmul.f32 -1.442695, %v15101_v34  ;;  %v7741_v8 = vsub.f32 1.0, %v7740_v57  ;;  %v8148_v52 = vmul.f32 %v7737_v59, %v15011_v22  ;;  %9266 = vpow2.f32 %v8681_v26 }
 0x654   : > { %v6961_v60 = vadd.f32 %v9257_v7, %v6960_v25  ;;  %v15122_v28 = vadd.f32 1.0, %v9263_v43  ;;  %v7763_v62 = vand.u32 2147483647, %v15105_v14  ;;  %v7765_v55 = vand.u32 2147483648, %v15105_v14 }
 0x655   : > { %v7742_v37 = vmul.f32 %v9261_v40, %v7741_v8  ;;  %9268 = vpow2.f32 %v8633_v29  ;;  %8180 = vst.msk [vmem:[%s14925_s27 + $0x20] sm:$0xff] %vm16151_vm1, %v8148_v52  ;;  %vm7759_vm4 = vweird.f32 %v15105_v14 }
 0x656   : > { %v6965_v11 = vsel %vm6964_vm8, %v9257_v7, %v6961_v60  ;;  %9270 = vrcp.f32 %v15122_v28  ;;  %vm7764_vm3 = vcmp.eq.f32.partialorder %v7763_v62, 8.507059e+37  ;;  %v7766_v38 = vor.u32 1.1754944e-38, %v7765_v55 }
 0x657   : > { %v6970_v19 = vsel %vm15096_vm12, %v6969_v16, %v6965_v11  ;;  %v7743_v5 = vadd.f32 %v9261_v40, %v7742_v37  ;;  %v6981_v45 = vand.u32 2147483647, %v15122_v28  ;;  %v6983_v43 = vand.u32 2147483648, %v15122_v28 }
 0x658   : > { %v6494_v53 = vpop.f32.mrf.mxu3  ;;  %v7143_v22 = vmul.f32 %v6970_v19, %v15024_v13  ;;  %v9265_v61 = vpop.eup %9264  ;;  %vm6977_vm12 = vweird.f32 %v15122_v28 }
 0x659   : > { %v15132_v50 = vadd.f32 %v14836_v9, %v6494_v53  ;;  %v7747_v12 = vsel %vm7746_vm13, %v9261_v40, %v7743_v5  ;;  %v7755_v10 = vmul.f32 %v9265_v61, %v15105_v14  ;;  %v9267_v13 = vpop.eup %9266  ;;  %vm7760_vm11 = vweird.f32 %v9265_v61 }
 0x65a   : > { %v7440_v49 = vpop.f32.mrf.mxu1  ;;  %v7175_v56 = vadd.f32 %v7143_v22, %v16153_v15  ;;  %v7752_v48 = vsel %vm7749_vm10, %v7751_v47, %v7747_v12  ;;  %v15140_v44 = vadd.f32 1.0, %v9267_v13  ;;  %vm7761_vm2 = vmor %vm7759_vm4, %vm7760_vm11  ;;  %vm15178_vm14 = vcmp.eq.f32.partialorder %v6981_v45, 8.507059e+37  ;;  %v16161_v45 = vld [vmem:[#allocation17_spill] sm:$0xff] }
 0x65b   : > { %v8634_v42 = vmul.f32 -1.442695, %v15132_v50  ;;  %v7441_v46 = vadd.f32 %v7440_v49, %v7300_v17  ;;  %v9269_v7 = vpop.eup %9268  ;;  %v8149_v35 = vmul.f32 %v7752_v48, %v15039_v33  ;;  %v7756_v32 = vsub.f32 1.0, %v7755_v10 }
 0x65c   : > { %v7196_v2 = vpack.c.bf16 %v7175_v56, %v7174_v4  ;;  %v15142_v39 = vpop.eup %9270  ;;  %v15145_v6 = vadd.f32 1.0, %v9269_v7  ;;  %vm7774_vm5 = vweird.f32 %v15140_v44  ;;  %v7780_v19 = vand.u32 2147483648, %v15140_v44 }
 0x65d   : > { %9272 = vpow2.f32 %v8634_v42  ;;  %v15148_v63 = vadd.f32 %v14863_v20, %v7441_v46  ;;  %8181 = vst.msk [vmem:[%s14925_s27 + $0x28] sm:$0xff] %vm16154_vm0, %v8149_v35  ;;  %v7757_v27 = vmul.f32 %v9265_v61, %v7756_v32  ;;  %v6973_v33 = vmul.f32 %v15142_v39, %v15122_v28 }
 0x65e   : > { %9274 = vrcp.f32 %v15140_v44  ;;  %8668 = vmatmul.msk.bf16.gmra.mxu1 %vm4519_vm15, %v7196_v2  ;;  %vm6978_vm7 = vweird.f32 %v15142_v39  ;;  %v6996_v22 = vand.u32 2147483647, %v15145_v6  ;;  %v6998_v47 = vand.u32 2147483648, %v15145_v6 }
 0x65f   : > { %9276 = vrcp.f32 %v15145_v6  ;;  %v7758_v0 = vadd.f32 %v9265_v61, %v7757_v27  ;;  %v6974_v54 = vsub.f32 1.0, %v6973_v33  ;;  %v8682_v31 = vmul.f32 -1.442695, %v15148_v63  ;;  %vm15186_vm8 = vmor %vm6977_vm12, %vm6978_vm7 }
 0x660   : > { %v6496_v3 = vpop.f32.mrf.mxu3  ;;  %vm6992_vm9 = vweird.f32 %v15145_v6  ;;  %v7781_v48 = vor.u32 1.1754944e-38, %v7780_v19  ;;  %vm6997_vm4 = vcmp.eq.f32.partialorder %v6996_v22, 8.507059e+37  ;;  %v6999_v46 = vor.u32 1.1754944e-38, %v6998_v47 }
 0x661   : > { %v7762_v51 = vsel %vm7761_vm2, %v9265_v61, %v7758_v0  ;;  %v6975_v26 = vmul.f32 %v15142_v39, %v6974_v54  ;;  %v15163_v25 = vadd.f32 %v14836_v9, %v6496_v3  ;;  %9278 = vpow2.f32 %v8682_v31  ;;  %vm16160_vm2 = vmmov %vm16155_vm6 }
 0x662   : > { %v7442_v40 = vpop.f32.mrf.mxu1  ;;  %v7767_v57 = vsel %vm7764_vm3, %v7766_v38, %v7762_v51 }
 0x663   : > { %v9273_v14 = vpop.eup %9272  ;;  %v7443_v29 = vadd.f32 %v7442_v40, %v7302_v21  ;;  %v8150_v16 = vmul.f32 %v7767_v57, %v15058_v1  ;;  %v6976_v24 = vadd.f32 %v15142_v39, %v6975_v26  ;;  %v8635_v60 = vmul.f32 -1.442695, %v15163_v25  ;;  %v16162_v40 = vld [vmem:[#allocation18_spill] sm:$0xff] }
 0x664   : > { %v9275_v23 = vpop.eup %9274  ;;  %v15168_v59 = vadd.f32 1.0, %v9273_v14  ;;  %v6984_v1 = vor.u32 1.1754944e-38, %v6983_v43 }
 0x665   : > { %v9277_v8 = vpop.eup %9276  ;;  %v7770_v58 = vmul.f32 %v9275_v23, %v15140_v44  ;;  %v15174_v36 = vadd.f32 %v14863_v20, %v7443_v29  ;;  %8182 = vst.msk [vmem:[%s14925_s27 + $0x30] sm:$0xff] %vm16155_vm6, %v8150_v16  ;;  %v7778_v20 = vand.u32 2147483647, %v15140_v44  ;;  %v6980_v53 = vsel %vm15186_vm8, %v15142_v39, %v6976_v24  ;;  %v7305_v39 = vpop.f32.mrf.mxu0  ;;  %v15237_v29 = vld [vmem:[%s15672_s13] ss:$0 sm:$0xff] }
 0x666   : > { %v6988_v11 = vmul.f32 %v9277_v8, %v15145_v6  ;;  %9280 = vrcp.f32 %v15168_v59  ;;  %vm7775_vm1 = vweird.f32 %v9275_v23  ;;  %vm6993_vm13 = vweird.f32 %v9277_v8 }
 0x667   : > { %v7771_v37 = vsub.f32 1.0, %v7770_v58  ;;  %9282 = vpow2.f32 %v8635_v60  ;;  %v9279_v5 = vpop.eup %9278  ;;  %v8683_v49 = vmul.f32 -1.442695, %v15174_v36  ;;  %v6985_v56 = vsel %vm15178_vm14, %v6984_v1, %v6980_v53  ;;  %vm7776_vm10 = vmor %vm7774_vm5, %vm7775_vm1  ;;  %v15264_v53 = vld [vmem:[%s15675_s16] ss:$0 sm:$0xff] }
 0x668   : > { %v6989_v17 = vsub.f32 1.0, %v6988_v11  ;;  %v15200_v4 = vadd.f32 1.0, %v9279_v5  ;;  %vm7779_vm0 = vcmp.eq.f32.partialorder %v7778_v20, 8.507059e+37  ;;  %vm6994_vm11 = vmor %vm6992_vm9, %vm6993_vm13  ;;  %v7144_v2 = vmul.f32 %v6985_v56, %v15064_v41 }
 0x669   : > { %v7772_v61 = vmul.f32 %v9275_v23, %v7771_v37  ;;  %v6499_v15 = vpop.f32.mrf.mxu3  ;;  %9284 = vpow2.f32 %v8683_v49  ;;  %vm7007_vm7 = vweird.f32 %v15168_v59 }
 0x66a   : > { %v6990_v30 = vmul.f32 %v9277_v8, %v6989_v17  ;;  %v15205_v10 = vadd.f32 %v14836_v9, %v6499_v15  ;;  %9286 = vrcp.f32 %v15200_v4  ;;  %v7176_v31 = vadd.f32 %v7144_v2, %v16161_v45 }
 0x66b   : > { %v7773_v12 = vadd.f32 %v9275_v23, %v7772_v61  ;;  %v7793_v14 = vand.u32 2147483647, %v15200_v4  ;;  %v7795_v52 = vand.u32 2147483648, %v15200_v4  ;;  %vm7789_vm8 = vweird.f32 %v15200_v4 }
 0x66c   : > { %v15207_v13 = vpop.eup %9280  ;;  %v6991_v62 = vadd.f32 %v9277_v8, %v6990_v30  ;;  %v8636_v44 = vmul.f32 -1.442695, %v15205_v10 }
 0x66d   : > { %v7777_v42 = vsel %vm7776_vm10, %v9275_v23, %v7773_v12  ;;  %v7003_v9 = vmul.f32 %v15207_v13, %v15168_v59  ;;  %v9283_v7 = vpop.eup %9282  ;;  %vm7008_vm3 = vweird.f32 %v15207_v13  ;;  %v7307_v22 = vpop.f32.mrf.mxu0  ;;  %vm7794_vm5 = vcmp.eq.f32.partialorder %v7793_v14, 8.507059e+37 }
 0x66e   : > { %v7782_v35 = vsel %vm7779_vm0, %v7781_v48, %v7777_v42  ;;  %v6995_v32 = vsel %vm6994_vm11, %v9277_v8, %v6991_v62  ;;  %v15220_v3 = vadd.f32 1.0, %v9283_v7  ;;  %9288 = vpow2.f32 %v8636_v44  ;;  %vm15255_vm14 = vmor %vm7007_vm7, %vm7008_vm3 }
 0x66f   : > { %v8151_v55 = vmul.f32 %v7782_v35, %v15093_v18  ;;  %v7000_v27 = vsel %vm6997_vm4, %v6999_v46, %v6995_v32  ;;  %v7004_v33 = vsub.f32 1.0, %v7003_v9  ;;  %v9285_v0 = vpop.eup %9284  ;;  %v7011_v18 = vand.u32 2147483647, %v15168_v59  ;;  %vm16169_vm0 = vmmov %vm16160_vm2 }
 0x670   : > { %v7145_v6 = vmul.f32 %v7000_v27, %v15101_v34  ;;  %v9287_v38 = vpop.eup %9286  ;;  %9290 = vrcp.f32 %v15220_v3  ;;  %v7013_v34 = vand.u32 2147483648, %v15168_v59  ;;  %v15232_v57 = vadd.f32 1.0, %v9285_v0 }
 0x671   : > { %8183 = vst.msk [vmem:[%s14925_s27 + $0x38] sm:$0xff] %vm16160_vm2, %v8151_v55  ;;  %v7005_v54 = vmul.f32 %v15207_v13, %v7004_v33  ;;  %v6501_v51 = vpop.f32.mrf.mxu3  ;;  %v7785_v26 = vmul.f32 %v9287_v38, %v15200_v4  ;;  %vm15245_vm12 = vcmp.eq.f32.partialorder %v7011_v18, 8.507059e+37  ;;  %vm7790_vm6 = vweird.f32 %v9287_v38 }
 0x672   : > { %v7445_v41 = vpop.f32.mrf.mxu1  ;;  %v7177_v21 = vadd.f32 %v7145_v6, %v16162_v40  ;;  %v15240_v23 = vadd.f32 %v15237_v29, %v6501_v51  ;;  %9292 = vrcp.f32 %v15232_v57  ;;  %v7026_v11 = vand.u32 2147483647, %v15220_v3  ;;  %vm7791_vm1 = vmor %vm7789_vm8, %vm7790_vm6 }
 0x673   : > { %v7006_v16 = vadd.f32 %v15207_v13, %v7005_v54  ;;  %v7786_v24 = vsub.f32 1.0, %v7785_v26  ;;  %v7446_v60 = vadd.f32 %v7445_v41, %v7305_v39  ;;  %v7014_v59 = vor.u32 1.1754944e-38, %v7013_v34  ;;  %v16172_v26 = vld [vmem:[#allocation19_spill] sm:$0xff] }
 0x674   : > { %v7197_v43 = vpack.c.bf16 %v7177_v21, %v7176_v31  ;;  %v9289_v8 = vpop.eup %9288  ;;  %v8637_v19 = vmul.f32 -1.442695, %v15240_v23  ;;  %v7796_v30 = vor.u32 1.1754944e-38, %v7795_v52  ;;  %vm7022_vm9 = vweird.f32 %v15220_v3 }
 0x675   : > { %v7787_v1 = vmul.f32 %v9287_v38, %v7786_v24  ;;  %v15253_v28 = vadd.f32 1.0, %v9289_v8  ;;  %v15267_v17 = vadd.f32 %v15264_v53, %v7446_v60  ;;  %v7010_v5 = vsel %vm15255_vm14, %v15207_v13, %v7006_v16  ;;  %v7310_v34 = vpop.f32.mrf.mxu0 }
 0x676   : > { %8669 = vmatmul.msk.bf16.gmra.mxu1 %vm4519_vm15, %v7197_v43  ;;  %v9291_v37 = vpop.eup %9290  ;;  %v7028_v4 = vand.u32 2147483648, %v15220_v3  ;;  %vm15277_vm13 = vcmp.eq.f32.partialorder %v7026_v11, 8.507059e+37  ;;  %v7015_v62 = vsel %vm15245_vm12, %v7014_v59, %v7010_v5  ;;  %v7808_v32 = vand.u32 2147483647, %v15232_v57  ;;  %vm16174_vm12 = vmmov %vm16169_vm0 }
 0x677   : > { %v7788_v61 = vadd.f32 %v9287_v38, %v7787_v1  ;;  %v7018_v47 = vmul.f32 %v9291_v37, %v15220_v3  ;;  %9294 = vrcp.f32 %v15253_v28  ;;  %v8684_v46 = vmul.f32 -1.442695, %v15267_v17  ;;  %v16173_v1 = vld [vmem:[#allocation20_spill] sm:$0xff] }
 0x678   : > { %9296 = vpow2.f32 %v8637_v19  ;;  %v9293_v13 = vpop.eup %9292  ;;  %vm7023_vm10 = vweird.f32 %v9291_v37  ;;  %v7146_v55 = vmul.f32 %v7015_v62, %v15132_v50  ;;  %v7029_v33 = vor.u32 1.1754944e-38, %v7028_v4 }
 0x679   : > { %v6504_v15 = vpop.f32.mrf.mxu3  ;;  %v7792_v56 = vsel %vm7791_vm1, %v9287_v38, %v7788_v61  ;;  %v7019_v12 = vsub.f32 1.0, %v7018_v47  ;;  %v7800_v35 = vmul.f32 %v9293_v13, %v15232_v57  ;;  %9298 = vpow2.f32 %v8684_v46  ;;  %vm7024_vm11 = vmor %vm7022_vm9, %vm7023_vm10 }
 0x67a   : > { %v7447_v49 = vpop.f32.mrf.mxu1  ;;  %v7797_v42 = vsel %vm7794_vm5, %v7796_v30, %v7792_v56  ;;  %v15285_v9 = vadd.f32 %v15237_v29, %v6504_v15  ;;  %vm7804_vm4 = vweird.f32 %v15232_v57  ;;  %vm7805_vm2 = vweird.f32 %v9293_v13 }
 0x67b   : > { %v8152_v7 = vmul.f32 %v7797_v42, %v15148_v63  ;;  %v7020_v2 = vmul.f32 %v9291_v37, %v7019_v12  ;;  %v7448_v39 = vadd.f32 %v7447_v49, %v7307_v22  ;;  %v7801_v6 = vsub.f32 1.0, %v7800_v35  ;;  %vm7806_vm7 = vmor %vm7804_vm4, %vm7805_vm2 }
 0x67c   : > { %v8638_v44 = vmul.f32 -1.442695, %v15285_v9  ;;  %v7810_v63 = vand.u32 2147483648, %v15232_v57  ;;  %vm15307_vm3 = vcmp.eq.f32.partialorder %v7808_v32, 8.507059e+37  ;;  %v7178_v43 = vadd.f32 %v7146_v55, %v16172_v26 }
 0x67d   : > { %8184 = vst.msk [vmem:[%s14925_s27 + $0x40] sm:$0xff] %vm16169_vm0, %v8152_v7  ;;  %v7021_v27 = vadd.f32 %v9291_v37, %v7020_v2  ;;  %v15294_v0 = vpop.eup %9294  ;;  %v15301_v54 = vadd.f32 %v15264_v53, %v7448_v39  ;;  %v7802_v38 = vmul.f32 %v9293_v13, %v7801_v6  ;;  %v7041_v5 = vand.u32 2147483647, %v15253_v28  ;;  %v7312_v35 = vpop.f32.mrf.mxu0 }
 0x67e   : > { %9300 = vpow2.f32 %v8638_v44  ;;  %v9297_v41 = vpop.eup %9296  ;;  %v7033_v45 = vmul.f32 %v15294_v0, %v15253_v28  ;;  %v7811_v8 = vor.u32 1.1754944e-38, %v7810_v63  ;;  %v7043_v61 = vand.u32 2147483648, %v15253_v28 }
 0x67f   : > { %v7025_v50 = vsel %vm7024_vm11, %v9291_v37, %v7021_v27  ;;  %v15311_v21 = vadd.f32 1.0, %v9297_v41  ;;  %v8685_v18 = vmul.f32 -1.442695, %v15301_v54  ;;  %v7803_v16 = vadd.f32 %v9293_v13, %v7802_v38  ;;  %v9299_v60 = vpop.eup %9298 }
 0x680   : > { %v7030_v3 = vsel %vm15277_vm13, %v7029_v33, %v7025_v50  ;;  %v7034_v24 = vsub.f32 1.0, %v7033_v45  ;;  %vm7038_vm6 = vweird.f32 %v15294_v0  ;;  %vm7037_vm14 = vweird.f32 %v15253_v28 }
 0x681   : > { %v6506_v51 = vpop.f32.mrf.mxu3  ;;  %v7147_v14 = vmul.f32 %v7030_v3, %v15163_v25  ;;  %9302 = vrcp.f32 %v15311_v21  ;;  %v7807_v37 = vsel %vm7806_vm7, %v9293_v13, %v7803_v16  ;;  %v15324_v25 = vadd.f32 1.0, %v9299_v60  ;;  %vm15351_vm5 = vmor %vm7037_vm14, %vm7038_vm6 }
 0x682   : > { %v7450_v31 = vpop.f32.mrf.mxu1  ;;  %v15320_v58 = vadd.f32 %v15237_v29, %v6506_v51  ;;  %v7035_v20 = vmul.f32 %v15294_v0, %v7034_v24  ;;  %v7812_v57 = vsel %vm15307_vm3, %v7811_v8, %v7807_v37  ;;  %9304 = vpow2.f32 %v8685_v18 }
 0x683   : > { %v7451_v52 = vadd.f32 %v7450_v31, %v7310_v34  ;;  %v7179_v11 = vadd.f32 %v7147_v14, %v16173_v1  ;;  %v8153_v22 = vmul.f32 %v7812_v57, %v15174_v36  ;;  %9306 = vrcp.f32 %v15324_v25 }
 0x684   : > { %v9301_v59 = vpop.eup %9300  ;;  %v7036_v49 = vadd.f32 %v15294_v0, %v7035_v20  ;;  %v8639_v30 = vmul.f32 -1.442695, %v15320_v58  ;;  %v7056_v15 = vand.u32 2147483647, %v15311_v21  ;;  %vm15346_vm8 = vcmp.eq.f32.partialorder %v7041_v5, 8.507059e+37  ;;  %v16184_v5 = vld [vmem:[#allocation5_spill] sm:$0xff] }
 0x685   : > { %v7198_v19 = vpack.c.bf16 %v7179_v11, %v7178_v43  ;;  %v15332_v47 = vadd.f32 1.0, %v9301_v59  ;;  %8185 = vst.msk [vmem:[%s14925_s27 + $0x48] sm:$0xff] %vm16174_vm12, %v8153_v22  ;;  %v15340_v4 = vadd.f32 %v15264_v53, %v7451_v52  ;;  %v7044_v42 = vor.u32 1.1754944e-38, %v7043_v61  ;;  %v16183_v22 = vld [vmem:[#allocation21_spill] sm:$0xff] }
 0x686   : > { %v7058_v46 = vand.u32 2147483648, %v15311_v21  ;;  %v7040_v28 = vsel %vm15351_vm5, %v15294_v0, %v7036_v49  ;;  %vm7052_vm1 = vweird.f32 %v15311_v21  ;;  %vm15366_vm9 = vcmp.eq.f32.partialorder %v7056_v15, 8.507059e+37 }
 0x687   : > { %8670 = vmatmul.msk.bf16.gmra.mxu1 %vm4519_vm15, %v7198_v19  ;;  %v9303_v36 = vpop.eup %9302  ;;  %9308 = vrcp.f32 %v15332_v47  ;;  %v8686_v7 = vmul.f32 -1.442695, %v15340_v4  ;;  %v7823_v33 = vand.u32 2147483647, %v15324_v25  ;;  %v7825_v0 = vand.u32 2147483648, %v15324_v25  ;;  %v7315_v19 = vpop.f32.mrf.mxu0 }
 0x688   : > { %v7048_v48 = vmul.f32 %v9303_v36, %v15311_v21  ;;  %v9305_v13 = vpop.eup %9304  ;;  %9310 = vpow2.f32 %v8639_v30  ;;  %vm7053_vm13 = vweird.f32 %v9303_v36  ;;  %v7045_v41 = vsel %vm15346_vm8, %v7044_v42, %v7040_v28 }
 0x689   : > { %v9307_v2 = vpop.eup %9306  ;;  %v15360_v44 = vadd.f32 1.0, %v9305_v13  ;;  %v7059_v31 = vor.u32 1.1754944e-38, %v7058_v46  ;;  %vm7819_vm10 = vweird.f32 %v15324_v25  ;;  %vm7054_vm0 = vmor %vm7052_vm1, %vm7053_vm13  ;;  %vm15384_vm4 = vcmp.eq.f32.partialorder %v7823_v33, 8.507059e+37 }
 0x68a   : > { %v6509_v56 = vpop.f32.mrf.mxu3  ;;  %v7049_v32 = vsub.f32 1.0, %v7048_v48  ;;  %v7815_v27 = vmul.f32 %v9307_v2, %v15324_v25  ;;  %v7452_v40 = vpop.f32.mrf.mxu1  ;;  %vm7820_vm11 = vweird.f32 %v9307_v2  ;;  %v7148_v26 = vmul.f32 %v7045_v41, %v15205_v10 }
 0x68b   : > { %v15363_v39 = vadd.f32 %v15237_v29, %v6509_v56  ;;  %9312 = vrcp.f32 %v15360_v44  ;;  %v7826_v8 = vor.u32 1.1754944e-38, %v7825_v0  ;;  %vm7067_vm2 = vweird.f32 %v15332_v47  ;;  %vm7821_vm3 = vmor %vm7819_vm10, %vm7820_vm11 }
 0x68c   : > { %v7050_v6 = vmul.f32 %v9303_v36, %v7049_v32  ;;  %v7816_v50 = vsub.f32 1.0, %v7815_v27  ;;  %9314 = vpow2.f32 %v8686_v7  ;;  %v7071_v10 = vand.u32 2147483647, %v15332_v47  ;;  %vm16191_vm11 = vmmov %vm16174_vm12 }
 0x68d   : > { %v15374_v63 = vpop.eup %9308  ;;  %v8640_v38 = vmul.f32 -1.442695, %v15363_v39  ;;  %v7073_v20 = vand.u32 2147483648, %v15332_v47  ;;  %v7453_v57 = vadd.f32 %v7452_v40, %v7312_v35  ;;  %v7838_v13 = vand.u32 2147483647, %v15360_v44 }
 0x68e   : > { %v7051_v45 = vadd.f32 %v9303_v36, %v7050_v6  ;;  %v7063_v3 = vmul.f32 %v15374_v63, %v15332_v47  ;;  %v9311_v18 = vpop.eup %9310  ;;  %v7817_v51 = vmul.f32 %v9307_v2, %v7816_v50  ;;  %vm7068_vm7 = vweird.f32 %v15374_v63 }
 0x68f   : > { %9316 = vpow2.f32 %v8640_v38  ;;  %v15389_v16 = vadd.f32 1.0, %v9311_v18  ;;  %v7840_v62 = vand.u32 2147483648, %v15360_v44  ;;  %vm15425_vm14 = vmor %vm7067_vm2, %vm7068_vm7  ;;  %vm15429_vm8 = vcmp.eq.f32.partialorder %v7071_v10, 8.507059e+37  ;;  %v7317_v34 = vpop.f32.mrf.mxu0 }
 0x690   : > { %v7055_v43 = vsel %vm7054_vm0, %v9303_v36, %v7051_v45  ;;  %v7064_v14 = vsub.f32 1.0, %v7063_v3  ;;  %v7818_v60 = vadd.f32 %v9307_v2, %v7817_v51  ;;  %v7074_v32 = vor.u32 1.1754944e-38, %v7073_v20 }
 0x691   : > { %v7060_v24 = vsel %vm15366_vm9, %v7059_v31, %v7055_v43  ;;  %v9313_v21 = vpop.eup %9312  ;;  %9318 = vrcp.f32 %v15389_v16  ;;  %vm7834_vm5 = vweird.f32 %v15360_v44  ;;  %vm7839_vm9 = vcmp.eq.f32.partialorder %v7838_v13, 8.507059e+37 }
 0x692   : > { %v7149_v52 = vmul.f32 %v7060_v24, %v15240_v23  ;;  %v7065_v1 = vmul.f32 %v15374_v63, %v7064_v14  ;;  %v9315_v11 = vpop.eup %9314  ;;  %v7822_v37 = vsel %vm7821_vm3, %v9307_v2, %v7818_v60  ;;  %v7830_v59 = vmul.f32 %v9313_v21, %v15360_v44  ;;  %v6511_v12 = vpop.f32.mrf.mxu3 }
 0x693   : > { %v7180_v23 = vadd.f32 %v7148_v26, %v16183_v22  ;;  %v7827_v61 = vsel %vm15384_vm4, %v7826_v8, %v7822_v37  ;;  %v15409_v56 = vadd.f32 1.0, %v9315_v11  ;;  %vm7835_vm6 = vweird.f32 %v9313_v21 }
 0x694   : > { %v7181_v25 = vadd.f32 %v7149_v52, %v16184_v5  ;;  %v8154_v30 = vmul.f32 %v7827_v61, %v15267_v17  ;;  %v7066_v36 = vadd.f32 %v15374_v63, %v7065_v1  ;;  %v7831_v15 = vsub.f32 1.0, %v7830_v59  ;;  %vm7836_vm1 = vmor %vm7834_vm5, %vm7835_vm6  ;;  %v16192_v61 = vld [vmem:[#allocation4_spill] sm:$0xff] }
 0x695   : > { %v9317_v49 = vpop.eup %9316  ;;  %9320 = vrcp.f32 %v15409_v56  ;;  %v15419_v17 = vadd.f32 %v15264_v53, %v7453_v57  ;;  %v15435_v55 = vadd.f32 %v15237_v29, %v6511_v12  ;;  %v7841_v6 = vor.u32 1.1754944e-38, %v7840_v62  ;;  %vm16194_vm5 = vmmov %vm16191_vm11 }
 0x696   : > { %v7199_v48 = vpack.c.bf16 %v7181_v25, %v7180_v23  ;;  %v15413_v42 = vadd.f32 1.0, %v9317_v49  ;;  %8186 = vst.msk [vmem:[%s14925_s27 + $0x50] sm:$0xff] %vm16174_vm12, %v8154_v30  ;;  %v7832_v7 = vmul.f32 %v9313_v21, %v7831_v15  ;;  %v7070_v47 = vsel %vm15425_vm14, %v15374_v63, %v7066_v36  ;;  %v16193_v15 = vld [vmem:[#allocation22_spill] sm:$0xff] }
 0x697   : > { %v9319_v2 = vpop.eup %9318  ;;  %vm7082_vm13 = vweird.f32 %v15389_v16  ;;  %v7086_v0 = vand.u32 2147483647, %v15389_v16  ;;  %v7088_v50 = vand.u32 2147483648, %v15389_v16  ;;  %v8687_v38 = vmul.f32 -1.442695, %v15419_v17 }
 0x698   : > { %9322 = vrcp.f32 %v15413_v42  ;;  %8671 = vmatmul.msk.bf16.gmra.mxu1 %vm4519_vm15, %v7199_v48  ;;  %v7833_v27 = vadd.f32 %v9313_v21, %v7832_v7  ;;  %v7078_v33 = vmul.f32 %v9319_v2, %v15389_v16  ;;  %v7075_v63 = vsel %vm15429_vm8, %v7074_v32, %v7070_v47  ;;  %v7320_v32 = vpop.f32.mrf.mxu0 }
 0x699   : > { %v8641_v45 = vmul.f32 -1.442695, %v15435_v55  ;;  %vm7083_vm10 = vweird.f32 %v9319_v2  ;;  %9324 = vpow2.f32 %v8687_v38  ;;  %vm15453_vm0 = vcmp.eq.f32.partialorder %v7086_v0, 8.507059e+37 }
 0x69a   : > { %v7455_v46 = vpop.f32.mrf.mxu1  ;;  %v7837_v29 = vsel %vm7836_vm1, %v9313_v21, %v7833_v27  ;;  %v7079_v41 = vsub.f32 1.0, %v7078_v33  ;;  %v7089_v60 = vor.u32 1.1754944e-38, %v7088_v50  ;;  %v7150_v52 = vmul.f32 %v7075_v63, %v15285_v9  ;;  %vm7084_vm4 = vmor %vm7082_vm13, %vm7083_vm10 }
 0x69b   : > { %v7842_v44 = vsel %vm7839_vm9, %v7841_v6, %v7837_v29  ;;  %v7456_v31 = vadd.f32 %v7455_v46, %v7315_v19  ;;  %v9321_v3 = vpop.eup %9320  ;;  %9326 = vpow2.f32 %v8641_v45  ;;  %v7853_v10 = vand.u32 2147483647, %v15409_v56 }
 0x69c   : > { %v8155_v40 = vmul.f32 %v7842_v44, %v15301_v54  ;;  %v7080_v18 = vmul.f32 %v9319_v2, %v7079_v41  ;;  %v7845_v43 = vmul.f32 %v9321_v3, %v15409_v56  ;;  %v7855_v20 = vand.u32 2147483648, %v15409_v56 }
 0x69d   : > { %v15459_v14 = vadd.f32 %v15264_v53, %v7456_v31  ;;  %vm7850_vm2 = vweird.f32 %v9321_v3  ;;  %vm7849_vm3 = vweird.f32 %v15409_v56  ;;  %v7182_v49 = vadd.f32 %v7150_v52, %v16192_v61 }
 0x69e   : > { %v15451_v51 = vpop.eup %9322  ;;  %8187 = vst.msk [vmem:[%s14925_s27 + $0x58] sm:$0xff] %vm16191_vm11, %v8155_v40  ;;  %v7081_v54 = vadd.f32 %v9319_v2, %v7080_v18  ;;  %v7846_v1 = vsub.f32 1.0, %v7845_v43  ;;  %vm7854_vm7 = vcmp.eq.f32.partialorder %v7853_v10, 8.507059e+37  ;;  %vm7851_vm12 = vmor %vm7849_vm3, %vm7850_vm2  ;;  %v7856_v48 = vor.u32 1.1754944e-38, %v7855_v20 }
 0x69f   : > { %v7093_v8 = vmul.f32 %v15451_v51, %v15413_v42  ;;  %v8688_v11 = vmul.f32 -1.442695, %v15459_v14  ;;  %v9325_v16 = vpop.eup %9324  ;;  %vm7098_vm6 = vweird.f32 %v15451_v51  ;;  %v7103_v7 = vand.u32 2147483648, %v15413_v42 }
 0x6a0   : > { %v7085_v37 = vsel %vm7084_vm4, %v9319_v2, %v7081_v54  ;;  %v7847_v9 = vmul.f32 %v9321_v3, %v7846_v1  ;;  %v7645_v36 = vadd.f32 1.0, %v9325_v16  ;;  %vm7097_vm14 = vweird.f32 %v15413_v42 }
 0x6a1   : > { %v7094_v59 = vsub.f32 1.0, %v7093_v8  ;;  %v7090_v19 = vsel %vm15453_vm0, %v7089_v60, %v7085_v37  ;;  %9328 = vpow2.f32 %v8688_v11  ;;  %v9327_v25 = vpop.eup %9326  ;;  %v7101_v28 = vand.u32 2147483647, %v15413_v42  ;;  %vm7099_vm8 = vmor %vm7097_vm14, %vm7098_vm6 }
 0x6a2   : > { %v7457_v24 = vpop.f32.mrf.mxu1  ;;  %v7151_v22 = vmul.f32 %v7090_v19, %v15320_v58  ;;  %v7848_v30 = vadd.f32 %v9321_v3, %v7847_v9  ;;  %v15483_v13 = vadd.f32 1.0, %v9327_v25  ;;  %v7104_v6 = vor.u32 1.1754944e-38, %v7103_v7  ;;  %vm16200_vm6 = vmmov %vm16194_vm5 }
 0x6a3   : > { %v7458_v21 = vadd.f32 %v7457_v24, %v7317_v34  ;;  %v7095_v23 = vmul.f32 %v15451_v51, %v7094_v59  ;;  %vm7102_vm1 = vcmp.eq.f32.partialorder %v7101_v28, 8.507059e+37  ;;  %v7868_v50 = vand.u32 2147483647, %v7645_v36 }
 0x6a4   : > { %v7183_v12 = vadd.f32 %v7151_v22, %v16193_v15  ;;  %v7852_v58 = vsel %vm7851_vm12, %v9321_v3, %v7848_v30  ;;  %v7870_v38 = vand.u32 2147483648, %v7645_v36  ;;  %v7116_v3 = vand.u32 2147483647, %v15483_v13 }
 0x6a5   : > { %v15473_v57 = vadd.f32 %v15264_v53, %v7458_v21  ;;  %v7096_v56 = vadd.f32 %v15451_v51, %v7095_v23  ;;  %v7857_v46 = vsel %vm7854_vm7, %v7856_v48, %v7852_v58  ;;  %v7118_v40 = vand.u32 2147483648, %v15483_v13  ;;  %v16197_v21 = vld [vmem:[#allocation23_spill] sm:$0xff] }
 0x6a6   : > { %v7200_v62 = vpack.c.bf16 %v7183_v12, %v7182_v49  ;;  %v8156_v35 = vmul.f32 %v7857_v46, %v15340_v4  ;;  %vm7864_vm13 = vweird.f32 %v7645_v36  ;;  %vm15506_vm10 = vcmp.eq.f32.partialorder %v7868_v50, 8.507059e+37  ;;  %v16201_v46 = vld [vmem:[#allocation32_spill] sm:$0xff] }
 0x6a7   : > { %v8689_v5 = vmul.f32 -1.442695, %v15473_v57  ;;  %v9329_v2 = vpop.eup %9328  ;;  %v7100_v47 = vsel %vm7099_vm8, %v15451_v51, %v7096_v56  ;;  %v7871_v24 = vor.u32 1.1754944e-38, %v7870_v38  ;;  %vm7112_vm0 = vweird.f32 %v15483_v13 }
 0x6a8   : > { %8672 = vmatmul.msk.bf16.gmra.mxu1 %vm4519_vm15, %v7200_v62  ;;  %8188 = vst.msk [vmem:[%s14925_s27 + $0x60] sm:$0xff] %vm16194_vm5, %v8156_v35  ;;  %v15496_v27 = vadd.f32 1.0, %v9329_v2  ;;  %v7105_v4 = vsel %vm7102_vm1, %v7104_v6, %v7100_v47  ;;  %vm15513_vm2 = vcmp.eq.f32.partialorder %v7116_v3, 8.507059e+37  ;;  %v7119_v10 = vor.u32 1.1754944e-38, %v7118_v40 }
 0x6a9   : > { %9330 = vpow2.f32 %v8689_v5  ;;  %v7152_v31 = vmul.f32 %v7105_v4, %v15363_v39  ;;  %v7322_v39 = vpop.f32.mrf.mxu0 }
 0x6aa   : > { %9332 = vrcp.f32 %v7645_v36  ;;  %v7883_v19 = vand.u32 2147483647, %v15496_v27  ;;  %v7885_v22 = vand.u32 2147483648, %v15496_v27  ;;  %vm7879_vm12 = vweird.f32 %v15496_v27 }
 0x6ab   : > { %9334 = vrcp.f32 %v15483_v13  ;;  %v7184_v52 = vadd.f32 %v7152_v31, %v16197_v21 }
 0x6ac   : > { %9336 = vrcp.f32 %v15496_v27  ;;  %vm7884_vm14 = vcmp.eq.f32.partialorder %v7883_v19, 8.507059e+37 }
 0x6af   : > { %v9331_v33 = vpop.eup %9330 }
 0x6b0   : > { %v9333_v0 = vpop.eup %9332  ;;  %v15499_v29 = vadd.f32 1.0, %v9331_v33 }
 0x6b1   : > { %v7860_v42 = vmul.f32 %v9333_v0, %v7645_v36  ;;  %v9335_v41 = vpop.eup %9334  ;;  %vm7865_vm9 = vweird.f32 %v9333_v0 }
 0x6b2   : > { %v7108_v44 = vmul.f32 %v9335_v41, %v15483_v13  ;;  %9338 = vrcp.f32 %v15499_v29  ;;  %v9337_v26 = vpop.eup %9336  ;;  %vm7113_vm11 = vweird.f32 %v9335_v41  ;;  %vm7866_vm4 = vmor %vm7864_vm13, %vm7865_vm9  ;;  %v7898_v58 = vand.u32 2147483647, %v15499_v29 }
 0x6b3   : > { %v7861_v63 = vsub.f32 1.0, %v7860_v42  ;;  %v7460_v45 = vpop.f32.mrf.mxu1  ;;  %v7875_v8 = vmul.f32 %v9337_v26, %v15496_v27  ;;  %vm7114_vm3 = vmor %vm7112_vm0, %vm7113_vm11  ;;  %vm7880_vm7 = vweird.f32 %v9337_v26  ;;  %v7900_v56 = vand.u32 2147483648, %v15499_v29 }
 0x6b4   : > { %v7109_v51 = vsub.f32 1.0, %v7108_v44  ;;  %v7461_v34 = vadd.f32 %v7460_v45, %v7320_v32  ;;  %vm7881_vm8 = vmor %vm7879_vm12, %vm7880_vm7  ;;  %v7325_v32 = vpop.f32.mrf.mxu0  ;;  %vm7894_vm1 = vweird.f32 %v15499_v29 }
 0x6b5   : > { %v7862_v18 = vmul.f32 %v9333_v0, %v7861_v63  ;;  %v7876_v59 = vsub.f32 1.0, %v7875_v8  ;;  %vm16202_vm13 = vmmov %vm16200_vm6 }
 0x6b6   : > { %v7110_v60 = vmul.f32 %v9335_v41, %v7109_v51  ;;  %v15518_v11 = vadd.f32 %v15264_v53, %v7461_v34  ;;  %vm16203_vm0 = vmmov %vm16200_vm6 }
 0x6b7   : > { %v7863_v54 = vadd.f32 %v9333_v0, %v7862_v18  ;;  %v7877_v61 = vmul.f32 %v9337_v26, %v7876_v59  ;;  %vm16204_vm7 = vmmov %vm16203_vm0 }
 0x6b8   : > { %v7111_v20 = vadd.f32 %v9335_v41, %v7110_v60  ;;  %v9339_v9 = vpop.eup %9338  ;;  %v8690_v23 = vmul.f32 -1.442695, %v15518_v11 }
 0x6b9   : > { %v7867_v37 = vsel %vm7866_vm4, %v9333_v0, %v7863_v54  ;;  %v7890_v49 = vmul.f32 %v9339_v9, %v15499_v29  ;;  %v7878_v48 = vadd.f32 %v9337_v26, %v7877_v61  ;;  %vm7895_vm5 = vweird.f32 %v9339_v9 }
 0x6ba   : > { %v7872_v16 = vsel %vm15506_vm10, %v7871_v24, %v7867_v37  ;;  %v7115_v25 = vsel %vm7114_vm3, %v9335_v41, %v7111_v20  ;;  %9340 = vpow2.f32 %v8690_v23  ;;  %vm7896_vm9 = vmor %vm7894_vm1, %vm7895_vm5  ;;  %v7901_v0 = vor.u32 1.1754944e-38, %v7900_v56 }
 0x6bb   : > { %v8157_v5 = vmul.f32 %v7872_v16, %v15419_v17  ;;  %v7462_v30 = vpop.f32.mrf.mxu1  ;;  %v7120_v36 = vsel %vm15513_vm2, %v7119_v10, %v7115_v25  ;;  %v7891_v13 = vsub.f32 1.0, %v7890_v49  ;;  %v7886_v17 = vor.u32 1.1754944e-38, %v7885_v22 }
 0x6bc   : > { %v7463_v15 = vadd.f32 %v7462_v30, %v7322_v39  ;;  %v7153_v12 = vmul.f32 %v7120_v36, %v15435_v55  ;;  %v7882_v2 = vsel %vm7881_vm8, %v9337_v26, %v7878_v48  ;;  %vm7899_vm10 = vcmp.eq.f32.partialorder %v7898_v58, 8.507059e+37  ;;  %v7327_v3 = vpop.f32.mrf.mxu0  ;;  %vm16205_vm8 = vmmov %vm16203_vm0 }
 0x6bd   : > { %8189 = vst.msk [vmem:[%s14925_s27 + $0x68] sm:$0xff] %vm16200_vm6, %v8157_v5  ;;  %v7892_v35 = vmul.f32 %v9339_v9, %v7891_v13  ;;  %v7887_v55 = vsel %vm7884_vm14, %v7886_v17, %v7882_v2 }
 0x6be   : > { %v15539_v62 = vadd.f32 %v15264_v53, %v7463_v15  ;;  %v7185_v7 = vadd.f32 %v7153_v12, %v16201_v46  ;;  %v8158_v27 = vmul.f32 %v7887_v55, %v15459_v14 }
 0x6bf   : > { %v7893_v33 = vadd.f32 %v9339_v9, %v7892_v35 }
 0x6c0   : > { %v8691_v28 = vmul.f32 -1.442695, %v15539_v62  ;;  %v7201_v47 = vpack.c.bf16 %v7185_v7, %v7184_v52  ;;  %v9341_v6 = vpop.eup %9340  ;;  %8190 = vst.msk [vmem:[%s14925_s27 + $0x70] sm:$0xff] %vm16202_vm13, %v8158_v27 }
 0x6c1   : > { %v7897_v4 = vsel %vm7896_vm9, %v9339_v9, %v7893_v33  ;;  %v7648_v42 = vadd.f32 1.0, %v9341_v6 }
 0x6c2   : > { %9342 = vpow2.f32 %v8691_v28  ;;  %8673 = vmatmul.msk.bf16.gmra.mxu1 %vm4519_vm15, %v7201_v47  ;;  %v7902_v50 = vsel %vm7899_vm10, %v7901_v0, %v7897_v4  ;;  %vm16206_vm10 = vmmov %vm16203_vm0 }
 0x6c3   : > { %v7465_v41 = vpop.f32.mrf.mxu1  ;;  %v8159_v14 = vmul.f32 %v7902_v50, %v15473_v57  ;;  %9344 = vrcp.f32 %v7648_v42  ;;  %v7915_v26 = vand.u32 2147483648, %v7648_v42  ;;  %v7913_v39 = vand.u32 2147483647, %v7648_v42 }
 0x6c4   : > { %v7466_v38 = vadd.f32 %v7465_v41, %v7325_v32  ;;  %vm7909_vm11 = vweird.f32 %v7648_v42  ;;  %v7330_v23 = vpop.f32.mrf.mxu0 }
 0x6c5   : > { %8191 = vst.msk [vmem:[%s14925_s27 + $0x78] sm:$0xff] %vm16203_vm0, %v8159_v14  ;;  %v7916_v1 = vor.u32 1.1754944e-38, %v7915_v26  ;;  %vm7914_vm2 = vcmp.eq.f32.partialorder %v7913_v39, 8.507059e+37 }
 0x6c6   : > { %v15550_v29 = vadd.f32 %v15264_v53, %v7466_v38 }
 0x6c8   : > { %v9343_v63 = vpop.eup %9342  ;;  %v8692_v44 = vmul.f32 -1.442695, %v15550_v29 }
 0x6c9   : > { %v7649_v45 = vadd.f32 1.0, %v9343_v63  ;;  %v9345_v31 = vpop.eup %9344 }
 0x6ca   : > { %9346 = vpow2.f32 %v8692_v44  ;;  %v7905_v18 = vmul.f32 %v9345_v31, %v7648_v42  ;;  %vm7910_vm15 = vweird.f32 %v9345_v31 }
 0x6cb   : > { %9348 = vrcp.f32 %v7649_v45  ;;  %v7467_v40 = vpop.f32.mrf.mxu1  ;;  %vm7911_vm4 = vmor %vm7909_vm11, %vm7910_vm15  ;;  %v7930_v59 = vand.u32 2147483648, %v7649_v45  ;;  %v7928_v16 = vand.u32 2147483647, %v7649_v45  ;;  %vm7924_vm12 = vweird.f32 %v7649_v45 }
 0x6cc   : > { %v7468_v51 = vadd.f32 %v7467_v40, %v7327_v3  ;;  %v7906_v34 = vsub.f32 1.0, %v7905_v18  ;;  %v7332_v55 = vpop.f32.mrf.mxu0 }
 0x6cd   : > { %v7931_v61 = vor.u32 1.1754944e-38, %v7930_v59  ;;  %vm7929_vm14 = vcmp.eq.f32.partialorder %v7928_v16, 8.507059e+37 }
 0x6ce   : > { %v15556_v57 = vadd.f32 %v15264_v53, %v7468_v51  ;;  %v7907_v24 = vmul.f32 %v9345_v31, %v7906_v34 }
 0x6d0   : > { %v9347_v43 = vpop.eup %9346  ;;  %v8693_v54 = vmul.f32 -1.442695, %v15556_v57  ;;  %v7908_v21 = vadd.f32 %v9345_v31, %v7907_v24 }
 0x6d1   : > { %v9349_v60 = vpop.eup %9348  ;;  %v7650_v8 = vadd.f32 1.0, %v9347_v43 }
 0x6d2   : > { %v7920_v52 = vmul.f32 %v9349_v60, %v7649_v45  ;;  %9350 = vpow2.f32 %v8693_v54  ;;  %v7912_v10 = vsel %vm7911_vm4, %v9345_v31, %v7908_v21  ;;  %vm7925_vm3 = vweird.f32 %v9349_v60 }
 0x6d3   : > { %9352 = vrcp.f32 %v7650_v8  ;;  %v7917_v20 = vsel %vm7914_vm2, %v7916_v1, %v7912_v10  ;;  %vm7926_vm6 = vmor %vm7924_vm12, %vm7925_vm3  ;;  %v7945_v13 = vand.u32 2147483648, %v7650_v8  ;;  %v7943_v56 = vand.u32 2147483647, %v7650_v8 }
 0x6d4   : > { %v7921_v37 = vsub.f32 1.0, %v7920_v52  ;;  %v8160_v19 = vmul.f32 %v7917_v20, %v15518_v11  ;;  %vm7939_vm1 = vweird.f32 %v7650_v8  ;;  %v7335_v3 = vpop.f32.mrf.mxu0  ;;  %vm16207_vm2 = vmmov %vm16204_vm7 }
 0x6d5   : > { %v7946_v35 = vor.u32 1.1754944e-38, %v7945_v13  ;;  %vm7944_vm13 = vcmp.eq.f32.partialorder %v7943_v56, 8.507059e+37 }
 0x6d6   : > { %v7922_v9 = vmul.f32 %v9349_v60, %v7921_v37  ;;  %8192 = vst.msk [vmem:[%s14925_s27 + $0x80] sm:$0xff] %vm16204_vm7, %v8160_v19 }
 0x6d8   : > { %v9351_v22 = vpop.eup %9350  ;;  %v7923_v5 = vadd.f32 %v9349_v60, %v7922_v9 }
 0x6d9   : > { %v9353_v25 = vpop.eup %9352  ;;  %v7651_v49 = vadd.f32 1.0, %v9351_v22 }
 0x6da   : > { %v7927_v30 = vsel %vm7926_vm6, %v9349_v60, %v7923_v5  ;;  %v7935_v36 = vmul.f32 %v9353_v25, %v7650_v8  ;;  %vm7940_vm5 = vweird.f32 %v9353_v25 }
 0x6db   : > { %v7932_v15 = vsel %vm7929_vm14, %v7931_v61, %v7927_v30  ;;  %9354 = vrcp.f32 %v7651_v49  ;;  %v7470_v48 = vpop.f32.mrf.mxu1  ;;  %vm7941_vm9 = vmor %vm7939_vm1, %vm7940_vm5  ;;  %v7960_v0 = vand.u32 2147483648, %v7651_v49  ;;  %v7958_v41 = vand.u32 2147483647, %v7651_v49 }
 0x6dc   : > { %v8161_v11 = vmul.f32 %v7932_v15, %v15539_v62  ;;  %v7936_v12 = vsub.f32 1.0, %v7935_v36  ;;  %v7471_v17 = vadd.f32 %v7470_v48, %v7330_v23  ;;  %vm7954_vm15 = vweird.f32 %v7651_v49  ;;  %v7337_v54 = vpop.f32.mrf.mxu0  ;;  %vm16208_vm14 = vmmov %vm16207_vm2 }
 0x6dd   : > { %v7961_v63 = vor.u32 1.1754944e-38, %v7960_v0  ;;  %vm7959_vm4 = vcmp.eq.f32.partialorder %v7958_v41, 8.507059e+37 }
 0x6de   : > { %8193 = vst.msk [vmem:[%s14925_s27 + $0x88] sm:$0xff] %vm16205_vm8, %v8161_v11  ;;  %v7937_v58 = vmul.f32 %v9353_v25, %v7936_v12  ;;  %v15566_v46 = vadd.f32 %v15264_v53, %v7471_v17 }
 0x6e0   : > { %v7938_v7 = vadd.f32 %v9353_v25, %v7937_v58  ;;  %v8694_v62 = vmul.f32 -1.442695, %v15566_v46 }
 0x6e1   : > { %v9355_v2 = vpop.eup %9354 }
 0x6e2   : > { %v7942_v28 = vsel %vm7941_vm9, %v9353_v25, %v7938_v7  ;;  %v7950_v32 = vmul.f32 %v9355_v2, %v7651_v49  ;;  %9356 = vpow2.f32 %v8694_v62  ;;  %vm7955_vm0 = vweird.f32 %v9355_v2 }
 0x6e3   : > { %v7947_v47 = vsel %vm7944_vm13, %v7946_v35, %v7942_v28  ;;  %v7472_v6 = vpop.f32.mrf.mxu1  ;;  %vm7956_vm11 = vmor %vm7954_vm15, %vm7955_vm0 }
 0x6e4   : > { %v8162_v27 = vmul.f32 %v7947_v47, %v15550_v29  ;;  %v7951_v33 = vsub.f32 1.0, %v7950_v32  ;;  %v7473_v4 = vadd.f32 %v7472_v6, %v7332_v55  ;;  %v7340_v30 = vpop.f32.mrf.mxu0  ;;  %vm16209_vm13 = vmmov %vm16207_vm2 }
 0x6e6   : > { %8194 = vst.msk [vmem:[%s14925_s27 + $0x90] sm:$0xff] %vm16206_vm10, %v8162_v27  ;;  %v7952_v42 = vmul.f32 %v9355_v2, %v7951_v33  ;;  %v15573_v50 = vadd.f32 %v15264_v53, %v7473_v4 }
 0x6e8   : > { %v7953_v38 = vadd.f32 %v9355_v2, %v7952_v42  ;;  %v9357_v14 = vpop.eup %9356  ;;  %v8695_v29 = vmul.f32 -1.442695, %v15573_v50 }
 0x6e9   : > { %v7652_v45 = vadd.f32 1.0, %v9357_v14 }
 0x6ea   : > { %v7957_v44 = vsel %vm7956_vm11, %v9355_v2, %v7953_v38  ;;  %9358 = vpow2.f32 %v8695_v29 }
 0x6eb   : > { %v7962_v31 = vsel %vm7959_vm4, %v7961_v63, %v7957_v44  ;;  %9360 = vrcp.f32 %v7652_v45  ;;  %v7975_v60 = vand.u32 2147483648, %v7652_v45  ;;  %v7973_v21 = vand.u32 2147483647, %v7652_v45  ;;  %vm16210_vm4 = vmmov %vm16207_vm2 }
 0x6ec   : > { %v8163_v40 = vmul.f32 %v7962_v31, %v15556_v57  ;;  %vm7969_vm7 = vweird.f32 %v7652_v45  ;;  %v7342_v35 = vpop.f32.mrf.mxu0 }
 0x6ed   : > { %v7976_v37 = vor.u32 1.1754944e-38, %v7975_v60  ;;  %vm7974_vm6 = vcmp.eq.f32.partialorder %v7973_v21, 8.507059e+37 }
 0x6ee   : > { %8195 = vst.msk [vmem:[%s14925_s27 + $0x98] sm:$0xff] %vm16207_vm2, %v8163_v40 }
 0x6f0   : > { %v9359_v18 = vpop.eup %9358 }
 0x6f1   : > { %v9361_v51 = vpop.eup %9360  ;;  %v7653_v34 = vadd.f32 1.0, %v9359_v18 }
 0x6f2   : > { %v7965_v26 = vmul.f32 %v9361_v51, %v7652_v45  ;;  %vm7970_vm3 = vweird.f32 %v9361_v51 }
 0x6f3   : > { %9362 = vrcp.f32 %v7653_v34  ;;  %v7475_v43 = vpop.f32.mrf.mxu1  ;;  %vm7971_vm12 = vmor %vm7969_vm7, %vm7970_vm3  ;;  %v7990_v5 = vand.u32 2147483648, %v7653_v34  ;;  %v7988_v61 = vand.u32 2147483647, %v7653_v34  ;;  %vm7984_vm5 = vweird.f32 %v7653_v34 }
 0x6f4   : > { %v7966_v24 = vsub.f32 1.0, %v7965_v26  ;;  %v7476_v39 = vadd.f32 %v7475_v43, %v7335_v3  ;;  %v7345_v29 = vpop.f32.mrf.mxu0 }
 0x6f5   : > { %v7991_v12 = vor.u32 1.1754944e-38, %v7990_v5  ;;  %vm7989_vm9 = vcmp.eq.f32.partialorder %v7988_v61, 8.507059e+37 }
 0x6f6   : > { %v7967_v8 = vmul.f32 %v9361_v51, %v7966_v24  ;;  %v15580_v52 = vadd.f32 %v15264_v53, %v7476_v39 }
 0x6f8   : > { %v7968_v57 = vadd.f32 %v9361_v51, %v7967_v8  ;;  %v8696_v1 = vmul.f32 -1.442695, %v15580_v52 }
 0x6f9   : > { %v9363_v10 = vpop.eup %9362 }
 0x6fa   : > { %v7972_v20 = vsel %vm7971_vm12, %v9361_v51, %v7968_v57  ;;  %v7980_v59 = vmul.f32 %v9363_v10, %v7653_v34  ;;  %9364 = vpow2.f32 %v8696_v1  ;;  %vm7985_vm8 = vweird.f32 %v9363_v10 }
 0x6fb   : > { %v7977_v19 = vsel %vm7974_vm6, %v7976_v37, %v7972_v20  ;;  %v7477_v9 = vpop.f32.mrf.mxu1  ;;  %vm7986_vm1 = vmor %vm7984_vm5, %vm7985_vm8 }
 0x6fc   : > { %v8164_v16 = vmul.f32 %v7977_v19, %v15566_v46  ;;  %v7981_v22 = vsub.f32 1.0, %v7980_v59  ;;  %v7478_v23 = vadd.f32 %v7477_v9, %v7337_v54  ;;  %v7347_v37 = vpop.f32.mrf.mxu0  ;;  %vm16211_vm6 = vmmov %vm16210_vm4 }
 0x6fe   : > { %8196 = vst.msk [vmem:[%s14925_s27 + $0xa0] sm:$0xff] %vm16208_vm14, %v8164_v16  ;;  %v7982_v25 = vmul.f32 %v9363_v10, %v7981_v22  ;;  %v15587_v49 = vadd.f32 %v15264_v53, %v7478_v23 }
 0x700   : > { %v9365_v36 = vpop.eup %9364  ;;  %v7983_v15 = vadd.f32 %v9363_v10, %v7982_v25  ;;  %v8697_v11 = vmul.f32 -1.442695, %v15587_v49 }
 0x701   : > { %v7654_v48 = vadd.f32 1.0, %v9365_v36 }
 0x702   : > { %v7987_v13 = vsel %vm7986_vm1, %v9363_v10, %v7983_v15  ;;  %9366 = vpow2.f32 %v8697_v11 }
 0x703   : > { %v7992_v17 = vsel %vm7989_vm9, %v7991_v12, %v7987_v13  ;;  %9368 = vrcp.f32 %v7654_v48  ;;  %v8005_v27 = vand.u32 2147483648, %v7654_v48  ;;  %v8003_v6 = vand.u32 2147483647, %v7654_v48 }
 0x704   : > { %v8165_v58 = vmul.f32 %v7992_v17, %v15573_v50  ;;  %v7480_v56 = vpop.f32.mrf.mxu1  ;;  %vm7999_vm0 = vweird.f32 %v7654_v48  ;;  %v7350_v13 = vpop.f32.mrf.mxu0 }
 0x705   : > { %v7481_v46 = vadd.f32 %v7480_v56, %v7340_v30  ;;  %v8006_v50 = vor.u32 1.1754944e-38, %v8005_v27  ;;  %vm8004_vm11 = vcmp.eq.f32.partialorder %v8003_v6, 8.507059e+37 }
 0x706   : > { %8197 = vst.msk [vmem:[%s14925_s27 + $0xa8] sm:$0xff] %vm16209_vm13, %v8165_v58  ;;  %vm16212_vm13 = vmmov %vm16210_vm4 }
 0x707   : > { %v15594_v55 = vadd.f32 %v15264_v53, %v7481_v46  ;;  %v15600_v53 = vld [vmem:[%s15675_s16] ss:$0 sm:$0xff] }
 0x708   : > { %v9367_v7 = vpop.eup %9366 }
 0x709   : > { %v9369_v2 = vpop.eup %9368  ;;  %v7655_v62 = vadd.f32 1.0, %v9367_v7  ;;  %v8698_v47 = vmul.f32 -1.442695, %v15594_v55 }
 0x70a   : > { %v7995_v28 = vmul.f32 %v9369_v2, %v7654_v48  ;;  %vm8000_vm10 = vweird.f32 %v9369_v2 }
 0x70b   : > { %9370 = vrcp.f32 %v7655_v62  ;;  %vm8001_vm15 = vmor %vm7999_vm0, %vm8000_vm10  ;;  %v8020_v18 = vand.u32 2147483648, %v7655_v62  ;;  %v8018_v26 = vand.u32 2147483647, %v7655_v62  ;;  %vm8014_vm3 = vweird.f32 %v7655_v62 }
 0x70c   : > { %v7996_v32 = vsub.f32 1.0, %v7995_v28  ;;  %9372 = vpow2.f32 %v8698_v47  ;;  %v7482_v0 = vpop.f32.mrf.mxu1 }
 0x70d   : > { %v7483_v4 = vadd.f32 %v7482_v0, %v7342_v35  ;;  %v8021_v39 = vor.u32 1.1754944e-38, %v8020_v18  ;;  %vm8019_vm12 = vcmp.eq.f32.partialorder %v8018_v26, 8.507059e+37 }
 0x70e   : > { %v7997_v33 = vmul.f32 %v9369_v2, %v7996_v32 }
 0x70f   : > { %v15603_v38 = vadd.f32 %v15600_v53, %v7483_v4 }
 0x710   : > { %v7998_v42 = vadd.f32 %v9369_v2, %v7997_v33 }
 0x711   : > { %v9371_v41 = vpop.eup %9370  ;;  %v8699_v45 = vmul.f32 -1.442695, %v15603_v38 }
 0x712   : > { %v8002_v14 = vsel %vm8001_vm15, %v9369_v2, %v7998_v42  ;;  %v8010_v63 = vmul.f32 %v9371_v41, %v7655_v62  ;;  %v9373_v31 = vpop.eup %9372  ;;  %vm8015_vm2 = vweird.f32 %v9371_v41 }
 0x713   : > { %v8007_v44 = vsel %vm8004_vm11, %v8006_v50, %v8002_v14  ;;  %v7656_v51 = vadd.f32 1.0, %v9373_v31  ;;  %9374 = vpow2.f32 %v8699_v45  ;;  %vm8016_vm7 = vmor %vm8014_vm3, %vm8015_vm2  ;;  %v7352_v50 = vpop.f32.mrf.mxu0 }
 0x714   : > { %v8166_v3 = vmul.f32 %v8007_v44, %v15580_v52  ;;  %v8011_v40 = vsub.f32 1.0, %v8010_v63  ;;  %vm16213_vm11 = vmmov %vm16210_vm4 }
 0x715   : > { %9376 = vrcp.f32 %v7656_v51  ;;  %v7485_v24 = vpop.f32.mrf.mxu1  ;;  %v8035_v16 = vand.u32 2147483648, %v7656_v51  ;;  %v8033_v5 = vand.u32 2147483647, %v7656_v51  ;;  %vm8029_vm8 = vweird.f32 %v7656_v51 }
 0x716   : > { %8198 = vst.msk [vmem:[%s14925_s27 + $0xb0] sm:$0xff] %vm16210_vm4, %v8166_v3  ;;  %v8012_v34 = vmul.f32 %v9371_v41, %v8011_v40  ;;  %v7486_v54 = vadd.f32 %v7485_v24, %v7345_v29 }
 0x717   : > { %v8036_v36 = vor.u32 1.1754944e-38, %v8035_v16  ;;  %vm8034_vm1 = vcmp.eq.f32.partialorder %v8033_v5, 8.507059e+37 }
 0x718   : > { %v8013_v43 = vadd.f32 %v9371_v41, %v8012_v34  ;;  %v15610_v52 = vadd.f32 %v15600_v53, %v7486_v54 }
 0x719   : > { %v9375_v8 = vpop.eup %9374 }
 0x71a   : > { %v8017_v60 = vsel %vm8016_vm7, %v9371_v41, %v8013_v43  ;;  %v7657_v1 = vadd.f32 1.0, %v9375_v8  ;;  %v8700_v20 = vmul.f32 -1.442695, %v15610_v52 }
 0x71b   : > { %v8022_v21 = vsel %vm8019_vm12, %v8021_v39, %v8017_v60  ;;  %v9377_v10 = vpop.eup %9376  ;;  %vm16214_vm12 = vmmov %vm16211_vm6 }
 0x71c   : > { %v8167_v57 = vmul.f32 %v8022_v21, %v15587_v49  ;;  %v8025_v59 = vmul.f32 %v9377_v10, %v7656_v51  ;;  %9378 = vrcp.f32 %v7657_v1  ;;  %vm8030_vm14 = vweird.f32 %v9377_v10 }
 0x71d   : > { %9380 = vpow2.f32 %v8700_v20  ;;  %v7487_v9 = vpop.f32.mrf.mxu1  ;;  %vm8031_vm5 = vmor %vm8029_vm8, %vm8030_vm14  ;;  %v8050_v46 = vand.u32 2147483648, %v7657_v1  ;;  %v8048_v2 = vand.u32 2147483647, %v7657_v1  ;;  %vm8044_vm10 = vweird.f32 %v7657_v1 }
 0x71e   : > { %8199 = vst.msk [vmem:[%s14925_s27 + $0xb8] sm:$0xff] %vm16211_vm6, %v8167_v57  ;;  %v8026_v19 = vsub.f32 1.0, %v8025_v59  ;;  %v7488_v22 = vadd.f32 %v7487_v9, %v7347_v37 }
 0x71f   : > { %v8051_v32 = vor.u32 1.1754944e-38, %v8050_v46  ;;  %vm8049_vm15 = vcmp.eq.f32.partialorder %v8048_v2, 8.507059e+37 }
 0x720   : > { %v8027_v23 = vmul.f32 %v9377_v10, %v8026_v19  ;;  %v15617_v25 = vadd.f32 %v15600_v53, %v7488_v22 }
 0x722   : > { %v9379_v61 = vpop.eup %9378  ;;  %v8028_v49 = vadd.f32 %v9377_v10, %v8027_v23  ;;  %v8701_v11 = vmul.f32 -1.442695, %v15617_v25 }
 0x723   : > { %v9381_v30 = vpop.eup %9380  ;;  %v8040_v15 = vmul.f32 %v9379_v61, %v7657_v1  ;;  %vm8045_vm9 = vweird.f32 %v9379_v61  ;;  %v7355_v1 = vpop.f32.mrf.mxu0 }
 0x724   : > { %v8032_v12 = vsel %vm8031_vm5, %v9377_v10, %v8028_v49  ;;  %v7658_v48 = vadd.f32 1.0, %v9381_v30  ;;  %9382 = vpow2.f32 %v8701_v11  ;;  %vm8046_vm0 = vmor %vm8044_vm10, %vm8045_vm9 }
 0x725   : > { %v8037_v17 = vsel %vm8034_vm1, %v8036_v36, %v8032_v12  ;;  %v8041_v58 = vsub.f32 1.0, %v8040_v15  ;;  %v7490_v35 = vpop.f32.mrf.mxu1  ;;  %vm16215_vm1 = vmmov %vm16213_vm11 }
 0x726   : > { %v8168_v56 = vmul.f32 %v8037_v17, %v15594_v55  ;;  %9384 = vrcp.f32 %v7658_v48  ;;  %v7491_v62 = vadd.f32 %v7490_v35, %v7350_v13  ;;  %v8065_v29 = vand.u32 2147483648, %v7658_v48 }
 0x727   : > { %v8042_v7 = vmul.f32 %v9379_v61, %v8041_v58  ;;  %v8063_v31 = vand.u32 2147483647, %v7658_v48  ;;  %vm8059_vm2 = vweird.f32 %v7658_v48 }
 0x728   : > { %8200 = vst.msk [vmem:[%s14925_s27 + $0xc0] sm:$0xff] %vm16212_vm13, %v8168_v56  ;;  %v15624_v47 = vadd.f32 %v15600_v53, %v7491_v62  ;;  %v8066_v18 = vor.u32 1.1754944e-38, %v8065_v29 }
 0x729   : > { %v8043_v28 = vadd.f32 %v9379_v61, %v8042_v7  ;;  %vm8064_vm7 = vcmp.eq.f32.partialorder %v8063_v31, 8.507059e+37 }
 0x72a   : > { %v9383_v27 = vpop.eup %9382  ;;  %v8702_v4 = vmul.f32 -1.442695, %v15624_v47 }
 0x72b   : > { %v8047_v33 = vsel %vm8046_vm0, %v9379_v61, %v8043_v28  ;;  %v7659_v0 = vadd.f32 1.0, %v9383_v27 }
 0x72c   : > { %v9385_v55 = vpop.eup %9384  ;;  %v8052_v6 = vsel %vm8049_vm15, %v8051_v32, %v8047_v33 }
 0x72d   : > { %v8169_v42 = vmul.f32 %v8052_v6, %v15603_v38  ;;  %v8055_v41 = vmul.f32 %v9385_v55, %v7658_v48  ;;  %9386 = vrcp.f32 %v7659_v0  ;;  %v7492_v63 = vpop.f32.mrf.mxu1  ;;  %vm8060_vm4 = vweird.f32 %v9385_v55  ;;  %v7357_v48 = vpop.f32.mrf.mxu0 }
 0x72e   : > { %9388 = vpow2.f32 %v8702_v4  ;;  %v7493_v44 = vadd.f32 %v7492_v63, %v7352_v50  ;;  %vm8061_vm3 = vmor %vm8059_vm2, %vm8060_vm4  ;;  %v8080_v8 = vand.u32 2147483648, %v7659_v0  ;;  %v8078_v57 = vand.u32 2147483647, %v7659_v0 }
 0x72f   : > { %8201 = vst.msk [vmem:[%s14925_s27 + $0xc8] sm:$0xff] %vm16213_vm11, %v8169_v42  ;;  %v8056_v14 = vsub.f32 1.0, %v8055_v41  ;;  %vm8074_vm14 = vweird.f32 %v7659_v0  ;;  %vm16216_vm11 = vmmov %vm16215_vm1 }
 0x730   : > { %v15631_v3 = vadd.f32 %v15600_v53, %v7493_v44  ;;  %v8081_v20 = vor.u32 1.1754944e-38, %v8080_v8  ;;  %vm8079_vm5 = vcmp.eq.f32.partialorder %v8078_v57, 8.507059e+37 }
 0x731   : > { %v8057_v45 = vmul.f32 %v9385_v55, %v8056_v14 }
 0x732   : > { %v8703_v51 = vmul.f32 -1.442695, %v15631_v3 }
 0x733   : > { %v8058_v40 = vadd.f32 %v9385_v55, %v8057_v45  ;;  %v9387_v38 = vpop.eup %9386 }
 0x734   : > { %v9389_v34 = vpop.eup %9388  ;;  %v8070_v43 = vmul.f32 %v9387_v38, %v7659_v0  ;;  %9390 = vpow2.f32 %v8703_v51  ;;  %vm8075_vm6 = vweird.f32 %v9387_v38 }
 0x735   : > { %v8062_v26 = vsel %vm8061_vm3, %v9385_v55, %v8058_v40  ;;  %v7660_v39 = vadd.f32 1.0, %v9389_v34  ;;  %vm8076_vm8 = vmor %vm8074_vm14, %vm8075_vm6 }
 0x736   : > { %v8067_v24 = vsel %vm8064_vm7, %v8066_v18, %v8062_v26  ;;  %v8071_v60 = vsub.f32 1.0, %v8070_v43  ;;  %vm16217_vm7 = vmmov %vm16215_vm1 }
 0x737   : > { %v8170_v54 = vmul.f32 %v8067_v24, %v15610_v52  ;;  %9392 = vrcp.f32 %v7660_v39  ;;  %v8095_v30 = vand.u32 2147483648, %v7660_v39  ;;  %v8093_v11 = vand.u32 2147483647, %v7660_v39 }
 0x738   : > { %v8072_v21 = vmul.f32 %v9387_v38, %v8071_v60  ;;  %vm8089_vm13 = vweird.f32 %v7660_v39 }
 0x739   : > { %8202 = vst.msk [vmem:[%s14925_s27 + $0xd0] sm:$0xff] %vm16214_vm12, %v8170_v54  ;;  %v8096_v17 = vor.u32 1.1754944e-38, %v8095_v30  ;;  %vm8094_vm0 = vcmp.eq.f32.partialorder %v8093_v11, 8.507059e+37 }
 0x73a   : > { %v8073_v10 = vadd.f32 %v9387_v38, %v8072_v21  ;;  %v9391_v37 = vpop.eup %9390 }
 0x73b   : > { %v7661_v19 = vadd.f32 1.0, %v9391_v37 }
 0x73c   : > { %v8077_v59 = vsel %vm8076_vm8, %v9387_v38, %v8073_v10 }
 0x73d   : > { %v9393_v52 = vpop.eup %9392  ;;  %v8082_v16 = vsel %vm8079_vm5, %v8081_v20, %v8077_v59  ;;  %9394 = vrcp.f32 %v7661_v19  ;;  %v8110_v28 = vand.u32 2147483648, %v7661_v19  ;;  %v8108_v33 = vand.u32 2147483647, %v7661_v19  ;;  %vm16218_vm5 = vmmov %vm16215_vm1 }
 0x73e   : > { %v8171_v23 = vmul.f32 %v8082_v16, %v15617_v25  ;;  %v8085_v5 = vmul.f32 %v9393_v52, %v7660_v39  ;;  %vm8090_vm9 = vweird.f32 %v9393_v52  ;;  %vm8104_vm4 = vweird.f32 %v7661_v19 }
 0x73f   : > { %v7495_v9 = vpop.f32.mrf.mxu1  ;;  %vm8091_vm10 = vmor %vm8089_vm13, %vm8090_vm9  ;;  %v8111_v4 = vor.u32 1.1754944e-38, %v8110_v28  ;;  %vm8109_vm3 = vcmp.eq.f32.partialorder %v8108_v33, 8.507059e+37 }
 0x740   : > { %v7496_v22 = vadd.f32 %v7495_v9, %v7355_v1  ;;  %8203 = vst.msk [vmem:[%s14925_s27 + $0xd8] sm:$0xff] %vm16215_vm1, %v8171_v23  ;;  %v8086_v49 = vsub.f32 1.0, %v8085_v5 }
 0x742   : > { %v15639_v61 = vadd.f32 %v15600_v53, %v7496_v22  ;;  %v8087_v15 = vmul.f32 %v9393_v52, %v8086_v49 }
 0x743   : > { %v9395_v12 = vpop.eup %9394 }
 0x744   : > { %v8704_v36 = vmul.f32 -1.442695, %v15639_v61  ;;  %v8088_v13 = vadd.f32 %v9393_v52, %v8087_v15  ;;  %v8100_v58 = vmul.f32 %v9395_v12, %v7661_v19  ;;  %vm8105_vm15 = vweird.f32 %v9395_v12 }
 0x745   : > { %vm8106_vm2 = vmor %vm8104_vm4, %vm8105_vm15 }
 0x746   : > { %9396 = vpow2.f32 %v8704_v36  ;;  %v8092_v46 = vsel %vm8091_vm10, %v9393_v52, %v8088_v13  ;;  %v8101_v2 = vsub.f32 1.0, %v8100_v58 }
 0x747   : > { %v7497_v25 = vpop.f32.mrf.mxu1  ;;  %v8097_v7 = vsel %vm8094_vm0, %v8096_v17, %v8092_v46  ;;  %vm16219_vm0 = vmmov %vm16218_vm5 }
 0x748   : > { %v7498_v56 = vadd.f32 %v7497_v25, %v7357_v48  ;;  %v8172_v62 = vmul.f32 %v8097_v7, %v15624_v47  ;;  %v8102_v27 = vmul.f32 %v9395_v12, %v8101_v2 }
 0x74a   : > { %v7535_v35 = vadd.f32 %v15600_v53, %v7498_v56  ;;  %8204 = vst.msk [vmem:[%s14925_s27 + $0xe0] sm:$0xff] %vm16216_vm11, %v8172_v62  ;;  %v8103_v0 = vadd.f32 %v9395_v12, %v8102_v27 }
 0x74c   : > { %v9397_v32 = vpop.eup %9396  ;;  %v8705_v55 = vmul.f32 -1.442695, %v7535_v35  ;;  %v8107_v42 = vsel %vm8106_vm2, %v9395_v12, %v8103_v0 }
 0x74d   : > { %v7662_v6 = vadd.f32 1.0, %v9397_v32  ;;  %v8112_v53 = vsel %vm8109_vm3, %v8111_v4, %v8107_v42 }
 0x74e   : > { %9398 = vpow2.f32 %v8705_v55  ;;  %v8173_v47 = vmul.f32 %v8112_v53, %v15631_v3 }
 0x74f   : > { %9400 = vrcp.f32 %v7662_v6  ;;  %v8125_v44 = vand.u32 2147483648, %v7662_v6  ;;  %v8123_v31 = vand.u32 2147483647, %v7662_v6  ;;  %vm8119_vm6 = vweird.f32 %v7662_v6 }
 0x750   : > { %8205 = vst.msk [vmem:[%s14925_s27 + $0xe8] sm:$0xff] %vm16217_vm7, %v8173_v47 }
 0x751   : > { %v8126_v18 = vor.u32 1.1754944e-38, %v8125_v44  ;;  %vm8124_vm8 = vcmp.eq.f32.partialorder %v8123_v31, 8.507059e+37 }
 0x754   : > { %v9399_v41 = vpop.eup %9398 }
 0x755   : > { %v9401_v50 = vpop.eup %9400  ;;  %v7663_v14 = vadd.f32 1.0, %v9399_v41 }
 0x756   : > { %v8115_v63 = vmul.f32 %v9401_v50, %v7662_v6  ;;  %vm8120_vm12 = vweird.f32 %v9401_v50 }
 0x757   : > { %9402 = vrcp.f32 %v7663_v14  ;;  %vm8121_vm14 = vmor %vm8119_vm6, %vm8120_vm12  ;;  %v8140_v24 = vand.u32 2147483648, %v7663_v14  ;;  %v8138_v54 = vand.u32 2147483647, %v7663_v14  ;;  %vm8134_vm9 = vweird.f32 %v7663_v14 }
 0x758   : > { %v8116_v29 = vsub.f32 1.0, %v8115_v63 }
 0x759   : > { %v8141_v8 = vor.u32 1.1754944e-38, %v8140_v24  ;;  %vm8139_vm10 = vcmp.eq.f32.partialorder %v8138_v54, 8.507059e+37 }
 0x75a   : > { %v8117_v45 = vmul.f32 %v9401_v50, %v8116_v29 }
 0x75c   : > { %v8118_v40 = vadd.f32 %v9401_v50, %v8117_v45 }
 0x75d   : > { %v9403_v38 = vpop.eup %9402 }
 0x75e   : > { %v8122_v51 = vsel %vm8121_vm14, %v9401_v50, %v8118_v40  ;;  %v8130_v3 = vmul.f32 %v9403_v38, %v7663_v14  ;;  %vm8135_vm1 = vweird.f32 %v9403_v38 }
 0x75f   : > { %v8127_v34 = vsel %vm8124_vm8, %v8126_v18, %v8122_v51  ;;  %vm8136_vm13 = vmor %vm8134_vm9, %vm8135_vm1 }
 0x760   : > { %v8174_v26 = vmul.f32 %v8127_v34, %v15639_v61  ;;  %v8131_v43 = vsub.f32 1.0, %v8130_v3 }
 0x762   : > { %8206 = vst.msk [vmem:[%s14925_s27 + $0xf0] sm:$0xff] %vm16218_vm5, %v8174_v26  ;;  %v8132_v39 = vmul.f32 %v9403_v38, %v8131_v43 }
 0x764   : > { %v8133_v60 = vadd.f32 %v9403_v38, %v8132_v39 }
 0x766   : > { %v8137_v21 = vsel %vm8136_vm13, %v9403_v38, %v8133_v60 }
 0x767   : > { %v8142_v57 = vsel %vm8139_vm10, %v8141_v8, %v8137_v21 }
 0x768   : > { %v8175_v1 = vmul.f32 %v8142_v57, %v7535_v35 }
 0x76a   : > { %8207 = vst.msk [vmem:[%s14925_s27 + $0xf8] sm:$0xff] %vm16219_vm0, %v8175_v1 }
 0x76b PF: > { %s27_s24 = sadd.s32 1, %s9421_s24  }
 0x76c   : > { %p24_p4 = scmp.ge.s32.totalorder %s27_s24, 4  }
 0x76e   :  { %26 = sbr.rel (!%p24_p4) target bundleno = 3 (0x3), region = 128 }

</bundles_post_ra>
